<compile_context>
chip_gen: v5e
topology: v5e:2x2
jax: 0.10.0
libtpu: 0.0.40
codegen_flags: <defaults>
</compile_context>

<pallas_src>
import functools

import jax
import jax.numpy as jnp
from jax.experimental import pallas as pl
from jax.experimental.pallas import tpu as pltpu

EPS = 1e-5
LANE = 128


def _round_up(x, m):
    return (x + m - 1) // m * m


# ----------------------------------------------------------------------------
# Pallas kernel: in-kernel tap formation + single fused matmul + bias
# (BN scale already folded into weights) + optional residual add + ReLU.
# ----------------------------------------------------------------------------
def _conv_bn_kernel(x_ref, w_ref, bias_ref, *rest, kh, kw, stride, trh, wo,
                    cin_p, apply_relu, has_residual):
    # x_ref   : (1, s*s, plane_h, plane_w, cin_p)  bf16  stride-phase planes
    # w_ref   : (kh*kw*cin_p, cout_p)              bf16  BN-scale-folded weights
    # bias_ref: (1, cout_p)                        f32
    # res_ref : (1, trh*wo, cout_p)                bf16  (optional residual)
    # o_ref   : (1, trh*wo, cout_p)                f32
    # lhs_ref : (trh*wo, kh*kw*cin_p)              bf16  VMEM scratch
    if has_residual:
        res_ref, o_ref, lhs_ref = rest
    else:
        res_ref = None
        o_ref, lhs_ref = rest

    s = stride
    tp = trh * wo
    row_base = pl.program_id(1) * trh        # output-row tile offset

    # Build the (TP, K2*Cin_p) LHS from shifted views of the VMEM tile.
    t_idx = 0
    for dy in range(kh):
        for dx in range(kw):
            ph = (dy % s) * s + (dx % s)      # stride-phase plane index
            r0 = row_base + (dy // s)         # dynamic row start (per tile)
            c0 = dx // s                      # static col start
            tap = x_ref[0, ph, pl.ds(r0, trh), pl.ds(c0, wo), :]
            lhs_ref[:, t_idx * cin_p:(t_idx + 1) * cin_p] = tap.reshape(tp, cin_p)
            t_idx += 1

    # One big MXU matmul: (TP, K2*Cin_p) x (K2*Cin_p, Cout_p), fp32 accumulate.
    acc = jnp.dot(lhs_ref[...], w_ref[...], preferred_element_type=jnp.float32)

    acc = acc + bias_ref[...]                 # folded-BN bias (scale is in W)
    if has_residual:
        acc = acc + res_ref[0].astype(jnp.float32)
    if apply_relu:
        acc = jnp.maximum(acc, 0.0)
    o_ref[0] = acc.astype(o_ref.dtype)


# ----------------------------------------------------------------------------
# Wrapper: padding / stride-phase decomposition (pure layout), channel padding
# to 128 lanes, weight folding, row-tile selection, pallas_call.
# ----------------------------------------------------------------------------
def _pick_row_tile(Ho, Wo, cout_p, cin_p, K2):
    """Largest divisor of Ho whose per-tile buffers fit a modest VMEM budget."""
    budget = 4 * 1024 * 1024
    for t in range(Ho, 0, -1):
        if Ho % t:
            continue
        tp = t * Wo
        if t != Ho and tp % 8:               # (8,128) block constraint
            continue
        tile_bytes = tp * cout_p * 4 + tp * K2 * cin_p * 2 + tp * cout_p * 2
        if tile_bytes <= budget:
            return t
    return Ho


def conv_bn(x_nhwc, w_hwio, scale, bias, *, stride, pad, apply_relu,
            residual=None):
    """conv2d(no bias) + BN(scale,bias) [+ residual] [+ relu]; NHWC in/out."""
    N, H, W, Cin = x_nhwc.shape
    kh, kw, _, Cout = w_hwio.shape
    s = stride
    Ho = (H + 2 * pad - kh) // s + 1
    Wo = (W + 2 * pad - kw) // s + 1
    K2 = kh * kw
    P = Ho * Wo

    cin_p = _round_up(Cin, LANE)
    cout_p = _round_up(Cout, LANE)

    # ---- spatial pad + stride-phase decomposition (layout only; no MACs) ----
    req_h = Ho + (kh - 1) // s
    req_w = Wo + (kw - 1) // s
    hp = max(_round_up(H + 2 * pad, s), s * req_h)
    wp = max(_round_up(W + 2 * pad, s), s * req_w)
    plane_h, plane_w = hp // s, wp // s

    xp = jnp.pad(x_nhwc.astype(jnp.float32),
                 ((0, 0), (pad, hp - H - pad), (pad, wp - W - pad),
                  (0, cin_p - Cin)))
    phases = (xp.reshape(N, plane_h, s, plane_w, s, cin_p)
                .transpose(0, 2, 4, 1, 3, 5)
                .reshape(N, s * s, plane_h, plane_w, cin_p)
                .astype(jnp.bfloat16))

    # ---- weights: fold BN scale per out-channel, pad, flatten tap axis ----
    wf = w_hwio.astype(jnp.float32) * scale.astype(jnp.float32)[None, None, None, :]
    wf = jnp.pad(wf, ((0, 0), (0, 0), (0, cin_p - Cin), (0, cout_p - Cout)))
    w2 = wf.reshape(K2 * cin_p, cout_p).astype(jnp.bfloat16)

    bias_p = jnp.pad(bias.astype(jnp.float32),
                     (0, cout_p - Cout)).reshape(1, cout_p)

    trh = _pick_row_tile(Ho, Wo, cout_p, cin_p, K2)
    tp = trh * Wo
    grid = (N, Ho // trh)

    in_specs = [
        pl.BlockSpec((1, s * s, plane_h, plane_w, cin_p),
                     lambda n, r: (n, 0, 0, 0, 0)),
        pl.BlockSpec((K2 * cin_p, cout_p), lambda n, r: (0, 0)),
        pl.BlockSpec((1, cout_p), lambda n, r: (0, 0)),
    ]
    args = [phases, w2, bias_p]

    if residual is not None:
        res = jnp.pad(residual.astype(jnp.bfloat16),
                      ((0, 0), (0, 0), (0, 0), (0, cout_p - Cout)))
        res = res.reshape(N, P, cout_p)
        in_specs.append(pl.BlockSpec((1, tp, cout_p), lambda n, r: (n, r, 0)))
        args.append(res)

    kernel = functools.partial(
        _conv_bn_kernel, kh=kh, kw=kw, stride=s, trh=trh, wo=Wo,
        cin_p=cin_p, apply_relu=apply_relu, has_residual=residual is not None)

    out = pl.pallas_call(
        kernel,
        out_shape=jax.ShapeDtypeStruct((N, P, cout_p), jnp.float32),
        grid=grid,
        in_specs=in_specs,
        out_specs=pl.BlockSpec((1, tp, cout_p), lambda n, r: (n, r, 0)),
        scratch_shapes=[pltpu.VMEM((tp, K2 * cin_p), jnp.bfloat16)],
        compiler_params=pltpu.CompilerParams(
            dimension_semantics=("parallel", "parallel"),
            vmem_limit_bytes=32 * 1024 * 1024),
    )(*args)

    return out.reshape(N, Ho, Wo, cout_p)[..., :Cout]


# ----------------------------------------------------------------------------
# BasicBlock parameters + forward
# ----------------------------------------------------------------------------
def _fold_bn(gamma, beta, mean, var):
    scale = gamma / jnp.sqrt(var + EPS)
    return scale, beta - mean * scale


def _init_bn(keys, c):
    gamma = 1.0 + 0.1 * jax.random.normal(keys[0], (c,), jnp.float32)
    beta = 0.1 * jax.random.normal(keys[1], (c,), jnp.float32)
    mean = 0.1 * jax.random.normal(keys[2], (c,), jnp.float32)
    var = 0.5 + jax.random.uniform(keys[3], (c,), jnp.float32)
    return gamma, beta, mean, var


def init_basic_block(key, in_c, out_c, stride):
    ks = jax.random.split(key, 16)
    p = {
        "w1": 0.1 * jax.random.normal(ks[0], (3, 3, in_c, out_c), jnp.float32),
        "bn1": _init_bn(ks[1:5], out_c),
        "w2": 0.1 * jax.random.normal(ks[5], (3, 3, out_c, out_c), jnp.float32),
        "bn2": _init_bn(ks[6:10], out_c),
    }
    if stride != 1 or in_c != out_c:
        p["ws"] = 0.1 * jax.random.normal(ks[10], (1, 1, in_c, out_c),
                                          jnp.float32)
        p["bns"] = _init_bn(ks[11:15], out_c)
    return p


def basic_block_forward(x_nchw, params, stride, in_c, out_c):
    x = jnp.transpose(x_nchw, (0, 2, 3, 1))          # NCHW -> NHWC
    s1, b1 = _fold_bn(*params["bn1"])
    s2, b2 = _fold_bn(*params["bn2"])

    out = conv_bn(x, params["w1"], s1, b1,
                  stride=stride, pad=1, apply_relu=True)

    if stride != 1 or in_c != out_c:
        ss, bs = _fold_bn(*params["bns"])
        shortcut = conv_bn(x, params["ws"], ss, bs,
                           stride=stride, pad=0, apply_relu=False)
    else:
        shortcut = x

    out = conv_bn(out, params["w2"], s2, b2,
                  stride=1, pad=1, apply_relu=True, residual=shortcut)
    return jnp.transpose(out, (0, 3, 1, 2))          # NHWC -> NCHW


# ----------------------------------------------------------------------------
# Pure-JAX fp32 reference (mirrors the PyTorch forward in eval mode)
# ----------------------------------------------------------------------------
def _conv_ref(x_nchw, w_hwio, stride, pad):
    return jax.lax.conv_general_dilated(
        x_nchw, w_hwio, (stride, stride), ((pad, pad), (pad, pad)),
        dimension_numbers=("NCHW", "HWIO", "NCHW"),
        precision=jax.lax.Precision.HIGHEST)


def basic_block_ref(x_nchw, params, stride, in_c, out_c):
    def bn(y, bnp):
        s, b = _fold_bn(*bnp)
        return y * s[None, :, None, None] + b[None, :, None, None]

    out = jax.nn.relu(bn(_conv_ref(x_nchw, params["w1"], stride, 1),
                         params["bn1"]))
    out = bn(_conv_ref(out, params["w2"], 1, 1), params["bn2"])
    if stride != 1 or in_c != out_c:
        sc = bn(_conv_ref(x_nchw, params["ws"], stride, 0), params["bns"])
    else:
        sc = x_nchw
    return jax.nn.relu(out + sc)


if __name__ == "__main__":
    key = jax.random.PRNGKey(0)
    k_x, k_a, k_b = jax.random.split(key, 3)

    N, C, H, W = 2, 4, 16, 16
    x = jax.random.normal(k_x, (N, C, H, W), jnp.float32)

    fwd = jax.jit(basic_block_forward, static_argnums=(2, 3, 4))

    # Block A: identity shortcut (stride=1, in_c == out_c)
    pa = init_basic_block(k_a, 4, 4, 1)
    out_a = fwd(x, pa, 1, 4, 4)
    ref_a = basic_block_ref(x, pa, 1, 4, 4)

    # Block B: conv shortcut (stride=2, 4 -> 8 channels)
    pb = init_basic_block(k_b, 4, 8, 2)
    out_b = fwd(x, pb, 2, 4, 8)
    ref_b = basic_block_ref(x, pb, 2, 4, 8)

    jax.block_until_ready((out_a, out_b))

    assert out_a.shape == (N, 4, 16, 16), out_a.shape
    assert out_b.shape == (N, 8, 8, 8), out_b.shape
    # bf16 MXU inputs -> relaxed tolerance vs the fp32 HIGHEST-precision ref.
    assert jnp.allclose(out_a, ref_a, atol=5e-2, rtol=5e-2)
    assert jnp.allclose(out_b, ref_b, atol=5e-2, rtol=5e-2)

    print("KERNEL_OK")
</pallas_src>

<mosaic_0001>
module attributes {stable_mosaic.version = 11 : i64} {
  func.func @_conv_bn_kernel(%arg0: i32, %arg1: i32, %arg2: memref<1x1x18x18x128xbf16, #tpu.memory_space<vmem>>, %arg3: memref<1152x128xbf16, #tpu.memory_space<vmem>>, %arg4: memref<1x128xf32, #tpu.memory_space<vmem>>, %arg5: memref<1x256x128xf32, #tpu.memory_space<vmem>>, %arg6: memref<256x1152xbf16, #tpu.memory_space<vmem>>) attributes {dimension_semantics = [#tpu.dimension_semantics<parallel>, #tpu.dimension_semantics<parallel>], iteration_bounds = array<i64: 2, 1>, scalar_prefetch = 0 : i64, scratch_operands = 1 : i64, tpu.core_type = #tpu.core_type<tc>, window_params = [{transform_indices = @transform_0, window_bounds = array<i64: 1, 1, 18, 18, 128>}, {pipeline_mode = #tpu.pipeline_mode<synchronous>, transform_indices = @transform_1, window_bounds = array<i64: 1152, 128>}, {pipeline_mode = #tpu.pipeline_mode<synchronous>, transform_indices = @transform_2, window_bounds = array<i64: 1, 128>}, {transform_indices = @transform_3, window_bounds = array<i64: 1, 256, 128>}]} {
    %c16_i32 = arith.constant 16 : i32
    %0 = arith.muli %arg1, %c16_i32 : i32
    %c0_i32 = arith.constant 0 : i32
    %1 = arith.addi %0, %c0_i32 : i32
    %c0 = arith.constant 0 : index
    %c0_0 = arith.constant 0 : index
    %2 = arith.index_cast %1 : i32 to index
    %c0_1 = arith.constant 0 : index
    %c0_2 = arith.constant 0 : index
    %3 = vector.load %arg2[%c0, %c0_0, %2, %c0_1, %c0_2] : memref<1x1x18x18x128xbf16, #tpu.memory_space<vmem>>, vector<1x1x16x16x128xbf16>
    %4 = vector.shape_cast %3 : vector<1x1x16x16x128xbf16> to vector<16x16x128xbf16>
    %5 = vector.shape_cast %4 : vector<16x16x128xbf16> to vector<256x128xbf16>
    %c0_3 = arith.constant 0 : index
    %c0_4 = arith.constant 0 : index
    %6 = vector.load %arg6[%c0_3, %c0_4] : memref<256x1152xbf16, #tpu.memory_space<vmem>>, vector<256x128xbf16>
    tpu.vector_store %arg6[%c0_3, %c0_4], %5 {strides = array<i32>} : memref<256x1152xbf16, #tpu.memory_space<vmem>>, vector<256x128xbf16>,
    %c0_i32_5 = arith.constant 0 : i32
    %7 = arith.addi %0, %c0_i32_5 : i32
    %c0_6 = arith.constant 0 : index
    %c0_7 = arith.constant 0 : index
    %8 = arith.index_cast %7 : i32 to index
    %c1 = arith.constant 1 : index
    %c0_8 = arith.constant 0 : index
    %9 = vector.load %arg2[%c0_6, %c0_7, %8, %c1, %c0_8] : memref<1x1x18x18x128xbf16, #tpu.memory_space<vmem>>, vector<1x1x16x16x128xbf16>
    %10 = vector.shape_cast %9 : vector<1x1x16x16x128xbf16> to vector<16x16x128xbf16>
    %11 = vector.shape_cast %10 : vector<16x16x128xbf16> to vector<256x128xbf16>
    %c0_9 = arith.constant 0 : index
    %c128 = arith.constant 128 : index
    %12 = vector.load %arg6[%c0_9, %c128] : memref<256x1152xbf16, #tpu.memory_space<vmem>>, vector<256x128xbf16>
    tpu.vector_store %arg6[%c0_9, %c128], %11 {strides = array<i32>} : memref<256x1152xbf16, #tpu.memory_space<vmem>>, vector<256x128xbf16>,
    %c0_i32_10 = arith.constant 0 : i32
    %13 = arith.addi %0, %c0_i32_10 : i32
    %c0_11 = arith.constant 0 : index
    %c0_12 = arith.constant 0 : index
    %14 = arith.index_cast %13 : i32 to index
    %c2 = arith.constant 2 : index
    %c0_13 = arith.constant 0 : index
    %15 = vector.load %arg2[%c0_11, %c0_12, %14, %c2, %c0_13] : memref<1x1x18x18x128xbf16, #tpu.memory_space<vmem>>, vector<1x1x16x16x128xbf16>
    %16 = vector.shape_cast %15 : vector<1x1x16x16x128xbf16> to vector<16x16x128xbf16>
    %17 = vector.shape_cast %16 : vector<16x16x128xbf16> to vector<256x128xbf16>
    %c0_14 = arith.constant 0 : index
    %c256 = arith.constant 256 : index
    %18 = vector.load %arg6[%c0_14, %c256] : memref<256x1152xbf16, #tpu.memory_space<vmem>>, vector<256x128xbf16>
    tpu.vector_store %arg6[%c0_14, %c256], %17 {strides = array<i32>} : memref<256x1152xbf16, #tpu.memory_space<vmem>>, vector<256x128xbf16>,
    %c1_i32 = arith.constant 1 : i32
    %19 = arith.addi %0, %c1_i32 : i32
    %c0_15 = arith.constant 0 : index
    %c0_16 = arith.constant 0 : index
    %20 = arith.index_cast %19 : i32 to index
    %c0_17 = arith.constant 0 : index
    %c0_18 = arith.constant 0 : index
    %21 = vector.load %arg2[%c0_15, %c0_16, %20, %c0_17, %c0_18] : memref<1x1x18x18x128xbf16, #tpu.memory_space<vmem>>, vector<1x1x16x16x128xbf16>
    %22 = vector.shape_cast %21 : vector<1x1x16x16x128xbf16> to vector<16x16x128xbf16>
    %23 = vector.shape_cast %22 : vector<16x16x128xbf16> to vector<256x128xbf16>
    %c0_19 = arith.constant 0 : index
    %c384 = arith.constant 384 : index
    %24 = vector.load %arg6[%c0_19, %c384] : memref<256x1152xbf16, #tpu.memory_space<vmem>>, vector<256x128xbf16>
    tpu.vector_store %arg6[%c0_19, %c384], %23 {strides = array<i32>} : memref<256x1152xbf16, #tpu.memory_space<vmem>>, vector<256x128xbf16>,
    %c1_i32_20 = arith.constant 1 : i32
    %25 = arith.addi %0, %c1_i32_20 : i32
    %c0_21 = arith.constant 0 : index
    %c0_22 = arith.constant 0 : index
    %26 = arith.index_cast %25 : i32 to index
    %c1_23 = arith.constant 1 : index
    %c0_24 = arith.constant 0 : index
    %27 = vector.load %arg2[%c0_21, %c0_22, %26, %c1_23, %c0_24] : memref<1x1x18x18x128xbf16, #tpu.memory_space<vmem>>, vector<1x1x16x16x128xbf16>
    %28 = vector.shape_cast %27 : vector<1x1x16x16x128xbf16> to vector<16x16x128xbf16>
    %29 = vector.shape_cast %28 : vector<16x16x128xbf16> to vector<256x128xbf16>
    %c0_25 = arith.constant 0 : index
    %c512 = arith.constant 512 : index
    %30 = vector.load %arg6[%c0_25, %c512] : memref<256x1152xbf16, #tpu.memory_space<vmem>>, vector<256x128xbf16>
    tpu.vector_store %arg6[%c0_25, %c512], %29 {strides = array<i32>} : memref<256x1152xbf16, #tpu.memory_space<vmem>>, vector<256x128xbf16>,
    %c1_i32_26 = arith.constant 1 : i32
    %31 = arith.addi %0, %c1_i32_26 : i32
    %c0_27 = arith.constant 0 : index
    %c0_28 = arith.constant 0 : index
    %32 = arith.index_cast %31 : i32 to index
    %c2_29 = arith.constant 2 : index
    %c0_30 = arith.constant 0 : index
    %33 = vector.load %arg2[%c0_27, %c0_28, %32, %c2_29, %c0_30] : memref<1x1x18x18x128xbf16, #tpu.memory_space<vmem>>, vector<1x1x16x16x128xbf16>
    %34 = vector.shape_cast %33 : vector<1x1x16x16x128xbf16> to vector<16x16x128xbf16>
    %35 = vector.shape_cast %34 : vector<16x16x128xbf16> to vector<256x128xbf16>
    %c0_31 = arith.constant 0 : index
    %c640 = arith.constant 640 : index
    %36 = vector.load %arg6[%c0_31, %c640] : memref<256x1152xbf16, #tpu.memory_space<vmem>>, vector<256x128xbf16>
    tpu.vector_store %arg6[%c0_31, %c640], %35 {strides = array<i32>} : memref<256x1152xbf16, #tpu.memory_space<vmem>>, vector<256x128xbf16>,
    %c2_i32 = arith.constant 2 : i32
    %37 = arith.addi %0, %c2_i32 : i32
    %c0_32 = arith.constant 0 : index
    %c0_33 = arith.constant 0 : index
    %38 = arith.index_cast %37 : i32 to index
    %c0_34 = arith.constant 0 : index
    %c0_35 = arith.constant 0 : index
    %39 = vector.load %arg2[%c0_32, %c0_33, %38, %c0_34, %c0_35] : memref<1x1x18x18x128xbf16, #tpu.memory_space<vmem>>, vector<1x1x16x16x128xbf16>
    %40 = vector.shape_cast %39 : vector<1x1x16x16x128xbf16> to vector<16x16x128xbf16>
    %41 = vector.shape_cast %40 : vector<16x16x128xbf16> to vector<256x128xbf16>
    %c0_36 = arith.constant 0 : index
    %c768 = arith.constant 768 : index
    %42 = vector.load %arg6[%c0_36, %c768] : memref<256x1152xbf16, #tpu.memory_space<vmem>>, vector<256x128xbf16>
    tpu.vector_store %arg6[%c0_36, %c768], %41 {strides = array<i32>} : memref<256x1152xbf16, #tpu.memory_space<vmem>>, vector<256x128xbf16>,
    %c2_i32_37 = arith.constant 2 : i32
    %43 = arith.addi %0, %c2_i32_37 : i32
    %c0_38 = arith.constant 0 : index
    %c0_39 = arith.constant 0 : index
    %44 = arith.index_cast %43 : i32 to index
    %c1_40 = arith.constant 1 : index
    %c0_41 = arith.constant 0 : index
    %45 = vector.load %arg2[%c0_38, %c0_39, %44, %c1_40, %c0_41] : memref<1x1x18x18x128xbf16, #tpu.memory_space<vmem>>, vector<1x1x16x16x128xbf16>
    %46 = vector.shape_cast %45 : vector<1x1x16x16x128xbf16> to vector<16x16x128xbf16>
    %47 = vector.shape_cast %46 : vector<16x16x128xbf16> to vector<256x128xbf16>
    %c0_42 = arith.constant 0 : index
    %c896 = arith.constant 896 : index
    %48 = vector.load %arg6[%c0_42, %c896] : memref<256x1152xbf16, #tpu.memory_space<vmem>>, vector<256x128xbf16>
    tpu.vector_store %arg6[%c0_42, %c896], %47 {strides = array<i32>} : memref<256x1152xbf16, #tpu.memory_space<vmem>>, vector<256x128xbf16>,
    %c2_i32_43 = arith.constant 2 : i32
    %49 = arith.addi %0, %c2_i32_43 : i32
    %c0_44 = arith.constant 0 : index
    %c0_45 = arith.constant 0 : index
    %50 = arith.index_cast %49 : i32 to index
    %c2_46 = arith.constant 2 : index
    %c0_47 = arith.constant 0 : index
    %51 = vector.load %arg2[%c0_44, %c0_45, %50, %c2_46, %c0_47] : memref<1x1x18x18x128xbf16, #tpu.memory_space<vmem>>, vector<1x1x16x16x128xbf16>
    %52 = vector.shape_cast %51 : vector<1x1x16x16x128xbf16> to vector<16x16x128xbf16>
    %53 = vector.shape_cast %52 : vector<16x16x128xbf16> to vector<256x128xbf16>
    %c0_48 = arith.constant 0 : index
    %c1024 = arith.constant 1024 : index
    %54 = vector.load %arg6[%c0_48, %c1024] : memref<256x1152xbf16, #tpu.memory_space<vmem>>, vector<256x128xbf16>
    tpu.vector_store %arg6[%c0_48, %c1024], %53 {strides = array<i32>} : memref<256x1152xbf16, #tpu.memory_space<vmem>>, vector<256x128xbf16>,
    %c0_49 = arith.constant 0 : index
    %c0_50 = arith.constant 0 : index
    %55 = vector.load %arg6[%c0_49, %c0_50] : memref<256x1152xbf16, #tpu.memory_space<vmem>>, vector<256x1152xbf16>
    %c0_51 = arith.constant 0 : index
    %c0_52 = arith.constant 0 : index
    %56 = vector.load %arg3[%c0_51, %c0_52] : memref<1152x128xbf16, #tpu.memory_space<vmem>>, vector<1152x128xbf16>
    %cst = arith.constant dense<0.000000e+00> : vector<256x128xf32>
    %57 = tpu.matmul %55, %56, %cst {dimension_numbers = #tpu.dot_dimension_numbers<[1], [0], [0], [1], [0, 0, 1, 1], [], []>} : vector<256x1152xbf16>, vector<1152x128xbf16>, vector<256x128xf32> -> vector<256x128xf32>
    %c0_53 = arith.constant 0 : index
    %c0_54 = arith.constant 0 : index
    %58 = vector.load %arg4[%c0_53, %c0_54] : memref<1x128xf32, #tpu.memory_space<vmem>>, vector<1x128xf32>
    %59 = vector.broadcast %58 : vector<1x128xf32> to vector<256x128xf32>
    %60 = arith.addf %57, %59 : vector<256x128xf32>
    %cst_55 = arith.constant 0.000000e+00 : f32
    %61 = vector.broadcast %cst_55 : f32 to vector<256x128xf32>
    %62 = arith.maximumf %60, %61 : vector<256x128xf32>
    %c0_56 = arith.constant 0 : index
    %c0_57 = arith.constant 0 : index
    %c0_58 = arith.constant 0 : index
    %63 = vector.load %arg5[%c0_56, %c0_57, %c0_58] : memref<1x256x128xf32, #tpu.memory_space<vmem>>, vector<1x256x128xf32>
    %64 = vector.shape_cast %63 : vector<1x256x128xf32> to vector<256x128xf32>
    %65 = vector.shape_cast %62 : vector<256x128xf32> to vector<1x256x128xf32>
    tpu.vector_store %arg5[%c0_56, %c0_57, %c0_58], %65 {strides = array<i32>} : memref<1x256x128xf32, #tpu.memory_space<vmem>>, vector<1x256x128xf32>,
    return
  }
  func.func @transform_0(%arg0: i32, %arg1: i32) -> (i32, i32, i32, i32, i32) {
    %c0_i32 = arith.constant 0 : i32
    %c0_i32_0 = arith.constant 0 : i32
    %c0_i32_1 = arith.constant 0 : i32
    %c0_i32_2 = arith.constant 0 : i32
    %c0_i32_3 = arith.constant 0 : i32
    return %arg0, %c0_i32, %c0_i32_0, %c0_i32_1, %c0_i32_2 : i32, i32, i32, i32, i32
  }
  func.func @transform_1(%arg0: i32, %arg1: i32) -> (i32, i32) {
    %c0_i32 = arith.constant 0 : i32
    %c0_i32_0 = arith.constant 0 : i32
    %c0_i32_1 = arith.constant 0 : i32
    return %c0_i32, %c0_i32_0 : i32, i32
  }
  func.func @transform_2(%arg0: i32, %arg1: i32) -> (i32, i32) {
    %c0_i32 = arith.constant 0 : i32
    %c0_i32_0 = arith.constant 0 : i32
    %c0_i32_1 = arith.constant 0 : i32
    return %c0_i32, %c0_i32_0 : i32, i32
  }
  func.func @transform_3(%arg0: i32, %arg1: i32) -> (i32, i32, i32) {
    %c0_i32 = arith.constant 0 : i32
    %c0_i32_0 = arith.constant 0 : i32
    return %arg0, %arg1, %c0_i32 : i32, i32, i32
  }
}

module attributes {stable_mosaic.version = 11 : i64} {
  func.func @_conv_bn_kernel(%arg0: i32, %arg1: i32, %arg2: memref<1x1x18x18x128xbf16, #tpu.memory_space<vmem>>, %arg3: memref<1152x128xbf16, #tpu.memory_space<vmem>>, %arg4: memref<1x128xf32, #tpu.memory_space<vmem>>, %arg5: memref<1x256x128xbf16, #tpu.memory_space<vmem>>, %arg6: memref<1x256x128xf32, #tpu.memory_space<vmem>>, %arg7: memref<256x1152xbf16, #tpu.memory_space<vmem>>) attributes {dimension_semantics = [#tpu.dimension_semantics<parallel>, #tpu.dimension_semantics<parallel>], iteration_bounds = array<i64: 2, 1>, scalar_prefetch = 0 : i64, scratch_operands = 1 : i64, tpu.core_type = #tpu.core_type<tc>, window_params = [{transform_indices = @transform_0, window_bounds = array<i64: 1, 1, 18, 18, 128>}, {pipeline_mode = #tpu.pipeline_mode<synchronous>, transform_indices = @transform_1, window_bounds = array<i64: 1152, 128>}, {pipeline_mode = #tpu.pipeline_mode<synchronous>, transform_indices = @transform_2, window_bounds = array<i64: 1, 128>}, {transform_indices = @transform_3, window_bounds = array<i64: 1, 256, 128>}, {transform_indices = @transform_4, window_bounds = array<i64: 1, 256, 128>}]} {
    %c16_i32 = arith.constant 16 : i32
    %0 = arith.muli %arg1, %c16_i32 : i32
    %c0_i32 = arith.constant 0 : i32
    %1 = arith.addi %0, %c0_i32 : i32
    %c0 = arith.constant 0 : index
    %c0_0 = arith.constant 0 : index
    %2 = arith.index_cast %1 : i32 to index
    %c0_1 = arith.constant 0 : index
    %c0_2 = arith.constant 0 : index
    %3 = vector.load %arg2[%c0, %c0_0, %2, %c0_1, %c0_2] : memref<1x1x18x18x128xbf16, #tpu.memory_space<vmem>>, vector<1x1x16x16x128xbf16>
    %4 = vector.shape_cast %3 : vector<1x1x16x16x128xbf16> to vector<16x16x128xbf16>
    %5 = vector.shape_cast %4 : vector<16x16x128xbf16> to vector<256x128xbf16>
    %c0_3 = arith.constant 0 : index
    %c0_4 = arith.constant 0 : index
    %6 = vector.load %arg7[%c0_3, %c0_4] : memref<256x1152xbf16, #tpu.memory_space<vmem>>, vector<256x128xbf16>
    tpu.vector_store %arg7[%c0_3, %c0_4], %5 {strides = array<i32>} : memref<256x1152xbf16, #tpu.memory_space<vmem>>, vector<256x128xbf16>,
    %c0_i32_5 = arith.constant 0 : i32
    %7 = arith.addi %0, %c0_i32_5 : i32
    %c0_6 = arith.constant 0 : index
    %c0_7 = arith.constant 0 : index
    %8 = arith.index_cast %7 : i32 to index
    %c1 = arith.constant 1 : index
    %c0_8 = arith.constant 0 : index
    %9 = vector.load %arg2[%c0_6, %c0_7, %8, %c1, %c0_8] : memref<1x1x18x18x128xbf16, #tpu.memory_space<vmem>>, vector<1x1x16x16x128xbf16>
    %10 = vector.shape_cast %9 : vector<1x1x16x16x128xbf16> to vector<16x16x128xbf16>
    %11 = vector.shape_cast %10 : vector<16x16x128xbf16> to vector<256x128xbf16>
    %c0_9 = arith.constant 0 : index
    %c128 = arith.constant 128 : index
    %12 = vector.load %arg7[%c0_9, %c128] : memref<256x1152xbf16, #tpu.memory_space<vmem>>, vector<256x128xbf16>
    tpu.vector_store %arg7[%c0_9, %c128], %11 {strides = array<i32>} : memref<256x1152xbf16, #tpu.memory_space<vmem>>, vector<256x128xbf16>,
    %c0_i32_10 = arith.constant 0 : i32
    %13 = arith.addi %0, %c0_i32_10 : i32
    %c0_11 = arith.constant 0 : index
    %c0_12 = arith.constant 0 : index
    %14 = arith.index_cast %13 : i32 to index
    %c2 = arith.constant 2 : index
    %c0_13 = arith.constant 0 : index
    %15 = vector.load %arg2[%c0_11, %c0_12, %14, %c2, %c0_13] : memref<1x1x18x18x128xbf16, #tpu.memory_space<vmem>>, vector<1x1x16x16x128xbf16>
    %16 = vector.shape_cast %15 : vector<1x1x16x16x128xbf16> to vector<16x16x128xbf16>
    %17 = vector.shape_cast %16 : vector<16x16x128xbf16> to vector<256x128xbf16>
    %c0_14 = arith.constant 0 : index
    %c256 = arith.constant 256 : index
    %18 = vector.load %arg7[%c0_14, %c256] : memref<256x1152xbf16, #tpu.memory_space<vmem>>, vector<256x128xbf16>
    tpu.vector_store %arg7[%c0_14, %c256], %17 {strides = array<i32>} : memref<256x1152xbf16, #tpu.memory_space<vmem>>, vector<256x128xbf16>,
    %c1_i32 = arith.constant 1 : i32
    %19 = arith.addi %0, %c1_i32 : i32
    %c0_15 = arith.constant 0 : index
    %c0_16 = arith.constant 0 : index
    %20 = arith.index_cast %19 : i32 to index
    %c0_17 = arith.constant 0 : index
    %c0_18 = arith.constant 0 : index
    %21 = vector.load %arg2[%c0_15, %c0_16, %20, %c0_17, %c0_18] : memref<1x1x18x18x128xbf16, #tpu.memory_space<vmem>>, vector<1x1x16x16x128xbf16>
    %22 = vector.shape_cast %21 : vector<1x1x16x16x128xbf16> to vector<16x16x128xbf16>
    %23 = vector.shape_cast %22 : vector<16x16x128xbf16> to vector<256x128xbf16>
    %c0_19 = arith.constant 0 : index
    %c384 = arith.constant 384 : index
    %24 = vector.load %arg7[%c0_19, %c384] : memref<256x1152xbf16, #tpu.memory_space<vmem>>, vector<256x128xbf16>
    tpu.vector_store %arg7[%c0_19, %c384], %23 {strides = array<i32>} : memref<256x1152xbf16, #tpu.memory_space<vmem>>, vector<256x128xbf16>,
    %c1_i32_20 = arith.constant 1 : i32
    %25 = arith.addi %0, %c1_i32_20 : i32
    %c0_21 = arith.constant 0 : index
    %c0_22 = arith.constant 0 : index
    %26 = arith.index_cast %25 : i32 to index
    %c1_23 = arith.constant 1 : index
    %c0_24 = arith.constant 0 : index
    %27 = vector.load %arg2[%c0_21, %c0_22, %26, %c1_23, %c0_24] : memref<1x1x18x18x128xbf16, #tpu.memory_space<vmem>>, vector<1x1x16x16x128xbf16>
    %28 = vector.shape_cast %27 : vector<1x1x16x16x128xbf16> to vector<16x16x128xbf16>
    %29 = vector.shape_cast %28 : vector<16x16x128xbf16> to vector<256x128xbf16>
    %c0_25 = arith.constant 0 : index
    %c512 = arith.constant 512 : index
    %30 = vector.load %arg7[%c0_25, %c512] : memref<256x1152xbf16, #tpu.memory_space<vmem>>, vector<256x128xbf16>
    tpu.vector_store %arg7[%c0_25, %c512], %29 {strides = array<i32>} : memref<256x1152xbf16, #tpu.memory_space<vmem>>, vector<256x128xbf16>,
    %c1_i32_26 = arith.constant 1 : i32
    %31 = arith.addi %0, %c1_i32_26 : i32
    %c0_27 = arith.constant 0 : index
    %c0_28 = arith.constant 0 : index
    %32 = arith.index_cast %31 : i32 to index
    %c2_29 = arith.constant 2 : index
    %c0_30 = arith.constant 0 : index
    %33 = vector.load %arg2[%c0_27, %c0_28, %32, %c2_29, %c0_30] : memref<1x1x18x18x128xbf16, #tpu.memory_space<vmem>>, vector<1x1x16x16x128xbf16>
    %34 = vector.shape_cast %33 : vector<1x1x16x16x128xbf16> to vector<16x16x128xbf16>
    %35 = vector.shape_cast %34 : vector<16x16x128xbf16> to vector<256x128xbf16>
    %c0_31 = arith.constant 0 : index
    %c640 = arith.constant 640 : index
    %36 = vector.load %arg7[%c0_31, %c640] : memref<256x1152xbf16, #tpu.memory_space<vmem>>, vector<256x128xbf16>
    tpu.vector_store %arg7[%c0_31, %c640], %35 {strides = array<i32>} : memref<256x1152xbf16, #tpu.memory_space<vmem>>, vector<256x128xbf16>,
    %c2_i32 = arith.constant 2 : i32
    %37 = arith.addi %0, %c2_i32 : i32
    %c0_32 = arith.constant 0 : index
    %c0_33 = arith.constant 0 : index
    %38 = arith.index_cast %37 : i32 to index
    %c0_34 = arith.constant 0 : index
    %c0_35 = arith.constant 0 : index
    %39 = vector.load %arg2[%c0_32, %c0_33, %38, %c0_34, %c0_35] : memref<1x1x18x18x128xbf16, #tpu.memory_space<vmem>>, vector<1x1x16x16x128xbf16>
    %40 = vector.shape_cast %39 : vector<1x1x16x16x128xbf16> to vector<16x16x128xbf16>
    %41 = vector.shape_cast %40 : vector<16x16x128xbf16> to vector<256x128xbf16>
    %c0_36 = arith.constant 0 : index
    %c768 = arith.constant 768 : index
    %42 = vector.load %arg7[%c0_36, %c768] : memref<256x1152xbf16, #tpu.memory_space<vmem>>, vector<256x128xbf16>
    tpu.vector_store %arg7[%c0_36, %c768], %41 {strides = array<i32>} : memref<256x1152xbf16, #tpu.memory_space<vmem>>, vector<256x128xbf16>,
    %c2_i32_37 = arith.constant 2 : i32
    %43 = arith.addi %0, %c2_i32_37 : i32
    %c0_38 = arith.constant 0 : index
    %c0_39 = arith.constant 0 : index
    %44 = arith.index_cast %43 : i32 to index
    %c1_40 = arith.constant 1 : index
    %c0_41 = arith.constant 0 : index
    %45 = vector.load %arg2[%c0_38, %c0_39, %44, %c1_40, %c0_41] : memref<1x1x18x18x128xbf16, #tpu.memory_space<vmem>>, vector<1x1x16x16x128xbf16>
    %46 = vector.shape_cast %45 : vector<1x1x16x16x128xbf16> to vector<16x16x128xbf16>
    %47 = vector.shape_cast %46 : vector<16x16x128xbf16> to vector<256x128xbf16>
    %c0_42 = arith.constant 0 : index
    %c896 = arith.constant 896 : index
    %48 = vector.load %arg7[%c0_42, %c896] : memref<256x1152xbf16, #tpu.memory_space<vmem>>, vector<256x128xbf16>
    tpu.vector_store %arg7[%c0_42, %c896], %47 {strides = array<i32>} : memref<256x1152xbf16, #tpu.memory_space<vmem>>, vector<256x128xbf16>,
    %c2_i32_43 = arith.constant 2 : i32
    %49 = arith.addi %0, %c2_i32_43 : i32
    %c0_44 = arith.constant 0 : index
    %c0_45 = arith.constant 0 : index
    %50 = arith.index_cast %49 : i32 to index
    %c2_46 = arith.constant 2 : index
    %c0_47 = arith.constant 0 : index
    %51 = vector.load %arg2[%c0_44, %c0_45, %50, %c2_46, %c0_47] : memref<1x1x18x18x128xbf16, #tpu.memory_space<vmem>>, vector<1x1x16x16x128xbf16>
    %52 = vector.shape_cast %51 : vector<1x1x16x16x128xbf16> to vector<16x16x128xbf16>
    %53 = vector.shape_cast %52 : vector<16x16x128xbf16> to vector<256x128xbf16>
    %c0_48 = arith.constant 0 : index
    %c1024 = arith.constant 1024 : index
    %54 = vector.load %arg7[%c0_48, %c1024] : memref<256x1152xbf16, #tpu.memory_space<vmem>>, vector<256x128xbf16>
    tpu.vector_store %arg7[%c0_48, %c1024], %53 {strides = array<i32>} : memref<256x1152xbf16, #tpu.memory_space<vmem>>, vector<256x128xbf16>,
    %c0_49 = arith.constant 0 : index
    %c0_50 = arith.constant 0 : index
    %55 = vector.load %arg7[%c0_49, %c0_50] : memref<256x1152xbf16, #tpu.memory_space<vmem>>, vector<256x1152xbf16>
    %c0_51 = arith.constant 0 : index
    %c0_52 = arith.constant 0 : index
    %56 = vector.load %arg3[%c0_51, %c0_52] : memref<1152x128xbf16, #tpu.memory_space<vmem>>, vector<1152x128xbf16>
    %cst = arith.constant dense<0.000000e+00> : vector<256x128xf32>
    %57 = tpu.matmul %55, %56, %cst {dimension_numbers = #tpu.dot_dimension_numbers<[1], [0], [0], [1], [0, 0, 1, 1], [], []>} : vector<256x1152xbf16>, vector<1152x128xbf16>, vector<256x128xf32> -> vector<256x128xf32>
    %c0_53 = arith.constant 0 : index
    %c0_54 = arith.constant 0 : index
    %58 = vector.load %arg4[%c0_53, %c0_54] : memref<1x128xf32, #tpu.memory_space<vmem>>, vector<1x128xf32>
    %59 = vector.broadcast %58 : vector<1x128xf32> to vector<256x128xf32>
    %60 = arith.addf %57, %59 : vector<256x128xf32>
    %c0_55 = arith.constant 0 : index
    %c0_56 = arith.constant 0 : index
    %c0_57 = arith.constant 0 : index
    %61 = vector.load %arg5[%c0_55, %c0_56, %c0_57] : memref<1x256x128xbf16, #tpu.memory_space<vmem>>, vector<1x256x128xbf16>
    %62 = vector.shape_cast %61 : vector<1x256x128xbf16> to vector<256x128xbf16>
    %63 = arith.extf %62 : vector<256x128xbf16> to vector<256x128xf32>
    %64 = arith.addf %60, %63 : vector<256x128xf32>
    %cst_58 = arith.constant 0.000000e+00 : f32
    %65 = vector.broadcast %cst_58 : f32 to vector<256x128xf32>
    %66 = arith.maximumf %64, %65 : vector<256x128xf32>
    %c0_59 = arith.constant 0 : index
    %c0_60 = arith.constant 0 : index
    %c0_61 = arith.constant 0 : index
    %67 = vector.load %arg6[%c0_59, %c0_60, %c0_61] : memref<1x256x128xf32, #tpu.memory_space<vmem>>, vector<1x256x128xf32>
    %68 = vector.shape_cast %67 : vector<1x256x128xf32> to vector<256x128xf32>
    %69 = vector.shape_cast %66 : vector<256x128xf32> to vector<1x256x128xf32>
    tpu.vector_store %arg6[%c0_59, %c0_60, %c0_61], %69 {strides = array<i32>} : memref<1x256x128xf32, #tpu.memory_space<vmem>>, vector<1x256x128xf32>,
    return
  }
  func.func @transform_0(%arg0: i32, %arg1: i32) -> (i32, i32, i32, i32, i32) {
    %c0_i32 = arith.constant 0 : i32
    %c0_i32_0 = arith.constant 0 : i32
    %c0_i32_1 = arith.constant 0 : i32
    %c0_i32_2 = arith.constant 0 : i32
    %c0_i32_3 = arith.constant 0 : i32
    return %arg0, %c0_i32, %c0_i32_0, %c0_i32_1, %c0_i32_2 : i32, i32, i32, i32, i32
  }
  func.func @transform_1(%arg0: i32, %arg1: i32) -> (i32, i32) {
    %c0_i32 = arith.constant 0 : i32
    %c0_i32_0 = arith.constant 0 : i32
    %c0_i32_1 = arith.constant 0 : i32
    return %c0_i32, %c0_i32_0 : i32, i32
  }
  func.func @transform_2(%arg0: i32, %arg1: i32) -> (i32, i32) {
    %c0_i32 = arith.constant 0 : i32
    %c0_i32_0 = arith.constant 0 : i32
    %c0_i32_1 = arith.constant 0 : i32
    return %c0_i32, %c0_i32_0 : i32, i32
  }
  func.func @transform_3(%arg0: i32, %arg1: i32) -> (i32, i32, i32) {
    %c0_i32 = arith.constant 0 : i32
    %c0_i32_0 = arith.constant 0 : i32
    return %arg0, %arg1, %c0_i32 : i32, i32, i32
  }
  func.func @transform_4(%arg0: i32, %arg1: i32) -> (i32, i32, i32) {
    %c0_i32 = arith.constant 0 : i32
    %c0_i32_0 = arith.constant 0 : i32
    return %arg0, %arg1, %c0_i32 : i32, i32, i32
  }
}

</mosaic_0001>

<bundles_post_ra>
// kernel: basic_block_forward.2
= control target key start
LH: loop header
LB: loop body
LE: loop exit
PB: predicated region body
PF: predicated region fallthrough
CT: control target
= control target key end

     0   :  { %s6630_s12 = smov 0   ;;  %s6632_s13 = smov 0   ;;  %s7968_s0 = inlined_call_operand.vmem [shape: bf16[2,1,18,18,128], index: 0, kind: input, shape index: {}]   ;;  %s7969_s1 = inlined_call_operand.vmem [shape: bf16[1152,128], index: 1, kind: input, shape index: {}]   ;;  %s7970_s2 = inlined_call_operand.vmem [shape: f32[1,128], index: 2, kind: input, shape index: {}]   ;;  %s7971_s3 = inlined_call_operand.vmem [shape: f32[2,256,128], index: 3, kind: output, shape index: {}]  }
   0x1   :  { %s6634_s14 = smov 0  }
   0x2 LB: > { %s25_s15 = sadd.s32 1, %s6604_s13  ;;  %p5144_p0 = scmp.ge.s32.totalorder %s6608_s14, 1  ;;  %s6608_s14 = sphi %s6634_s14, %s13_s14   ;;  %s6604_s13 = sphi %s6632_s13, %s7987_s13   ;;  %s6600_s12 = sphi %s6630_s12, %s7986_s12  }
   0x3   : > { %p27_p1 = scmp.ge.s32.totalorder %s25_s15, 2  ;;  %p151_p2 = scmp.lt.s32.totalorder %s6608_s14, 3 }
   0x5   : > { %s7989_s15 = smov (%p27_p1, %s25_s15), 0  ;;  %p152_p3 = pnand %p5144_p0, %p151_p2 }
   0x7   : > { %155 = sbr.rel (%p152_p3) target bundleno = 753 (0x2f1), region = 32 }
   0xc   : > { %v6470_v0 = vld [vmem:[%s7969_s1 + $0x38] sm:$0xff]  ;;  %p179_p4 = scmp.lt.s32.totalorder %s6600_s12, 1  ;;  %v6469_v1 = vld [vmem:[%s7969_s1 + $0x30] sm:$0xff]  ;;  %v6468_v2 = vld [vmem:[%s7969_s1 + $0x28] sm:$0xff]  ;;  %vm310_vm0 = vsmask.f32 3328 }
   0xd   : > { %6535 = vmatpush.bf16.msra.mxu1 %v6470_v0  ;;  %6536 = vmatpush.bf16.msra.mxu2 %v6470_v0  ;;  %v6467_v8 = vld [vmem:[%s7969_s1 + $0x20] sm:$0xff]  ;;  %v6466_v13 = vld [vmem:[%s7969_s1 + $0x18] sm:$0xff]  ;;  %v6465_v18 = vld [vmem:[%s7969_s1 + $0x10] sm:$0xff]  ;;  %vm311_vm1 = vsmask.f32 7440  ;;  %vm857_vm2 = vcmask 1042432  }
   0xe   : > { %s7991_s12 = smov (!%p179_p4, %s6600_s12), 1  ;;  %6537 = vmatpush.bf16.msra.mxu3 %v6470_v0  ;;  %4184 = vmatpush.bf16.msra.mxu0 %v6470_v0  ;;  %v6464_v22 = vld [vmem:[%s7969_s1 + $0x8] sm:$0xff]  ;;  %v6463_v25 = vld [vmem:[%s7969_s1] sm:$0xff]  ;;  %v6486_v38 = vld [vmem:[%s7969_s1 + $0xb8] sm:$0xff]  ;;  %vm858_vm4 = vcmask 1046532  }
   0xf   : > { %s6559_s20 = smul.u32 216, %s7991_s12  ;;  %v6494_v39 = vld [vmem:[%s7969_s1 + $0xf8] sm:$0xff]  ;;  %v6485_v48 = vld [vmem:[%s7969_s1 + $0xb0] sm:$0xff]  ;;  %v6484_v52 = vld [vmem:[%s7969_s1 + $0xa8] sm:$0xff]  ;;  %s6318_s9 = sshll.u32 %s7991_s12, 8 }
  0x10   : > { %v6478_v46 = vld [vmem:[%s7969_s1 + $0x78] sm:$0xff]  ;;  %v6493_v49 = vld [vmem:[%s7969_s1 + $0xf0] sm:$0xff]  ;;  %v6492_v53 = vld [vmem:[%s7969_s1 + $0xe8] sm:$0xff]  ;;  %s7796_s16 = scalar_lea.vmem %s7971_s3, %s6318_s9 }
  0x11   : > { %6538 = vmatpush.bf16.msra.mxu1 %v6469_v1  ;;  %6539 = vmatpush.bf16.msra.mxu2 %v6469_v1  ;;  %s6663_s25 = scalar_lea.vmem %s7968_s0, %s6559_s20  ;;  %v6502_v47 = vld [vmem:[%s7969_s1 + $0x138] sm:$0xff]  ;;  %v6477_v50 = vld [vmem:[%s7969_s1 + $0x70] sm:$0xff]  ;;  %v6476_v54 = vld [vmem:[%s7969_s1 + $0x68] sm:$0xff] }
  0x12   : > { %6540 = vmatpush.bf16.msra.mxu3 %v6469_v1  ;;  %4185 = vmatpush.bf16.msra.mxu0 %v6469_v1  ;;  %v206_v3 = vld [vmem:[%s6663_s25 + $0x30] sm:$0xf]  ;;  %v207_v4 = vld [vmem:[%s6663_s25 + $0x34] sm:$0xf]  ;;  %v214_v5 = vld [vmem:[%s6663_s25 + $0x60] sm:$0xf] }
  0x13   : > { %238 = vst [vmem:[#allocation2 + $0x120] sm:$0xf] %v206_v3  ;;  %v215_v6 = vld [vmem:[%s6663_s25 + $0x64] sm:$0xf]  ;;  %v222_v7 = vld [vmem:[%s6663_s25 + $0x90] sm:$0xf]  ;;  %vm6810_vm3 = vmor %vm310_vm0, %vm311_vm1 }
  0x14   : > { %239 = vst [vmem:[#allocation2 + $0x144] sm:$0xf] %v207_v4  ;;  %v223_v9 = vld [vmem:[%s6663_s25 + $0x94] sm:$0xf]  ;;  %v198_v10 = vld [vmem:[%s6663_s25] sm:$0xf]  ;;  %vm6824_vm5 = vmor %vm857_vm2, %vm858_vm4 }
  0x15   : > { %6541 = vmatpush.bf16.msra.mxu1 %v6468_v2  ;;  %6542 = vmatpush.bf16.msra.mxu2 %v6468_v2  ;;  %246 = vst [vmem:[#allocation2 + $0x240] sm:$0xf] %v214_v5  ;;  %v199_v11 = vld [vmem:[%s6663_s25 + $0x4] sm:$0xf]  ;;  %v208_v12 = vld [vmem:[%s6663_s25 + $0x3c] sm:$0xf] }
  0x16   : > { %6543 = vmatpush.bf16.msra.mxu3 %v6468_v2  ;;  %4186 = vmatpush.bf16.msra.mxu0 %v6468_v2  ;;  %247 = vst [vmem:[#allocation2 + $0x264] sm:$0xf] %v215_v6  ;;  %v209_v14 = vld [vmem:[%s6663_s25 + $0x40] sm:$0xf]  ;;  %v216_v15 = vld [vmem:[%s6663_s25 + $0x6c] sm:$0xf] }
  0x17   : > { %254 = vst [vmem:[#allocation2 + $0x360] sm:$0xf] %v222_v7  ;;  %v217_v16 = vld [vmem:[%s6663_s25 + $0x70] sm:$0xf]  ;;  %v224_v17 = vld [vmem:[%s6663_s25 + $0x9c] sm:$0xf] }
  0x18   : > { %255 = vst [vmem:[#allocation2 + $0x384] sm:$0xf] %v223_v9  ;;  %v225_v19 = vld [vmem:[%s6663_s25 + $0xa0] sm:$0xf]  ;;  %v200_v20 = vld [vmem:[%s6663_s25 + $0xc] sm:$0xf] }
  0x19   : > { %6544 = vmatpush.bf16.msra.mxu1 %v6467_v8  ;;  %6545 = vmatpush.bf16.msra.mxu2 %v6467_v8  ;;  %230 = vst [vmem:[#allocation2] sm:$0xf] %v198_v10  ;;  %v201_v21 = vld [vmem:[%s6663_s25 + $0x10] sm:$0xf]  ;;  %v210_v23 = vld [vmem:[%s6663_s25 + $0x48] sm:$0xf] }
  0x1a   : > { %6546 = vmatpush.bf16.msra.mxu3 %v6467_v8  ;;  %4187 = vmatpush.bf16.msra.mxu0 %v6467_v8  ;;  %231 = vst [vmem:[#allocation2 + $0x24] sm:$0xf] %v199_v11  ;;  %v211_v24 = vld [vmem:[%s6663_s25 + $0x4c] sm:$0xf]  ;;  %v5598_v26 = vld [vmem:[#allocation2 + $0x120] sm:$0xf] }
  0x1b   : > { %240 = vst [vmem:[#allocation2 + $0x168] sm:$0xf] %v208_v12  ;;  %v6359_v27 = vld [vmem:[#allocation2 + $0x140] sm:$0xf0]  ;;  %v218_v30 = vld [vmem:[%s6663_s25 + $0x78] sm:$0xf] }
  0x1c   : > { %241 = vst [vmem:[#allocation2 + $0x18c] sm:$0xf] %v209_v14  ;;  %v5742_v28 = vld [vmem:[#allocation2 + $0x240] sm:$0xf]  ;;  %v219_v33 = vld [vmem:[%s6663_s25 + $0x7c] sm:$0xf]  ;;  %v5599_v41 = vor.u32 %v6359_v27, %v5598_v26 }
  0x1d   : > { %6547 = vmatpush.bf16.msra.mxu1 %v6466_v13  ;;  %6548 = vmatpush.bf16.msra.mxu2 %v6466_v13  ;;  %248 = vst [vmem:[#allocation2 + $0x288] sm:$0xf] %v216_v15  ;;  %v6395_v29 = vld [vmem:[#allocation2 + $0x260] sm:$0xf0]  ;;  %v226_v35 = vld [vmem:[%s6663_s25 + $0xa8] sm:$0xf] }
  0x1e   : > { %6549 = vmatpush.bf16.msra.mxu3 %v6466_v13  ;;  %4188 = vmatpush.bf16.msra.mxu0 %v6466_v13  ;;  %249 = vst [vmem:[#allocation2 + $0x2ac] sm:$0xf] %v217_v16  ;;  %v5886_v31 = vld [vmem:[#allocation2 + $0x360] sm:$0xf]  ;;  %v227_v37 = vld [vmem:[%s6663_s25 + $0xac] sm:$0xf]  ;;  %v5743_v42 = vor.u32 %v6395_v29, %v5742_v28 }
  0x1f   : > { %256 = vst [vmem:[#allocation2 + $0x3a8] sm:$0xf] %v224_v17  ;;  %v6431_v32 = vld [vmem:[#allocation2 + $0x380] sm:$0xf0]  ;;  %v202_v40 = vld [vmem:[%s6663_s25 + $0x18] sm:$0xf] }
  0x20   : > { %257 = vst [vmem:[#allocation2 + $0x3cc] sm:$0xf] %v225_v19  ;;  %v5454_v34 = vld [vmem:[#allocation2] sm:$0xf]  ;;  %v203_v43 = vld [vmem:[%s6663_s25 + $0x1c] sm:$0xf]  ;;  %v5887_v44 = vor.u32 %v6431_v32, %v5886_v31 }
  0x21   : > { %6550 = vmatpush.bf16.msra.mxu1 %v6465_v18  ;;  %6551 = vmatpush.bf16.msra.mxu2 %v6465_v18  ;;  %232 = vst [vmem:[#allocation2 + $0x48] sm:$0xf] %v200_v20  ;;  %v6323_v36 = vld [vmem:[#allocation2 + $0x20] sm:$0xf0]  ;;  %v6501_v51 = vld [vmem:[%s7969_s1 + $0x130] sm:$0xff]  ;;  %v6500_v57 = vld [vmem:[%s7969_s1 + $0x128] sm:$0xff] }
  0x22   : > { %6552 = vmatpush.bf16.msra.mxu3 %v6465_v18  ;;  %4189 = vmatpush.bf16.msra.mxu0 %v6465_v18  ;;  %233 = vst [vmem:[#allocation2 + $0x6c] sm:$0xf] %v201_v21  ;;  %v5455_v45 = vor.u32 %v6323_v36, %v5454_v34  ;;  %v6483_v55 = vld [vmem:[%s7969_s1 + $0xa0] sm:$0xff]  ;;  %v212_v58 = vld [vmem:[%s6663_s25 + $0x54] sm:$0xf]  ;;  %v6482_v12 = vld [vmem:[%s7969_s1 + $0x98] sm:$0xff] }
  0x23   : > { %242 = vst [vmem:[#allocation2 + $0x1b0] sm:$0xf] %v210_v23  ;;  %v6491_v56 = vld [vmem:[%s7969_s1 + $0xe0] sm:$0xff]  ;;  %v213_v59 = vld [vmem:[%s6663_s25 + $0x58] sm:$0xf]  ;;  %v6473_v31 = vld [vmem:[%s7969_s1 + $0x50] sm:$0xff] }
  0x24   : > { %243 = vst [vmem:[#allocation2 + $0x1d4] sm:$0xf] %v211_v24  ;;  %v220_v60 = vld [vmem:[%s6663_s25 + $0x84] sm:$0xf]  ;;  %v221_v61 = vld [vmem:[%s6663_s25 + $0x88] sm:$0xf] }
  0x25   : > { %6553 = vmatpush.bf16.msra.mxu1 %v6464_v22  ;;  %6554 = vmatpush.bf16.msra.mxu2 %v6464_v22  ;;  %250 = vst [vmem:[#allocation2 + $0x2d0] sm:$0xf] %v218_v30  ;;  %v5634_v62 = vld [vmem:[#allocation2 + $0x168] sm:$0xf]  ;;  %v6368_v63 = vld [vmem:[#allocation2 + $0x188] sm:$0xf0] }
  0x26   : > { %6555 = vmatpush.bf16.msra.mxu3 %v6464_v22  ;;  %4190 = vmatpush.bf16.msra.mxu0 %v6464_v22  ;;  %251 = vst [vmem:[#allocation2 + $0x2f4] sm:$0xf] %v219_v33  ;;  %v5778_v0 = vld [vmem:[#allocation2 + $0x288] sm:$0xf]  ;;  %v6404_v1 = vld [vmem:[#allocation2 + $0x2a8] sm:$0xf0]  ;;  %v5635_v14 = vor.u32 %v6368_v63, %v5634_v62 }
  0x27   : > { %258 = vst [vmem:[#allocation2 + $0x3f0] sm:$0xf] %v226_v35  ;;  %v228_v2 = vld [vmem:[%s6663_s25 + $0xb4] sm:$0xf]  ;;  %v5922_v3 = vld [vmem:[#allocation2 + $0x3a8] sm:$0xf]  ;;  %v5779_v15 = vor.u32 %v6404_v1, %v5778_v0 }
  0x28   : > { %259 = vst [vmem:[#allocation2 + $0x414] sm:$0xf] %v227_v37  ;;  %v6440_v4 = vld [vmem:[#allocation2 + $0x3c8] sm:$0xf0]  ;;  %v5490_v5 = vld [vmem:[#allocation2 + $0x48] sm:$0xf] }
  0x29   : > { %6556 = vmatpush.bf16.msra.mxu1 %v6463_v25  ;;  %6557 = vmatpush.bf16.msra.mxu2 %v6463_v25  ;;  %234 = vst [vmem:[#allocation2 + $0x90] sm:$0xf] %v202_v40  ;;  %v229_v6 = vld [vmem:[%s6663_s25 + $0xb8] sm:$0xf]  ;;  %v6332_v7 = vld [vmem:[#allocation2 + $0x68] sm:$0xf0]  ;;  %v5923_v16 = vor.u32 %v6440_v4, %v5922_v3 }
  0x2a   : > { %6558 = vmatpush.bf16.msra.mxu3 %v6463_v25  ;;  %4191 = vmatpush.bf16.msra.mxu0 %v6463_v25  ;;  %235 = vst [vmem:[#allocation2 + $0xb4] sm:$0xf] %v203_v43  ;;  %v204_v8 = vld [vmem:[%s6663_s25 + $0x24] sm:$0xf]  ;;  %v205_v11 = vld [vmem:[%s6663_s25 + $0x28] sm:$0xf]  ;;  %v5491_v17 = vor.u32 %v6332_v7, %v5490_v5 }
  0x2b   : > { %244 = vst [vmem:[#allocation2 + $0x1f8] sm:$0xf] %v212_v58  ;;  %v6475_v9 = vld [vmem:[%s7969_s1 + $0x60] sm:$0xff]  ;;  %v6490_v13 = vld [vmem:[%s7969_s1 + $0xd8] sm:$0xff]  ;;  %v6481_v24 = vld [vmem:[%s7969_s1 + $0x90] sm:$0xff] }
  0x2c   : > { %4212 = vmatmul.bf16.vlgmr.msra.gmra.mxu1 %v5599_v41  ;;  %4232 = vmatmul.bf16.vlgmr.msra.gmra.mxu2 %v5743_v42  ;;  %245 = vst [vmem:[#allocation2 + $0x21c] sm:$0xf] %v213_v59  ;;  %v6499_v10 = vld [vmem:[%s7969_s1 + $0x120] sm:$0xff]  ;;  %v6474_v19 = vld [vmem:[%s7969_s1 + $0x58] sm:$0xff]  ;;  %v6489_v25 = vld [vmem:[%s7969_s1 + $0xd0] sm:$0xff] }
  0x2d   : > { %4362 = vmatpush.bf16.msrb.mxu2 %v6486_v38  ;;  %4252 = vmatmul.bf16.vlgmr.msra.gmra.mxu3 %v5887_v44  ;;  %252 = vst [vmem:[#allocation2 + $0x318] sm:$0xf] %v220_v60  ;;  %v262_v18 = vld [vmem:[%s6663_s25] sm:$0xf]  ;;  %v6498_v20 = vld [vmem:[%s7969_s1 + $0x118] sm:$0xff]  ;;  %v6497_v32 = vld [vmem:[%s7969_s1 + $0x110] sm:$0xff] }
  0x2e   : > { %4451 = vmatpush.bf16.msrb.mxu3 %v6494_v39  ;;  %4192 = vmatmul.bf16.vlgmr.msra.gmra.mxu0 %v5455_v45  ;;  %253 = vst [vmem:[#allocation2 + $0x33c] sm:$0xf] %v221_v61  ;;  %v263_v21 = vld [vmem:[%s6663_s25 + $0x4] sm:$0xf]  ;;  %v314_v22 = vshrl.u32 %v262_v18, 16  ;;  %v317_v23 = vshll.u32 %v262_v18, 16 }
  0x2f   : > { %4273 = vmatpush.bf16.msrb.mxu1 %v6478_v46  ;;  %4540 = vmatpush.bf16.msrb.mxu0 %v6502_v47  ;;  %260 = vst [vmem:[#allocation2 + $0x438] sm:$0xf] %v228_v2  ;;  %v323_v26 = vshll.u32 %v263_v21, 16  ;;  %v327_v27 = vshrl.u32 %v263_v21, 16  ;;  %v6781_v30 = vld [vmem:[%s6663_s25 + $0xc] sm:$0xf] }
  0x30   : > { %261 = vst [vmem:[#allocation2 + $0x45c] sm:$0xf] %v229_v6  ;;  %v316_v28 = vrot.slane %v314_v22, 4  ;;  %v319_v29 = vrot.slane %v317_v23, 5  ;;  %v6480_v34 = vld [vmem:[%s7969_s1 + $0x88] sm:$0xff]  ;;  %v6479_v40 = vld [vmem:[%s7969_s1 + $0x80] sm:$0xff] }
  0x31   : > { %4363 = vmatpush.bf16.msrb.mxu2 %v6485_v48  ;;  %236 = vst [vmem:[#allocation2 + $0xd8] sm:$0xf] %v204_v8  ;;  %v6488_v35 = vld [vmem:[%s7969_s1 + $0xc8] sm:$0xff]  ;;  %v325_v36 = vrot.slane %v323_v26, 5  ;;  %v329_v37 = vrot.slane %v327_v27, 4  ;;  %v6487_v41 = vld [vmem:[%s7969_s1 + $0xc0] sm:$0xff] }
  0x32   : > { %4452 = vmatpush.bf16.msrb.mxu3 %v6493_v49  ;;  %237 = vst [vmem:[#allocation2 + $0xfc] sm:$0xf] %v205_v11  ;;  %v320_v33 = vor.u32 %v319_v29, %v316_v28  ;;  %v6472_v38 = vld [vmem:[%s7969_s1 + $0x48] sm:$0xff]  ;;  %v1153_v46 = vshrl.u32 %v6781_v30, 16  ;;  %v761_v49 = vld [vmem:[%s6663_s25] sm:$0xe] }
  0x33   : > { %4274 = vmatpush.bf16.msrb.mxu1 %v6477_v50  ;;  %4541 = vmatpush.bf16.msrb.mxu0 %v6501_v51  ;;  %v6496_v42 = vld [vmem:[%s7969_s1 + $0x108] sm:$0xff]  ;;  %v330_v45 = vor.u32 %v329_v37, %v325_v36  ;;  %v762_v50 = vld [vmem:[%s6663_s25 + $0x4] sm:$0xf]  ;;  %v5197_v51 = vld [vmem:[%s6663_s25 + $0x10] sm:$0xf]  ;;  %v5148_v60 = vrot.slane %v761_v49, 9 }
  0x34   : > { %v321_v39 = vrot.slane %v320_v33, 4  ;;  %v264_v43 = vld [vmem:[%s6663_s25 + $0x8] sm:$0x1]  ;;  %v5958_v61 = vld [vmem:[#allocation2 + $0x3f0] sm:$0xf]  ;;  %v862_v2 = vrot.slane %v762_v50, 5 }
  0x35   : > { %4364 = vmatpush.bf16.msrb.mxu2 %v6484_v52  ;;  %v333_v48 = vshll.u32 %v264_v43, 16  ;;  %v1156_v52 = vshll.u32 %v6781_v30, 16  ;;  %v763_v58 = vld [vmem:[%s6663_s25 + $0x8] sm:$0x1]  ;;  %v6449_v62 = vld [vmem:[#allocation2 + $0x410] sm:$0xf0] }
  0x36   : > { %4453 = vmatpush.bf16.msrb.mxu3 %v6492_v53  ;;  %v326_v47 = vsel %vm6810_vm3, %v321_v39, %v325_v36  ;;  %v5670_v53 = vld [vmem:[#allocation2 + $0x1b0] sm:$0xf]  ;;  %v6341_v0 = vld [vmem:[#allocation2 + $0xb0] sm:$0xf0]  ;;  %v865_v3 = vrot.slane %v763_v58, 5  ;;  %v1155_v5 = vrot.slane %v1153_v46, 4  ;;  %v863_v11 = vsel %vm6824_vm5, %v5148_v60, %v862_v2 }
  0x37   : > { %4275 = vmatpush.bf16.msrb.mxu1 %v6476_v54  ;;  %4542 = vmatpush.bf16.msrb.mxu0 %v6500_v57  ;;  %v6377_v54 = vld [vmem:[#allocation2 + $0x1d0] sm:$0xf0]  ;;  %v331_v57 = vrot.slane %v330_v45, 4  ;;  %729 = vst [vmem:[#allocation2 + $0x4] sm:$0xf] %v326_v47  ;;  %v335_v1 = vrot.slane %v333_v48, 5  ;;  %v5959_v21 = vor.u32 %v6449_v62, %v5958_v61 }
  0x38   : > { %v5526_v63 = vld [vmem:[#allocation2 + $0x90] sm:$0xf]  ;;  %v5164_v4 = vld [vmem:[%s6663_s25 + $0xc] sm:$0xf]  ;;  %v5198_v7 = vld [vmem:[%s6663_s25 + $0x14] sm:$0x1] }
  0x39   : > { %4365 = vmatpush.bf16.msrb.mxu2 %v6483_v55  ;;  %v5814_v55 = vld [vmem:[#allocation2 + $0x2d0] sm:$0xf]  ;;  %1072 = vst [vmem:[#allocation2 + $0xc] sm:$0xf] %v5164_v4  ;;  %v6471_v8 = vld [vmem:[%s7969_s1 + $0x40] sm:$0xff]  ;;  %v5527_v22 = vor.u32 %v6341_v0, %v5526_v63  ;;  %v6526_v37 = vld [vmem:[%s7969_s1 + $0x1f8] sm:$0xff] }
  0x3a   : > { %4454 = vmatpush.bf16.msrb.mxu3 %v6491_v56  ;;  %v6413_v56 = vld [vmem:[#allocation2 + $0x2f0] sm:$0xf0]  ;;  %v5165_v6 = vld [vmem:[%s6663_s25 + $0x10] sm:$0xf]  ;;  %1004 = vst [vmem:[#allocation2 + $0x8] sm:$0xf] %v863_v11 }
  0x3b   : > { %4276 = vmatpush.bf16.msrb.mxu1 %v6475_v9  ;;  %4543 = vmatpush.bf16.msrb.mxu0 %v6499_v10  ;;  %v6495_v9 = vld [vmem:[%s7969_s1 + $0x100] sm:$0xff]  ;;  %v336_v10 = vsel %vm6810_vm3, %v331_v57, %v335_v1  ;;  %1073 = vst [vmem:[#allocation2 + $0x30] sm:$0xf] %v5165_v6  ;;  %v5815_v18 = vor.u32 %v6413_v56, %v5814_v55  ;;  %v265_v26 = vld [vmem:[%s6663_s25 + $0xc] sm:$0xf] }
  0x3c   : > { %4217 = vmatmul.bf16.gmra.mxu1 %v5635_v14  ;;  %4237 = vmatmul.bf16.gmra.mxu2 %v5779_v15  ;;  %730 = vst [vmem:[#allocation2 + $0x28] sm:$0xf] %v336_v10  ;;  %v1162_v14 = vshll.u32 %v5197_v51, 16  ;;  %v1166_v15 = vshrl.u32 %v5197_v51, 16  ;;  %v266_v29 = vld [vmem:[%s6663_s25 + $0x10] sm:$0xf] }
  0x3d   : > { %4366 = vmatpush.bf16.msrb.mxu2 %v6482_v12  ;;  %4257 = vmatmul.bf16.gmra.mxu3 %v5923_v16  ;;  %v864_v12 = vrot.slane %v862_v2, 4  ;;  %v1172_v16 = vshll.u32 %v5198_v7, 16  ;;  %v338_v30 = vshrl.u32 %v265_v26, 16  ;;  %v347_v33 = vshll.u32 %v266_v29, 16  ;;  %v267_v43 = vld [vmem:[%s6663_s25 + $0x14] sm:$0x1] }
  0x3e   : > { %4455 = vmatpush.bf16.msrb.mxu3 %v6490_v13  ;;  %4197 = vmatmul.bf16.gmra.mxu0 %v5491_v17  ;;  %v1158_v13 = vrot.slane %v1156_v52, 5  ;;  %v5671_v17 = vor.u32 %v6377_v54, %v5670_v53  ;;  %v1164_v23 = vrot.slane %v1162_v14, 5  ;;  %v357_v48 = vshll.u32 %v267_v43, 16  ;;  %v5199_v49 = vld [vmem:[%s6663_s25 + $0x18] sm:$0xf] }
  0x3f   : > { %4277 = vmatpush.bf16.msrb.mxu1 %v6474_v19  ;;  %4544 = vmatpush.bf16.msrb.mxu0 %v6498_v20  ;;  %v866_v19 = vsel %vm6824_vm5, %v864_v12, %v865_v3  ;;  %v1174_v28 = vrot.slane %v1172_v16, 5  ;;  %v340_v39 = vrot.slane %v338_v30, 4  ;;  %v349_v45 = vrot.slane %v347_v33, 5  ;;  %v764_v50 = vld [vmem:[%s6663_s25 + $0xc] sm:$0xe] }
  0x40   : > { %v1159_v20 = vor.u32 %v1158_v13, %v1155_v5  ;;  %1005 = vst [vmem:[#allocation2 + $0x2c] sm:$0xf] %v866_v19  ;;  %v765_v51 = vld [vmem:[%s6663_s25 + $0x10] sm:$0xf]  ;;  %v766_v52 = vld [vmem:[%s6663_s25 + $0x14] sm:$0x1] }
  0x41   : > { %4367 = vmatpush.bf16.msrb.mxu2 %v6481_v24  ;;  %v1168_v24 = vrot.slane %v1166_v15, 4  ;;  %v5200_v53 = vld [vmem:[%s6663_s25 + $0x1c] sm:$0xf]  ;;  %v359_v56 = vrot.slane %v357_v48, 5  ;;  %v5149_v57 = vrot.slane %v764_v50, 9  ;;  %v869_v0 = vrot.slane %v765_v51, 5 }
  0x42   : > { %4456 = vmatpush.bf16.msrb.mxu3 %v6489_v25  ;;  %v1160_v25 = vrot.slane %v1159_v20, 4  ;;  %v5166_v58 = vld [vmem:[%s6663_s25 + $0x18] sm:$0xf]  ;;  %v6386_v61 = vld [vmem:[#allocation2 + $0x218] sm:$0xf0]  ;;  %v872_v1 = vrot.slane %v766_v52, 5 }
  0x43   : > { %4278 = vmatpush.bf16.msrb.mxu1 %v6473_v31  ;;  %4545 = vmatpush.bf16.msrb.mxu0 %v6497_v32  ;;  %v1169_v27 = vor.u32 %v1168_v24, %v1164_v23  ;;  %v341_v31 = vshll.u32 %v265_v26, 16  ;;  %v5706_v60 = vld [vmem:[#allocation2 + $0x1f8] sm:$0xf]  ;;  %v6422_v63 = vld [vmem:[#allocation2 + $0x338] sm:$0xf0]  ;;  %v870_v10 = vsel %vm6824_vm5, %v5149_v57, %v869_v0  ;;  %v871_v11 = vrot.slane %v869_v0, 4 }
  0x44   : > { %v1165_v32 = vsel %vm6810_vm3, %v1160_v25, %v1164_v23  ;;  %v5850_v62 = vld [vmem:[#allocation2 + $0x318] sm:$0xf]  ;;  %v5167_v2 = vld [vmem:[%s6663_s25 + $0x1c] sm:$0xf]  ;;  %1074 = vst [vmem:[#allocation2 + $0x54] sm:$0xf] %v5166_v58 }
  0x45   : > { %4368 = vmatpush.bf16.msrb.mxu2 %v6480_v34  ;;  %v351_v34 = vshrl.u32 %v266_v29, 16  ;;  %v1170_v36 = vrot.slane %v1169_v27, 4  ;;  %1568 = vst [vmem:[#allocation2 + $0x10] sm:$0xf] %v1165_v32  ;;  %v5994_v3 = vld [vmem:[#allocation2 + $0x438] sm:$0xf] }
  0x46   : > { %4457 = vmatpush.bf16.msrb.mxu3 %v6488_v35  ;;  %v6518_v35 = vld [vmem:[%s7969_s1 + $0x1b8] sm:$0xff]  ;;  %1075 = vst [vmem:[#allocation2 + $0x78] sm:$0xf] %v5167_v2  ;;  %v5201_v12 = vld [vmem:[%s6663_s25 + $0x20] sm:$0x1]  ;;  %v1180_v13 = vshll.u32 %v5199_v49, 16 }
  0x47   : > { %4279 = vmatpush.bf16.msrb.mxu1 %v6472_v38  ;;  %4546 = vmatpush.bf16.msrb.mxu0 %v6496_v42  ;;  %v6510_v38 = vld [vmem:[%s7969_s1 + $0x178] sm:$0xff]  ;;  %v353_v47 = vrot.slane %v351_v34, 4  ;;  %1006 = vst [vmem:[#allocation2 + $0x50] sm:$0xf] %v870_v10  ;;  %v1186_v16 = vshll.u32 %v5200_v53, 16  ;;  %v1196_v20 = vshll.u32 %v5201_v12, 16 }
  0x48   : > { %v6534_v42 = vld [vmem:[%s7969_s1 + $0x238] sm:$0xff]  ;;  %v1182_v19 = vrot.slane %v1180_v13, 5  ;;  %v6319_v0 = vld [vmem:[#allocation2 + $0x4] sm:$0xf]  ;;  %v5462_v2 = vld [vmem:[#allocation2 + $0x8] sm:$0xf] }
  0x49   : > { %4369 = vmatpush.bf16.msrb.mxu2 %v6479_v40  ;;  %v343_v40 = vrot.slane %v341_v31, 5  ;;  %v354_v55 = vor.u32 %v353_v47, %v349_v45  ;;  %v6458_v4 = vld [vmem:[#allocation2 + $0x458] sm:$0xf0]  ;;  %v5562_v5 = vld [vmem:[#allocation2 + $0xd8] sm:$0xf]  ;;  %v1188_v23 = vrot.slane %v1186_v16, 5 }
  0x4a   : > { %4458 = vmatpush.bf16.msrb.mxu3 %v6487_v41  ;;  %v1175_v41 = vsel %vm6810_vm3, %v1170_v36, %v1174_v28  ;;  %v6350_v6 = vld [vmem:[#allocation2 + $0xf8] sm:$0xf0]  ;;  %v5995_v25 = vor.u32 %v6458_v4, %v5994_v3  ;;  %v1198_v28 = vrot.slane %v1196_v20, 5  ;;  %v268_v29 = vld [vmem:[%s6663_s25 + $0x18] sm:$0xf] }
  0x4b   : > { %4280 = vmatpush.bf16.msrb.mxu1 %v6471_v8  ;;  %4547 = vmatpush.bf16.msrb.mxu0 %v6495_v9  ;;  %1569 = vst [vmem:[#allocation2 + $0x34] sm:$0xf] %v1175_v41  ;;  %v344_v46 = vor.u32 %v343_v40, %v340_v39  ;;  %v355_v8 = vrot.slane %v354_v55, 4  ;;  %v1177_v9 = vshrl.u32 %v5199_v49, 16  ;;  %v5563_v26 = vor.u32 %v6350_v6, %v5562_v5  ;;  %v269_v30 = vld [vmem:[%s6663_s25 + $0x1c] sm:$0xf] }
  0x4c   : > { %4222 = vmatmul.bf16.gmra.mxu1 %v5671_v17  ;;  %4242 = vmatmul.bf16.gmra.mxu2 %v5815_v18  ;;  %v1190_v17 = vshrl.u32 %v5200_v53, 16  ;;  %v873_v18 = vsel %vm6824_vm5, %v871_v11, %v872_v1  ;;  %v362_v32 = vshrl.u32 %v268_v29, 16  ;;  %v365_v33 = vshll.u32 %v268_v29, 16  ;;  %v5202_v40 = vld [vmem:[%s6663_s25 + $0x24] sm:$0xf] }
  0x4d   : > { %4262 = vmatmul.bf16.gmra.mxu3 %v5959_v21  ;;  %4718 = vmatpush.bf16.msra.mxu2 %v6518_v35  ;;  %v345_v54 = vrot.slane %v344_v46, 4  ;;  %v360_v14 = vsel %vm6810_vm3, %v355_v8, %v359_v56  ;;  %v1179_v15 = vrot.slane %v1177_v9, 4  ;;  %v5707_v21 = vor.u32 %v6386_v61, %v5706_v60  ;;  %1007 = vst [vmem:[#allocation2 + $0x74] sm:$0xf] %v873_v18  ;;  %v767_v50 = vld [vmem:[%s6663_s25 + $0x18] sm:$0xe] }
  0x4e   : > { %4202 = vmatmul.bf16.gmra.mxu0 %v5527_v22  ;;  %4807 = vmatpush.bf16.msra.mxu3 %v6526_v37  ;;  %732 = vst [vmem:[#allocation2 + $0x70] sm:$0xf] %v360_v14  ;;  %v5851_v22 = vor.u32 %v6422_v63, %v5850_v62  ;;  %v1192_v24 = vrot.slane %v1190_v17, 4  ;;  %v371_v34 = vshll.u32 %v269_v30, 16  ;;  %v375_v36 = vshrl.u32 %v269_v30, 16 }
  0x4f   : > { %4629 = vmatpush.bf16.msra.mxu1 %v6510_v38  ;;  %4896 = vmatpush.bf16.msra.mxu0 %v6534_v42  ;;  %v350_v7 = vsel %vm6810_vm3, %v345_v54, %v349_v45  ;;  %v1183_v27 = vor.u32 %v1182_v19, %v1179_v15  ;;  %v364_v38 = vrot.slane %v362_v32, 4  ;;  %v367_v39 = vrot.slane %v365_v33, 5  ;;  %v270_v42 = vld [vmem:[%s6663_s25 + $0x20] sm:$0x1]  ;;  %v768_v54 = vld [vmem:[%s6663_s25 + $0x1c] sm:$0xf] }
  0x50   : > { %731 = vst [vmem:[#allocation2 + $0x4c] sm:$0xf] %v350_v7  ;;  %v1193_v31 = vor.u32 %v1192_v24, %v1188_v23  ;;  %v373_v43 = vrot.slane %v371_v34, 5  ;;  %v377_v45 = vrot.slane %v375_v36, 4  ;;  %v381_v48 = vshll.u32 %v270_v42, 16  ;;  %v6525_v42 = vld [vmem:[%s7969_s1 + $0x1f0] sm:$0xff] }
  0x51   : > { %v1184_v35 = vrot.slane %v1183_v27, 4  ;;  %v368_v47 = vor.u32 %v367_v39, %v364_v38  ;;  %v1201_v51 = vshrl.u32 %v5202_v40, 16  ;;  %v769_v55 = vld [vmem:[%s6663_s25 + $0x20] sm:$0x1]  ;;  %v5150_v57 = vrot.slane %v767_v50, 9 }
  0x52   : > { %v1194_v37 = vrot.slane %v1193_v31, 4  ;;  %v378_v49 = vor.u32 %v377_v45, %v373_v43  ;;  %v383_v53 = vrot.slane %v381_v48, 5  ;;  %v876_v58 = vrot.slane %v768_v54, 5  ;;  %v5203_v61 = vld [vmem:[%s6663_s25 + $0x28] sm:$0xf]  ;;  %v6533_v45 = vld [vmem:[%s7969_s1 + $0x230] sm:$0xff]  ;;  %4808 = vmatpush.bf16.msra.mxu3 %v6525_v42 }
  0x53   : > { %v1189_v41 = vsel %vm6810_vm3, %v1184_v35, %v1188_v23  ;;  %v369_v52 = vrot.slane %v368_v47, 4  ;;  %v879_v60 = vrot.slane %v769_v55, 5  ;;  %v5204_v63 = vld [vmem:[%s6663_s25 + $0x2c] sm:$0x1]  ;;  %v5456_v1 = vld [vmem:[#allocation2 + $0x24] sm:$0xf0]  ;;  %4897 = vmatpush.bf16.msra.mxu0 %v6533_v45 }
  0x54   : > { %v1199_v46 = vsel %vm6810_vm3, %v1194_v37, %v1198_v28  ;;  %1570 = vst [vmem:[#allocation2 + $0x58] sm:$0xf] %v1189_v41  ;;  %v379_v56 = vrot.slane %v378_v49, 4  ;;  %v6324_v3 = vld [vmem:[#allocation2 + $0x28] sm:$0xf0]  ;;  %v877_v5 = vsel %vm6824_vm5, %v5150_v57, %v876_v58  ;;  %v878_v6 = vrot.slane %v876_v58, 4 }
  0x55   : > { %1571 = vst [vmem:[#allocation2 + $0x7c] sm:$0xf] %v1199_v46  ;;  %v374_v62 = vsel %vm6810_vm3, %v369_v52, %v373_v43  ;;  %v5168_v7 = vld [vmem:[%s6663_s25 + $0x24] sm:$0xf]  ;;  %v6320_v8 = vld [vmem:[#allocation2 + $0xc] sm:$0xf]  ;;  %v5463_v23 = vor.u32 %v6324_v3, %v5462_v2 }
  0x56   : > { %v384_v4 = vsel %vm6810_vm3, %v379_v56, %v383_v53  ;;  %733 = vst [vmem:[#allocation2 + $0x94] sm:$0xf] %v374_v62  ;;  %v5464_v9 = vld [vmem:[#allocation2 + $0x2c] sm:$0xf0]  ;;  %v1203_v11 = vrot.slane %v1201_v51, 4  ;;  %v1204_v12 = vshll.u32 %v5202_v40, 16  ;;  %v880_v15 = vsel %vm6824_vm5, %v878_v6, %v879_v60 }
  0x57   : > { %v5470_v10 = vld [vmem:[#allocation2 + $0x10] sm:$0xf]  ;;  %734 = vst [vmem:[#allocation2 + $0xb8] sm:$0xf] %v384_v4  ;;  %v1210_v13 = vshll.u32 %v5203_v61, 16  ;;  %v1214_v14 = vshrl.u32 %v5203_v61, 16 }
  0x58   : > { %1008 = vst [vmem:[#allocation2 + $0x98] sm:$0xf] %v877_v5  ;;  %v5169_v16 = vld [vmem:[%s6663_s25 + $0x28] sm:$0xf]  ;;  %v1220_v17 = vshll.u32 %v5204_v63, 16  ;;  %v1206_v19 = vrot.slane %v1204_v12, 5 }
  0x59   : > { %v6325_v18 = vld [vmem:[#allocation2 + $0x30] sm:$0xf0]  ;;  %1009 = vst [vmem:[#allocation2 + $0xbc] sm:$0xf] %v880_v15  ;;  %v1212_v20 = vrot.slane %v1210_v13, 5 }
  0x5a   : > { %1076 = vst [vmem:[#allocation2 + $0x9c] sm:$0xf] %v5168_v7  ;;  %v1207_v24 = vor.u32 %v1206_v19, %v1203_v11  ;;  %v1222_v28 = vrot.slane %v1220_v17, 5  ;;  %v271_v29 = vld [vmem:[%s6663_s25 + $0x24] sm:$0xf]  ;;  %v6517_v40 = vld [vmem:[%s7969_s1 + $0x1b0] sm:$0xff] }
  0x5b   : > { %1077 = vst [vmem:[#allocation2 + $0xc0] sm:$0xf] %v5169_v16  ;;  %v272_v30 = vld [vmem:[%s6663_s25 + $0x28] sm:$0xf]  ;;  %v386_v32 = vshrl.u32 %v271_v29, 16  ;;  %v389_v33 = vshll.u32 %v271_v29, 16  ;;  %4719 = vmatpush.bf16.msra.mxu2 %v6517_v40 }
  0x5c   : > { %4227 = vmatmul.bf16.gmra.mxu1 %v5707_v21  ;;  %4247 = vmatmul.bf16.gmra.mxu2 %v5851_v22  ;;  %v1216_v21 = vrot.slane %v1214_v14, 4  ;;  %v5459_v22 = vor.u32 %v6319_v0, %v5456_v1  ;;  %v1208_v31 = vrot.slane %v1207_v24, 4  ;;  %v395_v35 = vshll.u32 %v272_v30, 16  ;;  %v6509_v43 = vld [vmem:[%s7969_s1 + $0x170] sm:$0xff]  ;;  %v273_v47 = vld [vmem:[%s6663_s25 + $0x2c] sm:$0x1] }
  0x5d   : > { %4267 = vmatmul.bf16.gmra.mxu3 %v5995_v25  ;;  %v5467_v25 = vor.u32 %v6320_v8, %v5464_v9  ;;  %v399_v36 = vshrl.u32 %v272_v30, 16  ;;  %v388_v38 = vrot.slane %v386_v32, 4  ;;  %v391_v39 = vrot.slane %v389_v33, 5  ;;  %v5205_v50 = vld [vmem:[%s6663_s25 + $0x30] sm:$0xf]  ;;  %4630 = vmatpush.bf16.msra.mxu1 %v6509_v43 }
  0x5e   : > { %4207 = vmatmul.bf16.gmra.mxu0 %v5563_v26  ;;  %v5471_v26 = vor.u32 %v6325_v18, %v5470_v10  ;;  %v1217_v27 = vor.u32 %v1216_v21, %v1212_v20  ;;  %v1213_v37 = vsel %vm6810_vm3, %v1208_v31, %v1212_v20  ;;  %v397_v48 = vrot.slane %v395_v35, 5  ;;  %v770_v53 = vld [vmem:[%s6663_s25 + $0x24] sm:$0xe]  ;;  %v771_v54 = vld [vmem:[%s6663_s25 + $0x28] sm:$0xf] }
  0x5f   : > { %1572 = vst [vmem:[#allocation2 + $0xa0] sm:$0xf] %v1213_v37  ;;  %v392_v46 = vor.u32 %v391_v39, %v388_v38  ;;  %v401_v49 = vrot.slane %v399_v36, 4  ;;  %v405_v52 = vshll.u32 %v273_v47, 16  ;;  %v772_v56 = vld [vmem:[%s6663_s25 + $0x2c] sm:$0x1] }
  0x60   : > { %v1218_v34 = vrot.slane %v1217_v27, 4  ;;  %v5151_v57 = vrot.slane %v770_v53, 9  ;;  %v883_v58 = vrot.slane %v771_v54, 5  ;;  %v5206_v60 = vld [vmem:[%s6663_s25 + $0x34] sm:$0xf]  ;;  %v886_v63 = vrot.slane %v772_v56, 5 }
  0x61   : > { %v393_v51 = vrot.slane %v392_v46, 4  ;;  %v402_v55 = vor.u32 %v401_v49, %v397_v48  ;;  %v407_v62 = vrot.slane %v405_v52, 5  ;;  %v5170_v0 = vld [vmem:[%s6663_s25 + $0x30] sm:$0xf]  ;;  %v5207_v1 = vld [vmem:[%s6663_s25 + $0x38] sm:$0x1] }
  0x62   : > { %v1223_v41 = vsel %vm6810_vm3, %v1218_v34, %v1222_v28  ;;  %v6328_v2 = vld [vmem:[#allocation2 + $0x4c] sm:$0xf]  ;;  %v5492_v3 = vld [vmem:[#allocation2 + $0x6c] sm:$0xf0]  ;;  %v6333_v5 = vld [vmem:[#allocation2 + $0x70] sm:$0xf0]  ;;  %v884_v7 = vsel %vm6824_vm5, %v5151_v57, %v883_v58 }
  0x63   : > { %1573 = vst [vmem:[#allocation2 + $0xc4] sm:$0xf] %v1223_v41  ;;  %v398_v61 = vsel %vm6810_vm3, %v393_v51, %v397_v48  ;;  %v5498_v4 = vld [vmem:[#allocation2 + $0x50] sm:$0xf]  ;;  %v403_v6 = vrot.slane %v402_v55, 4  ;;  %v885_v8 = vrot.slane %v883_v58, 4 }
  0x64   : > { %735 = vst [vmem:[#allocation2 + $0xdc] sm:$0xf] %v398_v61  ;;  %v1225_v9 = vshrl.u32 %v5205_v50, 16  ;;  %v6329_v10 = vld [vmem:[#allocation2 + $0x54] sm:$0xf]  ;;  %v1228_v14 = vshll.u32 %v5205_v50, 16 }
  0x65   : > { %v5500_v11 = vld [vmem:[#allocation2 + $0x74] sm:$0xf0]  ;;  %v6334_v13 = vld [vmem:[#allocation2 + $0x78] sm:$0xf0]  ;;  %1010 = vst [vmem:[#allocation2 + $0xe0] sm:$0xf] %v884_v7  ;;  %v408_v16 = vsel %vm6810_vm3, %v403_v6, %v407_v62  ;;  %v887_v17 = vsel %vm6824_vm5, %v885_v8, %v886_v63 }
  0x66   : > { %v5506_v12 = vld [vmem:[#allocation2 + $0x58] sm:$0xf]  ;;  %v1234_v15 = vshll.u32 %v5206_v60, 16  ;;  %v5171_v18 = vld [vmem:[%s6663_s25 + $0x34] sm:$0xf]  ;;  %v1227_v19 = vrot.slane %v1225_v9, 4  ;;  %v5503_v28 = vor.u32 %v6329_v10, %v5500_v11 }
  0x67   : > { %1078 = vst [vmem:[#allocation2 + $0xe4] sm:$0xf] %v5170_v0  ;;  %v1238_v20 = vshrl.u32 %v5206_v60, 16  ;;  %v1230_v21 = vrot.slane %v1228_v14, 5  ;;  %v5507_v29 = vor.u32 %v6334_v13, %v5506_v12  ;;  %v274_v32 = vld [vmem:[%s6663_s25 + $0x30] sm:$0xf] }
  0x68   : > { %736 = vst [vmem:[#allocation2 + $0x100] sm:$0xf] %v408_v16  ;;  %v275_v33 = vld [vmem:[%s6663_s25 + $0x34] sm:$0xf]  ;;  %v410_v35 = vshrl.u32 %v274_v32, 16  ;;  %v413_v36 = vshll.u32 %v274_v32, 16 }
  0x69   : > { %1011 = vst [vmem:[#allocation2 + $0x104] sm:$0xf] %v887_v17  ;;  %v1240_v24 = vrot.slane %v1238_v20, 4  ;;  %v1231_v27 = vor.u32 %v1230_v21, %v1227_v19  ;;  %v419_v37 = vshll.u32 %v275_v33, 16  ;;  %v423_v39 = vshrl.u32 %v275_v33, 16 }
  0x6a   : > { %1079 = vst [vmem:[#allocation2 + $0x108] sm:$0xf] %v5171_v18  ;;  %v412_v41 = vrot.slane %v410_v35, 4  ;;  %v415_v42 = vrot.slane %v413_v36, 5  ;;  %v276_v46 = vld [vmem:[%s6663_s25 + $0x38] sm:$0x1] }
  0x6b   : > { %v1232_v34 = vrot.slane %v1231_v27, 4  ;;  %v421_v45 = vrot.slane %v419_v37, 5  ;;  %v425_v48 = vrot.slane %v423_v39, 4  ;;  %v429_v49 = vshll.u32 %v276_v46, 16  ;;  %v773_v50 = vld [vmem:[%s6663_s25 + $0x30] sm:$0xe] }
  0x6c   : > { %4281 = vmatmul.bf16.vlgmr.msrb.gmra.mxu1 %v5459_v22  ;;  %4370 = vmatmul.bf16.vlgmr.msrb.gmra.mxu2 %v5463_v23  ;;  %v1236_v22 = vrot.slane %v1234_v15, 5  ;;  %v1244_v23 = vshll.u32 %v5207_v1, 16  ;;  %v416_v47 = vor.u32 %v415_v42, %v412_v41  ;;  %v5208_v51 = vld [vmem:[%s6663_s25 + $0x3c] sm:$0xf]  ;;  %v774_v53 = vld [vmem:[%s6663_s25 + $0x34] sm:$0xf] }
  0x6d   : > { %4459 = vmatmul.bf16.vlgmr.msrb.gmra.mxu3 %v5467_v25  ;;  %v5495_v25 = vor.u32 %v6328_v2, %v5492_v3  ;;  %v775_v54 = vld [vmem:[%s6663_s25 + $0x38] sm:$0x1]  ;;  %v5152_v55 = vrot.slane %v773_v50, 9  ;;  %v426_v56 = vor.u32 %v425_v48, %v421_v45  ;;  %v431_v57 = vrot.slane %v429_v49, 5  ;;  %v5209_v61 = vld [vmem:[%s6663_s25 + $0x40] sm:$0xf] }
  0x6e   : > { %4548 = vmatmul.bf16.vlgmr.msrb.gmra.mxu0 %v5471_v26  ;;  %v5499_v26 = vor.u32 %v6333_v5, %v5498_v4  ;;  %v1241_v30 = vor.u32 %v1240_v24, %v1236_v22  ;;  %v1246_v31 = vrot.slane %v1244_v23, 5  ;;  %v1237_v40 = vsel %vm6810_vm3, %v1232_v34, %v1236_v22  ;;  %v5172_v63 = vld [vmem:[%s6663_s25 + $0x3c] sm:$0xf]  ;;  %v5210_v0 = vld [vmem:[%s6663_s25 + $0x44] sm:$0x1]  ;;  %v6516_v42 = vld [vmem:[%s7969_s1 + $0x1a8] sm:$0xff] }
  0x6f   : > { %1574 = vst [vmem:[#allocation2 + $0xe8] sm:$0xf] %v1237_v40  ;;  %v417_v52 = vrot.slane %v416_v47, 4  ;;  %v890_v58 = vrot.slane %v774_v53, 5  ;;  %v893_v60 = vrot.slane %v775_v54, 5  ;;  %v427_v5 = vrot.slane %v426_v56, 4  ;;  %4720 = vmatpush.bf16.msra.mxu2 %v6516_v42 }
  0x70   : > { %v1242_v38 = vrot.slane %v1241_v30, 4  ;;  %v6337_v1 = vld [vmem:[#allocation2 + $0x94] sm:$0xf]  ;;  %v5528_v2 = vld [vmem:[#allocation2 + $0xb4] sm:$0xf0]  ;;  %v1249_v8 = vshrl.u32 %v5208_v51, 16 }
  0x71   : > { %v422_v62 = vsel %vm6810_vm3, %v417_v52, %v421_v45  ;;  %v5534_v3 = vld [vmem:[#allocation2 + $0x98] sm:$0xf]  ;;  %v6342_v4 = vld [vmem:[#allocation2 + $0xb8] sm:$0xf0]  ;;  %v891_v6 = vsel %vm6824_vm5, %v5152_v55, %v890_v58  ;;  %v892_v7 = vrot.slane %v890_v58, 4  ;;  %v1252_v13 = vshll.u32 %v5208_v51, 16 }
  0x72   : > { %v1247_v43 = vsel %vm6810_vm3, %v1242_v38, %v1246_v31  ;;  %737 = vst [vmem:[#allocation2 + $0x124] sm:$0xf] %v422_v62  ;;  %v6338_v9 = vld [vmem:[#allocation2 + $0x9c] sm:$0xf]  ;;  %v5536_v10 = vld [vmem:[#allocation2 + $0xbc] sm:$0xf0]  ;;  %v432_v15 = vsel %vm6810_vm3, %v427_v5, %v431_v57  ;;  %v5531_v24 = vor.u32 %v6337_v1, %v5528_v2 }
  0x73   : > { %1575 = vst [vmem:[#allocation2 + $0x10c] sm:$0xf] %v1247_v43  ;;  %v5542_v11 = vld [vmem:[#allocation2 + $0xa0] sm:$0xf]  ;;  %v6343_v12 = vld [vmem:[#allocation2 + $0xc0] sm:$0xf0]  ;;  %v894_v16 = vsel %vm6824_vm5, %v892_v7, %v893_v60  ;;  %v5539_v27 = vor.u32 %v6338_v9, %v5536_v10 }
  0x74   : > { %1012 = vst [vmem:[#allocation2 + $0x128] sm:$0xf] %v891_v6  ;;  %v1258_v14 = vshll.u32 %v5209_v61, 16  ;;  %v5173_v17 = vld [vmem:[%s6663_s25 + $0x40] sm:$0xf]  ;;  %v1251_v18 = vrot.slane %v1249_v8, 4 }
  0x75   : > { %1080 = vst [vmem:[#allocation2 + $0x12c] sm:$0xf] %v5172_v63  ;;  %v1262_v19 = vshrl.u32 %v5209_v61, 16  ;;  %v1254_v20 = vrot.slane %v1252_v13, 5  ;;  %v1268_v22 = vshll.u32 %v5210_v0, 16  ;;  %v6524_v45 = vld [vmem:[%s7969_s1 + $0x1e8] sm:$0xff] }
  0x76   : > { %738 = vst [vmem:[#allocation2 + $0x148] sm:$0xf] %v432_v15  ;;  %v1260_v21 = vrot.slane %v1258_v14, 5  ;;  %v277_v31 = vld [vmem:[%s6663_s25 + $0x3c] sm:$0xf]  ;;  %4809 = vmatpush.bf16.msra.mxu3 %v6524_v45  ;;  %v6508_v57 = vld [vmem:[%s7969_s1 + $0x168] sm:$0xff] }
  0x77   : > { %1013 = vst [vmem:[#allocation2 + $0x14c] sm:$0xf] %v894_v16  ;;  %v1264_v23 = vrot.slane %v1262_v19, 4  ;;  %v1270_v30 = vrot.slane %v1268_v22, 5  ;;  %v278_v32 = vld [vmem:[%s6663_s25 + $0x40] sm:$0xf]  ;;  %4631 = vmatpush.bf16.msra.mxu1 %v6508_v57 }
  0x78   : > { %1081 = vst [vmem:[#allocation2 + $0x150] sm:$0xf] %v5173_v17  ;;  %v434_v34 = vshrl.u32 %v277_v31, 16  ;;  %v437_v35 = vshll.u32 %v277_v31, 16  ;;  %v443_v36 = vshll.u32 %v278_v32, 16  ;;  %v447_v38 = vshrl.u32 %v278_v32, 16 }
  0x79   : > { %v279_v47 = vld [vmem:[%s6663_s25 + $0x44] sm:$0x1]  ;;  %v776_v51 = vld [vmem:[%s6663_s25 + $0x3c] sm:$0xe]  ;;  %v5211_v52 = vld [vmem:[%s6663_s25 + $0x48] sm:$0xf] }
  0x7a   : > { %v436_v40 = vrot.slane %v434_v34, 4  ;;  %v439_v41 = vrot.slane %v437_v35, 5  ;;  %v445_v46 = vrot.slane %v443_v36, 5  ;;  %v449_v49 = vrot.slane %v447_v38, 4  ;;  %v777_v54 = vld [vmem:[%s6663_s25 + $0x40] sm:$0xf] }
  0x7b   : > { %v453_v50 = vshll.u32 %v279_v47, 16  ;;  %v778_v55 = vld [vmem:[%s6663_s25 + $0x44] sm:$0x1]  ;;  %v5153_v56 = vrot.slane %v776_v51, 9  ;;  %v897_v61 = vrot.slane %v777_v54, 5  ;;  %v6532_v7 = vld [vmem:[%s7969_s1 + $0x228] sm:$0xff] }
  0x7c   : > { %4286 = vmatmul.bf16.gmra.mxu1 %v5495_v25  ;;  %4375 = vmatmul.bf16.gmra.mxu2 %v5499_v26  ;;  %v5535_v25 = vor.u32 %v6342_v4, %v5534_v3  ;;  %v1255_v26 = vor.u32 %v1254_v20, %v1251_v18  ;;  %v440_v48 = vor.u32 %v439_v41, %v436_v40  ;;  %v900_v62 = vrot.slane %v778_v55, 5  ;;  %v5212_v63 = vld [vmem:[%s6663_s25 + $0x4c] sm:$0xf]  ;;  %v5174_v1 = vld [vmem:[%s6663_s25 + $0x48] sm:$0xf] }
  0x7d   : > { %4464 = vmatmul.bf16.gmra.mxu3 %v5503_v28  ;;  %v5543_v28 = vor.u32 %v6343_v12, %v5542_v11  ;;  %v450_v58 = vor.u32 %v449_v49, %v445_v46  ;;  %v455_v60 = vrot.slane %v453_v50, 5  ;;  %v5213_v2 = vld [vmem:[%s6663_s25 + $0x50] sm:$0x1]  ;;  %v6346_v3 = vld [vmem:[#allocation2 + $0xdc] sm:$0xf]  ;;  %v898_v9 = vsel %vm6824_vm5, %v5153_v56, %v897_v61  ;;  %4898 = vmatpush.bf16.msra.mxu0 %v6532_v7 }
  0x7e   : > { %4553 = vmatmul.bf16.gmra.mxu0 %v5507_v29  ;;  %v1265_v29 = vor.u32 %v1264_v23, %v1260_v21  ;;  %v1256_v33 = vrot.slane %v1255_v26, 4  ;;  %v441_v53 = vrot.slane %v440_v48, 4  ;;  %v5564_v4 = vld [vmem:[#allocation2 + $0xfc] sm:$0xf0]  ;;  %v6351_v6 = vld [vmem:[#allocation2 + $0x100] sm:$0xf0] }
  0x7f   : > { %v5570_v5 = vld [vmem:[#allocation2 + $0xe0] sm:$0xf]  ;;  %v451_v8 = vrot.slane %v450_v58, 4  ;;  %v899_v10 = vrot.slane %v897_v61, 4  ;;  %v1273_v11 = vshrl.u32 %v5211_v52, 16  ;;  %v1276_v16 = vshll.u32 %v5211_v52, 16 }
  0x80   : > { %v1266_v37 = vrot.slane %v1265_v29, 4  ;;  %v1261_v39 = vsel %vm6810_vm3, %v1256_v33, %v1260_v21  ;;  %v446_v0 = vsel %vm6810_vm3, %v441_v53, %v445_v46  ;;  %v6347_v12 = vld [vmem:[#allocation2 + $0xe4] sm:$0xf]  ;;  %v5572_v13 = vld [vmem:[#allocation2 + $0x104] sm:$0xf0]  ;;  %v1282_v17 = vshll.u32 %v5212_v63, 16 }
  0x81   : > { %1576 = vst [vmem:[#allocation2 + $0x130] sm:$0xf] %v1261_v39  ;;  %v5578_v14 = vld [vmem:[#allocation2 + $0xe8] sm:$0xf]  ;;  %v6352_v15 = vld [vmem:[#allocation2 + $0x108] sm:$0xf0]  ;;  %v456_v18 = vsel %vm6810_vm3, %v451_v8, %v455_v60  ;;  %v901_v19 = vsel %vm6824_vm5, %v899_v10, %v900_v62 }
  0x82   : > { %v1271_v43 = vsel %vm6810_vm3, %v1266_v37, %v1270_v30  ;;  %739 = vst [vmem:[#allocation2 + $0x16c] sm:$0xf] %v446_v0  ;;  %v5175_v20 = vld [vmem:[%s6663_s25 + $0x4c] sm:$0xf]  ;;  %v1275_v21 = vrot.slane %v1273_v11, 4  ;;  %v1286_v22 = vshrl.u32 %v5212_v63, 16  ;;  %v5575_v30 = vor.u32 %v6347_v12, %v5572_v13 }
  0x83   : > { %1577 = vst [vmem:[#allocation2 + $0x154] sm:$0xf] %v1271_v43  ;;  %v1278_v23 = vrot.slane %v1276_v16, 5  ;;  %v5579_v31 = vor.u32 %v6352_v15, %v5578_v14  ;;  %v280_v34 = vld [vmem:[%s6663_s25 + $0x48] sm:$0xf] }
  0x84   : > { %1014 = vst [vmem:[#allocation2 + $0x170] sm:$0xf] %v898_v9  ;;  %v1288_v26 = vrot.slane %v1286_v22, 4  ;;  %v281_v35 = vld [vmem:[%s6663_s25 + $0x4c] sm:$0xf]  ;;  %v458_v37 = vshrl.u32 %v280_v34, 16 }
  0x85   : > { %1082 = vst [vmem:[#allocation2 + $0x174] sm:$0xf] %v5174_v1  ;;  %v1279_v29 = vor.u32 %v1278_v23, %v1275_v21  ;;  %v461_v38 = vshll.u32 %v280_v34, 16  ;;  %v467_v39 = vshll.u32 %v281_v35, 16  ;;  %v471_v41 = vshrl.u32 %v281_v35, 16 }
  0x86   : > { %740 = vst [vmem:[#allocation2 + $0x190] sm:$0xf] %v456_v18  ;;  %v460_v43 = vrot.slane %v458_v37, 4  ;;  %v282_v48 = vld [vmem:[%s6663_s25 + $0x50] sm:$0x1] }
  0x87   : > { %1015 = vst [vmem:[#allocation2 + $0x194] sm:$0xf] %v901_v19  ;;  %v1280_v36 = vrot.slane %v1279_v29, 4  ;;  %v463_v45 = vrot.slane %v461_v38, 5  ;;  %v469_v46 = vrot.slane %v467_v39, 5  ;;  %v473_v50 = vrot.slane %v471_v41, 4 }
  0x88   : > { %1083 = vst [vmem:[#allocation2 + $0x198] sm:$0xf] %v5175_v20  ;;  %v477_v51 = vshll.u32 %v282_v48, 16  ;;  %v5214_v52 = vld [vmem:[%s6663_s25 + $0x54] sm:$0xf] }
  0x89   : > { %v464_v49 = vor.u32 %v463_v45, %v460_v43  ;;  %v779_v53 = vld [vmem:[%s6663_s25 + $0x48] sm:$0xe]  ;;  %v780_v54 = vld [vmem:[%s6663_s25 + $0x4c] sm:$0xf]  ;;  %v474_v56 = vor.u32 %v473_v50, %v469_v46  ;;  %v781_v58 = vld [vmem:[%s6663_s25 + $0x50] sm:$0x1] }
  0x8a   : > { %v479_v57 = vrot.slane %v477_v51, 5  ;;  %v5215_v60 = vld [vmem:[%s6663_s25 + $0x58] sm:$0xf]  ;;  %v5154_v61 = vrot.slane %v779_v53, 9  ;;  %v904_v62 = vrot.slane %v780_v54, 5  ;;  %v907_v63 = vrot.slane %v781_v58, 5 }
  0x8b   : > { %v465_v55 = vrot.slane %v464_v49, 4  ;;  %v1297_v0 = vshrl.u32 %v5214_v52, 16  ;;  %v6355_v1 = vld [vmem:[#allocation2 + $0x124] sm:$0xf]  ;;  %v5606_v7 = vld [vmem:[#allocation2 + $0x128] sm:$0xf] }
  0x8c   : > { %4291 = vmatmul.bf16.gmra.mxu1 %v5531_v24  ;;  %4380 = vmatmul.bf16.gmra.mxu2 %v5535_v25  ;;  %v1284_v24 = vrot.slane %v1282_v17, 5  ;;  %v1292_v25 = vshll.u32 %v5213_v2, 16  ;;  %v5600_v2 = vld [vmem:[#allocation2 + $0x144] sm:$0xf0]  ;;  %v6360_v8 = vld [vmem:[#allocation2 + $0x148] sm:$0xf0]  ;;  %v905_v9 = vsel %vm6824_vm5, %v5154_v61, %v904_v62 }
  0x8d   : > { %4469 = vmatmul.bf16.gmra.mxu3 %v5539_v27  ;;  %v5567_v27 = vor.u32 %v6346_v3, %v5564_v4  ;;  %v470_v3 = vsel %vm6810_vm3, %v465_v55, %v469_v46  ;;  %v475_v4 = vrot.slane %v474_v56, 4  ;;  %v906_v10 = vrot.slane %v904_v62, 4  ;;  %v7014_v13 = vld [vmem:[%s7970_s2] ss:$0 sm:$0xff]  ;;  %v6356_v14 = vld [vmem:[#allocation2 + $0x12c] sm:$0xf] }
  0x8e   : > { %4558 = vmatmul.bf16.gmra.mxu0 %v5543_v28  ;;  %v5571_v28 = vor.u32 %v6351_v6, %v5570_v5  ;;  %v1289_v32 = vor.u32 %v1288_v26, %v1284_v24  ;;  %v1294_v33 = vrot.slane %v1292_v25, 5  ;;  %v1285_v42 = vsel %vm6810_vm3, %v1280_v36, %v1284_v24  ;;  %v5216_v5 = vld [vmem:[%s6663_s25 + $0x5c] sm:$0x1]  ;;  %741 = vst [vmem:[#allocation2 + $0x1b4] sm:$0xf] %v470_v3  ;;  %v6515_v49 = vld [vmem:[%s7969_s1 + $0x1a0] sm:$0xff] }
  0x8f   : > { %1578 = vst [vmem:[#allocation2 + $0x178] sm:$0xf] %v1285_v42  ;;  %v1300_v6 = vshll.u32 %v5214_v52, 16  ;;  %v1299_v11 = vrot.slane %v1297_v0, 4  ;;  %v1306_v12 = vshll.u32 %v5215_v60, 16  ;;  %v480_v17 = vsel %vm6810_vm3, %v475_v4, %v479_v57  ;;  %v6523_v50 = vld [vmem:[%s7969_s1 + $0x1e0] sm:$0xff]  ;;  %4721 = vmatpush.bf16.msra.mxu2 %v6515_v49 }
  0x90   : > { %v1290_v40 = vrot.slane %v1289_v32, 4  ;;  %v5608_v15 = vld [vmem:[#allocation2 + $0x14c] sm:$0xf0]  ;;  %1016 = vst [vmem:[#allocation2 + $0x1b8] sm:$0xf] %v905_v9  ;;  %v1310_v20 = vshrl.u32 %v5215_v60, 16  ;;  %v908_v21 = vsel %vm6824_vm5, %v906_v10, %v907_v63  ;;  %v5607_v29 = vor.u32 %v6360_v8, %v5606_v7  ;;  %4810 = vmatpush.bf16.msra.mxu3 %v6523_v50 }
  0x91   : > { %v5614_v16 = vld [vmem:[#allocation2 + $0x130] sm:$0xf]  ;;  %v5176_v18 = vld [vmem:[%s6663_s25 + $0x54] sm:$0xf]  ;;  %v1302_v19 = vrot.slane %v1300_v6, 5  ;;  %v1308_v23 = vrot.slane %v1306_v12, 5  ;;  %v5611_v34 = vor.u32 %v6356_v14, %v5608_v15 }
  0x92   : > { %v1295_v47 = vsel %vm6810_vm3, %v1290_v40, %v1294_v33  ;;  %742 = vst [vmem:[#allocation2 + $0x1d8] sm:$0xf] %v480_v17  ;;  %v5177_v22 = vld [vmem:[%s6663_s25 + $0x58] sm:$0xf]  ;;  %v1316_v24 = vshll.u32 %v5216_v5, 16  ;;  %v6507_v3 = vld [vmem:[%s7969_s1 + $0x160] sm:$0xff] }
  0x93   : > { %1579 = vst [vmem:[#allocation2 + $0x19c] sm:$0xf] %v1295_v47  ;;  %v6361_v25 = vld [vmem:[#allocation2 + $0x150] sm:$0xf0]  ;;  %v1303_v26 = vor.u32 %v1302_v19, %v1299_v11  ;;  %v284_v37 = vld [vmem:[%s6663_s25 + $0x58] sm:$0xf]  ;;  %4632 = vmatpush.bf16.msra.mxu1 %v6507_v3 }
  0x94   : > { %1017 = vst [vmem:[#allocation2 + $0x1dc] sm:$0xf] %v908_v21  ;;  %v1318_v32 = vrot.slane %v1316_v24, 5  ;;  %v5615_v35 = vor.u32 %v6361_v25, %v5614_v16  ;;  %v283_v36 = vld [vmem:[%s6663_s25 + $0x54] sm:$0xf]  ;;  %v491_v45 = vshll.u32 %v284_v37, 16 }
  0x95   : > { %1084 = vst [vmem:[#allocation2 + $0x1bc] sm:$0xf] %v5176_v18  ;;  %v482_v42 = vshrl.u32 %v283_v36, 16  ;;  %v485_v43 = vshll.u32 %v283_v36, 16  ;;  %v495_v48 = vshrl.u32 %v284_v37, 16  ;;  %v6531_v17 = vld [vmem:[%s7969_s1 + $0x220] sm:$0xff] }
  0x96   : > { %1085 = vst [vmem:[#allocation2 + $0x1e0] sm:$0xf] %v5177_v22  ;;  %v285_v51 = vld [vmem:[%s6663_s25 + $0x5c] sm:$0x1]  ;;  %v493_v53 = vrot.slane %v491_v45, 5  ;;  %4899 = vmatpush.bf16.msra.mxu0 %v6531_v17 }
  0x97   : > { %v484_v47 = vrot.slane %v482_v42, 4  ;;  %v487_v52 = vrot.slane %v485_v43, 5  ;;  %v497_v55 = vrot.slane %v495_v48, 4  ;;  %v501_v56 = vshll.u32 %v285_v51, 16  ;;  %v782_v57 = vld [vmem:[%s6663_s25 + $0x54] sm:$0xe] }
  0x98   : > { %v783_v62 = vld [vmem:[%s6663_s25 + $0x58] sm:$0xf]  ;;  %v784_v63 = vld [vmem:[%s6663_s25 + $0x5c] sm:$0x1]  ;;  %v5155_v0 = vrot.slane %v782_v57, 9 }
  0x99   : > { %v488_v61 = vor.u32 %v487_v52, %v484_v47  ;;  %v498_v4 = vor.u32 %v497_v55, %v493_v53  ;;  %v503_v5 = vrot.slane %v501_v56, 5  ;;  %v911_v6 = vrot.slane %v783_v62, 5  ;;  %v6364_v9 = vld [vmem:[#allocation2 + $0x16c] sm:$0xf]  ;;  %v5636_v10 = vld [vmem:[#allocation2 + $0x18c] sm:$0xf0] }
  0x9a   : > { %v5642_v11 = vld [vmem:[#allocation2 + $0x170] sm:$0xf]  ;;  %v6369_v12 = vld [vmem:[#allocation2 + $0x190] sm:$0xf0]  ;;  %v914_v15 = vrot.slane %v784_v63, 5 }
  0x9b   : > { %v489_v14 = vrot.slane %v488_v61, 4  ;;  %v5217_v16 = vld [vmem:[%s6663_s25 + $0x60] sm:$0xf]  ;;  %v499_v18 = vrot.slane %v498_v4, 4  ;;  %v912_v19 = vsel %vm6824_vm5, %v5155_v0, %v911_v6  ;;  %v5218_v21 = vld [vmem:[%s6663_s25 + $0x64] sm:$0xf] }
  0x9c   : > { %4296 = vmatmul.bf16.gmra.mxu1 %v5567_v27  ;;  %4385 = vmatmul.bf16.gmra.mxu2 %v5571_v28  ;;  %v1312_v27 = vrot.slane %v1310_v20, 4  ;;  %v5603_v28 = vor.u32 %v6355_v1, %v5600_v2  ;;  %v913_v20 = vrot.slane %v911_v6, 4  ;;  %v6365_v22 = vld [vmem:[#allocation2 + $0x174] sm:$0xf]  ;;  %v5650_v24 = vld [vmem:[#allocation2 + $0x178] sm:$0xf] }
  0x9d   : > { %4474 = vmatmul.bf16.gmra.mxu3 %v5575_v30  ;;  %v1304_v30 = vrot.slane %v1303_v26, 4  ;;  %v6370_v25 = vld [vmem:[#allocation2 + $0x198] sm:$0xf0]  ;;  %v494_v26 = vsel %vm6810_vm3, %v489_v14, %v493_v53  ;;  %1018 = vst [vmem:[#allocation2 + $0x200] sm:$0xf] %v912_v19 }
  0x9e   : > { %4563 = vmatmul.bf16.gmra.mxu0 %v5579_v31  ;;  %v1313_v31 = vor.u32 %v1312_v27, %v1308_v23  ;;  %v5178_v27 = vld [vmem:[%s6663_s25 + $0x60] sm:$0xf]  ;;  %743 = vst [vmem:[#allocation2 + $0x1fc] sm:$0xf] %v494_v26  ;;  %v5651_v52 = vor.u32 %v6370_v25, %v5650_v24  ;;  %v287_v61 = vld [vmem:[%s6663_s25 + $0x64] sm:$0xf] }
  0x9f   : > { %v1309_v40 = vsel %vm6810_vm3, %v1304_v30, %v1308_v23  ;;  %v5644_v23 = vld [vmem:[#allocation2 + $0x194] sm:$0xf0]  ;;  %v915_v30 = vsel %vm6824_vm5, %v913_v20, %v914_v15  ;;  %1086 = vst [vmem:[#allocation2 + $0x204] sm:$0xf] %v5178_v27  ;;  %v515_v0 = vshll.u32 %v287_v61, 16 }
  0xa0   : > { %v1314_v41 = vrot.slane %v1313_v31, 4  ;;  %1580 = vst [vmem:[#allocation2 + $0x1c0] sm:$0xf] %v1309_v40  ;;  %v5179_v31 = vld [vmem:[%s6663_s25 + $0x64] sm:$0xf]  ;;  %v5639_v40 = vor.u32 %v6364_v9, %v5636_v10  ;;  %v5647_v51 = vor.u32 %v6365_v22, %v5644_v23 }
  0xa1   : > { %1019 = vst [vmem:[#allocation2 + $0x224] sm:$0xf] %v915_v30  ;;  %v288_v6 = vld [vmem:[%s6663_s25 + $0x68] sm:$0x1]  ;;  %v517_v10 = vrot.slane %v515_v0, 5 }
  0xa2   : > { %v1319_v46 = vsel %vm6810_vm3, %v1314_v41, %v1318_v32  ;;  %v1321_v32 = vshrl.u32 %v5217_v16, 16  ;;  %v5643_v41 = vor.u32 %v6369_v12, %v5642_v11  ;;  %1087 = vst [vmem:[#allocation2 + $0x228] sm:$0xf] %v5179_v31  ;;  %v786_v15 = vld [vmem:[%s6663_s25 + $0x64] sm:$0xf] }
  0xa3   : > { %1581 = vst [vmem:[#allocation2 + $0x1e4] sm:$0xf] %v1319_v46  ;;  %v918_v19 = vrot.slane %v786_v15, 5  ;;  %v785_v23 = vld [vmem:[%s6663_s25 + $0x60] sm:$0xe] }
  0xa4   : > { %v1323_v42 = vrot.slane %v1321_v32, 4  ;;  %v6373_v32 = vld [vmem:[#allocation2 + $0x1b4] sm:$0xf] }
  0xa9   : > { %v4213_v33 = vpop.f32.mrf.mxu1 }
  0xaa   : > { %v7025_v38 = vadd.f32 %v7014_v13, %v4213_v33  ;;  %v1324_v33 = vshll.u32 %v5217_v16, 16  ;;  %v6379_v0 = vld [vmem:[#allocation2 + $0x1e0] sm:$0xf0] }
  0xab   : > { %v7027_v39 = vpop.f32.mrf.mxu0 }
  0xac   : > { %4301 = vmatmul.bf16.gmra.mxu1 %v5603_v28  ;;  %4390 = vmatmul.bf16.gmra.mxu2 %v5607_v29  ;;  %v5219_v28 = vld [vmem:[%s6663_s25 + $0x68] sm:$0x1]  ;;  %v504_v29 = vsel %vm6810_vm3, %v499_v18, %v503_v5  ;;  %v1326_v46 = vrot.slane %v1324_v33, 5  ;;  %v525_v18 = vshll.u32 %v288_v6, 16  ;;  %v5672_v33 = vld [vmem:[#allocation2 + $0x1d4] sm:$0xf0] }
  0xad   : > { %4479 = vmatmul.bf16.gmra.mxu3 %v5611_v34  ;;  %744 = vst [vmem:[#allocation2 + $0x220] sm:$0xf] %v504_v29  ;;  %v1330_v34 = vshll.u32 %v5218_v21, 16  ;;  %v1340_v36 = vshll.u32 %v5219_v28, 16  ;;  %v787_v28 = vld [vmem:[%s6663_s25 + $0x68] sm:$0x1] }
  0xae   : > { %4568 = vmatmul.bf16.gmra.mxu0 %v5615_v35  ;;  %v1334_v35 = vshrl.u32 %v5218_v21, 16  ;;  %v1327_v57 = vor.u32 %v1326_v46, %v1323_v42  ;;  %v527_v27 = vrot.slane %v525_v18, 5  ;;  %v5220_v29 = vld [vmem:[%s6663_s25 + $0x6c] sm:$0xf]  ;;  %v6374_v42 = vld [vmem:[#allocation2 + $0x1bc] sm:$0xf] }
  0xaf   : > { %v4233_v54 = vpop.f32.mrf.mxu2  ;;  %v1332_v47 = vrot.slane %v1330_v34, 5  ;;  %v1342_v53 = vrot.slane %v1340_v36, 5  ;;  %v920_v36 = vrot.slane %v918_v19, 4 }
  0xb0   : > { %v7042_v58 = vadd.f32 %v7014_v13, %v4233_v54  ;;  %v4253_v60 = vpop.f32.mrf.mxu3  ;;  %v1336_v48 = vrot.slane %v1334_v35, 4  ;;  %v286_v54 = vld [vmem:[%s6663_s25 + $0x60] sm:$0xf]  ;;  %v1328_v3 = vrot.slane %v1327_v57, 4  ;;  %v5156_v35 = vrot.slane %v785_v23, 9 }
  0xb1   : > { %v7047_v1 = vadd.f32 %v7014_v13, %v4253_v60  ;;  %v4215_v2 = vpop.f32.mrf.mxu1  ;;  %v506_v62 = vshrl.u32 %v286_v54, 16  ;;  %v509_v63 = vshll.u32 %v286_v54, 16  ;;  %v5221_v54 = vld [vmem:[%s6663_s25 + $0x70] sm:$0xf]  ;;  %v5222_v57 = vld [vmem:[%s6663_s25 + $0x74] sm:$0x1] }
  0xb2   : > { %v7053_v7 = vadd.f32 %v7014_v13, %v4215_v2  ;;  %v1337_v60 = vor.u32 %v1336_v48, %v1332_v47  ;;  %v519_v2 = vshrl.u32 %v287_v61, 16  ;;  %v1333_v11 = vsel %vm6810_vm3, %v1328_v3, %v1332_v47  ;;  %v5181_v48 = vld [vmem:[%s6663_s25 + $0x70] sm:$0xf] }
  0xb3   : > { %v7055_v8 = vpop.f32.mrf.mxu0  ;;  %v508_v5 = vrot.slane %v506_v62, 4  ;;  %v511_v9 = vrot.slane %v509_v63, 5  ;;  %1582 = vst [vmem:[#allocation2 + $0x208] sm:$0xf] %v1333_v11  ;;  %v921_v47 = vrot.slane %v787_v28, 5  ;;  %v1348_v62 = vshll.u32 %v5220_v29, 16 }
  0xb4   : > { %v1338_v4 = vrot.slane %v1337_v60, 4  ;;  %v521_v14 = vrot.slane %v519_v2, 4  ;;  %v1354_v63 = vshll.u32 %v5221_v54, 16  ;;  %v1358_v2 = vshrl.u32 %v5221_v54, 16  ;;  %1089 = vst [vmem:[#allocation2 + $0x270] sm:$0xf] %v5181_v48 }
  0xb5   : > { %v512_v17 = vor.u32 %v511_v9, %v508_v5  ;;  %v922_v60 = vsel %vm6824_vm5, %v920_v36, %v921_v47  ;;  %v1364_v3 = vshll.u32 %v5222_v57, 16  ;;  %v5675_v5 = vor.u32 %v6373_v32, %v5672_v33  ;;  %v290_v23 = vld [vmem:[%s6663_s25 + $0x70] sm:$0xf]  ;;  %v291_v48 = vld [vmem:[%s6663_s25 + $0x74] sm:$0x1] }
  0xb6   : > { %v1343_v12 = vsel %vm6810_vm3, %v1338_v4, %v1342_v53  ;;  %v522_v22 = vor.u32 %v521_v14, %v517_v10  ;;  %v919_v53 = vsel %vm6824_vm5, %v5156_v35, %v918_v19  ;;  %1021 = vst [vmem:[#allocation2 + $0x26c] sm:$0xf] %v922_v60  ;;  %v1350_v6 = vrot.slane %v1348_v62, 5  ;;  %v789_v62 = vld [vmem:[%s6663_s25 + $0x70] sm:$0xf] }
  0xb7   : > { %v4235_v37 = vpop.f32.mrf.mxu2  ;;  %1583 = vst [vmem:[#allocation2 + $0x22c] sm:$0xf] %v1343_v12  ;;  %v513_v26 = vrot.slane %v512_v17, 4  ;;  %v1356_v9 = vrot.slane %v1354_v63, 5  ;;  %v1360_v15 = vrot.slane %v1358_v2, 4  ;;  %v539_v33 = vshll.u32 %v290_v23, 16 }
  0xb8   : > { %v7074_v43 = vadd.f32 %v7014_v13, %v4235_v37  ;;  %v4255_v45 = vpop.f32.mrf.mxu3  ;;  %v523_v34 = vrot.slane %v522_v22, 4  ;;  %v5180_v37 = vld [vmem:[%s6663_s25 + $0x6c] sm:$0xf]  ;;  %1020 = vst [vmem:[#allocation2 + $0x248] sm:$0xf] %v919_v53  ;;  %v549_v53 = vshll.u32 %v291_v48, 16 }
  0xb9   : > { %v7077_v49 = vadd.f32 %v7014_v13, %v4255_v45  ;;  %v4218_v50 = vpop.f32.mrf.mxu1  ;;  %v5680_v45 = vld [vmem:[#allocation2 + $0x1dc] sm:$0xf0]  ;;  %v518_v46 = vsel %vm6810_vm3, %v513_v26, %v517_v10  ;;  %1088 = vst [vmem:[#allocation2 + $0x24c] sm:$0xf] %v5180_v37  ;;  %v289_v22 = vld [vmem:[%s6663_s25 + $0x6c] sm:$0xf] }
  0xba   : > { %v7081_v55 = vadd.f32 %v7014_v13, %v4218_v50  ;;  %v1345_v50 = vshrl.u32 %v5220_v29, 16  ;;  %745 = vst [vmem:[#allocation2 + $0x244] sm:$0xf] %v518_v46  ;;  %v5683_v14 = vor.u32 %v6374_v42, %v5680_v45  ;;  %v530_v28 = vshrl.u32 %v289_v22, 16  ;;  %v6522_v42 = vld [vmem:[%s7969_s1 + $0x1d8] sm:$0xff] }
  0xbb   : > { %v7083_v56 = vpop.f32.mrf.mxu0  ;;  %v533_v29 = vshll.u32 %v289_v22, 16  ;;  %v541_v45 = vrot.slane %v539_v33, 5  ;;  %4811 = vmatpush.bf16.msra.mxu3 %v6522_v42  ;;  %v6387_v22 = vld [vmem:[#allocation2 + $0x220] sm:$0xf0]  ;;  %v5722_v33 = vld [vmem:[#allocation2 + $0x208] sm:$0xf] }
  0xbc   : > { %4306 = vmatmul.bf16.gmra.mxu1 %v5639_v40  ;;  %4395 = vmatmul.bf16.gmra.mxu2 %v5643_v41  ;;  %v5678_v40 = vld [vmem:[#allocation2 + $0x1b8] sm:$0xf]  ;;  %v6378_v41 = vld [vmem:[#allocation2 + $0x1d8] sm:$0xf0]  ;;  %v1347_v61 = vrot.slane %v1345_v50, 4  ;;  %v532_v36 = vrot.slane %v530_v28, 4 }
  0xbd   : > { %4484 = vmatmul.bf16.gmra.mxu3 %v5647_v51  ;;  %v5686_v51 = vld [vmem:[#allocation2 + $0x1c0] sm:$0xf]  ;;  %v5679_v12 = vor.u32 %v6378_v41, %v5678_v40  ;;  %v535_v37 = vrot.slane %v533_v29, 5  ;;  %v6514_v40 = vld [vmem:[%s7969_s1 + $0x198] sm:$0xff] }
  0xbe   : > { %4573 = vmatmul.bf16.gmra.mxu0 %v5651_v52  ;;  %v528_v52 = vsel %vm6810_vm3, %v523_v34, %v527_v27  ;;  %v5687_v18 = vor.u32 %v6379_v0, %v5686_v51  ;;  %v1351_v19 = vor.u32 %v1350_v6, %v1347_v61  ;;  %v1361_v27 = vor.u32 %v1360_v15, %v1356_v9  ;;  %v788_v61 = vld [vmem:[%s6663_s25 + $0x6c] sm:$0xe]  ;;  %v6530_v15 = vld [vmem:[%s7969_s1 + $0x218] sm:$0xff] }
  0xbf   : > { %v4238_v16 = vpop.f32.mrf.mxu2  ;;  %746 = vst [vmem:[#allocation2 + $0x268] sm:$0xf] %v528_v52  ;;  %v543_v34 = vshrl.u32 %v290_v23, 16  ;;  %v536_v50 = vor.u32 %v535_v37, %v532_v36  ;;  %4722 = vmatpush.bf16.msra.mxu2 %v6514_v40  ;;  %v6383_v23 = vld [vmem:[#allocation2 + $0x204] sm:$0xf]  ;;  %4900 = vmatpush.bf16.msra.mxu0 %v6530_v15 }
  0xc0   : > { %v7093_v20 = vadd.f32 %v7014_v13, %v4238_v16  ;;  %v4258_v21 = vpop.f32.mrf.mxu3  ;;  %v1352_v32 = vrot.slane %v1351_v19, 4  ;;  %v1362_v35 = vrot.slane %v1361_v27, 4  ;;  %v5716_v27 = vld [vmem:[#allocation2 + $0x224] sm:$0xf0]  ;;  %v5182_v29 = vld [vmem:[%s6663_s25 + $0x78] sm:$0xf] }
  0xc1   : > { %v7097_v24 = vadd.f32 %v7014_v13, %v4258_v21  ;;  %v4220_v25 = vpop.f32.mrf.mxu1  ;;  %v1366_v21 = vrot.slane %v1364_v3, 5  ;;  %v545_v46 = vrot.slane %v543_v34, 4  ;;  %v537_v60 = vrot.slane %v536_v50, 4  ;;  %v5224_v36 = vld [vmem:[%s6663_s25 + $0x7c] sm:$0xf] }
  0xc2   : > { %v7102_v30 = vadd.f32 %v7014_v13, %v4220_v25  ;;  %v1357_v41 = vsel %vm6810_vm3, %v1352_v32, %v1356_v9  ;;  %v551_v3 = vrot.slane %v549_v53, 5  ;;  %v5223_v32 = vld [vmem:[%s6663_s25 + $0x78] sm:$0xf]  ;;  %v5183_v40 = vld [vmem:[%s6663_s25 + $0x7c] sm:$0xf] }
  0xc3   : > { %v7104_v31 = vpop.f32.mrf.mxu0  ;;  %v1367_v47 = vsel %vm6810_vm3, %v1362_v35, %v1366_v21  ;;  %1584 = vst [vmem:[#allocation2 + $0x250] sm:$0xf] %v1357_v41  ;;  %v546_v52 = vor.u32 %v545_v46, %v541_v45  ;;  %v5714_v21 = vld [vmem:[#allocation2 + $0x200] sm:$0xf]  ;;  %v1369_v37 = vshrl.u32 %v5223_v32, 16 }
  0xc4   : > { %1585 = vst [vmem:[#allocation2 + $0x274] sm:$0xf] %v1367_v47  ;;  %v5225_v41 = vld [vmem:[%s6663_s25 + $0x80] sm:$0x1]  ;;  %v6388_v42 = vld [vmem:[#allocation2 + $0x228] sm:$0xf0] }
  0xc5   : > { %v547_v2 = vrot.slane %v546_v52, 4  ;;  %1090 = vst [vmem:[#allocation2 + $0x294] sm:$0xf] %v5182_v29  ;;  %v1371_v46 = vrot.slane %v1369_v37, 4  ;;  %v1372_v47 = vshll.u32 %v5223_v32, 16  ;;  %v1382_v52 = vshrl.u32 %v5224_v36, 16 }
  0xc6   : > { %v1388_v53 = vshll.u32 %v5225_v41, 16  ;;  %1091 = vst [vmem:[#allocation2 + $0x2b8] sm:$0xf] %v5183_v40 }
  0xc7   : > { %v4240_v4 = vpop.f32.mrf.mxu2  ;;  %v552_v28 = vsel %vm6810_vm3, %v547_v2, %v551_v3 }
  0xc8   : > { %v7119_v10 = vadd.f32 %v7014_v13, %v4240_v4  ;;  %v4260_v11 = vpop.f32.mrf.mxu3  ;;  %v790_v4 = vld [vmem:[%s6663_s25 + $0x74] sm:$0x1]  ;;  %748 = vst [vmem:[#allocation2 + $0x2b0] sm:$0xf] %v552_v28 }
  0xc9   : > { %v7122_v16 = vadd.f32 %v7014_v13, %v4260_v11  ;;  %v4223_v17 = vpop.f32.mrf.mxu1  ;;  %v6382_v11 = vld [vmem:[#allocation2 + $0x1fc] sm:$0xf]  ;;  %v928_v19 = vrot.slane %v790_v4, 5  ;;  %v5723_v4 = vor.u32 %v6388_v42, %v5722_v33 }
  0xca   : > { %v7127_v25 = vadd.f32 %v7014_v13, %v4223_v17  ;;  %v542_v17 = vsel %vm6810_vm3, %v537_v60, %v541_v45 }
  0xcb   : > { %v7129_v26 = vpop.f32.mrf.mxu0  ;;  %747 = vst [vmem:[#allocation2 + $0x28c] sm:$0xf] %v542_v17 }
  0xcc   : > { %4311 = vmatmul.bf16.gmra.mxu1 %v5675_v5  ;;  %4400 = vmatmul.bf16.gmra.mxu2 %v5679_v12  ;;  %v5157_v5 = vrot.slane %v788_v61, 9  ;;  %v5708_v12 = vld [vmem:[#allocation2 + $0x21c] sm:$0xf0]  ;;  %v5715_v61 = vor.u32 %v6387_v22, %v5714_v21 }
  0xcd   : > { %4489 = vmatmul.bf16.gmra.mxu3 %v5683_v14  ;;  %v6506_v14 = vld [vmem:[%s7969_s1 + $0x158] sm:$0xff]  ;;  %v5711_v50 = vor.u32 %v6382_v11, %v5708_v12  ;;  %v1384_v11 = vrot.slane %v1382_v52, 4 }
  0xce   : > { %4578 = vmatmul.bf16.gmra.mxu0 %v5687_v18  ;;  %v925_v18 = vrot.slane %v789_v62, 5  ;;  %4633 = vmatpush.bf16.msra.mxu1 %v6506_v14  ;;  %v5719_v62 = vor.u32 %v6383_v23, %v5716_v27  ;;  %v292_v12 = vld [vmem:[%s6663_s25 + $0x78] sm:$0xf]  ;;  %v1390_v23 = vrot.slane %v1388_v53, 5 }
  0xcf   : > { %v4243_v51 = vpop.f32.mrf.mxu2  ;;  %v557_v21 = vshll.u32 %v292_v12, 16 }
  0xd0   : > { %v7143_v54 = vadd.f32 %v7014_v13, %v4243_v51  ;;  %v4263_v57 = vpop.f32.mrf.mxu3  ;;  %v926_v34 = vsel %vm6824_vm5, %v5157_v5, %v925_v18  ;;  %v927_v35 = vrot.slane %v925_v18, 4  ;;  %v1378_v51 = vshll.u32 %v5224_v36, 16  ;;  %v293_v18 = vld [vmem:[%s6663_s25 + $0x7c] sm:$0xf] }
  0xd1   : > { %v7148_v63 = vadd.f32 %v7014_v13, %v4263_v57  ;;  %v4225_v0 = vpop.f32.mrf.mxu1  ;;  %1022 = vst [vmem:[#allocation2 + $0x290] sm:$0xf] %v926_v34  ;;  %v563_v27 = vshll.u32 %v293_v18, 16  ;;  %v567_v28 = vshrl.u32 %v293_v18, 16  ;;  %v559_v33 = vrot.slane %v557_v21, 5 }
  0xd2   : > { %v7152_v6 = vadd.f32 %v7014_v13, %v4225_v0  ;;  %v929_v45 = vsel %vm6824_vm5, %v927_v35, %v928_v19  ;;  %v1374_v0 = vrot.slane %v1372_v47, 5  ;;  %v1380_v5 = vrot.slane %v1378_v51, 5  ;;  %v294_v35 = vld [vmem:[%s6663_s25 + $0x80] sm:$0x1]  ;;  %v6391_v18 = vld [vmem:[#allocation2 + $0x244] sm:$0xf] }
  0xd3   : > { %v7154_v9 = vpop.f32.mrf.mxu0  ;;  %1023 = vst [vmem:[#allocation2 + $0x2b4] sm:$0xf] %v929_v45  ;;  %v554_v19 = vshrl.u32 %v292_v12, 16  ;;  %v565_v36 = vrot.slane %v563_v27, 5  ;;  %v569_v41 = vrot.slane %v567_v28, 4  ;;  %v573_v42 = vshll.u32 %v294_v35, 16 }
  0xd4   : > { %v1375_v17 = vor.u32 %v1374_v0, %v1371_v46  ;;  %v1385_v22 = vor.u32 %v1384_v11, %v1380_v5  ;;  %v792_v45 = vld [vmem:[%s6663_s25 + $0x7c] sm:$0xf]  ;;  %v5227_v11 = vld [vmem:[%s6663_s25 + $0x88] sm:$0xf]  ;;  %v5184_v27 = vld [vmem:[%s6663_s25 + $0x84] sm:$0xf] }
  0xd5   : > { %v556_v32 = vrot.slane %v554_v19, 4  ;;  %v5744_v19 = vld [vmem:[#allocation2 + $0x264] sm:$0xf0]  ;;  %1092 = vst [vmem:[#allocation2 + $0x2dc] sm:$0xf] %v5184_v27 }
  0xd6   : > { %v1376_v29 = vrot.slane %v1375_v17, 4  ;;  %v1386_v34 = vrot.slane %v1385_v22, 4  ;;  %v5750_v28 = vld [vmem:[#allocation2 + $0x248] sm:$0xf] }
  0xd7   : > { %v4245_v48 = vpop.f32.mrf.mxu2  ;;  %v560_v40 = vor.u32 %v559_v33, %v556_v32  ;;  %v6392_v32 = vld [vmem:[#allocation2 + $0x24c] sm:$0xf]  ;;  %v5752_v33 = vld [vmem:[#allocation2 + $0x26c] sm:$0xf0] }
  0xd8   : > { %v7176_v57 = vadd.f32 %v7014_v13, %v4245_v48  ;;  %v4265_v60 = vpop.f32.mrf.mxu3  ;;  %v1381_v37 = vsel %vm6810_vm3, %v1376_v29, %v1380_v5  ;;  %v1391_v47 = vsel %vm6810_vm3, %v1386_v34, %v1390_v23  ;;  %v791_v48 = vld [vmem:[%s6663_s25 + $0x78] sm:$0xe]  ;;  %v932_v5 = vrot.slane %v792_v45, 5  ;;  %v6396_v29 = vld [vmem:[#allocation2 + $0x268] sm:$0xf0] }
  0xd9   : > { %v7179_v2 = vadd.f32 %v7014_v13, %v4265_v60  ;;  %v4228_v3 = vpop.f32.mrf.mxu1  ;;  %1586 = vst [vmem:[#allocation2 + $0x298] sm:$0xf] %v1381_v37  ;;  %v561_v53 = vrot.slane %v560_v40, 4  ;;  %v570_v60 = vor.u32 %v569_v41, %v565_v36  ;;  %v5228_v37 = vld [vmem:[%s6663_s25 + $0x8c] sm:$0x1]  ;;  %v1402_v45 = vshll.u32 %v5227_v11, 16 }
  0xda   : > { %v7183_v14 = vadd.f32 %v7014_v13, %v4228_v3  ;;  %1587 = vst [vmem:[#allocation2 + $0x2bc] sm:$0xf] %v1391_v47  ;;  %v575_v3 = vrot.slane %v573_v42, 5  ;;  %v934_v35 = vrot.slane %v932_v5, 4  ;;  %v5758_v41 = vld [vmem:[#allocation2 + $0x250] sm:$0xf] }
  0xdb   : > { %7976 = vst [vmem:[#allocation3_spill] sm:$0xff] %v7179_v2  ;;  %v7185_v15 = vpop.f32.mrf.mxu0  ;;  %v566_v21 = vsel %vm6810_vm3, %v561_v53, %v565_v36  ;;  %v571_v22 = vrot.slane %v570_v60, 4  ;;  %v1412_v53 = vshll.u32 %v5228_v37, 16  ;;  %v6397_v60 = vld [vmem:[#allocation2 + $0x270] sm:$0xf0] }
  0xdc   : > { %4316 = vmatmul.bf16.gmra.mxu1 %v5711_v50  ;;  %4405 = vmatmul.bf16.gmra.mxu2 %v5715_v61  ;;  %v5226_v50 = vld [vmem:[%s6663_s25 + $0x84] sm:$0xf]  ;;  %v793_v61 = vld [vmem:[%s6663_s25 + $0x80] sm:$0x1]  ;;  %749 = vst [vmem:[#allocation2 + $0x2d4] sm:$0xf] %v566_v21 }
  0xdd   : > { %4494 = vmatmul.bf16.gmra.mxu3 %v5719_v62  ;;  %v935_v23 = vrot.slane %v793_v61, 5  ;;  %v1393_v40 = vshrl.u32 %v5226_v50, 16  ;;  %v576_v42 = vsel %vm6810_vm3, %v571_v22, %v575_v3  ;;  %v1396_v36 = vshll.u32 %v5226_v50, 16 }
  0xde   : > { %4583 = vmatmul.bf16.gmra.mxu0 %v5723_v4  ;;  %v5158_v4 = vrot.slane %v791_v48, 9  ;;  %750 = vst [vmem:[#allocation2 + $0x2f8] sm:$0xf] %v576_v42  ;;  %v5185_v48 = vld [vmem:[%s6663_s25 + $0x88] sm:$0xf]  ;;  %v5747_v50 = vor.u32 %v6391_v18, %v5744_v19  ;;  %v5751_v22 = vor.u32 %v6396_v29, %v5750_v28  ;;  %v1414_v42 = vrot.slane %v1412_v53, 5 }
  0xdf   : > { %v4248_v46 = vpop.f32.mrf.mxu2  ;;  %v936_v47 = vsel %vm6824_vm5, %v934_v35, %v935_v23  ;;  %v1398_v61 = vrot.slane %v1396_v36, 5  ;;  %v5755_v23 = vor.u32 %v6392_v32, %v5752_v33  ;;  %1093 = vst [vmem:[#allocation2 + $0x300] sm:$0xf] %v5185_v48  ;;  %v295_v36 = vld [vmem:[%s6663_s25 + $0x84] sm:$0xf]  ;;  %v6513_v53 = vld [vmem:[%s7969_s1 + $0x190] sm:$0xff] }
  0xe0   : > { %v7197_v51 = vadd.f32 %v7014_v13, %v4248_v46  ;;  %v4268_v52 = vpop.f32.mrf.mxu3  ;;  %v933_v34 = vsel %vm6824_vm5, %v5158_v4, %v932_v5  ;;  %v1406_v46 = vshrl.u32 %v5227_v11, 16  ;;  %1025 = vst [vmem:[#allocation2 + $0x2fc] sm:$0xf] %v936_v47  ;;  %v4194_v4 = vadd.f32 %v7014_v13, %v7027_v39  ;;  %v296_v18 = vld [vmem:[%s6663_s25 + $0x88] sm:$0xf]  ;;  %4723 = vmatpush.bf16.msra.mxu2 %v6513_v53 }
  0xe1   : > { %v7201_v62 = vadd.f32 %v7014_v13, %v4268_v52  ;;  %v4230_v0 = vpop.f32.mrf.mxu1  ;;  %1024 = vst [vmem:[#allocation2 + $0x2d8] sm:$0xf] %v933_v34  ;;  %v1395_v52 = vrot.slane %v1393_v40, 4  ;;  %v5759_v40 = vor.u32 %v6397_v60, %v5758_v41  ;;  %v581_v47 = vshll.u32 %v295_v36, 16  ;;  %v5780_v53 = vld [vmem:[#allocation2 + $0x2ac] sm:$0xf0] }
  0xe2   : > { %v7205_v12 = vadd.f32 %v7014_v13, %v4230_v0  ;;  %v1404_v0 = vrot.slane %v1402_v45, 5  ;;  %v1408_v5 = vrot.slane %v1406_v46, 4  ;;  %v578_v46 = vshrl.u32 %v295_v36, 16 }
  0xe3   : > { %7977 = vst [vmem:[#allocation4_spill] sm:$0xff] %v7201_v62  ;;  %v7207_v17 = vpop.f32.mrf.mxu0  ;;  %v1399_v34 = vor.u32 %v1398_v61, %v1395_v52  ;;  %v587_v29 = vshll.u32 %v296_v18, 16  ;;  %v591_v32 = vshrl.u32 %v296_v18, 16  ;;  %v583_v48 = vrot.slane %v581_v47, 5  ;;  %v5229_v52 = vld [vmem:[%s6663_s25 + $0x90] sm:$0xf] }
  0xe4   : > { %v1409_v39 = vor.u32 %v1408_v5, %v1404_v0  ;;  %v580_v41 = vrot.slane %v578_v46, 4  ;;  %v6521_v61 = vld [vmem:[%s7969_s1 + $0x1d0] sm:$0xff]  ;;  %v1420_v36 = vshll.u32 %v5229_v52, 16  ;;  %v796_v47 = vld [vmem:[%s6663_s25 + $0x8c] sm:$0x1] }
  0xe5   : > { %v1400_v45 = vrot.slane %v1399_v34, 4  ;;  %4812 = vmatpush.bf16.msra.mxu3 %v6521_v61  ;;  %v593_v5 = vrot.slane %v591_v32, 4  ;;  %v5186_v61 = vld [vmem:[%s6663_s25 + $0x90] sm:$0xf] }
  0xe6   : > { %v1410_v28 = vrot.slane %v1409_v39, 4  ;;  %v794_v39 = vld [vmem:[%s6663_s25 + $0x84] sm:$0xe]  ;;  %1094 = vst [vmem:[#allocation2 + $0x324] sm:$0xf] %v5186_v61 }
  0xe7   : > { %v4250_v3 = vpop.f32.mrf.mxu2  ;;  %v1405_v33 = vsel %vm6810_vm3, %v1400_v45, %v1404_v0  ;;  %v297_v0 = vld [vmem:[%s6663_s25 + $0x8c] sm:$0x1]  ;;  %v298_v62 = vld [vmem:[%s6663_s25 + $0x90] sm:$0xf] }
  0xe8   : > { %v7223_v11 = vadd.f32 %v7014_v13, %v4250_v3  ;;  %v4270_v21 = vpop.f32.mrf.mxu3  ;;  %v1415_v60 = vsel %vm6810_vm3, %v1410_v28, %v1414_v42  ;;  %1588 = vst [vmem:[#allocation2 + $0x2e0] sm:$0xf] %v1405_v33  ;;  %v795_v42 = vld [vmem:[%s6663_s25 + $0x88] sm:$0xf]  ;;  %v5159_v28 = vrot.slane %v794_v39, 9 }
  0xe9   : > { %v7226_v35 = vadd.f32 %v7014_v13, %v4270_v21  ;;  %v4282_v37 = vpop.f32.mrf.mxu1  ;;  %1589 = vst [vmem:[#allocation2 + $0x304] sm:$0xf] %v1415_v60  ;;  %v597_v21 = vshll.u32 %v297_v0, 16  ;;  %v939_v33 = vrot.slane %v795_v42, 5  ;;  %v942_v60 = vrot.slane %v796_v47, 5 }
  0xea   : > { %v4283_v19 = vadd.f32 %v4282_v37, %v4194_v4  ;;  %v584_v4 = vor.u32 %v583_v48, %v580_v41  ;;  %v6400_v48 = vld [vmem:[#allocation2 + $0x28c] sm:$0xf]  ;;  %v5786_v0 = vld [vmem:[#allocation2 + $0x290] sm:$0xf]  ;;  %v6406_v39 = vld [vmem:[#allocation2 + $0x2b8] sm:$0xf0] }
  0xeb   : > { %7978 = vst [vmem:[#allocation5_spill] sm:$0xff] %v7226_v35  ;;  %v7230_v27 = vpop.f32.mrf.mxu0  ;;  %v599_v46 = vrot.slane %v597_v21, 5  ;;  %v941_v21 = vrot.slane %v939_v33, 4  ;;  %v5231_v47 = vld [vmem:[%s6663_s25 + $0x98] sm:$0x1] }
  0xec   : > { %4321 = vmatmul.bf16.gmra.mxu1 %v5747_v50  ;;  %4410 = vmatmul.bf16.gmra.mxu2 %v5751_v22  ;;  %v589_v50 = vrot.slane %v587_v29, 5  ;;  %v1417_v22 = vshrl.u32 %v5229_v52, 16 }
  0xed   : > { %4499 = vmatmul.bf16.gmra.mxu3 %v5755_v23  ;;  %v4196_v23 = vadd.f32 %v7014_v13, %v7055_v8  ;;  %v6505_v8 = vld [vmem:[%s7969_s1 + $0x150] sm:$0xff] }
  0xee   : > { %4588 = vmatmul.bf16.gmra.mxu0 %v5759_v40  ;;  %v585_v40 = vrot.slane %v584_v4, 4  ;;  %v594_v45 = vor.u32 %v593_v5, %v589_v50  ;;  %v6405_v4 = vld [vmem:[#allocation2 + $0x2b0] sm:$0xf0]  ;;  %v940_v5 = vsel %vm6824_vm5, %v5159_v28, %v939_v33  ;;  %4634 = vmatpush.bf16.msra.mxu1 %v6505_v8  ;;  %v1419_v28 = vrot.slane %v1417_v22, 4 }
  0xef   : > { %v4371_v3 = vpop.f32.mrf.mxu2  ;;  %1026 = vst [vmem:[#allocation2 + $0x320] sm:$0xf] %v940_v5  ;;  %v1422_v33 = vrot.slane %v1420_v36, 5  ;;  %v4199_v8 = vadd.f32 %v7014_v13, %v7083_v56  ;;  %v299_v13 = vld [vmem:[%s6663_s25 + $0x94] sm:$0xf] }
  0xf0   : > { %v4372_v34 = vadd.f32 %v4371_v3, %v4283_v19  ;;  %v4460_v37 = vpop.f32.mrf.mxu3  ;;  %v6529_v19 = vld [vmem:[%s7969_s1 + $0x210] sm:$0xff]  ;;  %v590_v52 = vsel %vm6810_vm3, %v585_v40, %v589_v50  ;;  %v595_v3 = vrot.slane %v594_v45, 4 }
  0xf1   : > { %v4284_v18 = vpop.f32.mrf.mxu1  ;;  %751 = vst [vmem:[#allocation2 + $0x31c] sm:$0xf] %v590_v52  ;;  %4901 = vmatpush.bf16.msra.mxu0 %v6529_v19  ;;  %v5230_v50 = vld [vmem:[%s6663_s25 + $0x94] sm:$0xf]  ;;  %v1423_v61 = vor.u32 %v1422_v33, %v1419_v28 }
  0xf2   : > { %v4461_v29 = vadd.f32 %v4460_v37, %v4372_v34  ;;  %v4285_v32 = vadd.f32 %v4284_v18, %v4196_v23  ;;  %v6401_v23 = vld [vmem:[#allocation2 + $0x294] sm:$0xf]  ;;  %v5788_v34 = vld [vmem:[#allocation2 + $0x2b4] sm:$0xf0]  ;;  %v600_v42 = vsel %vm6810_vm3, %v595_v3, %v599_v46  ;;  %v943_v18 = vsel %vm6824_vm5, %v941_v21, %v942_v60 }
  0xf3   : > { %v7249_v41 = vpop.f32.mrf.mxu0  ;;  %v5794_v37 = vld [vmem:[#allocation2 + $0x298] sm:$0xf]  ;;  %v5187_v45 = vld [vmem:[%s6663_s25 + $0x94] sm:$0xf]  ;;  %752 = vst [vmem:[#allocation2 + $0x340] sm:$0xf] %v600_v42  ;;  %v5787_v60 = vor.u32 %v6405_v4, %v5786_v0  ;;  %v5791_v22 = vor.u32 %v6401_v23, %v5788_v34 }
  0xf4   : > { %v7264_v40 = vadd.f32 %v7230_v27, %v4461_v29  ;;  %v1426_v52 = vshll.u32 %v5230_v50, 16  ;;  %v5783_v27 = vor.u32 %v6400_v48, %v5780_v53  ;;  %1027 = vst [vmem:[#allocation2 + $0x344] sm:$0xf] %v943_v18  ;;  %v1430_v29 = vshrl.u32 %v5230_v50, 16 }
  0xf5   : > { %v1436_v46 = vshll.u32 %v5231_v47, 16  ;;  %1095 = vst [vmem:[#allocation2 + $0x348] sm:$0xf] %v5187_v45  ;;  %v5795_v36 = vor.u32 %v6406_v39, %v5794_v37  ;;  %v1424_v53 = vrot.slane %v1423_v61, 4  ;;  %v602_v50 = vshrl.u32 %v298_v62, 16 }
  0xf6   : > { %7979 = vst [vmem:[#allocation6_spill] sm:$0xff] %v7264_v40  ;;  %v1428_v21 = vrot.slane %v1426_v52, 5  ;;  %v1432_v40 = vrot.slane %v1430_v29, 4  ;;  %v605_v18 = vshll.u32 %v298_v62, 16  ;;  %v611_v0 = vshll.u32 %v299_v13, 16 }
  0xf7   : > { %v4373_v19 = vpop.f32.mrf.mxu2  ;;  %v1438_v35 = vrot.slane %v1436_v46, 5  ;;  %v615_v4 = vshrl.u32 %v299_v13, 16  ;;  %v604_v34 = vrot.slane %v602_v50, 4  ;;  %v300_v62 = vld [vmem:[%s6663_s25 + $0x98] sm:$0x1] }
  0xf8   : > { %v4374_v3 = vadd.f32 %v4373_v19, %v4285_v32  ;;  %v4462_v5 = vpop.f32.mrf.mxu3  ;;  %v1433_v32 = vor.u32 %v1432_v40, %v1428_v21  ;;  %v1429_v23 = vsel %vm6810_vm3, %v1424_v53, %v1428_v21  ;;  %v607_v45 = vrot.slane %v605_v18, 5  ;;  %v797_v19 = vld [vmem:[%s6663_s25 + $0x90] sm:$0xe]  ;;  %v5233_v13 = vld [vmem:[%s6663_s25 + $0xa0] sm:$0xf] }
  0xf9   : > { %v4287_v42 = vpop.f32.mrf.mxu1  ;;  %1590 = vst [vmem:[#allocation2 + $0x328] sm:$0xf] %v1429_v23  ;;  %v613_v40 = vrot.slane %v611_v0, 5  ;;  %v617_v47 = vrot.slane %v615_v4, 4  ;;  %v5816_v0 = vld [vmem:[#allocation2 + $0x2f4] sm:$0xf0] }
  0xfa   : > { %v4463_v56 = vadd.f32 %v4462_v5, %v4374_v3  ;;  %v4288_v2 = vadd.f32 %v4287_v42, %v4199_v8  ;;  %v1434_v39 = vrot.slane %v1433_v32, 4  ;;  %v608_v52 = vor.u32 %v607_v45, %v604_v34  ;;  %v5822_v4 = vld [vmem:[#allocation2 + $0x2d8] sm:$0xf]  ;;  %v6414_v23 = vld [vmem:[#allocation2 + $0x2f8] sm:$0xf0] }
  0xfb   : > { %v7276_v48 = vpop.f32.mrf.mxu0  ;;  %v621_v8 = vshll.u32 %v300_v62, 16  ;;  %v618_v5 = vor.u32 %v617_v47, %v613_v40  ;;  %v5234_v62 = vld [vmem:[%s6663_s25 + $0xa4] sm:$0x1] }
  0xfc   : > { %4326 = vmatmul.bf16.gmra.mxu1 %v5783_v27  ;;  %4415 = vmatmul.bf16.gmra.mxu2 %v5787_v60  ;;  %v7281_v37 = vadd.f32 %v7249_v41, %v4463_v56  ;;  %v1439_v33 = vsel %vm6810_vm3, %v1434_v39, %v1438_v35  ;;  %v5232_v41 = vld [vmem:[%s6663_s25 + $0x9c] sm:$0xf]  ;;  %v7291_v27 = vld [vmem:[%s7970_s2] ss:$0 sm:$0xff]  ;;  %v798_v60 = vld [vmem:[%s6663_s25 + $0x94] sm:$0xf] }
  0xfd   : > { %4504 = vmatmul.bf16.gmra.mxu3 %v5791_v22  ;;  %v4201_v29 = vadd.f32 %v7291_v27, %v7104_v31  ;;  %1591 = vst [vmem:[#allocation2 + $0x34c] sm:$0xf] %v1439_v33  ;;  %v799_v35 = vld [vmem:[%s6663_s25 + $0x98] sm:$0x1]  ;;  %v609_v21 = vrot.slane %v608_v52, 4  ;;  %v623_v42 = vrot.slane %v621_v8, 5 }
  0xfe   : > { %4593 = vmatmul.bf16.gmra.mxu0 %v5795_v36  ;;  %v5160_v22 = vrot.slane %v797_v19, 9  ;;  %v946_v36 = vrot.slane %v798_v60, 5  ;;  %v619_v32 = vrot.slane %v618_v5, 4  ;;  %v949_v18 = vrot.slane %v799_v35, 5  ;;  %v5188_v31 = vld [vmem:[%s6663_s25 + $0x9c] sm:$0xf] }
  0xff   : > { %v4376_v28 = vpop.f32.mrf.mxu2  ;;  %v614_v34 = vsel %vm6810_vm3, %v609_v21, %v613_v40  ;;  %1096 = vst [vmem:[#allocation2 + $0x36c] sm:$0xf] %v5188_v31  ;;  %v1441_v47 = vshrl.u32 %v5232_v41, 16  ;;  %v5824_v33 = vld [vmem:[#allocation2 + $0x2fc] sm:$0xf0]  ;;  %v1454_v60 = vshrl.u32 %v5233_v13, 16  ;;  %v5823_v31 = vor.u32 %v6414_v23, %v5822_v4 }
 0x100   : > { %v4377_v46 = vadd.f32 %v4376_v28, %v4288_v2  ;;  %v4465_v3 = vpop.f32.mrf.mxu3  ;;  %v6409_v2 = vld [vmem:[#allocation2 + $0x2d4] sm:$0xf]  ;;  %v947_v39 = vsel %vm6824_vm5, %v5160_v22, %v946_v36  ;;  %v948_v45 = vrot.slane %v946_v36, 4  ;;  %v6410_v28 = vld [vmem:[#allocation2 + $0x2dc] sm:$0xf]  ;;  %v624_v8 = vsel %vm6810_vm3, %v619_v32, %v623_v42 }
 0x101   : > { %v4289_v61 = vpop.f32.mrf.mxu1  ;;  %v5830_v52 = vld [vmem:[#allocation2 + $0x2e0] sm:$0xf]  ;;  %753 = vst [vmem:[#allocation2 + $0x364] sm:$0xf] %v614_v34  ;;  %v1443_v5 = vrot.slane %v1441_v47, 4  ;;  %v1460_v35 = vshll.u32 %v5234_v62, 16  ;;  %v4204_v42 = vadd.f32 %v7291_v27, %v7129_v26  ;;  %v5819_v32 = vor.u32 %v6409_v2, %v5816_v0 }
 0x102   : > { %v4466_v56 = vadd.f32 %v4465_v3, %v4377_v46  ;;  %v4290_v53 = vadd.f32 %v4289_v61, %v4201_v29  ;;  %v5189_v19 = vld [vmem:[%s6663_s25 + $0xa0] sm:$0xf]  ;;  %v1444_v29 = vshll.u32 %v5232_v41, 16  ;;  %v1450_v46 = vshll.u32 %v5233_v13, 16  ;;  %754 = vst [vmem:[#allocation2 + $0x388] sm:$0xf] %v624_v8 }
 0x103   : > { %v4556_v50 = vpop.f32.mrf.mxu0  ;;  %v950_v40 = vsel %vm6824_vm5, %v948_v45, %v949_v18  ;;  %v6415_v61 = vld [vmem:[#allocation2 + $0x300] sm:$0xf0]  ;;  %1028 = vst [vmem:[#allocation2 + $0x368] sm:$0xf] %v947_v39  ;;  %v5827_v34 = vor.u32 %v6410_v28, %v5824_v33  ;;  %v1462_v62 = vrot.slane %v1460_v35, 5  ;;  %v6512_v33 = vld [vmem:[%s7969_s1 + $0x188] sm:$0xff] }
 0x104   : > { %v7308_v3 = vadd.f32 %v7276_v48, %v4466_v56  ;;  %v1446_v21 = vrot.slane %v1444_v29, 5  ;;  %v1452_v22 = vrot.slane %v1450_v46, 5  ;;  %1029 = vst [vmem:[#allocation2 + $0x38c] sm:$0xf] %v950_v40  ;;  %v1456_v48 = vrot.slane %v1454_v60, 4  ;;  %4724 = vmatpush.bf16.msra.mxu2 %v6512_v33 }
 0x105   : > { %1097 = vst [vmem:[#allocation2 + $0x390] sm:$0xf] %v5189_v19  ;;  %v5831_v45 = vor.u32 %v6415_v61, %v5830_v52  ;;  %v301_v47 = vld [vmem:[%s6663_s25 + $0x9c] sm:$0xf]  ;;  %v302_v8 = vld [vmem:[%s6663_s25 + $0xa0] sm:$0xf] }
 0x106   : > { %7980 = vst [vmem:[#allocation7_spill] sm:$0xff] %v7308_v3  ;;  %v1447_v18 = vor.u32 %v1446_v21, %v1443_v5  ;;  %v1457_v39 = vor.u32 %v1456_v48, %v1452_v22  ;;  %v626_v40 = vshrl.u32 %v301_v47, 16  ;;  %v629_v60 = vshll.u32 %v301_v47, 16  ;;  %v6520_v19 = vld [vmem:[%s7969_s1 + $0x1c8] sm:$0xff] }
 0x107   : > { %v4378_v41 = vpop.f32.mrf.mxu2  ;;  %v635_v2 = vshll.u32 %v302_v8, 16  ;;  %v639_v0 = vshrl.u32 %v302_v8, 16  ;;  %4813 = vmatpush.bf16.msra.mxu3 %v6520_v19 }
 0x108   : > { %v4379_v36 = vadd.f32 %v4378_v41, %v4290_v53  ;;  %v4467_v56 = vpop.f32.mrf.mxu3  ;;  %v1448_v3 = vrot.slane %v1447_v18, 4  ;;  %v1458_v53 = vrot.slane %v1457_v39, 4  ;;  %v628_v23 = vrot.slane %v626_v40, 4  ;;  %v6423_v40 = vld [vmem:[#allocation2 + $0x340] sm:$0xf0] }
 0x109   : > { %v4292_v13 = vpop.f32.mrf.mxu1  ;;  %v631_v35 = vrot.slane %v629_v60, 5  ;;  %v637_v61 = vrot.slane %v635_v2, 5  ;;  %v641_v21 = vrot.slane %v639_v0, 4  ;;  %v6528_v60 = vld [vmem:[%s7969_s1 + $0x208] sm:$0xff] }
 0x10a   : > { %v4468_v29 = vadd.f32 %v4467_v56, %v4379_v36  ;;  %v4293_v46 = vadd.f32 %v4292_v13, %v4204_v42  ;;  %v1453_v4 = vsel %vm6810_vm3, %v1448_v3, %v1452_v22  ;;  %v1463_v52 = vsel %vm6810_vm3, %v1458_v53, %v1462_v62  ;;  %v7331_v3 = vld [vmem:[%s6663_s25 + $0xa8] sm:$0xf]  ;;  %v800_v36 = vld [vmem:[%s6663_s25 + $0x9c] sm:$0xe]  ;;  %v801_v56 = vld [vmem:[%s6663_s25 + $0xa0] sm:$0xf]  ;;  %4902 = vmatpush.bf16.msra.mxu0 %v6528_v60 }
 0x10b   : > { %v7316_v26 = vpop.f32.mrf.mxu0  ;;  %1592 = vst [vmem:[#allocation2 + $0x370] sm:$0xf] %v1453_v4  ;;  %v4206_v22 = vadd.f32 %v7291_v27, %v7154_v9  ;;  %v632_v18 = vor.u32 %v631_v35, %v628_v23  ;;  %v642_v13 = vor.u32 %v641_v21, %v637_v61  ;;  %v953_v39 = vrot.slane %v801_v56, 5  ;;  %v6418_v9 = vld [vmem:[#allocation2 + $0x31c] sm:$0xf]  ;;  %v6504_v53 = vld [vmem:[%s7969_s1 + $0x148] sm:$0xff] }
 0x10c   : > { %4331 = vmatmul.bf16.gmra.mxu1 %v5819_v32  ;;  %4420 = vmatmul.bf16.gmra.mxu2 %v5823_v31  ;;  %v7320_v28 = vadd.f32 %v4556_v50, %v4468_v29  ;;  %1593 = vst [vmem:[#allocation2 + $0x394] sm:$0xf] %v1463_v52  ;;  %v303_v50 = vld [vmem:[%s6663_s25 + $0xa4] sm:$0x1]  ;;  %v1465_v32 = vshrl.u32 %v7331_v3, 16 }
 0x10d   : > { %4509 = vmatmul.bf16.gmra.mxu3 %v5827_v34  ;;  %v645_v48 = vshll.u32 %v303_v50, 16  ;;  %v802_v34 = vld [vmem:[%s6663_s25 + $0xa4] sm:$0x1]  ;;  %v5852_v29 = vld [vmem:[#allocation2 + $0x33c] sm:$0xf0]  ;;  %v633_v23 = vrot.slane %v632_v18, 4  ;;  %4635 = vmatpush.bf16.msra.mxu1 %v6504_v53 }
 0x10e   : > { %4598 = vmatmul.bf16.gmra.mxu0 %v5831_v45  ;;  %v5161_v45 = vrot.slane %v800_v36, 9  ;;  %v956_v0 = vrot.slane %v802_v34, 5  ;;  %v5190_v4 = vld [vmem:[%s6663_s25 + $0xa8] sm:$0xf]  ;;  %v643_v33 = vrot.slane %v642_v13, 4  ;;  %v955_v19 = vrot.slane %v953_v39, 4 }
 0x10f   : > { %v4381_v5 = vpop.f32.mrf.mxu2  ;;  %v647_v2 = vrot.slane %v645_v48, 5  ;;  %v5236_v50 = vld [vmem:[%s6663_s25 + $0xac] sm:$0xf]  ;;  %v5860_v35 = vld [vmem:[#allocation2 + $0x344] sm:$0xf0]  ;;  %v638_v48 = vsel %vm6810_vm3, %v633_v23, %v637_v61  ;;  %v1467_v18 = vrot.slane %v1465_v32, 4  ;;  %v5855_v61 = vor.u32 %v6418_v9, %v5852_v29 }
 0x110   : > { %v4382_v42 = vadd.f32 %v4381_v5, %v4293_v46  ;;  %v4470_v41 = vpop.f32.mrf.mxu3  ;;  %v5858_v46 = vld [vmem:[#allocation2 + $0x320] sm:$0xf]  ;;  %v954_v52 = vsel %vm6824_vm5, %v5161_v45, %v953_v39  ;;  %v6419_v5 = vld [vmem:[#allocation2 + $0x324] sm:$0xf]  ;;  %v5866_v21 = vld [vmem:[#allocation2 + $0x328] sm:$0xf]  ;;  %v957_v56 = vsel %vm6824_vm5, %v955_v19, %v956_v0 }
 0x111   : > { %v4294_v31 = vpop.f32.mrf.mxu1  ;;  %1030 = vst [vmem:[#allocation2 + $0x3b0] sm:$0xf] %v954_v52  ;;  %v648_v36 = vsel %vm6810_vm3, %v643_v33, %v647_v2  ;;  %v1468_v13 = vshll.u32 %v7331_v3, 16  ;;  %v1474_v34 = vshll.u32 %v5236_v50, 16  ;;  %v1478_v45 = vshrl.u32 %v5236_v50, 16 }
 0x112   : > { %v4471_v62 = vadd.f32 %v4470_v41, %v4382_v42  ;;  %v4295_v47 = vadd.f32 %v4294_v31, %v4206_v22  ;;  %v5237_v22 = vld [vmem:[%s6663_s25 + $0xb0] sm:$0x1]  ;;  %v6424_v41 = vld [vmem:[#allocation2 + $0x348] sm:$0xf0]  ;;  %1098 = vst [vmem:[#allocation2 + $0x3b4] sm:$0xf] %v5190_v4  ;;  %v5863_v3 = vor.u32 %v6419_v5, %v5860_v35 }
 0x113   : > { %v7340_v8 = vpop.f32.mrf.mxu0  ;;  %v5191_v31 = vld [vmem:[%s6663_s25 + $0xac] sm:$0xf]  ;;  %755 = vst [vmem:[#allocation2 + $0x3ac] sm:$0xf] %v638_v48  ;;  %v1484_v53 = vshll.u32 %v5237_v22, 16  ;;  %v1470_v0 = vrot.slane %v1468_v13, 5  ;;  %v5867_v33 = vor.u32 %v6424_v41, %v5866_v21 }
 0x114   : > { %v7354_v42 = vadd.f32 %v7316_v26, %v4471_v62  ;;  %v4209_v26 = vadd.f32 %v7291_v27, %v7185_v15  ;;  %v5859_v62 = vor.u32 %v6423_v40, %v5858_v46  ;;  %756 = vst [vmem:[#allocation2 + $0x3d0] sm:$0xf] %v648_v36  ;;  %v1476_v4 = vrot.slane %v1474_v34, 5  ;;  %v304_v19 = vld [vmem:[%s6663_s25 + $0xa8] sm:$0xf] }
 0x115   : > { %1031 = vst [vmem:[#allocation2 + $0x3d4] sm:$0xf] %v957_v56  ;;  %v1480_v32 = vrot.slane %v1478_v45, 4  ;;  %v1486_v52 = vrot.slane %v1484_v53, 5  ;;  %v1471_v29 = vor.u32 %v1470_v0, %v1467_v18  ;;  %v650_v40 = vshrl.u32 %v304_v19, 16 }
 0x116   : > { %1099 = vst [vmem:[#allocation2 + $0x3d8] sm:$0xf] %v5191_v31  ;;  %v653_v22 = vshll.u32 %v304_v19, 16  ;;  %v306_v41 = vld [vmem:[%s6663_s25 + $0xb0] sm:$0x1]  ;;  %v4211_v53 = vadd.f32 %v7291_v27, %v7207_v17 }
 0x117   : > { %v4383_v39 = vpop.f32.mrf.mxu2  ;;  %v1481_v46 = vor.u32 %v1480_v32, %v1476_v4  ;;  %v1472_v5 = vrot.slane %v1471_v29, 4  ;;  %v652_v56 = vrot.slane %v650_v40, 4  ;;  %v5238_v32 = vld [vmem:[%s6663_s25 + $0xb4] sm:$0xf]  ;;  %v6427_v27 = vld [vmem:[#allocation2 + $0x364] sm:$0xf] }
 0x118   : > { %v4384_v60 = vadd.f32 %v4383_v39, %v4295_v47  ;;  %v4472_v2 = vpop.f32.mrf.mxu3  ;;  %v305_v47 = vld [vmem:[%s6663_s25 + $0xac] sm:$0xf]  ;;  %v655_v31 = vrot.slane %v653_v22, 5  ;;  %v5192_v17 = vld [vmem:[%s6663_s25 + $0xb4] sm:$0xf] }
 0x119   : > { %v4297_v23 = vpop.f32.mrf.mxu1  ;;  %v659_v48 = vshll.u32 %v305_v47, 16  ;;  %v663_v36 = vshrl.u32 %v305_v47, 16  ;;  %v1482_v35 = vrot.slane %v1481_v46, 4  ;;  %v1477_v18 = vsel %vm6810_vm3, %v1472_v5, %v1476_v4  ;;  %v803_v4 = vld [vmem:[%s6663_s25 + $0xa8] sm:$0xe] }
 0x11a   : > { %v4473_v15 = vadd.f32 %v4472_v2, %v4384_v60  ;;  %v4298_v50 = vadd.f32 %v4297_v23, %v4209_v26  ;;  %v804_v26 = vld [vmem:[%s6663_s25 + $0xac] sm:$0xf]  ;;  %1594 = vst [vmem:[#allocation2 + $0x3b8] sm:$0xf] %v1477_v18  ;;  %v5162_v19 = vrot.slane %v803_v4, 9 }
 0x11b   : > { %v7367_v9 = vpop.f32.mrf.mxu0  ;;  %v1487_v13 = vsel %vm6810_vm3, %v1482_v35, %v1486_v52  ;;  %v661_v34 = vrot.slane %v659_v48, 5  ;;  %v665_v45 = vrot.slane %v663_v36, 4  ;;  %v805_v52 = vld [vmem:[%s6663_s25 + $0xb0] sm:$0x1]  ;;  %v5894_v22 = vld [vmem:[#allocation2 + $0x368] sm:$0xf] }
 0x11c   : > { %4336 = vmatmul.bf16.gmra.mxu1 %v5855_v61  ;;  %4425 = vmatmul.bf16.gmra.mxu2 %v5859_v62  ;;  %v7371_v21 = vadd.f32 %v7340_v8, %v4473_v15  ;;  %v656_v8 = vor.u32 %v655_v31, %v652_v56  ;;  %v669_v61 = vshll.u32 %v306_v41, 16  ;;  %v960_v62 = vrot.slane %v804_v26, 5  ;;  %1595 = vst [vmem:[#allocation2 + $0x3dc] sm:$0xf] %v1487_v13  ;;  %v6432_v48 = vld [vmem:[#allocation2 + $0x388] sm:$0xf0] }
 0x11d   : > { %4514 = vmatmul.bf16.gmra.mxu3 %v5863_v3  ;;  %v666_v0 = vor.u32 %v665_v45, %v661_v34  ;;  %v963_v35 = vrot.slane %v805_v52, 5  ;;  %v5193_v41 = vld [vmem:[%s6663_s25 + $0xb8] sm:$0xf]  ;;  %1100 = vst [vmem:[#allocation2 + $0x3fc] sm:$0xf] %v5192_v17  ;;  %v1489_v31 = vshrl.u32 %v5238_v32, 16 }
 0x11e   : > { %4603 = vmatmul.bf16.gmra.mxu0 %v5867_v33  ;;  %v657_v3 = vrot.slane %v656_v8, 4  ;;  %v671_v33 = vrot.slane %v669_v61, 5  ;;  %v962_v40 = vrot.slane %v960_v62, 4  ;;  %v961_v5 = vsel %vm6824_vm5, %v5162_v19, %v960_v62  ;;  %v5239_v56 = vld [vmem:[%s6663_s25 + $0xb8] sm:$0xf] }
 0x11f   : > { %v4386_v39 = vpop.f32.mrf.mxu2  ;;  %v667_v47 = vrot.slane %v666_v0, 4  ;;  %v6428_v18 = vld [vmem:[#allocation2 + $0x36c] sm:$0xf]  ;;  %v5896_v13 = vld [vmem:[#allocation2 + $0x38c] sm:$0xf0]  ;;  %v1492_v8 = vshll.u32 %v5238_v32, 16  ;;  %v5895_v19 = vor.u32 %v6432_v48, %v5894_v22 }
 0x120   : > { %v4387_v60 = vadd.f32 %v4386_v39, %v4298_v50  ;;  %v4475_v2 = vpop.f32.mrf.mxu3  ;;  %v5888_v50 = vld [vmem:[#allocation2 + $0x384] sm:$0xf0]  ;;  %v662_v36 = vsel %vm6810_vm3, %v657_v3, %v661_v34  ;;  %v5902_v45 = vld [vmem:[#allocation2 + $0x370] sm:$0xf]  ;;  %v5240_v39 = vld [vmem:[%s6663_s25 + $0xbc] sm:$0x1]  ;;  %v964_v62 = vsel %vm6824_vm5, %v962_v40, %v963_v35  ;;  %v5899_v40 = vor.u32 %v6428_v18, %v5896_v13 }
 0x121   : > { %v4299_v23 = vpop.f32.mrf.mxu1  ;;  %v672_v26 = vsel %vm6810_vm3, %v667_v47, %v671_v33  ;;  %757 = vst [vmem:[#allocation2 + $0x3f4] sm:$0xf] %v662_v36  ;;  %v1498_v61 = vshll.u32 %v5239_v56, 16  ;;  %v6433_v0 = vld [vmem:[#allocation2 + $0x390] sm:$0xf0]  ;;  %v1494_v4 = vrot.slane %v1492_v8, 5 }
 0x122   : > { %v4476_v15 = vadd.f32 %v4475_v2, %v4387_v60  ;;  %v4300_v29 = vadd.f32 %v4299_v23, %v4211_v53  ;;  %758 = vst [vmem:[#allocation2 + $0x418] sm:$0xf] %v672_v26  ;;  %v1491_v53 = vrot.slane %v1489_v31, 4  ;;  %v1502_v60 = vshrl.u32 %v5239_v56, 16  ;;  %v307_v56 = vld [vmem:[%s6663_s25 + $0xb4] sm:$0xf] }
 0x123   : > { %v4566_v46 = vpop.f32.mrf.mxu0  ;;  %v1508_v2 = vshll.u32 %v5240_v39, 16  ;;  %1032 = vst [vmem:[#allocation2 + $0x3f8] sm:$0xf] %v961_v5  ;;  %v1500_v23 = vrot.slane %v1498_v61, 5  ;;  %v5903_v17 = vor.u32 %v6433_v0, %v5902_v45  ;;  %v308_v5 = vld [vmem:[%s6663_s25 + $0xb8] sm:$0xf] }
 0x124   : > { %v7395_v34 = vadd.f32 %v7367_v9, %v4476_v15  ;;  %1033 = vst [vmem:[#allocation2 + $0x41c] sm:$0xf] %v964_v62  ;;  %v1504_v32 = vrot.slane %v1502_v60, 4  ;;  %v5891_v9 = vor.u32 %v6427_v27, %v5888_v50  ;;  %v1495_v15 = vor.u32 %v1494_v4, %v1491_v53  ;;  %v6519_v45 = vld [vmem:[%s7969_s1 + $0x1c0] sm:$0xff] }
 0x125   : > { %1101 = vst [vmem:[#allocation2 + $0x420] sm:$0xf] %v5193_v41  ;;  %v1510_v35 = vrot.slane %v1508_v2, 5  ;;  %v674_v61 = vshrl.u32 %v307_v56, 16  ;;  %v677_v27 = vshll.u32 %v307_v56, 16  ;;  %v683_v50 = vshll.u32 %v308_v5, 16  ;;  %4814 = vmatpush.bf16.msra.mxu3 %v6519_v45 }
 0x126   : > { %v1505_v36 = vor.u32 %v1504_v32, %v1500_v23  ;;  %v1496_v8 = vrot.slane %v1495_v15, 4  ;;  %v687_v22 = vshrl.u32 %v308_v5, 16  ;;  %v7417_v62 = vld [vmem:[%s6663_s25 + $0xc0] sm:$0xf]  ;;  %v806_v32 = vld [vmem:[%s6663_s25 + $0xb4] sm:$0xe] }
 0x127   : > { %v4388_v3 = vpop.f32.mrf.mxu2  ;;  %v676_v41 = vrot.slane %v674_v61, 4  ;;  %v679_v60 = vrot.slane %v677_v27, 5  ;;  %v685_v2 = vrot.slane %v683_v50, 5  ;;  %v6436_v5 = vld [vmem:[#allocation2 + $0x3ac] sm:$0xf]  ;;  %v6503_v61 = vld [vmem:[%s7969_s1 + $0x140] sm:$0xff] }
 0x128   : > { %v4389_v33 = vadd.f32 %v4388_v3, %v4300_v29  ;;  %v4477_v52 = vpop.f32.mrf.mxu3  ;;  %v1506_v29 = vrot.slane %v1505_v36, 4  ;;  %v1501_v48 = vsel %vm6810_vm3, %v1496_v8, %v1500_v23  ;;  %v689_v0 = vrot.slane %v687_v22, 4  ;;  %v6441_v8 = vld [vmem:[#allocation2 + $0x3d0] sm:$0xf0]  ;;  %v5194_v22 = vld [vmem:[%s6663_s25 + $0xc0] sm:$0xf]  ;;  %4636 = vmatpush.bf16.msra.mxu1 %v6503_v61 }
 0x129   : > { %v4302_v47 = vpop.f32.mrf.mxu1  ;;  %1596 = vst [vmem:[#allocation2 + $0x400] sm:$0xf] %v1501_v48  ;;  %v6437_v45 = vld [vmem:[#allocation2 + $0x3b4] sm:$0xf] }
 0x12a   : > { %v4478_v31 = vadd.f32 %v4477_v52, %v4389_v33  ;;  %v4303_v26 = vadd.f32 %v4302_v47, %v7025_v38  ;;  %v6511_v38 = vld [vmem:[%s7969_s1 + $0x180] sm:$0xff]  ;;  %v1511_v13 = vsel %vm6810_vm3, %v1506_v29, %v1510_v35  ;;  %v807_v33 = vld [vmem:[%s6663_s25 + $0xb8] sm:$0xf]  ;;  %v1513_v52 = vshrl.u32 %v7417_v62, 16  ;;  %v808_v47 = vld [vmem:[%s6663_s25 + $0xbc] sm:$0x1] }
 0x12b   : > { %v7402_v39 = vpop.f32.mrf.mxu0  ;;  %1597 = vst [vmem:[#allocation2 + $0x424] sm:$0xf] %v1511_v13  ;;  %4725 = vmatpush.bf16.msra.mxu2 %v6511_v38  ;;  %v690_v15 = vor.u32 %v689_v0, %v685_v2  ;;  %v6527_v29 = vld [vmem:[%s7969_s1 + $0x200] sm:$0xff]  ;;  %v970_v50 = vrot.slane %v808_v47, 5 }
 0x12c   : > { %4341 = vmatmul.bf16.gmra.mxu1 %v5891_v9  ;;  %4430 = vmatmul.bf16.gmra.mxu2 %v5895_v19  ;;  %v7406_v18 = vadd.f32 %v4566_v46, %v4478_v31  ;;  %v309_v46 = vld [vmem:[%s6663_s25 + $0xbc] sm:$0x1]  ;;  %v680_v19 = vor.u32 %v679_v60, %v676_v41  ;;  %v5924_v31 = vld [vmem:[#allocation2 + $0x3cc] sm:$0xf0]  ;;  %v5242_v13 = vld [vmem:[%s6663_s25 + $0xc4] sm:$0xf] }
 0x12d   : > { %4519 = vmatmul.bf16.gmra.mxu3 %v5899_v40  ;;  %v693_v3 = vshll.u32 %v309_v46, 16  ;;  %v5163_v40 = vrot.slane %v806_v32, 9  ;;  %v691_v41 = vrot.slane %v690_v15, 4  ;;  %v5932_v46 = vld [vmem:[#allocation2 + $0x3d4] sm:$0xf0]  ;;  %4903 = vmatpush.bf16.msra.mxu0 %v6527_v29  ;;  %v1522_v15 = vshll.u32 %v5242_v13, 16 }
 0x12e   : > { %4608 = vmatmul.bf16.gmra.mxu0 %v5903_v17  ;;  %v967_v17 = vrot.slane %v807_v33, 5  ;;  %v681_v48 = vrot.slane %v680_v19, 4  ;;  %v5243_v60 = vld [vmem:[%s6663_s25 + $0xc8] sm:$0x1]  ;;  %v5195_v33 = vld [vmem:[%s6663_s25 + $0xc4] sm:$0xf] }
 0x12f   : > { %v4391_v53 = vpop.f32.mrf.mxu2  ;;  %v695_v27 = vrot.slane %v693_v3, 5  ;;  %1102 = vst [vmem:[#allocation2 + $0x444] sm:$0xf] %v5194_v22  ;;  %v1516_v19 = vshll.u32 %v7417_v62, 16  ;;  %v1526_v47 = vshrl.u32 %v5242_v13, 16 }
 0x130   : > { %v4392_v4 = vadd.f32 %v4391_v53, %v4303_v26  ;;  %v4480_v23 = vpop.f32.mrf.mxu3  ;;  %v5930_v26 = vld [vmem:[#allocation2 + $0x3b0] sm:$0xf]  ;;  %v969_v38 = vrot.slane %v967_v17, 4  ;;  %v5938_v53 = vld [vmem:[#allocation2 + $0x3b8] sm:$0xf] }
 0x131   : > { %v4304_v9 = vpop.f32.mrf.mxu1  ;;  %v696_v3 = vsel %vm6810_vm3, %v691_v41, %v695_v27  ;;  %v1518_v29 = vrot.slane %v1516_v19, 5  ;;  %v1524_v27 = vrot.slane %v1522_v15, 5  ;;  %1103 = vst [vmem:[#allocation2 + $0x468] sm:$0xf] %v5195_v33  ;;  %v5340_v41 = vld [vmem:[%s6663_s25 + $0x18] sm:$0xf] }
 0x132   : > { %v4481_v36 = vadd.f32 %v4480_v23, %v4392_v4  ;;  %v4305_v35 = vadd.f32 %v4304_v9, %v7053_v7  ;;  %v968_v7 = vsel %vm6824_vm5, %v5163_v40, %v967_v17  ;;  %v6442_v4 = vld [vmem:[#allocation2 + $0x3d8] sm:$0xf0]  ;;  %v686_v23 = vsel %vm6810_vm3, %v681_v48, %v685_v2  ;;  %760 = vst [vmem:[#allocation2 + $0x460] sm:$0xf] %v696_v3 }
 0x133   : > { %v4571_v56 = vpop.f32.mrf.mxu0  ;;  %1034 = vst [vmem:[#allocation2 + $0x440] sm:$0xf] %v968_v7  ;;  %v971_v32 = vsel %vm6824_vm5, %v969_v38, %v970_v50  ;;  %v1515_v9 = vrot.slane %v1513_v52, 4  ;;  %v5927_v40 = vor.u32 %v6436_v5, %v5924_v31  ;;  %v5931_v17 = vor.u32 %v6441_v8, %v5930_v26 }
 0x134   : > { %v7437_v0 = vadd.f32 %v7402_v39, %v4481_v36  ;;  %759 = vst [vmem:[#allocation2 + $0x43c] sm:$0xf] %v686_v23  ;;  %v1532_v2 = vshll.u32 %v5243_v60, 16  ;;  %v1528_v50 = vrot.slane %v1526_v47, 4  ;;  %v5935_v48 = vor.u32 %v6437_v45, %v5932_v46  ;;  %v5245_v46 = vld [vmem:[%s6663_s25 + $0x10] sm:$0xf] }
 0x135   : > { %1035 = vst [vmem:[#allocation2 + $0x464] sm:$0xf] %v971_v32  ;;  %v5939_v52 = vor.u32 %v6442_v4, %v5938_v53  ;;  %v1519_v26 = vor.u32 %v1518_v29, %v1515_v9  ;;  %v1989_v60 = vshrl.u32 %v5340_v41, 16  ;;  %v1992_v53 = vshll.u32 %v5340_v41, 16  ;;  %v5244_v9 = vld [vmem:[%s6663_s25 + $0xc] sm:$0xe] }
 0x136   : > { %v1534_v62 = vrot.slane %v1532_v2, 5  ;;  %v1529_v8 = vor.u32 %v1528_v50, %v1524_v27  ;;  %v1698_v3 = vrot.slane %v5245_v46, 5  ;;  %v5246_v47 = vld [vmem:[%s6663_s25 + $0x14] sm:$0x1]  ;;  %v5968_v46 = vld [vmem:[#allocation2 + $0x41c] sm:$0xf0] }
 0x137   : > { %v4393_v39 = vpop.f32.mrf.mxu2  ;;  %v1520_v38 = vrot.slane %v1519_v26, 4  ;;  %v1994_v41 = vrot.slane %v1992_v53, 5  ;;  %v6450_v26 = vld [vmem:[#allocation2 + $0x418] sm:$0xf0] }
 0x138   : > { %v4394_v36 = vadd.f32 %v4393_v39, %v4305_v35  ;;  %v4482_v61 = vpop.f32.mrf.mxu3  ;;  %v5341_v35 = vld [vmem:[%s6663_s25 + $0x1c] sm:$0xf]  ;;  %v1530_v13 = vrot.slane %v1529_v8, 4  ;;  %v1991_v39 = vrot.slane %v1989_v60, 4  ;;  %v1700_v2 = vrot.slane %v1698_v3, 4 }
 0x139   : > { %v4307_v22 = vpop.f32.mrf.mxu1  ;;  %v1998_v4 = vshll.u32 %v5341_v35, 16  ;;  %v2002_v32 = vshrl.u32 %v5341_v35, 16  ;;  %v6446_v60 = vld [vmem:[#allocation2 + $0x3fc] sm:$0xf] }
 0x13a   : > { %v4483_v7 = vadd.f32 %v4482_v61, %v4394_v36  ;;  %v4308_v5 = vadd.f32 %v4307_v22, %v7081_v55  ;;  %v1525_v55 = vsel %vm6810_vm3, %v1520_v38, %v1524_v27  ;;  %v1535_v23 = vsel %vm6810_vm3, %v1530_v13, %v1534_v62  ;;  %v5388_v61 = vld [vmem:[%s6663_s25 + $0x18] sm:$0xe]  ;;  %v6445_v22 = vld [vmem:[#allocation2 + $0x3f4] sm:$0xf]  ;;  %v5309_v62 = vld [vmem:[%s6663_s25 + $0x1c] sm:$0xf] }
 0x13b   : > { %v4574_v31 = vpop.f32.mrf.mxu0  ;;  %1598 = vst [vmem:[#allocation2 + $0x448] sm:$0xf] %v1525_v55  ;;  %v1701_v36 = vrot.slane %v5246_v47, 5  ;;  %v2004_v38 = vrot.slane %v2002_v32, 4  ;;  %v1995_v55 = vor.u32 %v1994_v41, %v1991_v39  ;;  %v6451_v47 = vld [vmem:[#allocation2 + $0x420] sm:$0xf0]  ;;  %v5971_v41 = vor.u32 %v6446_v60, %v5968_v46 }
 0x13c   : > { %4346 = vmatmul.bf16.gmra.mxu1 %v5927_v40  ;;  %4435 = vmatmul.bf16.gmra.mxu2 %v5931_v17  ;;  %v7450_v45 = vadd.f32 %v4571_v56, %v4483_v7  ;;  %v5342_v56 = vld [vmem:[%s6663_s25 + $0x20] sm:$0x1]  ;;  %1599 = vst [vmem:[#allocation2 + $0x46c] sm:$0xf] %v1535_v23  ;;  %v5292_v17 = vrot.slane %v5244_v9, 9  ;;  %v2000_v7 = vrot.slane %v1998_v4, 5 }
 0x13d   : > { %4524 = vmatmul.bf16.gmra.mxu3 %v5935_v48  ;;  %v5960_v48 = vld [vmem:[#allocation2 + $0x414] sm:$0xf0]  ;;  %v1702_v35 = vsel %vm6824_vm5, %v1700_v2, %v1701_v36  ;;  %v2008_v13 = vshll.u32 %v5342_v56, 16  ;;  %v5390_v23 = vld [vmem:[%s6663_s25 + $0x20] sm:$0x1] }
 0x13e   : > { %4613 = vmatmul.bf16.gmra.mxu0 %v5939_v52  ;;  %v5308_v52 = vld [vmem:[%s6663_s25 + $0x18] sm:$0xf]  ;;  %v1699_v8 = vsel %vm6824_vm5, %v5292_v17, %v1698_v3  ;;  %v5974_v9 = vld [vmem:[#allocation2 + $0x400] sm:$0xf]  ;;  %1841 = vst [vmem:[#allocation2 + $0x38] sm:$0xf] %v1702_v35  ;;  %v5963_v17 = vor.u32 %v6445_v22, %v5960_v48 }
 0x13f   : > { %v4396_v33 = vpop.f32.mrf.mxu2  ;;  %1908 = vst [vmem:[#allocation2 + $0x18] sm:$0xf] %v5308_v52  ;;  %v2010_v3 = vrot.slane %v2008_v13, 5  ;;  %v5344_v22 = vld [vmem:[%s6663_s25 + $0x28] sm:$0xf] }
 0x140   : > { %v4397_v19 = vadd.f32 %v4396_v33, %v4308_v5  ;;  %v4485_v15 = vpop.f32.mrf.mxu3  ;;  %v5966_v5 = vld [vmem:[#allocation2 + $0x3f8] sm:$0xf]  ;;  %1840 = vst [vmem:[#allocation2 + $0x14] sm:$0xf] %v1699_v8  ;;  %v5436_v33 = vrot.slane %v5388_v61, 9  ;;  %v5975_v8 = vor.u32 %v6451_v47, %v5974_v9  ;;  %v2022_v13 = vshll.u32 %v5344_v22, 16 }
 0x141   : > { %v4309_v40 = vpop.f32.mrf.mxu1  ;;  %1909 = vst [vmem:[#allocation2 + $0x3c] sm:$0xf] %v5309_v62  ;;  %v5967_v61 = vor.u32 %v6450_v26, %v5966_v5 }
 0x142   : > { %v4486_v29 = vadd.f32 %v4485_v15, %v4397_v19  ;;  %v4310_v27 = vadd.f32 %v4309_v40, %v7102_v30  ;;  %v5389_v30 = vld [vmem:[%s6663_s25 + $0x1c] sm:$0xf]  ;;  %v2005_v19 = vor.u32 %v2004_v38, %v2000_v7  ;;  %v2537_v15 = vrot.slane %v5390_v23, 5  ;;  %v5343_v38 = vld [vmem:[%s6663_s25 + $0x24] sm:$0xf] }
 0x143   : > { %v4576_v50 = vpop.f32.mrf.mxu0  ;;  %v2534_v53 = vrot.slane %v5389_v30, 5  ;;  %v1996_v40 = vrot.slane %v1995_v55, 4  ;;  %v2016_v26 = vshll.u32 %v5343_v38, 16  ;;  %v2026_v30 = vshrl.u32 %v5344_v22, 16  ;;  %v5248_v23 = vld [vmem:[%s6663_s25 + $0x1c] sm:$0xf] }
 0x144   : > { %v7470_v4 = vadd.f32 %v4574_v31, %v4486_v29  ;;  %v2006_v2 = vrot.slane %v2005_v19, 4  ;;  %v2024_v9 = vrot.slane %v2022_v13, 5  ;;  %v6454_v22 = vld [vmem:[#allocation2 + $0x43c] sm:$0xf] }
 0x145   : > { %v2535_v32 = vsel %vm6824_vm5, %v5436_v33, %v2534_v53  ;;  %v2536_v56 = vrot.slane %v2534_v53, 4  ;;  %v2001_v29 = vsel %vm6810_vm3, %v1996_v40, %v2000_v7  ;;  %v2013_v7 = vshrl.u32 %v5343_v38, 16  ;;  %v5311_v38 = vld [vmem:[%s6663_s25 + $0x28] sm:$0xf] }
 0x146   : > { %2676 = vst [vmem:[#allocation2 + $0x20] sm:$0xf] %v2535_v32  ;;  %v2011_v35 = vsel %vm6810_vm3, %v2006_v2, %v2010_v3  ;;  %v2018_v46 = vrot.slane %v2016_v26, 5  ;;  %v1705_v33 = vrot.slane %v5248_v23, 5  ;;  %v5247_v3 = vld [vmem:[%s6663_s25 + $0x18] sm:$0xe] }
 0x147   : > { %v4398_v39 = vpop.f32.mrf.mxu2  ;;  %v2538_v52 = vsel %vm6824_vm5, %v2536_v56, %v2537_v15  ;;  %2404 = vst [vmem:[#allocation2 + $0x1c] sm:$0xf] %v2001_v29  ;;  %v2015_v60 = vrot.slane %v2013_v7, 4  ;;  %v5249_v15 = vld [vmem:[%s6663_s25 + $0x20] sm:$0x1]  ;;  %v2028_v47 = vrot.slane %v2026_v30, 4 }
 0x148   : > { %v4399_v31 = vadd.f32 %v4398_v39, %v4310_v27  ;;  %v4487_v36 = vpop.f32.mrf.mxu3  ;;  %2405 = vst [vmem:[#allocation2 + $0x40] sm:$0xf] %v2011_v35  ;;  %v5293_v39 = vrot.slane %v5247_v3, 9  ;;  %v5391_v29 = vld [vmem:[%s6663_s25 + $0x24] sm:$0xe] }
 0x149   : > { %v4312_v62 = vpop.f32.mrf.mxu1  ;;  %2677 = vst [vmem:[#allocation2 + $0x44] sm:$0xf] %v2538_v52  ;;  %v2019_v53 = vor.u32 %v2018_v46, %v2015_v60  ;;  %v5310_v35 = vld [vmem:[%s6663_s25 + $0x24] sm:$0xf]  ;;  %v5392_v30 = vld [vmem:[%s6663_s25 + $0x28] sm:$0xf] }
 0x14a   : > { %v4488_v48 = vadd.f32 %v4487_v36, %v4399_v31  ;;  %v4313_v27 = vadd.f32 %v4312_v62, %v7127_v25  ;;  %v5345_v25 = vld [vmem:[%s6663_s25 + $0x2c] sm:$0x1]  ;;  %v2029_v36 = vor.u32 %v2028_v47, %v2024_v9  ;;  %v6459_v7 = vld [vmem:[#allocation2 + $0x460] sm:$0xf0]  ;;  %v6004_v46 = vld [vmem:[#allocation2 + $0x464] sm:$0xf0] }
 0x14b   : > { %v4579_v5 = vpop.f32.mrf.mxu0  ;;  %v2032_v40 = vshll.u32 %v5345_v25, 16  ;;  %v2020_v31 = vrot.slane %v2019_v53, 4  ;;  %v6455_v60 = vld [vmem:[#allocation2 + $0x444] sm:$0xf]  ;;  %v5393_v23 = vld [vmem:[%s6663_s25 + $0x2c] sm:$0x1] }
 0x14c   : > { %4351 = vmatmul.bf16.gmra.mxu1 %v5963_v17  ;;  %4440 = vmatmul.bf16.gmra.mxu2 %v5967_v61  ;;  %v7483_v55 = vadd.f32 %v4576_v50, %v4488_v48  ;;  %v1707_v50 = vrot.slane %v1705_v33, 4  ;;  %v1708_v17 = vrot.slane %v5249_v15, 5  ;;  %v5996_v48 = vld [vmem:[#allocation2 + $0x45c] sm:$0xf0]  ;;  %v2030_v13 = vrot.slane %v2029_v36, 4 }
 0x14d   : > { %4529 = vmatmul.bf16.gmra.mxu3 %v5971_v41  ;;  %v2034_v61 = vrot.slane %v2032_v40, 5  ;;  %v5437_v25 = vrot.slane %v5391_v29, 9  ;;  %1910 = vst [vmem:[#allocation2 + $0x60] sm:$0xf] %v5310_v35  ;;  %v2544_v15 = vrot.slane %v5393_v23, 5 }
 0x14e   : > { %4618 = vmatmul.bf16.gmra.mxu0 %v5975_v8  ;;  %v1706_v8 = vsel %vm6824_vm5, %v5293_v39, %v1705_v33  ;;  %v1709_v26 = vsel %vm6824_vm5, %v1707_v50, %v1708_v17  ;;  %v2541_v33 = vrot.slane %v5392_v30, 5  ;;  %v6460_v47 = vld [vmem:[#allocation2 + $0x468] sm:$0xf0]  ;;  %1911 = vst [vmem:[#allocation2 + $0x84] sm:$0xf] %v5311_v38 }
 0x14f   : > { %v4401_v19 = vpop.f32.mrf.mxu2  ;;  %1842 = vst [vmem:[#allocation2 + $0x5c] sm:$0xf] %v1706_v8  ;;  %v2035_v3 = vsel %vm6810_vm3, %v2030_v13, %v2034_v61  ;;  %v5346_v61 = vld [vmem:[%s6663_s25 + $0x30] sm:$0xf]  ;;  %v5347_v29 = vld [vmem:[%s6663_s25 + $0x34] sm:$0xf] }
 0x150   : > { %v4402_v32 = vadd.f32 %v4401_v19, %v4313_v27  ;;  %v4490_v56 = vpop.f32.mrf.mxu3  ;;  %v6002_v27 = vld [vmem:[#allocation2 + $0x440] sm:$0xf]  ;;  %1843 = vst [vmem:[#allocation2 + $0x80] sm:$0xf] %v1709_v26  ;;  %v6010_v19 = vld [vmem:[#allocation2 + $0x448] sm:$0xf]  ;;  %v2542_v40 = vsel %vm6824_vm5, %v5437_v25, %v2541_v33 }
 0x151   : > { %v4314_v2 = vpop.f32.mrf.mxu1  ;;  %v6003_v50 = vor.u32 %v6459_v7, %v6002_v27  ;;  %2407 = vst [vmem:[#allocation2 + $0x88] sm:$0xf] %v2035_v3  ;;  %v6011_v36 = vor.u32 %v6460_v47, %v6010_v19  ;;  %v2040_v38 = vshll.u32 %v5346_v61, 16  ;;  %v5251_v26 = vld [vmem:[%s6663_s25 + $0x28] sm:$0xf]  ;;  %v2050_v13 = vshrl.u32 %v5347_v29, 16 }
 0x152   : > { %v4491_v52 = vadd.f32 %v4490_v56, %v4402_v32  ;;  %v4315_v62 = vadd.f32 %v4314_v2, %v7152_v6  ;;  %v2025_v6 = vsel %vm6810_vm3, %v2020_v31, %v2024_v9  ;;  %v2543_v32 = vrot.slane %v2541_v33, 4  ;;  %2678 = vst [vmem:[#allocation2 + $0x68] sm:$0xf] %v2542_v40  ;;  %v5252_v23 = vld [vmem:[%s6663_s25 + $0x2c] sm:$0x1] }
 0x153   : > { %v4581_v41 = vpop.f32.mrf.mxu0  ;;  %2406 = vst [vmem:[#allocation2 + $0x64] sm:$0xf] %v2025_v6  ;;  %v6007_v31 = vor.u32 %v6455_v60, %v6004_v46  ;;  %v2042_v27 = vrot.slane %v2040_v38, 5  ;;  %v1712_v30 = vrot.slane %v5251_v26, 5  ;;  %v5250_v6 = vld [vmem:[%s6663_s25 + $0x24] sm:$0xe] }
 0x154   : > { %v7501_v53 = vadd.f32 %v4579_v5, %v4491_v52  ;;  %v5999_v5 = vor.u32 %v6454_v22, %v5996_v48  ;;  %v2545_v17 = vsel %vm6824_vm5, %v2543_v32, %v2544_v15  ;;  %v2046_v22 = vshll.u32 %v5347_v29, 16  ;;  %v5472_v29 = vld [vmem:[#allocation2 + $0x34] sm:$0xf0]  ;;  %v5486_v26 = vld [vmem:[#allocation2 + $0x20] sm:$0xf] }
 0x155   : > { %2679 = vst [vmem:[#allocation2 + $0x8c] sm:$0xf] %v2545_v17  ;;  %v5294_v3 = vrot.slane %v5250_v6, 9  ;;  %v1715_v47 = vrot.slane %v5252_v23, 5  ;;  %v2052_v32 = vrot.slane %v2050_v13, 4 }
 0x156   : > { %v2048_v25 = vrot.slane %v2046_v22, 5  ;;  %v6327_v23 = vld [vmem:[#allocation2 + $0x40] sm:$0xf0] }
 0x157   : > { %v4403_v9 = vpop.f32.mrf.mxu2  ;;  %v1713_v17 = vsel %vm6824_vm5, %v5294_v3, %v1712_v30 }
 0x158   : > { %v4404_v56 = vadd.f32 %v4403_v9, %v4315_v62  ;;  %v4492_v39 = vpop.f32.mrf.mxu3  ;;  %v2037_v62 = vshrl.u32 %v5346_v61, 16  ;;  %v6321_v61 = vld [vmem:[#allocation2 + $0x14] sm:$0xf]  ;;  %1844 = vst [vmem:[#allocation2 + $0xa4] sm:$0xf] %v1713_v17  ;;  %v2053_v22 = vor.u32 %v2052_v32, %v2048_v25 }
 0x159   : > { %v4317_v2 = vpop.f32.mrf.mxu1  ;;  %v5350_v17 = vld [vmem:[%s6663_s25 + $0x40] sm:$0xf] }
 0x15a   : > { %v4493_v52 = vadd.f32 %v4492_v39, %v4404_v56  ;;  %v4318_v8 = vadd.f32 %v4317_v2, %v7183_v14  ;;  %v2039_v48 = vrot.slane %v2037_v62, 4  ;;  %v5348_v14 = vld [vmem:[%s6663_s25 + $0x38] sm:$0x1]  ;;  %v5395_v56 = vld [vmem:[%s6663_s25 + $0x34] sm:$0xf]  ;;  %v2054_v6 = vrot.slane %v2053_v22, 4 }
 0x15b   : > { %v4584_v35 = vpop.f32.mrf.mxu0  ;;  %v2056_v9 = vshll.u32 %v5348_v14, 16  ;;  %v5312_v2 = vld [vmem:[%s6663_s25 + $0x30] sm:$0xf]  ;;  %v2074_v22 = vshrl.u32 %v5350_v17, 16 }
 0x15c   : > { %4356 = vmatmul.bf16.gmra.mxu1 %v5999_v5  ;;  %4445 = vmatmul.bf16.gmra.mxu2 %v6003_v50  ;;  %v7512_v7 = vadd.f32 %v4581_v41, %v4493_v52  ;;  %v2043_v60 = vor.u32 %v2042_v27, %v2039_v48  ;;  %v1714_v41 = vrot.slane %v1712_v30, 4  ;;  %v5478_v52 = vld [vmem:[#allocation2 + $0x18] sm:$0xf]  ;;  %v6322_v27 = vld [vmem:[#allocation2 + $0x1c] sm:$0xf]  ;;  %v2548_v30 = vrot.slane %v5395_v56, 5 }
 0x15d   : > { %4534 = vmatmul.bf16.gmra.mxu3 %v6007_v31  ;;  %v5313_v31 = vld [vmem:[%s6663_s25 + $0x34] sm:$0xf]  ;;  %v5396_v48 = vld [vmem:[%s6663_s25 + $0x38] sm:$0x1]  ;;  %1912 = vst [vmem:[#allocation2 + $0xa8] sm:$0xf] %v5312_v2  ;;  %v5487_v56 = vor.u32 %v6327_v23, %v5486_v26 }
 0x15e   : > { %4623 = vmatmul.bf16.gmra.mxu0 %v6011_v36  ;;  %v2044_v40 = vrot.slane %v2043_v60, 4  ;;  %v5394_v36 = vld [vmem:[%s6663_s25 + $0x30] sm:$0xe]  ;;  %v1716_v62 = vsel %vm6824_vm5, %v1714_v41, %v1715_v47  ;;  %v2551_v14 = vrot.slane %v5396_v48, 5  ;;  %1913 = vst [vmem:[#allocation2 + $0xcc] sm:$0xf] %v5313_v31 }
 0x15f   : > { %v4406_v46 = vpop.f32.mrf.mxu2  ;;  %1845 = vst [vmem:[#allocation2 + $0xc8] sm:$0xf] %v1716_v62  ;;  %v5438_v13 = vrot.slane %v5394_v36, 9  ;;  %v5253_v26 = vld [vmem:[%s6663_s25 + $0x30] sm:$0xe] }
 0x160   : > { %v4407_v33 = vadd.f32 %v4406_v46, %v4318_v8  ;;  %v4495_v19 = vpop.f32.mrf.mxu3  ;;  %v6326_v8 = vld [vmem:[#allocation2 + $0x38] sm:$0xf0]  ;;  %v2049_v38 = vsel %vm6810_vm3, %v2044_v40, %v2048_v25  ;;  %v5480_v46 = vld [vmem:[#allocation2 + $0x3c] sm:$0xf0]  ;;  %v2550_v25 = vrot.slane %v2548_v30, 4 }
 0x161   : > { %v4319_v15 = vpop.f32.mrf.mxu1  ;;  %2408 = vst [vmem:[#allocation2 + $0xac] sm:$0xf] %v2049_v38  ;;  %v5479_v47 = vor.u32 %v6326_v8, %v5478_v52  ;;  %v5254_v38 = vld [vmem:[%s6663_s25 + $0x34] sm:$0xf] }
 0x162   : > { %v4496_v39 = vadd.f32 %v4495_v19, %v4407_v33  ;;  %v4320_v5 = vadd.f32 %v4319_v15, %v7205_v12  ;;  %v2058_v12 = vrot.slane %v2056_v9, 5  ;;  %v2549_v33 = vsel %vm6824_vm5, %v5438_v13, %v2548_v30  ;;  %v5255_v13 = vld [vmem:[%s6663_s25 + $0x38] sm:$0x1] }
 0x163   : > { %v4586_v50 = vpop.f32.mrf.mxu0  ;;  %v2552_v40 = vsel %vm6824_vm5, %v2550_v25, %v2551_v14  ;;  %v5483_v9 = vor.u32 %v6322_v27, %v5480_v46  ;;  %2680 = vst [vmem:[#allocation2 + $0xb0] sm:$0xf] %v2549_v33  ;;  %v1722_v33 = vrot.slane %v5255_v13, 5  ;;  %v6336_v13 = vld [vmem:[#allocation2 + $0x88] sm:$0xf0] }
 0x164   : > { %v7530_v60 = vadd.f32 %v4584_v35, %v4496_v39  ;;  %v2059_v3 = vsel %vm6810_vm3, %v2054_v6, %v2058_v12  ;;  %v5475_v35 = vor.u32 %v6321_v61, %v5472_v29  ;;  %v5349_v39 = vld [vmem:[%s6663_s25 + $0x3c] sm:$0xf]  ;;  %2681 = vst [vmem:[#allocation2 + $0xd4] sm:$0xf] %v2552_v40  ;;  %v2070_v29 = vshll.u32 %v5350_v17, 16 }
 0x165   : > { %2409 = vst [vmem:[#allocation2 + $0xd0] sm:$0xf] %v2059_v3  ;;  %v2064_v61 = vshll.u32 %v5349_v39, 16  ;;  %v1719_v12 = vrot.slane %v5254_v38, 5  ;;  %v5295_v6 = vrot.slane %v5253_v26, 9 }
 0x166   : > { %v2072_v30 = vrot.slane %v2070_v29, 5  ;;  %v5508_v17 = vld [vmem:[#allocation2 + $0x7c] sm:$0xf0]  ;;  %v5516_v38 = vld [vmem:[#allocation2 + $0x84] sm:$0xf0] }
 0x167   : > { %v4408_v19 = vpop.f32.mrf.mxu2  ;;  %v2066_v8 = vrot.slane %v2064_v61, 5  ;;  %v1720_v40 = vsel %vm6824_vm5, %v5295_v6, %v1719_v12 }
 0x168   : > { %v4409_v41 = vadd.f32 %v4408_v19, %v4320_v5  ;;  %v4497_v15 = vpop.f32.mrf.mxu3  ;;  %v2061_v5 = vshrl.u32 %v5349_v39, 16  ;;  %v2076_v19 = vrot.slane %v2074_v22, 4  ;;  %v6330_v39 = vld [vmem:[#allocation2 + $0x5c] sm:$0xf]  ;;  %1846 = vst [vmem:[#allocation2 + $0xec] sm:$0xf] %v1720_v40 }
 0x169   : > { %v4322_v32 = vpop.f32.mrf.mxu1  ;;  %v5353_v40 = vld [vmem:[%s6663_s25 + $0x4c] sm:$0xf] }
 0x16a   : > { %v4498_v2 = vadd.f32 %v4497_v15, %v4409_v41  ;;  %v4323_v31 = vadd.f32 %v4322_v32, %v7042_v58  ;;  %v2063_v52 = vrot.slane %v2061_v5, 4  ;;  %v5351_v58 = vld [vmem:[%s6663_s25 + $0x44] sm:$0x1]  ;;  %v5398_v41 = vld [vmem:[%s6663_s25 + $0x40] sm:$0xf]  ;;  %v2077_v29 = vor.u32 %v2076_v19, %v2072_v30 }
 0x16b   : > { %v4589_v36 = vpop.f32.mrf.mxu0  ;;  %v2080_v3 = vshll.u32 %v5351_v58, 16  ;;  %v5314_v32 = vld [vmem:[%s6663_s25 + $0x3c] sm:$0xf] }
 0x16c   : > { %4637 = vmatmul.bf16.vlgmr.msra.gmra.mxu1 %v5475_v35  ;;  %4726 = vmatmul.bf16.vlgmr.msra.gmra.mxu2 %v5479_v47  ;;  %v7541_v62 = vadd.f32 %v4586_v50, %v4498_v2  ;;  %v2067_v48 = vor.u32 %v2066_v8, %v2063_v52  ;;  %v1721_v50 = vrot.slane %v1719_v12, 4  ;;  %v5514_v2 = vld [vmem:[#allocation2 + $0x60] sm:$0xf]  ;;  %v5399_v52 = vld [vmem:[%s6663_s25 + $0x44] sm:$0x1]  ;;  %v2555_v12 = vrot.slane %v5398_v41, 5 }
 0x16d   : > { %4815 = vmatmul.bf16.vlgmr.msra.gmra.mxu3 %v5483_v9  ;;  %v5315_v9 = vld [vmem:[%s6663_s25 + $0x40] sm:$0xf]  ;;  %v6331_v8 = vld [vmem:[#allocation2 + $0x64] sm:$0xf]  ;;  %v2558_v58 = vrot.slane %v5399_v52, 5  ;;  %v2078_v26 = vrot.slane %v2077_v29, 4 }
 0x16e   : > { %4904 = vmatmul.bf16.vlgmr.msra.gmra.mxu0 %v5487_v56  ;;  %v2068_v25 = vrot.slane %v2067_v48, 4  ;;  %v5397_v56 = vld [vmem:[%s6663_s25 + $0x3c] sm:$0xe]  ;;  %v1723_v5 = vsel %vm6824_vm5, %v1721_v50, %v1722_v33  ;;  %1914 = vst [vmem:[#allocation2 + $0xf0] sm:$0xf] %v5314_v32  ;;  %v2098_v29 = vshrl.u32 %v5353_v40, 16 }
 0x16f   : > { %v4411_v27 = vpop.f32.mrf.mxu2  ;;  %1847 = vst [vmem:[#allocation2 + $0x110] sm:$0xf] %v1723_v5  ;;  %v5439_v22 = vrot.slane %v5397_v56, 9 }
 0x170   : > { %v4412_v14 = vadd.f32 %v4411_v27, %v4323_v31  ;;  %v4500_v46 = vpop.f32.mrf.mxu3  ;;  %v6335_v31 = vld [vmem:[#allocation2 + $0x80] sm:$0xf0]  ;;  %v2073_v61 = vsel %vm6810_vm3, %v2068_v25, %v2072_v30  ;;  %v5522_v27 = vld [vmem:[#allocation2 + $0x68] sm:$0xf]  ;;  %1915 = vst [vmem:[#allocation2 + $0x114] sm:$0xf] %v5315_v9 }
 0x171   : > { %v4324_v23 = vpop.f32.mrf.mxu1  ;;  %v2557_v30 = vrot.slane %v2555_v12, 4  ;;  %2410 = vst [vmem:[#allocation2 + $0xf4] sm:$0xf] %v2073_v61  ;;  %v5515_v33 = vor.u32 %v6335_v31, %v5514_v2  ;;  %v5523_v41 = vor.u32 %v6336_v13, %v5522_v27  ;;  %v5257_v61 = vld [vmem:[%s6663_s25 + $0x40] sm:$0xf] }
 0x172   : > { %v4501_v15 = vadd.f32 %v4500_v46, %v4412_v14  ;;  %v4325_v35 = vadd.f32 %v4324_v23, %v7074_v43  ;;  %v2082_v43 = vrot.slane %v2080_v3, 5  ;;  %v2556_v14 = vsel %vm6824_vm5, %v5439_v22, %v2555_v12  ;;  %v5258_v22 = vld [vmem:[%s6663_s25 + $0x44] sm:$0x1] }
 0x173   : > { %v4591_v47 = vpop.f32.mrf.mxu0  ;;  %v2559_v25 = vsel %vm6824_vm5, %v2557_v30, %v2558_v58  ;;  %v5519_v3 = vor.u32 %v6331_v8, %v5516_v38  ;;  %2682 = vst [vmem:[#allocation2 + $0xf8] sm:$0xf] %v2556_v14  ;;  %v5256_v38 = vld [vmem:[%s6663_s25 + $0x3c] sm:$0xe]  ;;  %v1729_v14 = vrot.slane %v5258_v22, 5 }
 0x174   : > { %v7559_v48 = vadd.f32 %v4589_v36, %v4501_v15  ;;  %v2083_v6 = vsel %vm6810_vm3, %v2078_v26, %v2082_v43  ;;  %v5511_v36 = vor.u32 %v6330_v39, %v5508_v17  ;;  %v5352_v15 = vld [vmem:[%s6663_s25 + $0x48] sm:$0xf]  ;;  %2683 = vst [vmem:[#allocation2 + $0x11c] sm:$0xf] %v2559_v25  ;;  %v2094_v17 = vshll.u32 %v5353_v40, 16 }
 0x175   : > { %2411 = vst [vmem:[#allocation2 + $0x118] sm:$0xf] %v2083_v6  ;;  %v2088_v39 = vshll.u32 %v5352_v15, 16  ;;  %v1726_v43 = vrot.slane %v5257_v61, 5  ;;  %v5296_v26 = vrot.slane %v5256_v38, 9 }
 0x176   : > { %v2096_v12 = vrot.slane %v2094_v17, 5  ;;  %v5544_v40 = vld [vmem:[#allocation2 + $0xc4] sm:$0xf0]  ;;  %v5552_v61 = vld [vmem:[#allocation2 + $0xcc] sm:$0xf0] }
 0x177   : > { %v4413_v46 = vpop.f32.mrf.mxu2  ;;  %v2090_v31 = vrot.slane %v2088_v39, 5  ;;  %v1727_v25 = vsel %vm6824_vm5, %v5296_v26, %v1726_v43  ;;  %v6345_v22 = vld [vmem:[#allocation2 + $0xd0] sm:$0xf0] }
 0x178   : > { %v4414_v50 = vadd.f32 %v4413_v46, %v4325_v35  ;;  %v4502_v23 = vpop.f32.mrf.mxu3  ;;  %v2085_v35 = vshrl.u32 %v5352_v15, 16  ;;  %v2100_v46 = vrot.slane %v2098_v29, 4  ;;  %v6339_v15 = vld [vmem:[#allocation2 + $0xa4] sm:$0xf]  ;;  %1848 = vst [vmem:[#allocation2 + $0x134] sm:$0xf] %v1727_v25 }
 0x179   : > { %v4327_v19 = vpop.f32.mrf.mxu1  ;;  %v5356_v25 = vld [vmem:[%s6663_s25 + $0x58] sm:$0xf] }
 0x17a   : > { %v4503_v32 = vadd.f32 %v4502_v23, %v4414_v50  ;;  %v4328_v9 = vadd.f32 %v4327_v19, %v7093_v20  ;;  %v2087_v2 = vrot.slane %v2085_v35, 4  ;;  %v5354_v20 = vld [vmem:[%s6663_s25 + $0x50] sm:$0x1]  ;;  %v5401_v50 = vld [vmem:[%s6663_s25 + $0x4c] sm:$0xf]  ;;  %v2101_v17 = vor.u32 %v2100_v46, %v2096_v12 }
 0x17b   : > { %v4594_v56 = vpop.f32.mrf.mxu0  ;;  %v2104_v6 = vshll.u32 %v5354_v20, 16  ;;  %v5316_v19 = vld [vmem:[%s6663_s25 + $0x48] sm:$0xf] }
 0x17c   : > { %4642 = vmatmul.bf16.gmra.mxu1 %v5511_v36  ;;  %4731 = vmatmul.bf16.gmra.mxu2 %v5515_v33  ;;  %v7570_v5 = vadd.f32 %v4591_v47, %v4503_v32  ;;  %v2091_v52 = vor.u32 %v2090_v31, %v2087_v2  ;;  %v1728_v47 = vrot.slane %v1726_v43, 4  ;;  %v5550_v32 = vld [vmem:[#allocation2 + $0xa8] sm:$0xf]  ;;  %v5402_v2 = vld [vmem:[%s6663_s25 + $0x50] sm:$0x1]  ;;  %v2562_v43 = vrot.slane %v5401_v50, 5 }
 0x17d   : > { %4820 = vmatmul.bf16.gmra.mxu3 %v5519_v3  ;;  %v5317_v3 = vld [vmem:[%s6663_s25 + $0x4c] sm:$0xf]  ;;  %v2565_v20 = vrot.slane %v5402_v2, 5  ;;  %1916 = vst [vmem:[#allocation2 + $0x138] sm:$0xf] %v5316_v19  ;;  %v2102_v38 = vrot.slane %v2101_v17, 4 }
 0x17e   : > { %4909 = vmatmul.bf16.gmra.mxu0 %v5523_v41  ;;  %v2092_v30 = vrot.slane %v2091_v52, 4  ;;  %v5400_v41 = vld [vmem:[%s6663_s25 + $0x48] sm:$0xe]  ;;  %v1730_v35 = vsel %vm6824_vm5, %v1728_v47, %v1729_v14  ;;  %v6340_v31 = vld [vmem:[#allocation2 + $0xac] sm:$0xf]  ;;  %v2122_v17 = vshrl.u32 %v5356_v25, 16 }
 0x17f   : > { %v4416_v8 = vpop.f32.mrf.mxu2  ;;  %1849 = vst [vmem:[#allocation2 + $0x158] sm:$0xf] %v1730_v35  ;;  %v5440_v29 = vrot.slane %v5400_v41, 9 }
 0x180   : > { %v4417_v58 = vadd.f32 %v4416_v8, %v4328_v9  ;;  %v4505_v27 = vpop.f32.mrf.mxu3  ;;  %v6344_v9 = vld [vmem:[#allocation2 + $0xc8] sm:$0xf0]  ;;  %v2097_v39 = vsel %vm6810_vm3, %v2092_v30, %v2096_v12  ;;  %v5558_v8 = vld [vmem:[#allocation2 + $0xb0] sm:$0xf]  ;;  %1917 = vst [vmem:[#allocation2 + $0x15c] sm:$0xf] %v5317_v3 }
 0x181   : > { %v4329_v13 = vpop.f32.mrf.mxu1  ;;  %v2564_v12 = vrot.slane %v2562_v43, 4  ;;  %2412 = vst [vmem:[#allocation2 + $0x13c] sm:$0xf] %v2097_v39  ;;  %v5551_v14 = vor.u32 %v6344_v9, %v5550_v32  ;;  %v5559_v50 = vor.u32 %v6345_v22, %v5558_v8  ;;  %v5260_v39 = vld [vmem:[%s6663_s25 + $0x4c] sm:$0xf] }
 0x182   : > { %v4506_v23 = vadd.f32 %v4505_v27, %v4417_v58  ;;  %v4330_v36 = vadd.f32 %v4329_v13, %v7119_v10  ;;  %v2106_v10 = vrot.slane %v2104_v6, 5  ;;  %v2563_v58 = vsel %vm6824_vm5, %v5440_v29, %v2562_v43  ;;  %v5261_v29 = vld [vmem:[%s6663_s25 + $0x50] sm:$0x1] }
 0x183   : > { %v4596_v33 = vpop.f32.mrf.mxu0  ;;  %v2566_v30 = vsel %vm6824_vm5, %v2564_v12, %v2565_v20  ;;  %v5555_v6 = vor.u32 %v6340_v31, %v5552_v61  ;;  %2684 = vst [vmem:[#allocation2 + $0x140] sm:$0xf] %v2563_v58  ;;  %v5259_v61 = vld [vmem:[%s6663_s25 + $0x48] sm:$0xe]  ;;  %v1736_v58 = vrot.slane %v5261_v29, 5 }
 0x184   : > { %v7588_v52 = vadd.f32 %v4594_v56, %v4506_v23  ;;  %v2107_v26 = vsel %vm6810_vm3, %v2102_v38, %v2106_v10  ;;  %v5547_v56 = vor.u32 %v6339_v15, %v5544_v40  ;;  %v5355_v23 = vld [vmem:[%s6663_s25 + $0x54] sm:$0xf]  ;;  %2685 = vst [vmem:[#allocation2 + $0x164] sm:$0xf] %v2566_v30  ;;  %v2118_v40 = vshll.u32 %v5356_v25, 16 }
 0x185   : > { %2413 = vst [vmem:[#allocation2 + $0x160] sm:$0xf] %v2107_v26  ;;  %v2112_v15 = vshll.u32 %v5355_v23, 16  ;;  %v1733_v10 = vrot.slane %v5260_v39, 5  ;;  %v5297_v38 = vrot.slane %v5259_v61, 9 }
 0x186   : > { %v2120_v43 = vrot.slane %v2118_v40, 5  ;;  %v5580_v25 = vld [vmem:[#allocation2 + $0x10c] sm:$0xf0]  ;;  %v5588_v39 = vld [vmem:[#allocation2 + $0x114] sm:$0xf0] }
 0x187   : > { %v4418_v27 = vpop.f32.mrf.mxu2  ;;  %v2114_v9 = vrot.slane %v2112_v15, 5  ;;  %v1734_v30 = vsel %vm6824_vm5, %v5297_v38, %v1733_v10  ;;  %v6354_v29 = vld [vmem:[#allocation2 + $0x118] sm:$0xf0] }
 0x188   : > { %v4419_v47 = vadd.f32 %v4418_v27, %v4330_v36  ;;  %v4507_v13 = vpop.f32.mrf.mxu3  ;;  %v2109_v36 = vshrl.u32 %v5355_v23, 16  ;;  %v2124_v27 = vrot.slane %v2122_v17, 4  ;;  %v6348_v23 = vld [vmem:[#allocation2 + $0xec] sm:$0xf]  ;;  %1850 = vst [vmem:[#allocation2 + $0x17c] sm:$0xf] %v1734_v30 }
 0x189   : > { %v4332_v46 = vpop.f32.mrf.mxu1  ;;  %v5359_v30 = vld [vmem:[%s6663_s25 + $0x64] sm:$0xf] }
 0x18a   : > { %v4508_v19 = vadd.f32 %v4507_v13, %v4419_v47  ;;  %v4333_v3 = vadd.f32 %v4332_v46, %v7143_v54  ;;  %v2111_v32 = vrot.slane %v2109_v36, 4  ;;  %v5357_v54 = vld [vmem:[%s6663_s25 + $0x5c] sm:$0x1]  ;;  %v5404_v47 = vld [vmem:[%s6663_s25 + $0x58] sm:$0xf]  ;;  %v2125_v40 = vor.u32 %v2124_v27, %v2120_v43 }
 0x18b   : > { %v4599_v41 = vpop.f32.mrf.mxu0  ;;  %v2128_v26 = vshll.u32 %v5357_v54, 16  ;;  %v5318_v46 = vld [vmem:[%s6663_s25 + $0x54] sm:$0xf] }
 0x18c   : > { %4647 = vmatmul.bf16.gmra.mxu1 %v5547_v56  ;;  %4736 = vmatmul.bf16.gmra.mxu2 %v5551_v14  ;;  %v7599_v35 = vadd.f32 %v4596_v33, %v4508_v19  ;;  %v2115_v2 = vor.u32 %v2114_v9, %v2111_v32  ;;  %v1735_v33 = vrot.slane %v1733_v10, 4  ;;  %v5586_v19 = vld [vmem:[#allocation2 + $0xf0] sm:$0xf]  ;;  %v5405_v32 = vld [vmem:[%s6663_s25 + $0x5c] sm:$0x1]  ;;  %v2569_v10 = vrot.slane %v5404_v47, 5 }
 0x18d   : > { %4825 = vmatmul.bf16.gmra.mxu3 %v5555_v6  ;;  %v5319_v6 = vld [vmem:[%s6663_s25 + $0x58] sm:$0xf]  ;;  %v6349_v9 = vld [vmem:[#allocation2 + $0xf4] sm:$0xf]  ;;  %v2572_v54 = vrot.slane %v5405_v32, 5  ;;  %v2126_v61 = vrot.slane %v2125_v40, 4 }
 0x18e   : > { %4914 = vmatmul.bf16.gmra.mxu0 %v5559_v50  ;;  %v2116_v12 = vrot.slane %v2115_v2, 4  ;;  %v5403_v50 = vld [vmem:[%s6663_s25 + $0x54] sm:$0xe]  ;;  %v1737_v36 = vsel %vm6824_vm5, %v1735_v33, %v1736_v58  ;;  %1918 = vst [vmem:[#allocation2 + $0x180] sm:$0xf] %v5318_v46  ;;  %v2146_v40 = vshrl.u32 %v5359_v30, 16 }
 0x18f   : > { %v4421_v31 = vpop.f32.mrf.mxu2  ;;  %1851 = vst [vmem:[#allocation2 + $0x1a0] sm:$0xf] %v1737_v36  ;;  %v5441_v17 = vrot.slane %v5403_v50, 9 }
 0x190   : > { %v4422_v20 = vadd.f32 %v4421_v31, %v4333_v3  ;;  %v4510_v8 = vpop.f32.mrf.mxu3  ;;  %v6353_v3 = vld [vmem:[#allocation2 + $0x110] sm:$0xf0]  ;;  %v2121_v15 = vsel %vm6810_vm3, %v2116_v12, %v2120_v43  ;;  %v5594_v31 = vld [vmem:[#allocation2 + $0xf8] sm:$0xf]  ;;  %1919 = vst [vmem:[#allocation2 + $0x1a4] sm:$0xf] %v5319_v6 }
 0x191   : > { %v4334_v22 = vpop.f32.mrf.mxu1  ;;  %v2571_v43 = vrot.slane %v2569_v10, 4  ;;  %2414 = vst [vmem:[#allocation2 + $0x184] sm:$0xf] %v2121_v15  ;;  %v5587_v58 = vor.u32 %v6353_v3, %v5586_v19  ;;  %v5595_v47 = vor.u32 %v6354_v29, %v5594_v31  ;;  %v5263_v15 = vld [vmem:[%s6663_s25 + $0x58] sm:$0xf] }
 0x192   : > { %v4511_v13 = vadd.f32 %v4510_v8, %v4422_v20  ;;  %v4335_v56 = vadd.f32 %v4334_v22, %v7176_v57  ;;  %v2130_v57 = vrot.slane %v2128_v26, 5  ;;  %v2570_v20 = vsel %vm6824_vm5, %v5441_v17, %v2569_v10  ;;  %v5264_v17 = vld [vmem:[%s6663_s25 + $0x5c] sm:$0x1] }
 0x193   : > { %v4601_v14 = vpop.f32.mrf.mxu0  ;;  %v2573_v12 = vsel %vm6824_vm5, %v2571_v43, %v2572_v54  ;;  %v5591_v26 = vor.u32 %v6349_v9, %v5588_v39  ;;  %2686 = vst [vmem:[#allocation2 + $0x188] sm:$0xf] %v2570_v20  ;;  %v5262_v39 = vld [vmem:[%s6663_s25 + $0x54] sm:$0xe]  ;;  %v1743_v20 = vrot.slane %v5264_v17, 5 }
 0x194   : > { %v7617_v2 = vadd.f32 %v4599_v41, %v4511_v13  ;;  %v2131_v38 = vsel %vm6810_vm3, %v2126_v61, %v2130_v57  ;;  %v5583_v41 = vor.u32 %v6348_v23, %v5580_v25  ;;  %v5358_v13 = vld [vmem:[%s6663_s25 + $0x60] sm:$0xf]  ;;  %2687 = vst [vmem:[#allocation2 + $0x1ac] sm:$0xf] %v2573_v12  ;;  %v2142_v25 = vshll.u32 %v5359_v30, 16 }
 0x195   : > { %2415 = vst [vmem:[#allocation2 + $0x1a8] sm:$0xf] %v2131_v38  ;;  %v2136_v23 = vshll.u32 %v5358_v13, 16  ;;  %v1740_v57 = vrot.slane %v5263_v15, 5  ;;  %v5298_v61 = vrot.slane %v5262_v39, 9 }
 0x196   : > { %v2144_v10 = vrot.slane %v2142_v25, 5  ;;  %v5616_v30 = vld [vmem:[#allocation2 + $0x154] sm:$0xf0]  ;;  %v5624_v15 = vld [vmem:[#allocation2 + $0x15c] sm:$0xf0] }
 0x197   : > { %v4423_v8 = vpop.f32.mrf.mxu2  ;;  %v2138_v3 = vrot.slane %v2136_v23, 5  ;;  %v1741_v12 = vsel %vm6824_vm5, %v5298_v61, %v1740_v57  ;;  %v6363_v17 = vld [vmem:[#allocation2 + $0x160] sm:$0xf0] }
 0x198   : > { %v4424_v33 = vadd.f32 %v4423_v8, %v4335_v56  ;;  %v4512_v22 = vpop.f32.mrf.mxu3  ;;  %v2133_v56 = vshrl.u32 %v5358_v13, 16  ;;  %v2148_v8 = vrot.slane %v2146_v40, 4  ;;  %v6357_v13 = vld [vmem:[#allocation2 + $0x134] sm:$0xf]  ;;  %1852 = vst [vmem:[#allocation2 + $0x1c4] sm:$0xf] %v1741_v12 }
 0x199   : > { %v4337_v27 = vpop.f32.mrf.mxu1  ;;  %v5362_v12 = vld [vmem:[%s6663_s25 + $0x70] sm:$0xf] }
 0x19a   : > { %v4513_v46 = vadd.f32 %v4512_v22, %v4424_v33  ;;  %v4338_v6 = vadd.f32 %v4337_v27, %v7197_v51  ;;  %v2135_v19 = vrot.slane %v2133_v56, 4  ;;  %v5360_v51 = vld [vmem:[%s6663_s25 + $0x68] sm:$0x1]  ;;  %v5407_v33 = vld [vmem:[%s6663_s25 + $0x64] sm:$0xf]  ;;  %v2149_v25 = vor.u32 %v2148_v8, %v2144_v10 }
 0x19b   : > { %v4604_v50 = vpop.f32.mrf.mxu0  ;;  %v2152_v38 = vshll.u32 %v5360_v51, 16  ;;  %v5320_v27 = vld [vmem:[%s6663_s25 + $0x60] sm:$0xf] }
 0x19c   : > { %4652 = vmatmul.bf16.gmra.mxu1 %v5583_v41  ;;  %4741 = vmatmul.bf16.gmra.mxu2 %v5587_v58  ;;  %v7628_v36 = vadd.f32 %v4601_v14, %v4513_v46  ;;  %v2139_v32 = vor.u32 %v2138_v3, %v2135_v19  ;;  %v1742_v14 = vrot.slane %v1740_v57, 4  ;;  %v5622_v46 = vld [vmem:[#allocation2 + $0x138] sm:$0xf]  ;;  %v5408_v19 = vld [vmem:[%s6663_s25 + $0x68] sm:$0x1]  ;;  %v2576_v57 = vrot.slane %v5407_v33, 5 }
 0x19d   : > { %4830 = vmatmul.bf16.gmra.mxu3 %v5591_v26  ;;  %v5321_v26 = vld [vmem:[%s6663_s25 + $0x64] sm:$0xf]  ;;  %v6358_v3 = vld [vmem:[#allocation2 + $0x13c] sm:$0xf]  ;;  %v2579_v51 = vrot.slane %v5408_v19, 5  ;;  %v2150_v39 = vrot.slane %v2149_v25, 4 }
 0x19e   : > { %4919 = vmatmul.bf16.gmra.mxu0 %v5595_v47  ;;  %v2140_v43 = vrot.slane %v2139_v32, 4  ;;  %v5406_v47 = vld [vmem:[%s6663_s25 + $0x60] sm:$0xe]  ;;  %v1744_v56 = vsel %vm6824_vm5, %v1742_v14, %v1743_v20  ;;  %1920 = vst [vmem:[#allocation2 + $0x1c8] sm:$0xf] %v5320_v27  ;;  %v2170_v25 = vshrl.u32 %v5362_v12, 16 }
 0x19f   : > { %v4426_v9 = vpop.f32.mrf.mxu2  ;;  %1853 = vst [vmem:[#allocation2 + $0x1e8] sm:$0xf] %v1744_v56  ;;  %v5442_v40 = vrot.slane %v5406_v47, 9 }
 0x1a0   : > { %v4427_v54 = vadd.f32 %v4426_v9, %v4338_v6  ;;  %v4515_v31 = vpop.f32.mrf.mxu3  ;;  %v6362_v6 = vld [vmem:[#allocation2 + $0x158] sm:$0xf0]  ;;  %v2145_v23 = vsel %vm6810_vm3, %v2140_v43, %v2144_v10  ;;  %v5630_v9 = vld [vmem:[#allocation2 + $0x140] sm:$0xf]  ;;  %1921 = vst [vmem:[#allocation2 + $0x1ec] sm:$0xf] %v5321_v26 }
 0x1a1   : > { %v4339_v29 = vpop.f32.mrf.mxu1  ;;  %v2578_v10 = vrot.slane %v2576_v57, 4  ;;  %2416 = vst [vmem:[#allocation2 + $0x1cc] sm:$0xf] %v2145_v23  ;;  %v5623_v20 = vor.u32 %v6362_v6, %v5622_v46  ;;  %v5631_v33 = vor.u32 %v6363_v17, %v5630_v9  ;;  %v5266_v23 = vld [vmem:[%s6663_s25 + $0x64] sm:$0xf] }
 0x1a2   : > { %v4516_v22 = vadd.f32 %v4515_v31, %v4427_v54  ;;  %v4340_v41 = vadd.f32 %v4339_v29, %v7223_v11  ;;  %v2154_v11 = vrot.slane %v2152_v38, 5  ;;  %v2577_v54 = vsel %vm6824_vm5, %v5442_v40, %v2576_v57  ;;  %v5267_v40 = vld [vmem:[%s6663_s25 + $0x68] sm:$0x1] }
 0x1a3   : > { %v4606_v58 = vpop.f32.mrf.mxu0  ;;  %v2580_v43 = vsel %vm6824_vm5, %v2578_v10, %v2579_v51  ;;  %v5627_v38 = vor.u32 %v6358_v3, %v5624_v15  ;;  %2688 = vst [vmem:[#allocation2 + $0x1d0] sm:$0xf] %v2577_v54  ;;  %v5265_v15 = vld [vmem:[%s6663_s25 + $0x60] sm:$0xe]  ;;  %v1750_v54 = vrot.slane %v5267_v40, 5 }
 0x1a4   : > { %v7646_v32 = vadd.f32 %v4604_v50, %v4516_v22  ;;  %v2155_v61 = vsel %vm6810_vm3, %v2150_v39, %v2154_v11  ;;  %v5619_v50 = vor.u32 %v6357_v13, %v5616_v30  ;;  %v5361_v22 = vld [vmem:[%s6663_s25 + $0x6c] sm:$0xf]  ;;  %2689 = vst [vmem:[#allocation2 + $0x1f4] sm:$0xf] %v2580_v43  ;;  %v2166_v30 = vshll.u32 %v5362_v12, 16 }
 0x1a5   : > { %2417 = vst [vmem:[#allocation2 + $0x1f0] sm:$0xf] %v2155_v61  ;;  %v2160_v13 = vshll.u32 %v5361_v22, 16  ;;  %v1747_v11 = vrot.slane %v5266_v23, 5  ;;  %v5299_v39 = vrot.slane %v5265_v15, 9 }
 0x1a6   : > { %v2168_v57 = vrot.slane %v2166_v30, 5  ;;  %v5652_v12 = vld [vmem:[#allocation2 + $0x19c] sm:$0xf0]  ;;  %v5660_v23 = vld [vmem:[#allocation2 + $0x1a4] sm:$0xf0] }
 0x1a7   : > { %v4428_v31 = vpop.f32.mrf.mxu2  ;;  %v2162_v6 = vrot.slane %v2160_v13, 5  ;;  %v1748_v43 = vsel %vm6824_vm5, %v5299_v39, %v1747_v11  ;;  %v6372_v40 = vld [vmem:[#allocation2 + $0x1a8] sm:$0xf0] }
 0x1a8   : > { %v4429_v14 = vadd.f32 %v4428_v31, %v4340_v41  ;;  %v4517_v29 = vpop.f32.mrf.mxu3  ;;  %v2157_v41 = vshrl.u32 %v5361_v22, 16  ;;  %v2172_v31 = vrot.slane %v2170_v25, 4  ;;  %v6366_v22 = vld [vmem:[#allocation2 + $0x17c] sm:$0xf]  ;;  %1854 = vst [vmem:[#allocation2 + $0x20c] sm:$0xf] %v1748_v43 }
 0x1a9   : > { %v4342_v8 = vpop.f32.mrf.mxu1  ;;  %v5365_v43 = vld [vmem:[%s6663_s25 + $0x7c] sm:$0xf] }
 0x1aa   : > { %v4518_v27 = vadd.f32 %v4517_v29, %v4429_v14  ;;  %v4343_v26 = vadd.f32 %v4342_v8, %v7047_v1  ;;  %v2159_v46 = vrot.slane %v2157_v41, 4  ;;  %v5363_v1 = vld [vmem:[%s6663_s25 + $0x74] sm:$0x1]  ;;  %v5410_v14 = vld [vmem:[%s6663_s25 + $0x70] sm:$0xf]  ;;  %v2173_v30 = vor.u32 %v2172_v31, %v2168_v57 }
 0x1ab   : > { %v4609_v47 = vpop.f32.mrf.mxu0  ;;  %v2176_v61 = vshll.u32 %v5363_v1, 16  ;;  %v5322_v8 = vld [vmem:[%s6663_s25 + $0x6c] sm:$0xf] }
 0x1ac   : > { %4657 = vmatmul.bf16.gmra.mxu1 %v5619_v50  ;;  %4746 = vmatmul.bf16.gmra.mxu2 %v5623_v20  ;;  %v7657_v56 = vadd.f32 %v4606_v58, %v4518_v27  ;;  %v2163_v19 = vor.u32 %v2162_v6, %v2159_v46  ;;  %v1749_v58 = vrot.slane %v1747_v11, 4  ;;  %v5658_v27 = vld [vmem:[#allocation2 + $0x180] sm:$0xf]  ;;  %v5411_v46 = vld [vmem:[%s6663_s25 + $0x74] sm:$0x1]  ;;  %v2583_v11 = vrot.slane %v5410_v14, 5 }
 0x1ad   : > { %4835 = vmatmul.bf16.gmra.mxu3 %v5627_v38  ;;  %v5323_v38 = vld [vmem:[%s6663_s25 + $0x70] sm:$0xf]  ;;  %v6367_v6 = vld [vmem:[#allocation2 + $0x184] sm:$0xf]  ;;  %v2586_v1 = vrot.slane %v5411_v46, 5  ;;  %v2174_v15 = vrot.slane %v2173_v30, 4 }
 0x1ae   : > { %4924 = vmatmul.bf16.gmra.mxu0 %v5631_v33  ;;  %v2164_v10 = vrot.slane %v2163_v19, 4  ;;  %v5409_v33 = vld [vmem:[%s6663_s25 + $0x6c] sm:$0xe]  ;;  %v1751_v41 = vsel %vm6824_vm5, %v1749_v58, %v1750_v54  ;;  %1922 = vst [vmem:[#allocation2 + $0x210] sm:$0xf] %v5322_v8  ;;  %v2194_v30 = vshrl.u32 %v5365_v43, 16 }
 0x1af   : > { %v4431_v3 = vpop.f32.mrf.mxu2  ;;  %1855 = vst [vmem:[#allocation2 + $0x230] sm:$0xf] %v1751_v41  ;;  %v5443_v25 = vrot.slane %v5409_v33, 9 }
 0x1b0   : > { %v4432_v51 = vadd.f32 %v4431_v3, %v4343_v26  ;;  %v4520_v9 = vpop.f32.mrf.mxu3  ;;  %v6371_v26 = vld [vmem:[#allocation2 + $0x1a0] sm:$0xf0]  ;;  %v2169_v13 = vsel %vm6810_vm3, %v2164_v10, %v2168_v57  ;;  %v5666_v3 = vld [vmem:[#allocation2 + $0x188] sm:$0xf]  ;;  %1923 = vst [vmem:[#allocation2 + $0x234] sm:$0xf] %v5323_v38 }
 0x1b1   : > { %v4344_v17 = vpop.f32.mrf.mxu1  ;;  %v2585_v57 = vrot.slane %v2583_v11, 4  ;;  %2418 = vst [vmem:[#allocation2 + $0x214] sm:$0xf] %v2169_v13  ;;  %v5659_v54 = vor.u32 %v6371_v26, %v5658_v27  ;;  %v5667_v14 = vor.u32 %v6372_v40, %v5666_v3  ;;  %v5269_v13 = vld [vmem:[%s6663_s25 + $0x70] sm:$0xf] }
 0x1b2   : > { %v4521_v29 = vadd.f32 %v4520_v9, %v4432_v51  ;;  %v4345_v50 = vadd.f32 %v4344_v17, %v7077_v49  ;;  %v2178_v49 = vrot.slane %v2176_v61, 5  ;;  %v2584_v51 = vsel %vm6824_vm5, %v5443_v25, %v2583_v11  ;;  %v5270_v25 = vld [vmem:[%s6663_s25 + $0x74] sm:$0x1] }
 0x1b3   : > { %v4611_v20 = vpop.f32.mrf.mxu0  ;;  %v2587_v10 = vsel %vm6824_vm5, %v2585_v57, %v2586_v1  ;;  %v5663_v61 = vor.u32 %v6367_v6, %v5660_v23  ;;  %2690 = vst [vmem:[#allocation2 + $0x218] sm:$0xf] %v2584_v51  ;;  %v5268_v23 = vld [vmem:[%s6663_s25 + $0x6c] sm:$0xe]  ;;  %v1757_v51 = vrot.slane %v5270_v25, 5 }
 0x1b4   : > { %v7675_v19 = vadd.f32 %v4609_v47, %v4521_v29  ;;  %v2179_v39 = vsel %vm6810_vm3, %v2174_v15, %v2178_v49  ;;  %v5655_v47 = vor.u32 %v6366_v22, %v5652_v12  ;;  %v5364_v29 = vld [vmem:[%s6663_s25 + $0x78] sm:$0xf]  ;;  %2691 = vst [vmem:[#allocation2 + $0x23c] sm:$0xf] %v2587_v10  ;;  %v2190_v12 = vshll.u32 %v5365_v43, 16 }
 0x1b5   : > { %2419 = vst [vmem:[#allocation2 + $0x238] sm:$0xf] %v2179_v39  ;;  %v2184_v22 = vshll.u32 %v5364_v29, 16  ;;  %v1754_v49 = vrot.slane %v5269_v13, 5  ;;  %v5300_v15 = vrot.slane %v5268_v23, 9 }
 0x1b6   : > { %v2192_v11 = vrot.slane %v2190_v12, 5  ;;  %v5688_v43 = vld [vmem:[#allocation2 + $0x1e4] sm:$0xf0]  ;;  %v5696_v13 = vld [vmem:[#allocation2 + $0x1ec] sm:$0xf0] }
 0x1b7   : > { %v4433_v9 = vpop.f32.mrf.mxu2  ;;  %v2186_v26 = vrot.slane %v2184_v22, 5  ;;  %v1755_v10 = vsel %vm6824_vm5, %v5300_v15, %v1754_v49  ;;  %v6381_v25 = vld [vmem:[#allocation2 + $0x1f0] sm:$0xf0] }
 0x1b8   : > { %v4434_v58 = vadd.f32 %v4433_v9, %v4345_v50  ;;  %v4522_v17 = vpop.f32.mrf.mxu3  ;;  %v2181_v50 = vshrl.u32 %v5364_v29, 16  ;;  %v2196_v9 = vrot.slane %v2194_v30, 4  ;;  %v6375_v29 = vld [vmem:[#allocation2 + $0x1c4] sm:$0xf]  ;;  %1856 = vst [vmem:[#allocation2 + $0x254] sm:$0xf] %v1755_v10 }
 0x1b9   : > { %v4347_v31 = vpop.f32.mrf.mxu1  ;;  %v5368_v10 = vld [vmem:[%s6663_s25 + $0x88] sm:$0xf] }
 0x1ba   : > { %v4523_v8 = vadd.f32 %v4522_v17, %v4434_v58  ;;  %v4348_v38 = vadd.f32 %v4347_v31, %v7097_v24  ;;  %v2183_v27 = vrot.slane %v2181_v50, 4  ;;  %v5366_v24 = vld [vmem:[%s6663_s25 + $0x80] sm:$0x1]  ;;  %v5413_v58 = vld [vmem:[%s6663_s25 + $0x7c] sm:$0xf]  ;;  %v2197_v12 = vor.u32 %v2196_v9, %v2192_v11 }
 0x1bb   : > { %v4614_v33 = vpop.f32.mrf.mxu0  ;;  %v2200_v39 = vshll.u32 %v5366_v24, 16  ;;  %v5324_v31 = vld [vmem:[%s6663_s25 + $0x78] sm:$0xf] }
 0x1bc   : > { %4662 = vmatmul.bf16.gmra.mxu1 %v5655_v47  ;;  %4751 = vmatmul.bf16.gmra.mxu2 %v5659_v54  ;;  %v7686_v41 = vadd.f32 %v4611_v20, %v4523_v8  ;;  %v2187_v46 = vor.u32 %v2186_v26, %v2183_v27  ;;  %v1756_v20 = vrot.slane %v1754_v49, 4  ;;  %v5694_v8 = vld [vmem:[#allocation2 + $0x1c8] sm:$0xf]  ;;  %v5414_v27 = vld [vmem:[%s6663_s25 + $0x80] sm:$0x1]  ;;  %v2590_v49 = vrot.slane %v5413_v58, 5 }
 0x1bd   : > { %4840 = vmatmul.bf16.gmra.mxu3 %v5663_v61  ;;  %v5325_v61 = vld [vmem:[%s6663_s25 + $0x7c] sm:$0xf]  ;;  %v6376_v26 = vld [vmem:[#allocation2 + $0x1cc] sm:$0xf]  ;;  %v2593_v24 = vrot.slane %v5414_v27, 5  ;;  %v2198_v23 = vrot.slane %v2197_v12, 4 }
 0x1be   : > { %4929 = vmatmul.bf16.gmra.mxu0 %v5667_v14  ;;  %v2188_v57 = vrot.slane %v2187_v46, 4  ;;  %v5412_v14 = vld [vmem:[%s6663_s25 + $0x78] sm:$0xe]  ;;  %v1758_v50 = vsel %vm6824_vm5, %v1756_v20, %v1757_v51  ;;  %1924 = vst [vmem:[#allocation2 + $0x258] sm:$0xf] %v5324_v31  ;;  %v2218_v12 = vshrl.u32 %v5368_v10, 16 }
 0x1bf   : > { %v4436_v6 = vpop.f32.mrf.mxu2  ;;  %1857 = vst [vmem:[#allocation2 + $0x278] sm:$0xf] %v1758_v50  ;;  %v5444_v30 = vrot.slane %v5412_v14, 9 }
 0x1c0   : > { %v4437_v1 = vadd.f32 %v4436_v6, %v4348_v38  ;;  %v4525_v3 = vpop.f32.mrf.mxu3  ;;  %v6380_v38 = vld [vmem:[#allocation2 + $0x1e8] sm:$0xf0]  ;;  %v2193_v22 = vsel %vm6810_vm3, %v2188_v57, %v2192_v11  ;;  %v5702_v6 = vld [vmem:[#allocation2 + $0x1d0] sm:$0xf]  ;;  %1925 = vst [vmem:[#allocation2 + $0x27c] sm:$0xf] %v5325_v61 }
 0x1c1   : > { %v4349_v40 = vpop.f32.mrf.mxu1  ;;  %v2592_v11 = vrot.slane %v2590_v49, 4  ;;  %2420 = vst [vmem:[#allocation2 + $0x25c] sm:$0xf] %v2193_v22  ;;  %v5695_v51 = vor.u32 %v6380_v38, %v5694_v8  ;;  %v5703_v58 = vor.u32 %v6381_v25, %v5702_v6  ;;  %v5272_v22 = vld [vmem:[%s6663_s25 + $0x7c] sm:$0xf] }
 0x1c2   : > { %v4526_v17 = vadd.f32 %v4525_v3, %v4437_v1  ;;  %v4350_v47 = vadd.f32 %v4349_v40, %v7122_v16  ;;  %v2202_v16 = vrot.slane %v2200_v39, 5  ;;  %v2591_v1 = vsel %vm6824_vm5, %v5444_v30, %v2590_v49  ;;  %v5273_v30 = vld [vmem:[%s6663_s25 + $0x80] sm:$0x1] }
 0x1c3   : > { %v4616_v54 = vpop.f32.mrf.mxu0  ;;  %v2594_v57 = vsel %vm6824_vm5, %v2592_v11, %v2593_v24  ;;  %v5699_v39 = vor.u32 %v6376_v26, %v5696_v13  ;;  %2692 = vst [vmem:[#allocation2 + $0x260] sm:$0xf] %v2591_v1  ;;  %v5271_v13 = vld [vmem:[%s6663_s25 + $0x78] sm:$0xe]  ;;  %v1764_v1 = vrot.slane %v5273_v30, 5 }
 0x1c4   : > { %v7704_v46 = vadd.f32 %v4614_v33, %v4526_v17  ;;  %v2203_v15 = vsel %vm6810_vm3, %v2198_v23, %v2202_v16  ;;  %v5691_v33 = vor.u32 %v6375_v29, %v5688_v43  ;;  %v5367_v17 = vld [vmem:[%s6663_s25 + $0x84] sm:$0xf]  ;;  %2693 = vst [vmem:[#allocation2 + $0x284] sm:$0xf] %v2594_v57  ;;  %v2214_v43 = vshll.u32 %v5368_v10, 16 }
 0x1c5   : > { %2421 = vst [vmem:[#allocation2 + $0x280] sm:$0xf] %v2203_v15  ;;  %v2208_v29 = vshll.u32 %v5367_v17, 16  ;;  %v1761_v16 = vrot.slane %v5272_v22, 5  ;;  %v5301_v23 = vrot.slane %v5271_v13, 9 }
 0x1c6   : > { %v2216_v49 = vrot.slane %v2214_v43, 5  ;;  %v6384_v10 = vld [vmem:[#allocation2 + $0x20c] sm:$0xf]  ;;  %v5738_v30 = vld [vmem:[#allocation2 + $0x218] sm:$0xf] }
 0x1c7   : > { %v4438_v3 = vpop.f32.mrf.mxu2  ;;  %v2210_v38 = vrot.slane %v2208_v29, 5  ;;  %v5417_v22 = vld [vmem:[%s6663_s25 + $0x8c] sm:$0x1] }
 0x1c8   : > { %v4439_v20 = vadd.f32 %v4438_v3, %v4350_v47  ;;  %v4527_v40 = vpop.f32.mrf.mxu3  ;;  %v2205_v47 = vshrl.u32 %v5367_v17, 16  ;;  %v2220_v3 = vrot.slane %v2218_v12, 4  ;;  %v5415_v17 = vld [vmem:[%s6663_s25 + $0x84] sm:$0xe]  ;;  %v6385_v12 = vld [vmem:[#allocation2 + $0x214] sm:$0xf] }
 0x1c9   : > { %v4352_v9 = vpop.f32.mrf.mxu1 }
 0x1ca   : > { %v4528_v31 = vadd.f32 %v4527_v40, %v4439_v20  ;;  %v4353_v61 = vadd.f32 %v4352_v9, %v7148_v63  ;;  %v2207_v8 = vrot.slane %v2205_v47, 4  ;;  %v5369_v63 = vld [vmem:[%s6663_s25 + $0x8c] sm:$0x1]  ;;  %v5416_v20 = vld [vmem:[%s6663_s25 + $0x88] sm:$0xf]  ;;  %v1762_v9 = vsel %vm6824_vm5, %v5301_v23, %v1761_v16 }
 0x1cb   : > { %v4619_v14 = vpop.f32.mrf.mxu0  ;;  %v2224_v15 = vshll.u32 %v5369_v63, 16  ;;  %v6389_v47 = vld [vmem:[#allocation2 + $0x230] sm:$0xf0]  ;;  %1858 = vst [vmem:[#allocation2 + $0x29c] sm:$0xf] %v1762_v9 }
 0x1cc   : > { %4667 = vmatmul.bf16.gmra.mxu1 %v5691_v33  ;;  %4756 = vmatmul.bf16.gmra.mxu2 %v5695_v51  ;;  %v7715_v50 = vadd.f32 %v4616_v54, %v4528_v31  ;;  %v2211_v27 = vor.u32 %v2210_v38, %v2207_v8  ;;  %v1763_v54 = vrot.slane %v1761_v16, 4  ;;  %v7981_v33 = vld [vmem:[#allocation3_spill] sm:$0xff]  ;;  %v5724_v31 = vld [vmem:[#allocation2 + $0x22c] sm:$0xf0]  ;;  %v2221_v8 = vor.u32 %v2220_v3, %v2216_v49  ;;  %v5732_v63 = vld [vmem:[#allocation2 + $0x234] sm:$0xf0] }
 0x1cd   : > { %4845 = vmatmul.bf16.gmra.mxu3 %v5699_v39  ;;  %v5326_v39 = vld [vmem:[%s6663_s25 + $0x84] sm:$0xf]  ;;  %v2226_v38 = vrot.slane %v2224_v15, 5  ;;  %v5445_v16 = vrot.slane %v5415_v17, 9  ;;  %v5370_v9 = vld [vmem:[%s6663_s25 + $0x90] sm:$0xf] }
 0x1ce   : > { %4934 = vmatmul.bf16.gmra.mxu0 %v5703_v58  ;;  %v2212_v11 = vrot.slane %v2211_v27, 4  ;;  %v5327_v58 = vld [vmem:[%s6663_s25 + $0x88] sm:$0xf]  ;;  %v1765_v29 = vsel %vm6824_vm5, %v1763_v54, %v1764_v1  ;;  %v2597_v27 = vrot.slane %v5416_v20, 5  ;;  %1926 = vst [vmem:[#allocation2 + $0x2a0] sm:$0xf] %v5326_v39 }
 0x1cf   : > { %v4441_v26 = vpop.f32.mrf.mxu2  ;;  %1859 = vst [vmem:[#allocation2 + $0x2c0] sm:$0xf] %v1765_v29  ;;  %v5371_v39 = vld [vmem:[%s6663_s25 + $0x94] sm:$0xf]  ;;  %v7982_v17 = vld [vmem:[#allocation4_spill] sm:$0xff] }
 0x1d0   : > { %v4442_v24 = vadd.f32 %v4441_v26, %v4353_v61  ;;  %v4530_v6 = vpop.f32.mrf.mxu3  ;;  %v5730_v61 = vld [vmem:[#allocation2 + $0x210] sm:$0xf]  ;;  %v2217_v43 = vsel %vm6810_vm3, %v2212_v11, %v2216_v49  ;;  %v2600_v26 = vrot.slane %v5417_v22, 5  ;;  %1927 = vst [vmem:[#allocation2 + $0x2c4] sm:$0xf] %v5327_v58  ;;  %v2598_v23 = vsel %vm6824_vm5, %v5445_v16, %v2597_v27 }
 0x1d1   : > { %v4354_v25 = vpop.f32.mrf.mxu1  ;;  %v2599_v49 = vrot.slane %v2597_v27, 4  ;;  %2422 = vst [vmem:[#allocation2 + $0x2a4] sm:$0xf] %v2217_v43  ;;  %v5731_v3 = vor.u32 %v6389_v47, %v5730_v61  ;;  %v2242_v22 = vshrl.u32 %v5371_v39, 16 }
 0x1d2   : > { %v4531_v40 = vadd.f32 %v4530_v6, %v4442_v24  ;;  %v4355_v51 = vadd.f32 %v4354_v25, %v7981_v33  ;;  %v2222_v24 = vrot.slane %v2221_v8, 4  ;;  %v6390_v6 = vld [vmem:[#allocation2 + $0x238] sm:$0xf0]  ;;  %2694 = vst [vmem:[#allocation2 + $0x2a8] sm:$0xf] %v2598_v23 }
 0x1d3   : > { %v4621_v57 = vpop.f32.mrf.mxu0  ;;  %v2601_v15 = vsel %vm6824_vm5, %v2599_v49, %v2600_v26  ;;  %v5739_v33 = vor.u32 %v6390_v6, %v5738_v30  ;;  %v5274_v26 = vld [vmem:[%s6663_s25 + $0x84] sm:$0xe]  ;;  %v5276_v30 = vld [vmem:[%s6663_s25 + $0x8c] sm:$0x1] }
 0x1d4   : > { %v7733_v13 = vadd.f32 %v4619_v14, %v4531_v40  ;;  %v2227_v25 = vsel %vm6810_vm3, %v2222_v24, %v2226_v38  ;;  %v5727_v14 = vor.u32 %v6384_v10, %v5724_v31  ;;  %v5735_v40 = vor.u32 %v6385_v12, %v5732_v63  ;;  %2695 = vst [vmem:[#allocation2 + $0x2cc] sm:$0xf] %v2601_v15  ;;  %v5275_v38 = vld [vmem:[%s6663_s25 + $0x88] sm:$0xf]  ;;  %v5372_v63 = vld [vmem:[%s6663_s25 + $0x98] sm:$0x1] }
 0x1d5   : > { %2423 = vst [vmem:[#allocation2 + $0x2c8] sm:$0xf] %v2227_v25  ;;  %v2232_v10 = vshll.u32 %v5370_v9, 16  ;;  %v2238_v31 = vshll.u32 %v5371_v39, 16  ;;  %v1768_v12 = vrot.slane %v5275_v38, 5  ;;  %v5302_v49 = vrot.slane %v5274_v26, 9 }
 0x1d6   : > { %v1771_v25 = vrot.slane %v5276_v30, 5  ;;  %v5328_v39 = vld [vmem:[%s6663_s25 + $0x90] sm:$0xf] }
 0x1d7   : > { %v4443_v54 = vpop.f32.mrf.mxu2  ;;  %v2234_v47 = vrot.slane %v2232_v10, 5  ;;  %v2240_v24 = vrot.slane %v2238_v31, 5  ;;  %v5766_v10 = vld [vmem:[#allocation2 + $0x258] sm:$0xf]  ;;  %v6398_v31 = vld [vmem:[#allocation2 + $0x278] sm:$0xf0] }
 0x1d8   : > { %v4444_v1 = vadd.f32 %v4443_v54, %v4355_v51  ;;  %v4532_v11 = vpop.f32.mrf.mxu3  ;;  %v2229_v51 = vshrl.u32 %v5370_v9, 16  ;;  %v1769_v9 = vsel %vm6824_vm5, %v5302_v49, %v1768_v12  ;;  %1928 = vst [vmem:[#allocation2 + $0x2e8] sm:$0xf] %v5328_v39 }
 0x1d9   : > { %v4357_v20 = vpop.f32.mrf.mxu1  ;;  %1860 = vst [vmem:[#allocation2 + $0x2e4] sm:$0xf] %v1769_v9 }
 0x1da   : > { %v4533_v58 = vadd.f32 %v4532_v11, %v4444_v1  ;;  %v4358_v29 = vadd.f32 %v4357_v20, %v7982_v17  ;;  %v2231_v61 = vrot.slane %v2229_v51, 4  ;;  %v2244_v11 = vrot.slane %v2242_v22, 4  ;;  %v7983_v20 = vld [vmem:[#allocation5_spill] sm:$0xff]  ;;  %v5760_v51 = vld [vmem:[#allocation2 + $0x274] sm:$0xf0] }
 0x1db   : > { %v4624_v43 = vpop.f32.mrf.mxu0  ;;  %v5418_v17 = vld [vmem:[%s6663_s25 + $0x90] sm:$0xe] }
 0x1dc   : > { %4672 = vmatmul.bf16.gmra.mxu1 %v5727_v14  ;;  %4761 = vmatmul.bf16.gmra.mxu2 %v5731_v3  ;;  %v7744_v8 = vadd.f32 %v4621_v57, %v4533_v58  ;;  %v2235_v16 = vor.u32 %v2234_v47, %v2231_v61  ;;  %v1770_v57 = vrot.slane %v1768_v12, 4  ;;  %v2248_v14 = vshll.u32 %v5372_v63, 16  ;;  %v5419_v3 = vld [vmem:[%s6663_s25 + $0x94] sm:$0xf]  ;;  %v5420_v63 = vld [vmem:[%s6663_s25 + $0x98] sm:$0x1] }
 0x1dd   : > { %4850 = vmatmul.bf16.gmra.mxu3 %v5735_v40  ;;  %v5329_v58 = vld [vmem:[%s6663_s25 + $0x94] sm:$0xf]  ;;  %v2245_v38 = vor.u32 %v2244_v11, %v2240_v24  ;;  %v5446_v12 = vrot.slane %v5418_v17, 9  ;;  %v2604_v26 = vrot.slane %v5419_v3, 5  ;;  %v2607_v30 = vrot.slane %v5420_v63, 5 }
 0x1de   : > { %4939 = vmatmul.bf16.gmra.mxu0 %v5739_v33  ;;  %v2236_v1 = vrot.slane %v2235_v16, 4  ;;  %v1772_v61 = vsel %vm6824_vm5, %v1770_v57, %v1771_v25  ;;  %v2250_v22 = vrot.slane %v2248_v14, 5  ;;  %v6394_v16 = vld [vmem:[#allocation2 + $0x25c] sm:$0xf]  ;;  %1929 = vst [vmem:[#allocation2 + $0x30c] sm:$0xf] %v5329_v58  ;;  %v5767_v3 = vor.u32 %v6398_v31, %v5766_v10 }
 0x1df   : > { %v4446_v27 = vpop.f32.mrf.mxu2  ;;  %1861 = vst [vmem:[#allocation2 + $0x308] sm:$0xf] %v1772_v61  ;;  %v2246_v49 = vrot.slane %v2245_v38, 4  ;;  %v2605_v57 = vsel %vm6824_vm5, %v5446_v12, %v2604_v26  ;;  %v5373_v58 = vld [vmem:[%s6663_s25 + $0x9c] sm:$0xf] }
 0x1e0   : > { %v4447_v6 = vadd.f32 %v4446_v27, %v4358_v29  ;;  %v4535_v23 = vpop.f32.mrf.mxu3  ;;  %v6393_v29 = vld [vmem:[#allocation2 + $0x254] sm:$0xf]  ;;  %v2241_v47 = vsel %vm6810_vm3, %v2236_v1, %v2240_v24  ;;  %v5768_v27 = vld [vmem:[#allocation2 + $0x27c] sm:$0xf0]  ;;  %v2606_v24 = vrot.slane %v2604_v26, 4 }
 0x1e1   : > { %v4359_v54 = vpop.f32.mrf.mxu1  ;;  %v2251_v1 = vsel %vm6810_vm3, %v2246_v49, %v2250_v22  ;;  %2424 = vst [vmem:[#allocation2 + $0x2ec] sm:$0xf] %v2241_v47  ;;  %v5771_v9 = vor.u32 %v6394_v16, %v5768_v27  ;;  %v5374_v17 = vld [vmem:[%s6663_s25 + $0xa0] sm:$0xf]  ;;  %v2253_v47 = vshrl.u32 %v5373_v58, 16  ;;  %v7984_v16 = vld [vmem:[#allocation6_spill] sm:$0xff] }
 0x1e2   : > { %v4536_v15 = vadd.f32 %v4535_v23, %v4447_v6  ;;  %v4360_v40 = vadd.f32 %v4359_v54, %v7983_v20  ;;  %v5774_v23 = vld [vmem:[#allocation2 + $0x260] sm:$0xf]  ;;  %v6399_v54 = vld [vmem:[#allocation2 + $0x280] sm:$0xf0]  ;;  %2425 = vst [vmem:[#allocation2 + $0x310] sm:$0xf] %v2251_v1 }
 0x1e3   : > { %v4626_v33 = vpop.f32.mrf.mxu0  ;;  %v5775_v39 = vor.u32 %v6399_v54, %v5774_v23  ;;  %2696 = vst [vmem:[#allocation2 + $0x2f0] sm:$0xf] %v2605_v57  ;;  %v5278_v22 = vld [vmem:[%s6663_s25 + $0x94] sm:$0xf]  ;;  %v2266_v63 = vshrl.u32 %v5374_v17, 16 }
 0x1e4   : > { %v7762_v6 = vadd.f32 %v4624_v43, %v4536_v15  ;;  %v5763_v43 = vor.u32 %v6393_v29, %v5760_v51  ;;  %v2608_v15 = vsel %vm6824_vm5, %v2606_v24, %v2607_v30  ;;  %v2262_v29 = vshll.u32 %v5374_v17, 16  ;;  %v5375_v26 = vld [vmem:[%s6663_s25 + $0xa4] sm:$0x1]  ;;  %v5277_v49 = vld [vmem:[%s6663_s25 + $0x90] sm:$0xe] }
 0x1e5   : > { %2697 = vst [vmem:[#allocation2 + $0x314] sm:$0xf] %v2608_v15  ;;  %v2255_v51 = vrot.slane %v2253_v47, 4  ;;  %v1775_v12 = vrot.slane %v5278_v22, 5  ;;  %v5279_v54 = vld [vmem:[%s6663_s25 + $0x98] sm:$0x1] }
 0x1e6   : > { %v2264_v57 = vrot.slane %v2262_v29, 5  ;;  %v2272_v15 = vshll.u32 %v5375_v26, 16  ;;  %v5330_v17 = vld [vmem:[%s6663_s25 + $0x9c] sm:$0xf]  ;;  %v5796_v29 = vld [vmem:[#allocation2 + $0x2bc] sm:$0xf0] }
 0x1e7   : > { %v4448_v25 = vpop.f32.mrf.mxu2  ;;  %v1777_v1 = vrot.slane %v1775_v12, 4  ;;  %v5421_v47 = vld [vmem:[%s6663_s25 + $0x9c] sm:$0xe]  ;;  %v5423_v26 = vld [vmem:[%s6663_s25 + $0xa4] sm:$0x1] }
 0x1e8   : > { %v4449_v11 = vadd.f32 %v4448_v25, %v4360_v40  ;;  %v4537_v14 = vpop.f32.mrf.mxu3  ;;  %v2256_v40 = vshll.u32 %v5373_v58, 16  ;;  %v5303_v25 = vrot.slane %v5277_v49, 9  ;;  %v5447_v49 = vrot.slane %v5421_v47, 9  ;;  %1930 = vst [vmem:[#allocation2 + $0x330] sm:$0xf] %v5330_v17 }
 0x1e9   : > { %v4638_v20 = vpop.f32.mrf.mxu1 }
 0x1ea   : > { %v4538_v61 = vadd.f32 %v4537_v14, %v4449_v11  ;;  %v2258_v10 = vrot.slane %v2256_v40, 5  ;;  %v4639_v27 = vadd.f32 %v4638_v20, %v7984_v16  ;;  %v1778_v14 = vrot.slane %v5279_v54, 5  ;;  %v5422_v20 = vld [vmem:[%s6663_s25 + $0xa0] sm:$0xf]  ;;  %v6402_v40 = vld [vmem:[#allocation2 + $0x29c] sm:$0xf] }
 0x1eb   : > { %v4905_v38 = vpop.f32.mrf.mxu0  ;;  %v1776_v58 = vsel %vm6824_vm5, %v5303_v25, %v1775_v12  ;;  %v6403_v12 = vld [vmem:[#allocation2 + $0x2a4] sm:$0xf]  ;;  %v2611_v54 = vrot.slane %v5422_v20, 5 }
 0x1ec   : > { %4677 = vmatmul.bf16.gmra.mxu1 %v5763_v43  ;;  %4766 = vmatmul.bf16.gmra.mxu2 %v5767_v3  ;;  %v7772_v31 = vadd.f32 %v4626_v33, %v4538_v61  ;;  %v2259_v30 = vor.u32 %v2258_v10, %v2255_v51  ;;  %v2268_v3 = vrot.slane %v2266_v63, 4  ;;  %v5331_v61 = vld [vmem:[%s6663_s25 + $0xa0] sm:$0xf]  ;;  %v6407_v10 = vld [vmem:[#allocation2 + $0x2c0] sm:$0xf0]  ;;  %v1779_v22 = vsel %vm6824_vm5, %v1777_v1, %v1778_v14 }
 0x1ed   : > { %4855 = vmatmul.bf16.gmra.mxu3 %v5771_v9  ;;  %v5802_v51 = vld [vmem:[#allocation2 + $0x2a0] sm:$0xf]  ;;  %1862 = vst [vmem:[#allocation2 + $0x32c] sm:$0xf] %v1776_v58  ;;  %v2613_v14 = vrot.slane %v2611_v54, 4  ;;  %v5799_v58 = vor.u32 %v6402_v40, %v5796_v29 }
 0x1ee   : > { %4944 = vmatmul.bf16.gmra.mxu0 %v5775_v39  ;;  %v2260_v43 = vrot.slane %v2259_v30, 4  ;;  %v2269_v16 = vor.u32 %v2268_v3, %v2264_v57  ;;  %1863 = vst [vmem:[#allocation2 + $0x350] sm:$0xf] %v1779_v22  ;;  %v5803_v17 = vor.u32 %v6407_v10, %v5802_v51  ;;  %v5376_v22 = vld [vmem:[%s6663_s25 + $0xa8] sm:$0xf] }
 0x1ef   : > { %v4727_v23 = vpop.f32.mrf.mxu2  ;;  %1931 = vst [vmem:[#allocation2 + $0x354] sm:$0xf] %v5331_v61 }
 0x1f0   : > { %v4728_v24 = vadd.f32 %v4727_v23, %v4639_v27  ;;  %v4816_v33 = vpop.f32.mrf.mxu3  ;;  %v2265_v63 = vsel %vm6810_vm3, %v2260_v43, %v2264_v57  ;;  %v2274_v27 = vrot.slane %v2272_v15, 5  ;;  %v5804_v23 = vld [vmem:[#allocation2 + $0x2c4] sm:$0xf0]  ;;  %v2270_v25 = vrot.slane %v2269_v16, 4  ;;  %v5377_v16 = vld [vmem:[%s6663_s25 + $0xac] sm:$0xf] }
 0x1f1   : > { %v4640_v11 = vpop.f32.mrf.mxu1  ;;  %2426 = vst [vmem:[#allocation2 + $0x334] sm:$0xf] %v2265_v63  ;;  %v2612_v15 = vsel %vm6824_vm5, %v5447_v49, %v2611_v54  ;;  %v5807_v61 = vor.u32 %v6403_v12, %v5804_v23  ;;  %v2286_v49 = vshll.u32 %v5377_v16, 16  ;;  %v2290_v40 = vshrl.u32 %v5377_v16, 16  ;;  %v5281_v12 = vld [vmem:[%s6663_s25 + $0xa0] sm:$0xf] }
 0x1f2   : > { %v4817_v9 = vadd.f32 %v4816_v33, %v4728_v24  ;;  %v2614_v24 = vrot.slane %v5423_v26, 5  ;;  %v5810_v33 = vld [vmem:[#allocation2 + $0x2a8] sm:$0xf]  ;;  %v4641_v1 = vadd.f32 %v4640_v11, %v7281_v37  ;;  %v2275_v3 = vsel %vm6810_vm3, %v2270_v25, %v2274_v27  ;;  %2698 = vst [vmem:[#allocation2 + $0x338] sm:$0xf] %v2612_v15  ;;  %v7985_v54 = vld [vmem:[#allocation7_spill] sm:$0xff] }
 0x1f3   : > { %v4907_v39 = vpop.f32.mrf.mxu0  ;;  %2427 = vst [vmem:[#allocation2 + $0x358] sm:$0xf] %v2275_v3  ;;  %v2277_v26 = vshrl.u32 %v5376_v22, 16  ;;  %v5378_v25 = vld [vmem:[%s6663_s25 + $0xb0] sm:$0x1] }
 0x1f4   : > { %v4906_v30 = vadd.f32 %v4905_v38, %v4817_v9  ;;  %v6408_v38 = vld [vmem:[#allocation2 + $0x2c8] sm:$0xf0]  ;;  %v2615_v37 = vsel %vm6824_vm5, %v2613_v14, %v2614_v24  ;;  %v5282_v14 = vld [vmem:[%s6663_s25 + $0xa4] sm:$0x1] }
 0x1f5   : > { %v5811_v47 = vor.u32 %v6408_v38, %v5810_v33  ;;  %2699 = vst [vmem:[#allocation2 + $0x35c] sm:$0xf] %v2615_v37  ;;  %v2279_v51 = vrot.slane %v2277_v26, 4  ;;  %v1782_v33 = vrot.slane %v5281_v12, 5  ;;  %v5280_v38 = vld [vmem:[%s6663_s25 + $0x9c] sm:$0xe] }
 0x1f6   : > { %v4985_v57 = vmax.f32 %v4906_v30, 0.0  ;;  %v2280_v30 = vshll.u32 %v5376_v22, 16 }
 0x1f7   : > { %v4729_v43 = vpop.f32.mrf.mxu2 }
 0x1f8   : > { %5017 = vst [vmem:[%s7796_s16] sm:$0xff] %v4985_v57  ;;  %v4730_v20 = vadd.f32 %v4729_v43, %v4641_v1  ;;  %v4818_v9 = vpop.f32.mrf.mxu3  ;;  %v2282_v10 = vrot.slane %v2280_v30, 5  ;;  %v2288_v43 = vrot.slane %v2286_v49, 5  ;;  %v5332_v30 = vld [vmem:[%s6663_s25 + $0xa8] sm:$0xf]  ;;  %v5333_v49 = vld [vmem:[%s6663_s25 + $0xac] sm:$0xf] }
 0x1f9   : > { %v4643_v11 = vpop.f32.mrf.mxu1  ;;  %1932 = vst [vmem:[#allocation2 + $0x378] sm:$0xf] %v5332_v30  ;;  %v5379_v30 = vld [vmem:[%s6663_s25 + $0xb4] sm:$0xf] }
 0x1fa   : > { %v4819_v27 = vadd.f32 %v4818_v9, %v4730_v20  ;;  %v4644_v24 = vadd.f32 %v4643_v11, %v7985_v54  ;;  %v2283_v57 = vor.u32 %v2282_v10, %v2279_v51  ;;  %v5304_v20 = vrot.slane %v5280_v38, 9  ;;  %v5838_v51 = vld [vmem:[#allocation2 + $0x2e8] sm:$0xf]  ;;  %v6416_v10 = vld [vmem:[#allocation2 + $0x308] sm:$0xf0] }
 0x1fb   : > { %v4910_v63 = vpop.f32.mrf.mxu0  ;;  %v1784_v9 = vrot.slane %v1782_v33, 4  ;;  %v5425_v54 = vld [vmem:[%s6663_s25 + $0xac] sm:$0xf]  ;;  %1933 = vst [vmem:[#allocation2 + $0x39c] sm:$0xf] %v5333_v49 }
 0x1fc   : > { %v4908_v29 = vadd.f32 %v4907_v39, %v4819_v27  ;;  %4682 = vmatmul.bf16.gmra.mxu1 %v5799_v58  ;;  %4771 = vmatmul.bf16.gmra.mxu2 %v5803_v17  ;;  %v2292_v39 = vrot.slane %v2290_v40, 4  ;;  %v1785_v58 = vrot.slane %v5282_v14, 5  ;;  %v2284_v37 = vrot.slane %v2283_v57, 4  ;;  %v6411_v40 = vld [vmem:[#allocation2 + $0x2e4] sm:$0xf] }
 0x1fd   : > { %4860 = vmatmul.bf16.gmra.mxu3 %v5807_v61  ;;  %v2296_v61 = vshll.u32 %v5378_v25, 16  ;;  %v1783_v27 = vsel %vm6824_vm5, %v5304_v20, %v1782_v33  ;;  %v6412_v25 = vld [vmem:[#allocation2 + $0x2ec] sm:$0xf]  ;;  %v5840_v57 = vld [vmem:[#allocation2 + $0x30c] sm:$0xf0]  ;;  %v2618_v14 = vrot.slane %v5425_v54, 5 }
 0x1fe   : > { %4949 = vmatmul.bf16.gmra.mxu0 %v5811_v47  ;;  %v4986_v23 = vmax.f32 %v4908_v29, 0.0  ;;  %v2293_v11 = vor.u32 %v2292_v39, %v2288_v43  ;;  %v5424_v47 = vld [vmem:[%s6663_s25 + $0xa8] sm:$0xe]  ;;  %v1786_v26 = vsel %vm6824_vm5, %v1784_v9, %v1785_v58  ;;  %1864 = vst [vmem:[#allocation2 + $0x374] sm:$0xf] %v1783_v27  ;;  %v2289_v33 = vsel %vm6810_vm3, %v2284_v37, %v2288_v43 }
 0x1ff   : > { %v4732_v1 = vpop.f32.mrf.mxu2  ;;  %v5832_v29 = vld [vmem:[#allocation2 + $0x304] sm:$0xf0]  ;;  %1865 = vst [vmem:[#allocation2 + $0x398] sm:$0xf] %v1786_v26  ;;  %v5448_v38 = vrot.slane %v5424_v47, 9  ;;  %v2620_v58 = vrot.slane %v2618_v14, 4  ;;  %v5843_v27 = vor.u32 %v6412_v25, %v5840_v57 }
 0x200   : > { %5018 = vst [vmem:[%s7796_s16 + $0x8] sm:$0xff] %v4986_v23  ;;  %v4733_v3 = vadd.f32 %v4732_v1, %v4644_v24  ;;  %v4821_v15 = vpop.f32.mrf.mxu3  ;;  %v2294_v12 = vrot.slane %v2293_v11, 4  ;;  %v2298_v23 = vrot.slane %v2296_v61, 5  ;;  %v5426_v1 = vld [vmem:[%s6663_s25 + $0xb0] sm:$0x1]  ;;  %v5835_v47 = vor.u32 %v6411_v40, %v5832_v29 }
 0x201   : > { %v4645_v17 = vpop.f32.mrf.mxu1  ;;  %v5846_v39 = vld [vmem:[#allocation2 + $0x2f0] sm:$0xf]  ;;  %v6417_v9 = vld [vmem:[#allocation2 + $0x310] sm:$0xf0]  ;;  %2428 = vst [vmem:[#allocation2 + $0x37c] sm:$0xf] %v2289_v33  ;;  %v2619_v43 = vsel %vm6824_vm5, %v5448_v38, %v2618_v14 }
 0x202   : > { %v4822_v22 = vadd.f32 %v4821_v15, %v4733_v3  ;;  %v2621_v3 = vrot.slane %v5426_v1, 5  ;;  %v4646_v20 = vadd.f32 %v4645_v17, %v7320_v28  ;;  %v5847_v26 = vor.u32 %v6417_v9, %v5846_v39  ;;  %v5380_v49 = vld [vmem:[%s6663_s25 + $0xb8] sm:$0xf]  ;;  %2700 = vst [vmem:[#allocation2 + $0x380] sm:$0xf] %v2619_v43 }
 0x203   : > { %v4912_v16 = vpop.f32.mrf.mxu0  ;;  %v2301_v54 = vshrl.u32 %v5379_v30, 16  ;;  %v2310_v33 = vshll.u32 %v5380_v49, 16  ;;  %v2314_v40 = vshrl.u32 %v5380_v49, 16  ;;  %v5284_v25 = vld [vmem:[%s6663_s25 + $0xac] sm:$0xf] }
 0x204   : > { %v4911_v24 = vadd.f32 %v4910_v63, %v4822_v22  ;;  %v2299_v63 = vsel %vm6810_vm3, %v2294_v12, %v2298_v23  ;;  %v5839_v22 = vor.u32 %v6416_v10, %v5838_v51  ;;  %v2622_v28 = vsel %vm6824_vm5, %v2620_v58, %v2621_v3  ;;  %v5381_v14 = vld [vmem:[%s6663_s25 + $0xbc] sm:$0x1]  ;;  %v5334_v49 = vld [vmem:[%s6663_s25 + $0xb4] sm:$0xf] }
 0x205   : > { %2429 = vst [vmem:[#allocation2 + $0x3a0] sm:$0xf] %v2299_v63  ;;  %v2303_v51 = vrot.slane %v2301_v54, 4  ;;  %v1789_v38 = vrot.slane %v5284_v25, 5  ;;  %v2312_v9 = vrot.slane %v2310_v33, 5 }
 0x206   : > { %v4987_v15 = vmax.f32 %v4911_v24, 0.0  ;;  %v2304_v24 = vshll.u32 %v5379_v30, 16  ;;  %2701 = vst [vmem:[#allocation2 + $0x3a4] sm:$0xf] %v2622_v28  ;;  %v5427_v28 = vld [vmem:[%s6663_s25 + $0xb4] sm:$0xe] }
 0x207   : > { %v4734_v11 = vpop.f32.mrf.mxu2  ;;  %v1791_v43 = vrot.slane %v1789_v38, 4  ;;  %v6420_v54 = vld [vmem:[#allocation2 + $0x32c] sm:$0xf]  ;;  %v5874_v33 = vld [vmem:[#allocation2 + $0x330] sm:$0xf] }
 0x208   : > { %5019 = vst [vmem:[%s7796_s16 + $0x10] sm:$0xff] %v4987_v15  ;;  %v4735_v37 = vadd.f32 %v4734_v11, %v4646_v20  ;;  %v4823_v61 = vpop.f32.mrf.mxu3  ;;  %v2306_v10 = vrot.slane %v2304_v24, 5  ;;  %v5283_v15 = vld [vmem:[%s6663_s25 + $0xa8] sm:$0xe]  ;;  %v5285_v20 = vld [vmem:[%s6663_s25 + $0xb0] sm:$0x1] }
 0x209   : > { %v4648_v17 = vpop.f32.mrf.mxu1  ;;  %v5305_v11 = vrot.slane %v5283_v15, 9  ;;  %v5868_v24 = vld [vmem:[#allocation2 + $0x34c] sm:$0xf0]  ;;  %v5882_v15 = vld [vmem:[#allocation2 + $0x338] sm:$0xf] }
 0x20a   : > { %v4824_v12 = vadd.f32 %v4823_v61, %v4735_v37  ;;  %v4649_v1 = vadd.f32 %v4648_v17, %v7354_v42  ;;  %v2307_v39 = vor.u32 %v2306_v10, %v2303_v51  ;;  %v1792_v37 = vrot.slane %v5285_v20, 5  ;;  %v5428_v10 = vld [vmem:[%s6663_s25 + $0xb8] sm:$0xf]  ;;  %1934 = vst [vmem:[#allocation2 + $0x3c0] sm:$0xf] %v5334_v49 }
 0x20b   : > { %v4915_v23 = vpop.f32.mrf.mxu0 }
 0x20c   : > { %v4913_v29 = vadd.f32 %v4912_v16, %v4824_v12  ;;  %4687 = vmatmul.bf16.gmra.mxu1 %v5835_v47  ;;  %4776 = vmatmul.bf16.gmra.mxu2 %v5839_v22  ;;  %v2316_v16 = vrot.slane %v2314_v40, 4  ;;  %v2308_v47 = vrot.slane %v2307_v39, 4  ;;  %v2320_v22 = vshll.u32 %v5381_v14, 16  ;;  %v5335_v12 = vld [vmem:[%s6663_s25 + $0xb8] sm:$0xf] }
 0x20d   : > { %4865 = vmatmul.bf16.gmra.mxu3 %v5843_v27  ;;  %v1793_v30 = vsel %vm6824_vm5, %v1791_v43, %v1792_v37  ;;  %v6425_v40 = vld [vmem:[#allocation2 + $0x350] sm:$0xf0]  ;;  %v5429_v14 = vld [vmem:[%s6663_s25 + $0xbc] sm:$0x1]  ;;  %v5449_v39 = vrot.slane %v5427_v28, 9 }
 0x20e   : > { %4954 = vmatmul.bf16.gmra.mxu0 %v5847_v26  ;;  %v4988_v57 = vmax.f32 %v4913_v29, 0.0  ;;  %v2317_v42 = vor.u32 %v2316_v16, %v2312_v9  ;;  %v1790_v26 = vsel %vm6824_vm5, %v5305_v11, %v1789_v38  ;;  %v2322_v51 = vrot.slane %v2320_v22, 5  ;;  %1867 = vst [vmem:[#allocation2 + $0x3e0] sm:$0xf] %v1793_v30  ;;  %v5383_v30 = vld [vmem:[%s6663_s25 + $0xc4] sm:$0xf] }
 0x20f   : > { %v4737_v3 = vpop.f32.mrf.mxu2  ;;  %1866 = vst [vmem:[#allocation2 + $0x3bc] sm:$0xf] %v1790_v26  ;;  %v2313_v38 = vsel %vm6810_vm3, %v2308_v47, %v2312_v9  ;;  %v2628_v20 = vrot.slane %v5429_v14, 5  ;;  %v5875_v22 = vor.u32 %v6425_v40, %v5874_v33  ;;  %v5382_v26 = vld [vmem:[%s6663_s25 + $0xc0] sm:$0xf] }
 0x210   : > { %5020 = vst [vmem:[%s7796_s16 + $0x18] sm:$0xff] %v4988_v57  ;;  %v4738_v63 = vadd.f32 %v4737_v3, %v4649_v1  ;;  %v4826_v58 = vpop.f32.mrf.mxu3  ;;  %v2318_v29 = vrot.slane %v2317_v42, 4  ;;  %v6421_v57 = vld [vmem:[#allocation2 + $0x334] sm:$0xf]  ;;  %v5876_v1 = vld [vmem:[#allocation2 + $0x354] sm:$0xf0]  ;;  %v5871_v42 = vor.u32 %v6420_v54, %v5868_v24 }
 0x211   : > { %v4650_v61 = vpop.f32.mrf.mxu1  ;;  %v2625_v3 = vrot.slane %v5428_v10, 5  ;;  %1935 = vst [vmem:[#allocation2 + $0x3e4] sm:$0xf] %v5335_v12  ;;  %v5879_v28 = vor.u32 %v6421_v57, %v5876_v1  ;;  %v2334_v10 = vshll.u32 %v5383_v30, 16  ;;  %v2338_v54 = vshrl.u32 %v5383_v30, 16 }
 0x212   : > { %v4827_v17 = vadd.f32 %v4826_v58, %v4738_v63  ;;  %v4651_v63 = vadd.f32 %v4650_v61, %v7371_v21  ;;  %v6426_v58 = vld [vmem:[#allocation2 + $0x358] sm:$0xf0]  ;;  %2430 = vst [vmem:[#allocation2 + $0x3c4] sm:$0xf] %v2313_v38  ;;  %v5384_v14 = vld [vmem:[%s6663_s25 + $0xc8] sm:$0x1] }
 0x213   : > { %v4917_v27 = vpop.f32.mrf.mxu0  ;;  %v2627_v11 = vrot.slane %v2625_v3, 4  ;;  %v2626_v9 = vsel %vm6824_vm5, %v5449_v39, %v2625_v3  ;;  %v6429_v30 = vld [vmem:[#allocation2 + $0x374] sm:$0xf] }
 0x214   : > { %v4916_v25 = vadd.f32 %v4915_v23, %v4827_v17  ;;  %v2323_v23 = vsel %vm6810_vm3, %v2318_v29, %v2322_v51  ;;  %v5883_v17 = vor.u32 %v6426_v58, %v5882_v15  ;;  %2702 = vst [vmem:[#allocation2 + $0x3c8] sm:$0xf] %v2626_v9  ;;  %v2325_v29 = vshrl.u32 %v5382_v26, 16  ;;  %v5286_v15 = vld [vmem:[%s6663_s25 + $0xb4] sm:$0xe] }
 0x215   : > { %v2629_v21 = vsel %vm6824_vm5, %v2627_v11, %v2628_v20  ;;  %2431 = vst [vmem:[#allocation2 + $0x3e8] sm:$0xf] %v2323_v23  ;;  %v2328_v51 = vshll.u32 %v5382_v26, 16  ;;  %v5288_v20 = vld [vmem:[%s6663_s25 + $0xbc] sm:$0x1]  ;;  %v5306_v23 = vrot.slane %v5286_v15, 9 }
 0x216   : > { %v4989_v16 = vmax.f32 %v4916_v25, 0.0  ;;  %2703 = vst [vmem:[#allocation2 + $0x3ec] sm:$0xf] %v2629_v21  ;;  %v2327_v33 = vrot.slane %v2325_v29, 4  ;;  %v5287_v25 = vld [vmem:[%s6663_s25 + $0xb8] sm:$0xf] }
 0x217   : > { %v4739_v43 = vpop.f32.mrf.mxu2  ;;  %v2330_v40 = vrot.slane %v2328_v51, 5  ;;  %v1796_v38 = vrot.slane %v5287_v25, 5  ;;  %v5337_v26 = vld [vmem:[%s6663_s25 + $0xc4] sm:$0xf]  ;;  %v5910_v29 = vld [vmem:[#allocation2 + $0x378] sm:$0xf] }
 0x218   : > { %5021 = vst [vmem:[%s7796_s16 + $0x20] sm:$0xff] %v4989_v16  ;;  %v4740_v37 = vadd.f32 %v4739_v43, %v4651_v63  ;;  %v4828_v47 = vpop.f32.mrf.mxu3  ;;  %v2336_v16 = vrot.slane %v2334_v10, 5  ;;  %v1799_v43 = vrot.slane %v5288_v20, 5  ;;  %v6434_v51 = vld [vmem:[#allocation2 + $0x398] sm:$0xf0] }
 0x219   : > { %v4653_v61 = vpop.f32.mrf.mxu1  ;;  %v2331_v39 = vor.u32 %v2330_v40, %v2327_v33  ;;  %v1798_v11 = vrot.slane %v1796_v38, 4  ;;  %v6430_v40 = vld [vmem:[#allocation2 + $0x37c] sm:$0xf]  ;;  %v5912_v25 = vld [vmem:[#allocation2 + $0x39c] sm:$0xf0] }
 0x21a   : > { %v4829_v49 = vadd.f32 %v4828_v47, %v4740_v37  ;;  %v4654_v1 = vadd.f32 %v4653_v61, %v7395_v34  ;;  %v2344_v47 = vshll.u32 %v5384_v14, 16  ;;  %v1797_v61 = vsel %vm6824_vm5, %v5306_v23, %v1796_v38  ;;  %1937 = vst [vmem:[#allocation2 + $0x42c] sm:$0xf] %v5337_v26 }
 0x21b   : > { %v4920_v12 = vpop.f32.mrf.mxu0  ;;  %v2332_v37 = vrot.slane %v2331_v39, 4  ;;  %1868 = vst [vmem:[#allocation2 + $0x404] sm:$0xf] %v1797_v61  ;;  %v5918_v39 = vld [vmem:[#allocation2 + $0x380] sm:$0xf] }
 0x21c   : > { %v4918_v24 = vadd.f32 %v4917_v27, %v4829_v49  ;;  %4692 = vmatmul.bf16.gmra.mxu1 %v5871_v42  ;;  %4781 = vmatmul.bf16.gmra.mxu2 %v5875_v22  ;;  %v2340_v27 = vrot.slane %v2338_v54, 4  ;;  %v5430_v42 = vld [vmem:[%s6663_s25 + $0xc0] sm:$0xe]  ;;  %v5904_v49 = vld [vmem:[#allocation2 + $0x394] sm:$0xf0]  ;;  %v2346_v54 = vrot.slane %v2344_v47, 5 }
 0x21d   : > { %4870 = vmatmul.bf16.gmra.mxu3 %v5879_v28  ;;  %v1800_v28 = vsel %vm6824_vm5, %v1798_v11, %v1799_v43  ;;  %v5450_v38 = vrot.slane %v5430_v42, 9  ;;  %v5907_v43 = vor.u32 %v6429_v30, %v5904_v49  ;;  %v5385_v42 = vld [vmem:[%s6663_s25 + $0xcc] sm:$0xf] }
 0x21e   : > { %4959 = vmatmul.bf16.gmra.mxu0 %v5883_v17  ;;  %v4990_v57 = vmax.f32 %v4918_v24, 0.0  ;;  %v2341_v34 = vor.u32 %v2340_v27, %v2336_v16  ;;  %v5336_v17 = vld [vmem:[%s6663_s25 + $0xc0] sm:$0xf]  ;;  %v5431_v24 = vld [vmem:[%s6663_s25 + $0xc4] sm:$0xf]  ;;  %v2352_v26 = vshll.u32 %v5385_v42, 16 }
 0x21f   : > { %v4742_v3 = vpop.f32.mrf.mxu2  ;;  %1869 = vst [vmem:[#allocation2 + $0x428] sm:$0xf] %v1800_v28  ;;  %v2632_v14 = vrot.slane %v5431_v24, 5  ;;  %v6435_v27 = vld [vmem:[#allocation2 + $0x3a0] sm:$0xf0] }
 0x220   : > { %5022 = vst [vmem:[%s7796_s16 + $0x28] sm:$0xff] %v4990_v57  ;;  %v4743_v63 = vadd.f32 %v4742_v3, %v4654_v1  ;;  %v4831_v58 = vpop.f32.mrf.mxu3  ;;  %v2342_v10 = vrot.slane %v2341_v34, 4  ;;  %v2337_v57 = vsel %vm6810_vm3, %v2332_v37, %v2336_v16  ;;  %v5432_v1 = vld [vmem:[%s6663_s25 + $0xc8] sm:$0x1]  ;;  %v5911_v37 = vor.u32 %v6434_v51, %v5910_v29 }
 0x221   : > { %v4655_v9 = vpop.f32.mrf.mxu1  ;;  %1936 = vst [vmem:[#allocation2 + $0x408] sm:$0xf] %v5336_v17  ;;  %v2635_v3 = vrot.slane %v5432_v1, 5  ;;  %v2633_v16 = vsel %vm6824_vm5, %v5450_v38, %v2632_v14  ;;  %v5915_v34 = vor.u32 %v6430_v40, %v5912_v25  ;;  %v5919_v47 = vor.u32 %v6435_v27, %v5918_v39  ;;  %v5387_v25 = vld [vmem:[%s6663_s25 + $0xd4] sm:$0x1] }
 0x222   : > { %v4832_v22 = vadd.f32 %v4831_v58, %v4743_v63  ;;  %v4656_v20 = vadd.f32 %v4655_v9, %v7406_v18  ;;  %v2634_v63 = vrot.slane %v2632_v14, 4  ;;  %2432 = vst [vmem:[#allocation2 + $0x40c] sm:$0xf] %v2337_v57  ;;  %v2349_v17 = vshrl.u32 %v5385_v42, 16  ;;  %v5289_v38 = vld [vmem:[%s6663_s25 + $0xc0] sm:$0xe] }
 0x223   : > { %v4922_v21 = vpop.f32.mrf.mxu0  ;;  %2704 = vst [vmem:[#allocation2 + $0x410] sm:$0xf] %v2633_v16  ;;  %v2354_v51 = vrot.slane %v2352_v26, 5  ;;  %v5291_v14 = vld [vmem:[%s6663_s25 + $0xc8] sm:$0x1]  ;;  %v2368_v16 = vshll.u32 %v5387_v25, 16 }
 0x224   : > { %v4921_v33 = vadd.f32 %v4920_v12, %v4832_v22  ;;  %v2347_v12 = vsel %vm6810_vm3, %v2342_v10, %v2346_v54  ;;  %v2636_v18 = vsel %vm6824_vm5, %v2634_v63, %v2635_v3  ;;  %v5386_v22 = vld [vmem:[%s6663_s25 + $0xd0] sm:$0xf]  ;;  %v2351_v29 = vrot.slane %v2349_v17, 4  ;;  %v5290_v54 = vld [vmem:[%s6663_s25 + $0xc4] sm:$0xf] }
 0x225   : > { %2433 = vst [vmem:[#allocation2 + $0x430] sm:$0xf] %v2347_v12  ;;  %v2358_v10 = vshll.u32 %v5386_v22, 16  ;;  %v2362_v30 = vshrl.u32 %v5386_v22, 16  ;;  %v1803_v40 = vrot.slane %v5290_v54, 5  ;;  %v1806_v12 = vrot.slane %v5291_v14, 5 }
 0x226   : > { %v4991_v15 = vmax.f32 %v4921_v33, 0.0  ;;  %2705 = vst [vmem:[#allocation2 + $0x434] sm:$0xf] %v2636_v18  ;;  %v2355_v57 = vor.u32 %v2354_v51, %v2351_v29  ;;  %v5940_v42 = vld [vmem:[#allocation2 + $0x3dc] sm:$0xf0]  ;;  %v2370_v26 = vrot.slane %v2368_v16, 5 }
 0x227   : > { %v4744_v58 = vpop.f32.mrf.mxu2  ;;  %v2360_v39 = vrot.slane %v2358_v10, 5  ;;  %v1805_v27 = vrot.slane %v1803_v40, 4  ;;  %v5946_v22 = vld [vmem:[#allocation2 + $0x3c0] sm:$0xf]  ;;  %v5434_v10 = vld [vmem:[%s6663_s25 + $0xd0] sm:$0xf] }
 0x228   : > { %5023 = vst [vmem:[%s7796_s16 + $0x30] sm:$0xff] %v4991_v15  ;;  %v4745_v23 = vadd.f32 %v4744_v58, %v4656_v20  ;;  %v4833_v11 = vpop.f32.mrf.mxu3  ;;  %v5307_v20 = vrot.slane %v5289_v38, 9  ;;  %v2356_v58 = vrot.slane %v2355_v57, 4  ;;  %v5948_v29 = vld [vmem:[#allocation2 + $0x3e4] sm:$0xf0] }
 0x229   : > { %v4658_v9 = vpop.f32.mrf.mxu1  ;;  %v1807_v18 = vsel %vm6824_vm5, %v1805_v27, %v1806_v12  ;;  %v5435_v54 = vld [vmem:[%s6663_s25 + $0xd4] sm:$0x1]  ;;  %v6444_v38 = vld [vmem:[#allocation2 + $0x3e8] sm:$0xf0] }
 0x22a   : > { %v4834_v61 = vadd.f32 %v4833_v11, %v4745_v23  ;;  %v4659_v33 = vadd.f32 %v4658_v9, %v7437_v0  ;;  %v5433_v23 = vld [vmem:[%s6663_s25 + $0xcc] sm:$0xe]  ;;  %1871 = vst [vmem:[#allocation2 + $0x470] sm:$0xf] %v1807_v18  ;;  %v2361_v51 = vsel %vm6810_vm3, %v2356_v58, %v2360_v39  ;;  %v2642_v25 = vrot.slane %v5435_v54, 5 }
 0x22b   : > { %v4925_v28 = vpop.f32.mrf.mxu0  ;;  %v5338_v9 = vld [vmem:[%s6663_s25 + $0xcc] sm:$0xf]  ;;  %2434 = vst [vmem:[#allocation2 + $0x454] sm:$0xf] %v2361_v51 }
 0x22c   : > { %v4923_v49 = vadd.f32 %v4922_v21, %v4834_v61  ;;  %4697 = vmatmul.bf16.gmra.mxu1 %v5907_v43  ;;  %4786 = vmatmul.bf16.gmra.mxu2 %v5911_v37  ;;  %v2364_v21 = vrot.slane %v2362_v30, 4  ;;  %v1804_v37 = vsel %vm6824_vm5, %v5307_v20, %v1803_v40  ;;  %v6443_v61 = vld [vmem:[#allocation2 + $0x3e0] sm:$0xf0]  ;;  %v5954_v40 = vld [vmem:[#allocation2 + $0x3c8] sm:$0xf] }
 0x22d   : > { %4875 = vmatmul.bf16.gmra.mxu3 %v5915_v34  ;;  %v5339_v34 = vld [vmem:[%s6663_s25 + $0xd0] sm:$0xf]  ;;  %1870 = vst [vmem:[#allocation2 + $0x44c] sm:$0xf] %v1804_v37  ;;  %v5947_v27 = vor.u32 %v6443_v61, %v5946_v22  ;;  %v5955_v58 = vor.u32 %v6444_v38, %v5954_v40  ;;  %v6447_v22 = vld [vmem:[#allocation2 + $0x404] sm:$0xf] }
 0x22e   : > { %4964 = vmatmul.bf16.gmra.mxu0 %v5919_v47  ;;  %v4992_v24 = vmax.f32 %v4923_v49, 0.0  ;;  %v2365_v0 = vor.u32 %v2364_v21, %v2360_v39  ;;  %v6438_v47 = vld [vmem:[#allocation2 + $0x3bc] sm:$0xf]  ;;  %v6439_v49 = vld [vmem:[#allocation2 + $0x3c4] sm:$0xf] }
 0x22f   : > { %v4747_v1 = vpop.f32.mrf.mxu2  ;;  %1938 = vst [vmem:[#allocation2 + $0x450] sm:$0xf] %v5338_v9  ;;  %v5943_v20 = vor.u32 %v6438_v47, %v5940_v42  ;;  %v5976_v61 = vld [vmem:[#allocation2 + $0x424] sm:$0xf0] }
 0x230   : > { %5024 = vst [vmem:[%s7796_s16 + $0x38] sm:$0xff] %v4992_v24  ;;  %v4748_v3 = vadd.f32 %v4747_v1, %v4659_v33  ;;  %v4836_v15 = vpop.f32.mrf.mxu3  ;;  %v2366_v17 = vrot.slane %v2365_v0, 4  ;;  %v5451_v24 = vrot.slane %v5433_v23, 9  ;;  %v2639_v33 = vrot.slane %v5434_v10, 5  ;;  %v5984_v10 = vld [vmem:[#allocation2 + $0x42c] sm:$0xf0] }
 0x231   : > { %v4660_v63 = vpop.f32.mrf.mxu1  ;;  %1939 = vst [vmem:[#allocation2 + $0x474] sm:$0xf] %v5339_v34 }
 0x232   : > { %v4837_v11 = vadd.f32 %v4836_v15, %v4748_v3  ;;  %v4661_v1 = vadd.f32 %v4660_v63, %v7450_v45  ;;  %v2641_v14 = vrot.slane %v2639_v33, 4  ;;  %v2640_v39 = vsel %vm6824_vm5, %v5451_v24, %v2639_v33 }
 0x233   : > { %v4927_v43 = vpop.f32.mrf.mxu0  ;;  %v5951_v63 = vor.u32 %v6439_v49, %v5948_v29  ;;  %2706 = vst [vmem:[#allocation2 + $0x458] sm:$0xf] %v2640_v39  ;;  %v5990_v29 = vld [vmem:[#allocation2 + $0x410] sm:$0xf]  ;;  %v5979_v33 = vor.u32 %v6447_v22, %v5976_v61 }
 0x234   : > { %v4926_v30 = vadd.f32 %v4925_v28, %v4837_v11  ;;  %v2371_v28 = vsel %vm6810_vm3, %v2366_v17, %v2370_v26  ;;  %v2643_v12 = vsel %vm6824_vm5, %v2641_v14, %v2642_v25  ;;  %v5982_v17 = vld [vmem:[#allocation2 + $0x408] sm:$0xf]  ;;  %v6448_v26 = vld [vmem:[#allocation2 + $0x40c] sm:$0xf] }
 0x235   : > { %2435 = vst [vmem:[#allocation2 + $0x478] sm:$0xf] %v2371_v28 }
 0x236   : > { %v4993_v57 = vmax.f32 %v4926_v30, 0.0  ;;  %2707 = vst [vmem:[#allocation2 + $0x47c] sm:$0xf] %v2643_v12 }
 0x237   : > { %v4749_v21 = vpop.f32.mrf.mxu2 }
 0x238   : > { %5025 = vst [vmem:[%s7796_s16 + $0x40] sm:$0xff] %v4993_v57  ;;  %v4750_v3 = vadd.f32 %v4749_v21, %v4661_v1  ;;  %v4838_v15 = vpop.f32.mrf.mxu3  ;;  %v5987_v57 = vor.u32 %v6448_v26, %v5984_v10 }
 0x239   : > { %v4663_v45 = vpop.f32.mrf.mxu1 }
 0x23a   : > { %v4839_v44 = vadd.f32 %v4838_v15, %v4750_v3  ;;  %v4664_v11 = vadd.f32 %v4663_v45, %v7470_v4  ;;  %v6453_v4 = vld [vmem:[#allocation2 + $0x430] sm:$0xf0] }
 0x23b   : > { %v4930_v0 = vpop.f32.mrf.mxu0  ;;  %v5991_v1 = vor.u32 %v6453_v4, %v5990_v29 }
 0x23c   : > { %v4928_v16 = vadd.f32 %v4927_v43, %v4839_v44  ;;  %4702 = vmatmul.bf16.gmra.mxu1 %v5943_v20  ;;  %4791 = vmatmul.bf16.gmra.mxu2 %v5947_v27  ;;  %v6452_v43 = vld [vmem:[#allocation2 + $0x428] sm:$0xf0]  ;;  %v6018_v44 = vld [vmem:[#allocation2 + $0x450] sm:$0xf] }
 0x23d   : > { %4880 = vmatmul.bf16.gmra.mxu3 %v5951_v63  ;;  %v5983_v40 = vor.u32 %v6452_v43, %v5982_v17  ;;  %v6456_v63 = vld [vmem:[#allocation2 + $0x44c] sm:$0xf] }
 0x23e   : > { %4969 = vmatmul.bf16.gmra.mxu0 %v5955_v58  ;;  %v4994_v23 = vmax.f32 %v4928_v16, 0.0  ;;  %v6012_v58 = vld [vmem:[#allocation2 + $0x46c] sm:$0xf0]  ;;  %v6457_v16 = vld [vmem:[#allocation2 + $0x454] sm:$0xf] }
 0x23f   : > { %v4752_v37 = vpop.f32.mrf.mxu2 }
 0x240   : > { %5026 = vst [vmem:[%s7796_s16 + $0x48] sm:$0xff] %v4994_v23  ;;  %v4753_v59 = vadd.f32 %v4752_v37, %v4664_v11  ;;  %v4841_v18 = vpop.f32.mrf.mxu3  ;;  %v6020_v23 = vld [vmem:[#allocation2 + $0x474] sm:$0xf0] }
 0x241   : > { %v4665_v9 = vpop.f32.mrf.mxu1  ;;  %v6023_v61 = vor.u32 %v6457_v16, %v6020_v23 }
 0x242   : > { %v4842_v34 = vadd.f32 %v4841_v18, %v4753_v59  ;;  %v4666_v49 = vadd.f32 %v4665_v9, %v7483_v55  ;;  %v6026_v59 = vld [vmem:[#allocation2 + $0x458] sm:$0xf] }
 0x243   : > { %v4932_v47 = vpop.f32.mrf.mxu0 }
 0x244   : > { %v4931_v42 = vadd.f32 %v4930_v0, %v4842_v34  ;;  %v6461_v0 = vld [vmem:[#allocation2 + $0x470] sm:$0xf0] }
 0x246   : > { %v4995_v30 = vmax.f32 %v4931_v42, 0.0  ;;  %v6019_v42 = vor.u32 %v6461_v0, %v6018_v44 }
 0x247   : > { %v4754_v51 = vpop.f32.mrf.mxu2 }
 0x248   : > { %5027 = vst [vmem:[%s7796_s16 + $0x50] sm:$0xff] %v4995_v30  ;;  %v4755_v54 = vadd.f32 %v4754_v51, %v4666_v49  ;;  %v4843_v24 = vpop.f32.mrf.mxu3 }
 0x249   : > { %v4668_v25 = vpop.f32.mrf.mxu1 }
 0x24a   : > { %v4844_v38 = vadd.f32 %v4843_v24, %v4755_v54  ;;  %v4669_v21 = vadd.f32 %v4668_v25, %v7501_v53  ;;  %v6462_v53 = vld [vmem:[#allocation2 + $0x478] sm:$0xf0] }
 0x24b   : > { %v4935_v28 = vpop.f32.mrf.mxu0  ;;  %v6027_v17 = vor.u32 %v6462_v53, %v6026_v59 }
 0x24c   : > { %v4933_v14 = vadd.f32 %v4932_v47, %v4844_v38  ;;  %4707 = vmatmul.bf16.gmra.mxu1 %v5979_v33  ;;  %4796 = vmatmul.bf16.gmra.mxu2 %v5983_v40  ;;  %v6015_v47 = vor.u32 %v6456_v63, %v6012_v58 }
 0x24d   : > { %4885 = vmatmul.bf16.gmra.mxu3 %v5987_v57 }
 0x24e   : > { %4974 = vmatmul.bf16.gmra.mxu0 %v5991_v1  ;;  %v4996_v55 = vmax.f32 %v4933_v14, 0.0 }
 0x24f   : > { %v4757_v39 = vpop.f32.mrf.mxu2 }
 0x250   : > { %5028 = vst [vmem:[%s7796_s16 + $0x58] sm:$0xff] %v4996_v55  ;;  %v4758_v3 = vadd.f32 %v4757_v39, %v4669_v21  ;;  %v4846_v15 = vpop.f32.mrf.mxu3 }
 0x251   : > { %v4670_v20 = vpop.f32.mrf.mxu1 }
 0x252   : > { %v4847_v27 = vadd.f32 %v4846_v15, %v4758_v3  ;;  %v4671_v37 = vadd.f32 %v4670_v20, %v7512_v7 }
 0x253   : > { %v4937_v12 = vpop.f32.mrf.mxu0 }
 0x254   : > { %v4936_v45 = vadd.f32 %v4935_v28, %v4847_v27 }
 0x256   : > { %v4997_v11 = vmax.f32 %v4936_v45, 0.0 }
 0x257   : > { %v4759_v18 = vpop.f32.mrf.mxu2 }
 0x258   : > { %5029 = vst [vmem:[%s7796_s16 + $0x60] sm:$0xff] %v4997_v11  ;;  %v4760_v9 = vadd.f32 %v4759_v18, %v4671_v37  ;;  %v4848_v34 = vpop.f32.mrf.mxu3 }
 0x259   : > { %v4673_v22 = vpop.f32.mrf.mxu1 }
 0x25a   : > { %v4849_v43 = vadd.f32 %v4848_v34, %v4760_v9  ;;  %v4674_v30 = vadd.f32 %v4673_v22, %v7530_v60 }
 0x25b   : > { %v4940_v26 = vpop.f32.mrf.mxu0 }
 0x25c   : > { %v4938_v10 = vadd.f32 %v4937_v12, %v4849_v43  ;;  %4712 = vmatmul.bf16.gmra.mxu1 %v6015_v47  ;;  %4801 = vmatmul.bf16.gmra.mxu2 %v6019_v42 }
 0x25d   : > { %4890 = vmatmul.bf16.gmra.mxu3 %v6023_v61 }
 0x25e   : > { %4979 = vmatmul.bf16.gmra.mxu0 %v6027_v17  ;;  %v4998_v7 = vmax.f32 %v4938_v10, 0.0 }
 0x25f   : > { %v4762_v49 = vpop.f32.mrf.mxu2 }
 0x260   : > { %5030 = vst [vmem:[%s7796_s16 + $0x68] sm:$0xff] %v4998_v7  ;;  %v4763_v29 = vadd.f32 %v4762_v49, %v4674_v30  ;;  %v4851_v4 = vpop.f32.mrf.mxu3 }
 0x261   : > { %v4675_v51 = vpop.f32.mrf.mxu1 }
 0x262   : > { %v4852_v54 = vadd.f32 %v4851_v4, %v4763_v29  ;;  %v4676_v25 = vadd.f32 %v4675_v51, %v7541_v62 }
 0x263   : > { %v4942_v24 = vpop.f32.mrf.mxu0 }
 0x264   : > { %v4941_v33 = vadd.f32 %v4940_v26, %v4852_v54 }
 0x266   : > { %v4999_v40 = vmax.f32 %v4941_v33, 0.0 }
 0x267   : > { %v4764_v57 = vpop.f32.mrf.mxu2 }
 0x268   : > { %5031 = vst [vmem:[%s7796_s16 + $0x70] sm:$0xff] %v4999_v40  ;;  %v4765_v1 = vadd.f32 %v4764_v57, %v4676_v25  ;;  %v4853_v38 = vpop.f32.mrf.mxu3 }
 0x269   : > { %v4678_v28 = vpop.f32.mrf.mxu1 }
 0x26a   : > { %v4854_v14 = vadd.f32 %v4853_v38, %v4765_v1  ;;  %v4679_v39 = vadd.f32 %v4678_v28, %v7559_v48 }
 0x26b   : > { %v4945_v60 = vpop.f32.mrf.mxu0 }
 0x26c   : > { %v4943_v55 = vadd.f32 %v4942_v24, %v4854_v14 }
 0x26e   : > { %v5000_v21 = vmax.f32 %v4943_v55, 0.0 }
 0x26f   : > { %v4767_v3 = vpop.f32.mrf.mxu2 }
 0x270   : > { %5032 = vst [vmem:[%s7796_s16 + $0x78] sm:$0xff] %v5000_v21  ;;  %v4768_v15 = vadd.f32 %v4767_v3, %v4679_v39  ;;  %v4856_v20 = vpop.f32.mrf.mxu3 }
 0x271   : > { %v4680_v27 = vpop.f32.mrf.mxu1 }
 0x272   : > { %v4857_v12 = vadd.f32 %v4856_v20, %v4768_v15  ;;  %v4681_v58 = vadd.f32 %v4680_v27, %v7570_v5 }
 0x273   : > { %v4947_v62 = vpop.f32.mrf.mxu0 }
 0x274   : > { %v4946_v45 = vadd.f32 %v4945_v60, %v4857_v12 }
 0x276   : > { %v5001_v63 = vmax.f32 %v4946_v45, 0.0 }
 0x277   : > { %v4769_v44 = vpop.f32.mrf.mxu2 }
 0x278   : > { %5033 = vst [vmem:[%s7796_s16 + $0x80] sm:$0xff] %v5001_v63  ;;  %v4770_v0 = vadd.f32 %v4769_v44, %v4681_v58  ;;  %v4858_v16 = vpop.f32.mrf.mxu3 }
 0x279   : > { %v4683_v23 = vpop.f32.mrf.mxu1 }
 0x27a   : > { %v4859_v11 = vadd.f32 %v4858_v16, %v4770_v0  ;;  %v4684_v53 = vadd.f32 %v4683_v23, %v7588_v52 }
 0x27b   : > { %v4950_v48 = vpop.f32.mrf.mxu0 }
 0x27c   : > { %v4948_v37 = vadd.f32 %v4947_v62, %v4859_v11 }
 0x27e   : > { %v5002_v59 = vmax.f32 %v4948_v37, 0.0 }
 0x27f   : > { %v4772_v18 = vpop.f32.mrf.mxu2 }
 0x280   : > { %5034 = vst [vmem:[%s7796_s16 + $0x88] sm:$0xff] %v5002_v59  ;;  %v4773_v9 = vadd.f32 %v4772_v18, %v4684_v53  ;;  %v4861_v34 = vpop.f32.mrf.mxu3 }
 0x281   : > { %v4685_v47 = vpop.f32.mrf.mxu1 }
 0x282   : > { %v4862_v42 = vadd.f32 %v4861_v34, %v4773_v9  ;;  %v4686_v17 = vadd.f32 %v4685_v47, %v7599_v35 }
 0x283   : > { %v4952_v5 = vpop.f32.mrf.mxu0 }
 0x284   : > { %v4951_v22 = vadd.f32 %v4950_v48, %v4862_v42 }
 0x286   : > { %v5003_v61 = vmax.f32 %v4951_v22, 0.0 }
 0x287   : > { %v4774_v43 = vpop.f32.mrf.mxu2 }
 0x288   : > { %5035 = vst [vmem:[%s7796_s16 + $0x90] sm:$0xff] %v5003_v61  ;;  %v4775_v26 = vadd.f32 %v4774_v43, %v4686_v17  ;;  %v4863_v10 = vpop.f32.mrf.mxu3 }
 0x289   : > { %v4688_v7 = vpop.f32.mrf.mxu1 }
 0x28a   : > { %v4864_v30 = vadd.f32 %v4863_v10, %v4775_v26  ;;  %v4689_v4 = vadd.f32 %v4688_v7, %v7617_v2 }
 0x28b   : > { %v4955_v52 = vpop.f32.mrf.mxu0 }
 0x28c   : > { %v4953_v49 = vadd.f32 %v4952_v5, %v4864_v30 }
 0x28e   : > { %v5004_v29 = vmax.f32 %v4953_v49, 0.0 }
 0x28f   : > { %v4777_v51 = vpop.f32.mrf.mxu2 }
 0x290   : > { %5036 = vst [vmem:[%s7796_s16 + $0x98] sm:$0xff] %v5004_v29  ;;  %v4778_v54 = vadd.f32 %v4777_v51, %v4689_v4  ;;  %v4866_v24 = vpop.f32.mrf.mxu3 }
 0x291   : > { %v4690_v33 = vpop.f32.mrf.mxu1 }
 0x292   : > { %v4867_v40 = vadd.f32 %v4866_v24, %v4778_v54  ;;  %v4691_v1 = vadd.f32 %v4690_v33, %v7628_v36 }
 0x293   : > { %v4957_v35 = vpop.f32.mrf.mxu0 }
 0x294   : > { %v4956_v25 = vadd.f32 %v4955_v52, %v4867_v40 }
 0x296   : > { %v5005_v57 = vmax.f32 %v4956_v25, 0.0 }
 0x297   : > { %v4779_v38 = vpop.f32.mrf.mxu2 }
 0x298   : > { %5037 = vst [vmem:[%s7796_s16 + $0xa0] sm:$0xff] %v5005_v57  ;;  %v4780_v28 = vadd.f32 %v4779_v38, %v4691_v1  ;;  %v4868_v14 = vpop.f32.mrf.mxu3 }
 0x299   : > { %v4693_v60 = vpop.f32.mrf.mxu1 }
 0x29a   : > { %v4869_v55 = vadd.f32 %v4868_v14, %v4780_v28  ;;  %v4694_v3 = vadd.f32 %v4693_v60, %v7646_v32 }
 0x29b   : > { %v4960_v2 = vpop.f32.mrf.mxu0 }
 0x29c   : > { %v4958_v21 = vadd.f32 %v4957_v35, %v4869_v55 }
 0x29e   : > { %v5006_v39 = vmax.f32 %v4958_v21, 0.0 }
 0x29f   : > { %v4782_v15 = vpop.f32.mrf.mxu2 }
 0x2a0   : > { %5038 = vst [vmem:[%s7796_s16 + $0xa8] sm:$0xff] %v5006_v39  ;;  %v4783_v20 = vadd.f32 %v4782_v15, %v4694_v3  ;;  %v4871_v27 = vpop.f32.mrf.mxu3 }
 0x2a1   : > { %v4695_v12 = vpop.f32.mrf.mxu1 }
 0x2a2   : > { %v4872_v62 = vadd.f32 %v4871_v27, %v4783_v20  ;;  %v4696_v58 = vadd.f32 %v4695_v12, %v7657_v56 }
 0x2a3   : > { %v4962_v36 = vpop.f32.mrf.mxu0 }
 0x2a4   : > { %v4961_v45 = vadd.f32 %v4960_v2, %v4872_v62 }
 0x2a6   : > { %v5007_v63 = vmax.f32 %v4961_v45, 0.0 }
 0x2a7   : > { %v4784_v44 = vpop.f32.mrf.mxu2 }
 0x2a8   : > { %5039 = vst [vmem:[%s7796_s16 + $0xb0] sm:$0xff] %v5007_v63  ;;  %v4785_v0 = vadd.f32 %v4784_v44, %v4696_v58  ;;  %v4873_v16 = vpop.f32.mrf.mxu3 }
 0x2a9   : > { %v4698_v23 = vpop.f32.mrf.mxu1 }
 0x2aa   : > { %v4874_v11 = vadd.f32 %v4873_v16, %v4785_v0  ;;  %v4699_v59 = vadd.f32 %v4698_v23, %v7675_v19 }
 0x2ab   : > { %v4965_v32 = vpop.f32.mrf.mxu0 }
 0x2ac   : > { %v4963_v48 = vadd.f32 %v4962_v36, %v4874_v11 }
 0x2ae   : > { %v5008_v37 = vmax.f32 %v4963_v48, 0.0 }
 0x2af   : > { %v4787_v53 = vpop.f32.mrf.mxu2 }
 0x2b0   : > { %5040 = vst [vmem:[%s7796_s16 + $0xb8] sm:$0xff] %v5008_v37  ;;  %v4788_v18 = vadd.f32 %v4787_v53, %v4699_v59  ;;  %v4876_v9 = vpop.f32.mrf.mxu3 }
 0x2b1   : > { %v4700_v34 = vpop.f32.mrf.mxu1 }
 0x2b2   : > { %v4877_v47 = vadd.f32 %v4876_v9, %v4788_v18  ;;  %v4701_v22 = vadd.f32 %v4700_v34, %v7686_v41 }
 0x2b3   : > { %v4967_v56 = vpop.f32.mrf.mxu0 }
 0x2b4   : > { %v4966_v42 = vadd.f32 %v4965_v32, %v4877_v47 }
 0x2b6   : > { %v5009_v5 = vmax.f32 %v4966_v42, 0.0 }
 0x2b7   : > { %v4789_v61 = vpop.f32.mrf.mxu2 }
 0x2b8   : > { %5041 = vst [vmem:[%s7796_s16 + $0xc0] sm:$0xff] %v5009_v5  ;;  %v4790_v17 = vadd.f32 %v4789_v61, %v4701_v22  ;;  %v4878_v43 = vpop.f32.mrf.mxu3 }
 0x2b9   : > { %v4703_v26 = vpop.f32.mrf.mxu1 }
 0x2ba   : > { %v4879_v10 = vadd.f32 %v4878_v43, %v4790_v17  ;;  %v4704_v52 = vadd.f32 %v4703_v26, %v7704_v46 }
 0x2bb   : > { %v4970_v19 = vpop.f32.mrf.mxu0 }
 0x2bc   : > { %v4968_v7 = vadd.f32 %v4967_v56, %v4879_v10 }
 0x2be   : > { %v5010_v30 = vmax.f32 %v4968_v7, 0.0 }
 0x2bf   : > { %v4792_v49 = vpop.f32.mrf.mxu2 }
 0x2c0   : > { %5042 = vst [vmem:[%s7796_s16 + $0xc8] sm:$0xff] %v5010_v30  ;;  %v4793_v29 = vadd.f32 %v4792_v49, %v4704_v52  ;;  %v4881_v4 = vpop.f32.mrf.mxu3 }
 0x2c1   : > { %v4705_v51 = vpop.f32.mrf.mxu1 }
 0x2c2   : > { %v4882_v54 = vadd.f32 %v4881_v4, %v4793_v29  ;;  %v4706_v40 = vadd.f32 %v4705_v51, %v7715_v50 }
 0x2c3   : > { %v4972_v41 = vpop.f32.mrf.mxu0 }
 0x2c4   : > { %v4971_v24 = vadd.f32 %v4970_v19, %v4882_v54 }
 0x2c6   : > { %v5011_v33 = vmax.f32 %v4971_v24, 0.0 }
 0x2c7   : > { %v4794_v35 = vpop.f32.mrf.mxu2 }
 0x2c8   : > { %5043 = vst [vmem:[%s7796_s16 + $0xd0] sm:$0xff] %v5011_v33  ;;  %v4795_v25 = vadd.f32 %v4794_v35, %v4706_v40  ;;  %v4883_v57 = vpop.f32.mrf.mxu3 }
 0x2c9   : > { %v4708_v1 = vpop.f32.mrf.mxu1 }
 0x2ca   : > { %v4884_v38 = vadd.f32 %v4883_v57, %v4795_v25  ;;  %v4709_v60 = vadd.f32 %v4708_v1, %v7733_v13 }
 0x2cb   : > { %v4975_v28 = vpop.f32.mrf.mxu0 }
 0x2cc   : > { %v4973_v46 = vadd.f32 %v4972_v41, %v4884_v38 }
 0x2ce   : > { %v5012_v14 = vmax.f32 %v4973_v46, 0.0 }
 0x2cf   : > { %v4797_v55 = vpop.f32.mrf.mxu2 }
 0x2d0   : > { %5044 = vst [vmem:[%s7796_s16 + $0xd8] sm:$0xff] %v5012_v14  ;;  %v4798_v2 = vadd.f32 %v4797_v55, %v4709_v60  ;;  %v4886_v21 = vpop.f32.mrf.mxu3 }
 0x2d1   : > { %v4710_v39 = vpop.f32.mrf.mxu1 }
 0x2d2   : > { %v4887_v3 = vadd.f32 %v4886_v21, %v4798_v2  ;;  %v4711_v20 = vadd.f32 %v4710_v39, %v7744_v8 }
 0x2d3   : > { %v4977_v27 = vpop.f32.mrf.mxu0 }
 0x2d4   : > { %v4976_v50 = vadd.f32 %v4975_v28, %v4887_v3 }
 0x2d6   : > { %v5013_v15 = vmax.f32 %v4976_v50, 0.0 }
 0x2d7   : > { %v4799_v12 = vpop.f32.mrf.mxu2 }
 0x2d8   : > { %5045 = vst [vmem:[%s7796_s16 + $0xe0] sm:$0xff] %v5013_v15  ;;  %v4800_v62 = vadd.f32 %v4799_v12, %v4711_v20  ;;  %v4888_v36 = vpop.f32.mrf.mxu3 }
 0x2d9   : > { %v4713_v45 = vpop.f32.mrf.mxu1 }
 0x2da   : > { %v4889_v63 = vadd.f32 %v4888_v36, %v4800_v62  ;;  %v4714_v44 = vadd.f32 %v4713_v45, %v7762_v6 }
 0x2db   : > { %v4980_v11 = vpop.f32.mrf.mxu0 }
 0x2dc   : > { %v4978_v13 = vadd.f32 %v4977_v27, %v4889_v63 }
 0x2de   : > { %v5014_v58 = vmax.f32 %v4978_v13, 0.0 }
 0x2df   : > { %v4802_v0 = vpop.f32.mrf.mxu2 }
 0x2e0   : > { %5046 = vst [vmem:[%s7796_s16 + $0xe8] sm:$0xff] %v5014_v58  ;;  %v4803_v16 = vadd.f32 %v4802_v0, %v4714_v44  ;;  %v4891_v23 = vpop.f32.mrf.mxu3 }
 0x2e1   : > { %v4715_v8 = vpop.f32.mrf.mxu1 }
 0x2e2   : > { %v4892_v32 = vadd.f32 %v4891_v23, %v4803_v16  ;;  %v4716_v59 = vadd.f32 %v4715_v8, %v7772_v31 }
 0x2e3   : > { %v4982_v47 = vpop.f32.mrf.mxu0 }
 0x2e4   : > { %v4981_v48 = vadd.f32 %v4980_v11, %v4892_v32 }
 0x2e6   : > { %v5015_v37 = vmax.f32 %v4981_v48, 0.0 }
 0x2e7   : > { %v4804_v53 = vpop.f32.mrf.mxu2 }
 0x2e8   : > { %5047 = vst [vmem:[%s7796_s16 + $0xf0] sm:$0xff] %v5015_v37  ;;  %v4805_v18 = vadd.f32 %v4804_v53, %v4716_v59  ;;  %v4893_v9 = vpop.f32.mrf.mxu3 }
 0x2ea   : > { %v4894_v34 = vadd.f32 %v4893_v9, %v4805_v18 }
 0x2ec   : > { %v4983_v56 = vadd.f32 %v4982_v47, %v4894_v34 }
 0x2ee   : > { %v5016_v6 = vmax.f32 %v4983_v56, 0.0 }
 0x2f0   : > { %5048 = vst [vmem:[%s7796_s16 + $0xf8] sm:$0xff] %v5016_v6 }
 0x2f1 PF: > { %s13_s14 = sadd.s32 1, %s6608_s14   ;;  %s7986_s12 = smov %s6604_s13 }
 0x2f2   : > { %p10_p5 = scmp.ge.s32.totalorder %s13_s14, 4   ;;  %s7987_s13 = smov %s7989_s15 }
 0x2f4   :  { %12 = sbr.rel (!%p10_p5) target bundleno = 2 (0x2), region = 65 }

// kernel: basic_block_forward.3
= control target key start
LH: loop header
LB: loop body
LE: loop exit
PB: predicated region body
PF: predicated region fallthrough
CT: control target
= control target key end

     0   :  { %s6894_s15 = smov 0   ;;  %s6896_s16 = smov 0   ;;  %s8272_s0 = inlined_call_operand.vmem [shape: bf16[2,1,18,18,128], index: 0, kind: input, shape index: {}]   ;;  %s8273_s1 = inlined_call_operand.vmem [shape: bf16[1152,128], index: 1, kind: input, shape index: {}]   ;;  %s8274_s2 = inlined_call_operand.vmem [shape: f32[1,128], index: 2, kind: input, shape index: {}]   ;;  %s8275_s3 = inlined_call_operand.vmem [shape: bf16[2,256,128], index: 3, kind: input, shape index: {}]   ;;  %s8276_s4 = inlined_call_operand.vmem [shape: f32[2,256,128], index: 4, kind: output, shape index: {}]  }
   0x1   :  { %s6898_s17 = smov 0  }
   0x2 LB: > { %s26_s18 = sadd.s32 1, %s6863_s16  ;;  %p5321_p0 = scmp.ge.s32.totalorder %s6867_s17, 1  ;;  %s6867_s17 = sphi %s6898_s17, %s14_s17   ;;  %s6863_s16 = sphi %s6896_s16, %s8298_s16   ;;  %s6859_s15 = sphi %s6894_s15, %s8297_s15  }
   0x3   : > { %p28_p1 = scmp.ge.s32.totalorder %s26_s18, 2  ;;  %p193_p2 = scmp.lt.s32.totalorder %s6867_s17, 3 }
   0x5   : > { %s8300_s18 = smov (%p28_p1, %s26_s18), 0  ;;  %p194_p3 = pnand %p5321_p0, %p193_p2 }
   0x7   : > { %197 = sbr.rel (%p194_p3) target bundleno = 755 (0x2f3), region = 36 }
   0xc   : > { %v6650_v0 = vld [vmem:[%s8273_s1 + $0x38] sm:$0xff]  ;;  %p232_p4 = scmp.lt.s32.totalorder %s6859_s15, 1  ;;  %v6649_v1 = vld [vmem:[%s8273_s1 + $0x30] sm:$0xff]  ;;  %v6648_v2 = vld [vmem:[%s8273_s1 + $0x28] sm:$0xff]  ;;  %vm373_vm0 = vsmask.f32 3328 }
   0xd   : > { %6794 = vmatpush.bf16.msra.mxu1 %v6650_v0  ;;  %6795 = vmatpush.bf16.msra.mxu2 %v6650_v0  ;;  %v6647_v8 = vld [vmem:[%s8273_s1 + $0x20] sm:$0xff]  ;;  %v6646_v13 = vld [vmem:[%s8273_s1 + $0x18] sm:$0xff]  ;;  %v6645_v18 = vld [vmem:[%s8273_s1 + $0x10] sm:$0xff]  ;;  %vm374_vm1 = vsmask.f32 7440  ;;  %vm920_vm2 = vcmask 1042432  }
   0xe   : > { %s8302_s15 = smov (!%p232_p4, %s6859_s15), 1  ;;  %6796 = vmatpush.bf16.msra.mxu3 %v6650_v0  ;;  %4247 = vmatpush.bf16.msra.mxu0 %v6650_v0  ;;  %v6644_v22 = vld [vmem:[%s8273_s1 + $0x8] sm:$0xff]  ;;  %v6643_v25 = vld [vmem:[%s8273_s1] sm:$0xff]  ;;  %v6666_v38 = vld [vmem:[%s8273_s1 + $0xb8] sm:$0xff]  ;;  %vm921_vm4 = vcmask 1046532  }
   0xf   : > { %s6818_s23 = smul.u32 216, %s8302_s15  ;;  %v6674_v39 = vld [vmem:[%s8273_s1 + $0xf8] sm:$0xff]  ;;  %v6665_v48 = vld [vmem:[%s8273_s1 + $0xb0] sm:$0xff]  ;;  %v6664_v52 = vld [vmem:[%s8273_s1 + $0xa8] sm:$0xff]  ;;  %s6498_s27 = sshll.u32 %s8302_s15, 8 }
  0x10   : > { %v6658_v46 = vld [vmem:[%s8273_s1 + $0x78] sm:$0xff]  ;;  %v6673_v49 = vld [vmem:[%s8273_s1 + $0xf0] sm:$0xff]  ;;  %v6672_v53 = vld [vmem:[%s8273_s1 + $0xe8] sm:$0xff]  ;;  %s8071_s30 = scalar_lea.vmem %s8276_s4, %s6498_s27 }
  0x11   : > { %6797 = vmatpush.bf16.msra.mxu1 %v6649_v1  ;;  %6798 = vmatpush.bf16.msra.mxu2 %v6649_v1  ;;  %s6927_s28 = scalar_lea.vmem %s8272_s0, %s6818_s23  ;;  %v6682_v47 = vld [vmem:[%s8273_s1 + $0x138] sm:$0xff]  ;;  %v6657_v50 = vld [vmem:[%s8273_s1 + $0x70] sm:$0xff]  ;;  %v6656_v54 = vld [vmem:[%s8273_s1 + $0x68] sm:$0xff]  ;;  %s6497_s23 = sshll.u32 %s8302_s15, 7 }
  0x12   : > { %6799 = vmatpush.bf16.msra.mxu3 %v6649_v1  ;;  %4248 = vmatpush.bf16.msra.mxu0 %v6649_v1  ;;  %v269_v3 = vld [vmem:[%s6927_s28 + $0x30] sm:$0xf]  ;;  %v270_v4 = vld [vmem:[%s6927_s28 + $0x34] sm:$0xf]  ;;  %v277_v5 = vld [vmem:[%s6927_s28 + $0x60] sm:$0xf]  ;;  %s8040_s26 = scalar_lea.vmem %s8275_s3, %s6497_s23 }
  0x13   : > { %301 = vst [vmem:[#allocation2 + $0x120] sm:$0xf] %v269_v3  ;;  %v278_v6 = vld [vmem:[%s6927_s28 + $0x64] sm:$0xf]  ;;  %v285_v7 = vld [vmem:[%s6927_s28 + $0x90] sm:$0xf]  ;;  %vm7074_vm3 = vmor %vm373_vm0, %vm374_vm1 }
  0x14   : > { %302 = vst [vmem:[#allocation2 + $0x144] sm:$0xf] %v270_v4  ;;  %v286_v9 = vld [vmem:[%s6927_s28 + $0x94] sm:$0xf]  ;;  %v261_v10 = vld [vmem:[%s6927_s28] sm:$0xf]  ;;  %vm7088_vm5 = vmor %vm920_vm2, %vm921_vm4 }
  0x15   : > { %6800 = vmatpush.bf16.msra.mxu1 %v6648_v2  ;;  %6801 = vmatpush.bf16.msra.mxu2 %v6648_v2  ;;  %309 = vst [vmem:[#allocation2 + $0x240] sm:$0xf] %v277_v5  ;;  %v262_v11 = vld [vmem:[%s6927_s28 + $0x4] sm:$0xf]  ;;  %v271_v12 = vld [vmem:[%s6927_s28 + $0x3c] sm:$0xf] }
  0x16   : > { %6802 = vmatpush.bf16.msra.mxu3 %v6648_v2  ;;  %4249 = vmatpush.bf16.msra.mxu0 %v6648_v2  ;;  %310 = vst [vmem:[#allocation2 + $0x264] sm:$0xf] %v278_v6  ;;  %v272_v14 = vld [vmem:[%s6927_s28 + $0x40] sm:$0xf]  ;;  %v279_v15 = vld [vmem:[%s6927_s28 + $0x6c] sm:$0xf] }
  0x17   : > { %317 = vst [vmem:[#allocation2 + $0x360] sm:$0xf] %v285_v7  ;;  %v280_v16 = vld [vmem:[%s6927_s28 + $0x70] sm:$0xf]  ;;  %v287_v17 = vld [vmem:[%s6927_s28 + $0x9c] sm:$0xf] }
  0x18   : > { %318 = vst [vmem:[#allocation2 + $0x384] sm:$0xf] %v286_v9  ;;  %v288_v19 = vld [vmem:[%s6927_s28 + $0xa0] sm:$0xf]  ;;  %v263_v20 = vld [vmem:[%s6927_s28 + $0xc] sm:$0xf] }
  0x19   : > { %6803 = vmatpush.bf16.msra.mxu1 %v6647_v8  ;;  %6804 = vmatpush.bf16.msra.mxu2 %v6647_v8  ;;  %293 = vst [vmem:[#allocation2] sm:$0xf] %v261_v10  ;;  %v264_v21 = vld [vmem:[%s6927_s28 + $0x10] sm:$0xf]  ;;  %v273_v23 = vld [vmem:[%s6927_s28 + $0x48] sm:$0xf] }
  0x1a   : > { %6805 = vmatpush.bf16.msra.mxu3 %v6647_v8  ;;  %4250 = vmatpush.bf16.msra.mxu0 %v6647_v8  ;;  %294 = vst [vmem:[#allocation2 + $0x24] sm:$0xf] %v262_v11  ;;  %v274_v24 = vld [vmem:[%s6927_s28 + $0x4c] sm:$0xf]  ;;  %v5777_v26 = vld [vmem:[#allocation2 + $0x120] sm:$0xf] }
  0x1b   : > { %303 = vst [vmem:[#allocation2 + $0x168] sm:$0xf] %v271_v12  ;;  %v6539_v27 = vld [vmem:[#allocation2 + $0x140] sm:$0xf0]  ;;  %v281_v30 = vld [vmem:[%s6927_s28 + $0x78] sm:$0xf] }
  0x1c   : > { %304 = vst [vmem:[#allocation2 + $0x18c] sm:$0xf] %v272_v14  ;;  %v5921_v28 = vld [vmem:[#allocation2 + $0x240] sm:$0xf]  ;;  %v282_v33 = vld [vmem:[%s6927_s28 + $0x7c] sm:$0xf]  ;;  %v5778_v41 = vor.u32 %v6539_v27, %v5777_v26 }
  0x1d   : > { %6806 = vmatpush.bf16.msra.mxu1 %v6646_v13  ;;  %6807 = vmatpush.bf16.msra.mxu2 %v6646_v13  ;;  %311 = vst [vmem:[#allocation2 + $0x288] sm:$0xf] %v279_v15  ;;  %v6575_v29 = vld [vmem:[#allocation2 + $0x260] sm:$0xf0]  ;;  %v289_v35 = vld [vmem:[%s6927_s28 + $0xa8] sm:$0xf] }
  0x1e   : > { %6808 = vmatpush.bf16.msra.mxu3 %v6646_v13  ;;  %4251 = vmatpush.bf16.msra.mxu0 %v6646_v13  ;;  %312 = vst [vmem:[#allocation2 + $0x2ac] sm:$0xf] %v280_v16  ;;  %v6065_v31 = vld [vmem:[#allocation2 + $0x360] sm:$0xf]  ;;  %v290_v37 = vld [vmem:[%s6927_s28 + $0xac] sm:$0xf]  ;;  %v5922_v42 = vor.u32 %v6575_v29, %v5921_v28 }
  0x1f   : > { %319 = vst [vmem:[#allocation2 + $0x3a8] sm:$0xf] %v287_v17  ;;  %v6611_v32 = vld [vmem:[#allocation2 + $0x380] sm:$0xf0]  ;;  %v265_v40 = vld [vmem:[%s6927_s28 + $0x18] sm:$0xf] }
  0x20   : > { %320 = vst [vmem:[#allocation2 + $0x3cc] sm:$0xf] %v288_v19  ;;  %v5633_v34 = vld [vmem:[#allocation2] sm:$0xf]  ;;  %v266_v43 = vld [vmem:[%s6927_s28 + $0x1c] sm:$0xf]  ;;  %v6066_v44 = vor.u32 %v6611_v32, %v6065_v31 }
  0x21   : > { %6809 = vmatpush.bf16.msra.mxu1 %v6645_v18  ;;  %6810 = vmatpush.bf16.msra.mxu2 %v6645_v18  ;;  %295 = vst [vmem:[#allocation2 + $0x48] sm:$0xf] %v263_v20  ;;  %v6503_v36 = vld [vmem:[#allocation2 + $0x20] sm:$0xf0]  ;;  %v6681_v51 = vld [vmem:[%s8273_s1 + $0x130] sm:$0xff]  ;;  %v6680_v57 = vld [vmem:[%s8273_s1 + $0x128] sm:$0xff] }
  0x22   : > { %6811 = vmatpush.bf16.msra.mxu3 %v6645_v18  ;;  %4252 = vmatpush.bf16.msra.mxu0 %v6645_v18  ;;  %296 = vst [vmem:[#allocation2 + $0x6c] sm:$0xf] %v264_v21  ;;  %v5634_v45 = vor.u32 %v6503_v36, %v5633_v34  ;;  %v6663_v55 = vld [vmem:[%s8273_s1 + $0xa0] sm:$0xff]  ;;  %v275_v58 = vld [vmem:[%s6927_s28 + $0x54] sm:$0xf]  ;;  %v6662_v12 = vld [vmem:[%s8273_s1 + $0x98] sm:$0xff] }
  0x23   : > { %305 = vst [vmem:[#allocation2 + $0x1b0] sm:$0xf] %v273_v23  ;;  %v6671_v56 = vld [vmem:[%s8273_s1 + $0xe0] sm:$0xff]  ;;  %v276_v59 = vld [vmem:[%s6927_s28 + $0x58] sm:$0xf]  ;;  %v6653_v31 = vld [vmem:[%s8273_s1 + $0x50] sm:$0xff] }
  0x24   : > { %306 = vst [vmem:[#allocation2 + $0x1d4] sm:$0xf] %v274_v24  ;;  %v283_v60 = vld [vmem:[%s6927_s28 + $0x84] sm:$0xf]  ;;  %v284_v61 = vld [vmem:[%s6927_s28 + $0x88] sm:$0xf] }
  0x25   : > { %6812 = vmatpush.bf16.msra.mxu1 %v6644_v22  ;;  %6813 = vmatpush.bf16.msra.mxu2 %v6644_v22  ;;  %313 = vst [vmem:[#allocation2 + $0x2d0] sm:$0xf] %v281_v30  ;;  %v5813_v62 = vld [vmem:[#allocation2 + $0x168] sm:$0xf]  ;;  %v6548_v63 = vld [vmem:[#allocation2 + $0x188] sm:$0xf0] }
  0x26   : > { %6814 = vmatpush.bf16.msra.mxu3 %v6644_v22  ;;  %4253 = vmatpush.bf16.msra.mxu0 %v6644_v22  ;;  %314 = vst [vmem:[#allocation2 + $0x2f4] sm:$0xf] %v282_v33  ;;  %v5957_v0 = vld [vmem:[#allocation2 + $0x288] sm:$0xf]  ;;  %v6584_v1 = vld [vmem:[#allocation2 + $0x2a8] sm:$0xf0]  ;;  %v5814_v14 = vor.u32 %v6548_v63, %v5813_v62 }
  0x27   : > { %321 = vst [vmem:[#allocation2 + $0x3f0] sm:$0xf] %v289_v35  ;;  %v291_v2 = vld [vmem:[%s6927_s28 + $0xb4] sm:$0xf]  ;;  %v6101_v3 = vld [vmem:[#allocation2 + $0x3a8] sm:$0xf]  ;;  %v5958_v15 = vor.u32 %v6584_v1, %v5957_v0 }
  0x28   : > { %322 = vst [vmem:[#allocation2 + $0x414] sm:$0xf] %v290_v37  ;;  %v6620_v4 = vld [vmem:[#allocation2 + $0x3c8] sm:$0xf0]  ;;  %v5669_v5 = vld [vmem:[#allocation2 + $0x48] sm:$0xf] }
  0x29   : > { %6815 = vmatpush.bf16.msra.mxu1 %v6643_v25  ;;  %6816 = vmatpush.bf16.msra.mxu2 %v6643_v25  ;;  %297 = vst [vmem:[#allocation2 + $0x90] sm:$0xf] %v265_v40  ;;  %v292_v6 = vld [vmem:[%s6927_s28 + $0xb8] sm:$0xf]  ;;  %v6512_v7 = vld [vmem:[#allocation2 + $0x68] sm:$0xf0]  ;;  %v6102_v16 = vor.u32 %v6620_v4, %v6101_v3 }
  0x2a   : > { %6817 = vmatpush.bf16.msra.mxu3 %v6643_v25  ;;  %4254 = vmatpush.bf16.msra.mxu0 %v6643_v25  ;;  %298 = vst [vmem:[#allocation2 + $0xb4] sm:$0xf] %v266_v43  ;;  %v267_v8 = vld [vmem:[%s6927_s28 + $0x24] sm:$0xf]  ;;  %v268_v11 = vld [vmem:[%s6927_s28 + $0x28] sm:$0xf]  ;;  %v5670_v17 = vor.u32 %v6512_v7, %v5669_v5 }
  0x2b   : > { %307 = vst [vmem:[#allocation2 + $0x1f8] sm:$0xf] %v275_v58  ;;  %v6655_v9 = vld [vmem:[%s8273_s1 + $0x60] sm:$0xff]  ;;  %v6670_v13 = vld [vmem:[%s8273_s1 + $0xd8] sm:$0xff]  ;;  %v6661_v24 = vld [vmem:[%s8273_s1 + $0x90] sm:$0xff] }
  0x2c   : > { %4275 = vmatmul.bf16.vlgmr.msra.gmra.mxu1 %v5778_v41  ;;  %4295 = vmatmul.bf16.vlgmr.msra.gmra.mxu2 %v5922_v42  ;;  %308 = vst [vmem:[#allocation2 + $0x21c] sm:$0xf] %v276_v59  ;;  %v6679_v10 = vld [vmem:[%s8273_s1 + $0x120] sm:$0xff]  ;;  %v6654_v19 = vld [vmem:[%s8273_s1 + $0x58] sm:$0xff]  ;;  %v6669_v25 = vld [vmem:[%s8273_s1 + $0xd0] sm:$0xff] }
  0x2d   : > { %4425 = vmatpush.bf16.msrb.mxu2 %v6666_v38  ;;  %4315 = vmatmul.bf16.vlgmr.msra.gmra.mxu3 %v6066_v44  ;;  %315 = vst [vmem:[#allocation2 + $0x318] sm:$0xf] %v283_v60  ;;  %v325_v18 = vld [vmem:[%s6927_s28] sm:$0xf]  ;;  %v6678_v20 = vld [vmem:[%s8273_s1 + $0x118] sm:$0xff]  ;;  %v6677_v32 = vld [vmem:[%s8273_s1 + $0x110] sm:$0xff] }
  0x2e   : > { %4514 = vmatpush.bf16.msrb.mxu3 %v6674_v39  ;;  %4255 = vmatmul.bf16.vlgmr.msra.gmra.mxu0 %v5634_v45  ;;  %316 = vst [vmem:[#allocation2 + $0x33c] sm:$0xf] %v284_v61  ;;  %v326_v21 = vld [vmem:[%s6927_s28 + $0x4] sm:$0xf]  ;;  %v377_v22 = vshrl.u32 %v325_v18, 16  ;;  %v380_v23 = vshll.u32 %v325_v18, 16 }
  0x2f   : > { %4336 = vmatpush.bf16.msrb.mxu1 %v6658_v46  ;;  %4603 = vmatpush.bf16.msrb.mxu0 %v6682_v47  ;;  %323 = vst [vmem:[#allocation2 + $0x438] sm:$0xf] %v291_v2  ;;  %v386_v26 = vshll.u32 %v326_v21, 16  ;;  %v390_v27 = vshrl.u32 %v326_v21, 16  ;;  %v7045_v30 = vld [vmem:[%s6927_s28 + $0xc] sm:$0xf] }
  0x30   : > { %324 = vst [vmem:[#allocation2 + $0x45c] sm:$0xf] %v292_v6  ;;  %v379_v28 = vrot.slane %v377_v22, 4  ;;  %v382_v29 = vrot.slane %v380_v23, 5  ;;  %v6660_v34 = vld [vmem:[%s8273_s1 + $0x88] sm:$0xff]  ;;  %v6659_v40 = vld [vmem:[%s8273_s1 + $0x80] sm:$0xff] }
  0x31   : > { %4426 = vmatpush.bf16.msrb.mxu2 %v6665_v48  ;;  %299 = vst [vmem:[#allocation2 + $0xd8] sm:$0xf] %v267_v8  ;;  %v6668_v35 = vld [vmem:[%s8273_s1 + $0xc8] sm:$0xff]  ;;  %v388_v36 = vrot.slane %v386_v26, 5  ;;  %v392_v37 = vrot.slane %v390_v27, 4  ;;  %v6667_v41 = vld [vmem:[%s8273_s1 + $0xc0] sm:$0xff] }
  0x32   : > { %4515 = vmatpush.bf16.msrb.mxu3 %v6673_v49  ;;  %300 = vst [vmem:[#allocation2 + $0xfc] sm:$0xf] %v268_v11  ;;  %v383_v33 = vor.u32 %v382_v29, %v379_v28  ;;  %v6652_v38 = vld [vmem:[%s8273_s1 + $0x48] sm:$0xff]  ;;  %v1216_v46 = vshrl.u32 %v7045_v30, 16  ;;  %v824_v49 = vld [vmem:[%s6927_s28] sm:$0xe] }
  0x33   : > { %4337 = vmatpush.bf16.msrb.mxu1 %v6657_v50  ;;  %4604 = vmatpush.bf16.msrb.mxu0 %v6681_v51  ;;  %v6676_v42 = vld [vmem:[%s8273_s1 + $0x108] sm:$0xff]  ;;  %v393_v45 = vor.u32 %v392_v37, %v388_v36  ;;  %v825_v50 = vld [vmem:[%s6927_s28 + $0x4] sm:$0xf]  ;;  %v5376_v51 = vld [vmem:[%s6927_s28 + $0x10] sm:$0xf]  ;;  %v5327_v60 = vrot.slane %v824_v49, 9 }
  0x34   : > { %v384_v39 = vrot.slane %v383_v33, 4  ;;  %v327_v43 = vld [vmem:[%s6927_s28 + $0x8] sm:$0x1]  ;;  %v6137_v61 = vld [vmem:[#allocation2 + $0x3f0] sm:$0xf]  ;;  %v925_v2 = vrot.slane %v825_v50, 5 }
  0x35   : > { %4427 = vmatpush.bf16.msrb.mxu2 %v6664_v52  ;;  %v396_v48 = vshll.u32 %v327_v43, 16  ;;  %v1219_v52 = vshll.u32 %v7045_v30, 16  ;;  %v826_v58 = vld [vmem:[%s6927_s28 + $0x8] sm:$0x1]  ;;  %v6629_v62 = vld [vmem:[#allocation2 + $0x410] sm:$0xf0] }
  0x36   : > { %4516 = vmatpush.bf16.msrb.mxu3 %v6672_v53  ;;  %v389_v47 = vsel %vm7074_vm3, %v384_v39, %v388_v36  ;;  %v5849_v53 = vld [vmem:[#allocation2 + $0x1b0] sm:$0xf]  ;;  %v6521_v0 = vld [vmem:[#allocation2 + $0xb0] sm:$0xf0]  ;;  %v928_v3 = vrot.slane %v826_v58, 5  ;;  %v1218_v5 = vrot.slane %v1216_v46, 4  ;;  %v926_v11 = vsel %vm7088_vm5, %v5327_v60, %v925_v2 }
  0x37   : > { %4338 = vmatpush.bf16.msrb.mxu1 %v6656_v54  ;;  %4605 = vmatpush.bf16.msrb.mxu0 %v6680_v57  ;;  %v6557_v54 = vld [vmem:[#allocation2 + $0x1d0] sm:$0xf0]  ;;  %v394_v57 = vrot.slane %v393_v45, 4  ;;  %792 = vst [vmem:[#allocation2 + $0x4] sm:$0xf] %v389_v47  ;;  %v398_v1 = vrot.slane %v396_v48, 5  ;;  %v6138_v21 = vor.u32 %v6629_v62, %v6137_v61 }
  0x38   : > { %v5705_v63 = vld [vmem:[#allocation2 + $0x90] sm:$0xf]  ;;  %v5343_v4 = vld [vmem:[%s6927_s28 + $0xc] sm:$0xf]  ;;  %v5377_v7 = vld [vmem:[%s6927_s28 + $0x14] sm:$0x1] }
  0x39   : > { %4428 = vmatpush.bf16.msrb.mxu2 %v6663_v55  ;;  %v5993_v55 = vld [vmem:[#allocation2 + $0x2d0] sm:$0xf]  ;;  %1135 = vst [vmem:[#allocation2 + $0xc] sm:$0xf] %v5343_v4  ;;  %v6651_v8 = vld [vmem:[%s8273_s1 + $0x40] sm:$0xff]  ;;  %v5706_v22 = vor.u32 %v6521_v0, %v5705_v63  ;;  %v6706_v37 = vld [vmem:[%s8273_s1 + $0x1f8] sm:$0xff] }
  0x3a   : > { %4517 = vmatpush.bf16.msrb.mxu3 %v6671_v56  ;;  %v6593_v56 = vld [vmem:[#allocation2 + $0x2f0] sm:$0xf0]  ;;  %v5344_v6 = vld [vmem:[%s6927_s28 + $0x10] sm:$0xf]  ;;  %1067 = vst [vmem:[#allocation2 + $0x8] sm:$0xf] %v926_v11 }
  0x3b   : > { %4339 = vmatpush.bf16.msrb.mxu1 %v6655_v9  ;;  %4606 = vmatpush.bf16.msrb.mxu0 %v6679_v10  ;;  %v6675_v9 = vld [vmem:[%s8273_s1 + $0x100] sm:$0xff]  ;;  %v399_v10 = vsel %vm7074_vm3, %v394_v57, %v398_v1  ;;  %1136 = vst [vmem:[#allocation2 + $0x30] sm:$0xf] %v5344_v6  ;;  %v5994_v18 = vor.u32 %v6593_v56, %v5993_v55  ;;  %v328_v26 = vld [vmem:[%s6927_s28 + $0xc] sm:$0xf] }
  0x3c   : > { %4280 = vmatmul.bf16.gmra.mxu1 %v5814_v14  ;;  %4300 = vmatmul.bf16.gmra.mxu2 %v5958_v15  ;;  %793 = vst [vmem:[#allocation2 + $0x28] sm:$0xf] %v399_v10  ;;  %v1225_v14 = vshll.u32 %v5376_v51, 16  ;;  %v1229_v15 = vshrl.u32 %v5376_v51, 16  ;;  %v329_v29 = vld [vmem:[%s6927_s28 + $0x10] sm:$0xf] }
  0x3d   : > { %4429 = vmatpush.bf16.msrb.mxu2 %v6662_v12  ;;  %4320 = vmatmul.bf16.gmra.mxu3 %v6102_v16  ;;  %v927_v12 = vrot.slane %v925_v2, 4  ;;  %v1235_v16 = vshll.u32 %v5377_v7, 16  ;;  %v401_v30 = vshrl.u32 %v328_v26, 16  ;;  %v410_v33 = vshll.u32 %v329_v29, 16  ;;  %v330_v43 = vld [vmem:[%s6927_s28 + $0x14] sm:$0x1] }
  0x3e   : > { %4518 = vmatpush.bf16.msrb.mxu3 %v6670_v13  ;;  %4260 = vmatmul.bf16.gmra.mxu0 %v5670_v17  ;;  %v1221_v13 = vrot.slane %v1219_v52, 5  ;;  %v5850_v17 = vor.u32 %v6557_v54, %v5849_v53  ;;  %v1227_v23 = vrot.slane %v1225_v14, 5  ;;  %v420_v48 = vshll.u32 %v330_v43, 16  ;;  %v5378_v49 = vld [vmem:[%s6927_s28 + $0x18] sm:$0xf] }
  0x3f   : > { %4340 = vmatpush.bf16.msrb.mxu1 %v6654_v19  ;;  %4607 = vmatpush.bf16.msrb.mxu0 %v6678_v20  ;;  %v929_v19 = vsel %vm7088_vm5, %v927_v12, %v928_v3  ;;  %v1237_v28 = vrot.slane %v1235_v16, 5  ;;  %v403_v39 = vrot.slane %v401_v30, 4  ;;  %v412_v45 = vrot.slane %v410_v33, 5  ;;  %v827_v50 = vld [vmem:[%s6927_s28 + $0xc] sm:$0xe] }
  0x40   : > { %v1222_v20 = vor.u32 %v1221_v13, %v1218_v5  ;;  %1068 = vst [vmem:[#allocation2 + $0x2c] sm:$0xf] %v929_v19  ;;  %v828_v51 = vld [vmem:[%s6927_s28 + $0x10] sm:$0xf]  ;;  %v829_v52 = vld [vmem:[%s6927_s28 + $0x14] sm:$0x1] }
  0x41   : > { %4430 = vmatpush.bf16.msrb.mxu2 %v6661_v24  ;;  %v1231_v24 = vrot.slane %v1229_v15, 4  ;;  %v5379_v53 = vld [vmem:[%s6927_s28 + $0x1c] sm:$0xf]  ;;  %v422_v56 = vrot.slane %v420_v48, 5  ;;  %v5328_v57 = vrot.slane %v827_v50, 9  ;;  %v932_v0 = vrot.slane %v828_v51, 5 }
  0x42   : > { %4519 = vmatpush.bf16.msrb.mxu3 %v6669_v25  ;;  %v1223_v25 = vrot.slane %v1222_v20, 4  ;;  %v5345_v58 = vld [vmem:[%s6927_s28 + $0x18] sm:$0xf]  ;;  %v6566_v61 = vld [vmem:[#allocation2 + $0x218] sm:$0xf0]  ;;  %v935_v1 = vrot.slane %v829_v52, 5 }
  0x43   : > { %4341 = vmatpush.bf16.msrb.mxu1 %v6653_v31  ;;  %4608 = vmatpush.bf16.msrb.mxu0 %v6677_v32  ;;  %v1232_v27 = vor.u32 %v1231_v24, %v1227_v23  ;;  %v404_v31 = vshll.u32 %v328_v26, 16  ;;  %v5885_v60 = vld [vmem:[#allocation2 + $0x1f8] sm:$0xf]  ;;  %v6602_v63 = vld [vmem:[#allocation2 + $0x338] sm:$0xf0]  ;;  %v933_v10 = vsel %vm7088_vm5, %v5328_v57, %v932_v0  ;;  %v934_v11 = vrot.slane %v932_v0, 4 }
  0x44   : > { %v1228_v32 = vsel %vm7074_vm3, %v1223_v25, %v1227_v23  ;;  %v6029_v62 = vld [vmem:[#allocation2 + $0x318] sm:$0xf]  ;;  %v5346_v2 = vld [vmem:[%s6927_s28 + $0x1c] sm:$0xf]  ;;  %1137 = vst [vmem:[#allocation2 + $0x54] sm:$0xf] %v5345_v58 }
  0x45   : > { %4431 = vmatpush.bf16.msrb.mxu2 %v6660_v34  ;;  %v414_v34 = vshrl.u32 %v329_v29, 16  ;;  %v1233_v36 = vrot.slane %v1232_v27, 4  ;;  %1631 = vst [vmem:[#allocation2 + $0x10] sm:$0xf] %v1228_v32  ;;  %v6173_v3 = vld [vmem:[#allocation2 + $0x438] sm:$0xf] }
  0x46   : > { %4520 = vmatpush.bf16.msrb.mxu3 %v6668_v35  ;;  %v6698_v35 = vld [vmem:[%s8273_s1 + $0x1b8] sm:$0xff]  ;;  %1138 = vst [vmem:[#allocation2 + $0x78] sm:$0xf] %v5346_v2  ;;  %v5380_v12 = vld [vmem:[%s6927_s28 + $0x20] sm:$0x1]  ;;  %v1243_v13 = vshll.u32 %v5378_v49, 16 }
  0x47   : > { %4342 = vmatpush.bf16.msrb.mxu1 %v6652_v38  ;;  %4609 = vmatpush.bf16.msrb.mxu0 %v6676_v42  ;;  %v6690_v38 = vld [vmem:[%s8273_s1 + $0x178] sm:$0xff]  ;;  %v416_v47 = vrot.slane %v414_v34, 4  ;;  %1069 = vst [vmem:[#allocation2 + $0x50] sm:$0xf] %v933_v10  ;;  %v1249_v16 = vshll.u32 %v5379_v53, 16  ;;  %v1259_v20 = vshll.u32 %v5380_v12, 16 }
  0x48   : > { %v6714_v42 = vld [vmem:[%s8273_s1 + $0x238] sm:$0xff]  ;;  %v1245_v19 = vrot.slane %v1243_v13, 5  ;;  %v6499_v0 = vld [vmem:[#allocation2 + $0x4] sm:$0xf]  ;;  %v5641_v2 = vld [vmem:[#allocation2 + $0x8] sm:$0xf] }
  0x49   : > { %4432 = vmatpush.bf16.msrb.mxu2 %v6659_v40  ;;  %v406_v40 = vrot.slane %v404_v31, 5  ;;  %v417_v55 = vor.u32 %v416_v47, %v412_v45  ;;  %v6638_v4 = vld [vmem:[#allocation2 + $0x458] sm:$0xf0]  ;;  %v5741_v5 = vld [vmem:[#allocation2 + $0xd8] sm:$0xf]  ;;  %v1251_v23 = vrot.slane %v1249_v16, 5 }
  0x4a   : > { %4521 = vmatpush.bf16.msrb.mxu3 %v6667_v41  ;;  %v1238_v41 = vsel %vm7074_vm3, %v1233_v36, %v1237_v28  ;;  %v6530_v6 = vld [vmem:[#allocation2 + $0xf8] sm:$0xf0]  ;;  %v6174_v25 = vor.u32 %v6638_v4, %v6173_v3  ;;  %v1261_v28 = vrot.slane %v1259_v20, 5  ;;  %v331_v29 = vld [vmem:[%s6927_s28 + $0x18] sm:$0xf] }
  0x4b   : > { %4343 = vmatpush.bf16.msrb.mxu1 %v6651_v8  ;;  %4610 = vmatpush.bf16.msrb.mxu0 %v6675_v9  ;;  %1632 = vst [vmem:[#allocation2 + $0x34] sm:$0xf] %v1238_v41  ;;  %v407_v46 = vor.u32 %v406_v40, %v403_v39  ;;  %v418_v8 = vrot.slane %v417_v55, 4  ;;  %v1240_v9 = vshrl.u32 %v5378_v49, 16  ;;  %v5742_v26 = vor.u32 %v6530_v6, %v5741_v5  ;;  %v332_v30 = vld [vmem:[%s6927_s28 + $0x1c] sm:$0xf] }
  0x4c   : > { %4285 = vmatmul.bf16.gmra.mxu1 %v5850_v17  ;;  %4305 = vmatmul.bf16.gmra.mxu2 %v5994_v18  ;;  %v1253_v17 = vshrl.u32 %v5379_v53, 16  ;;  %v936_v18 = vsel %vm7088_vm5, %v934_v11, %v935_v1  ;;  %v425_v32 = vshrl.u32 %v331_v29, 16  ;;  %v428_v33 = vshll.u32 %v331_v29, 16  ;;  %v5381_v40 = vld [vmem:[%s6927_s28 + $0x24] sm:$0xf] }
  0x4d   : > { %4325 = vmatmul.bf16.gmra.mxu3 %v6138_v21  ;;  %4781 = vmatpush.bf16.msra.mxu2 %v6698_v35  ;;  %v408_v54 = vrot.slane %v407_v46, 4  ;;  %v423_v14 = vsel %vm7074_vm3, %v418_v8, %v422_v56  ;;  %v1242_v15 = vrot.slane %v1240_v9, 4  ;;  %v5886_v21 = vor.u32 %v6566_v61, %v5885_v60  ;;  %1070 = vst [vmem:[#allocation2 + $0x74] sm:$0xf] %v936_v18  ;;  %v830_v50 = vld [vmem:[%s6927_s28 + $0x18] sm:$0xe] }
  0x4e   : > { %4265 = vmatmul.bf16.gmra.mxu0 %v5706_v22  ;;  %4870 = vmatpush.bf16.msra.mxu3 %v6706_v37  ;;  %795 = vst [vmem:[#allocation2 + $0x70] sm:$0xf] %v423_v14  ;;  %v6030_v22 = vor.u32 %v6602_v63, %v6029_v62  ;;  %v1255_v24 = vrot.slane %v1253_v17, 4  ;;  %v434_v34 = vshll.u32 %v332_v30, 16  ;;  %v438_v36 = vshrl.u32 %v332_v30, 16 }
  0x4f   : > { %4692 = vmatpush.bf16.msra.mxu1 %v6690_v38  ;;  %4959 = vmatpush.bf16.msra.mxu0 %v6714_v42  ;;  %v413_v7 = vsel %vm7074_vm3, %v408_v54, %v412_v45  ;;  %v1246_v27 = vor.u32 %v1245_v19, %v1242_v15  ;;  %v427_v38 = vrot.slane %v425_v32, 4  ;;  %v430_v39 = vrot.slane %v428_v33, 5  ;;  %v333_v42 = vld [vmem:[%s6927_s28 + $0x20] sm:$0x1]  ;;  %v831_v54 = vld [vmem:[%s6927_s28 + $0x1c] sm:$0xf] }
  0x50   : > { %794 = vst [vmem:[#allocation2 + $0x4c] sm:$0xf] %v413_v7  ;;  %v1256_v31 = vor.u32 %v1255_v24, %v1251_v23  ;;  %v436_v43 = vrot.slane %v434_v34, 5  ;;  %v440_v45 = vrot.slane %v438_v36, 4  ;;  %v444_v48 = vshll.u32 %v333_v42, 16  ;;  %v6705_v42 = vld [vmem:[%s8273_s1 + $0x1f0] sm:$0xff] }
  0x51   : > { %v1247_v35 = vrot.slane %v1246_v27, 4  ;;  %v431_v47 = vor.u32 %v430_v39, %v427_v38  ;;  %v1264_v51 = vshrl.u32 %v5381_v40, 16  ;;  %v832_v55 = vld [vmem:[%s6927_s28 + $0x20] sm:$0x1]  ;;  %v5329_v57 = vrot.slane %v830_v50, 9 }
  0x52   : > { %v1257_v37 = vrot.slane %v1256_v31, 4  ;;  %v441_v49 = vor.u32 %v440_v45, %v436_v43  ;;  %v446_v53 = vrot.slane %v444_v48, 5  ;;  %v939_v58 = vrot.slane %v831_v54, 5  ;;  %v5382_v61 = vld [vmem:[%s6927_s28 + $0x28] sm:$0xf]  ;;  %v6713_v45 = vld [vmem:[%s8273_s1 + $0x230] sm:$0xff]  ;;  %4871 = vmatpush.bf16.msra.mxu3 %v6705_v42 }
  0x53   : > { %v1252_v41 = vsel %vm7074_vm3, %v1247_v35, %v1251_v23  ;;  %v432_v52 = vrot.slane %v431_v47, 4  ;;  %v942_v60 = vrot.slane %v832_v55, 5  ;;  %v5383_v63 = vld [vmem:[%s6927_s28 + $0x2c] sm:$0x1]  ;;  %v5635_v1 = vld [vmem:[#allocation2 + $0x24] sm:$0xf0]  ;;  %4960 = vmatpush.bf16.msra.mxu0 %v6713_v45 }
  0x54   : > { %v1262_v46 = vsel %vm7074_vm3, %v1257_v37, %v1261_v28  ;;  %1633 = vst [vmem:[#allocation2 + $0x58] sm:$0xf] %v1252_v41  ;;  %v442_v56 = vrot.slane %v441_v49, 4  ;;  %v6504_v3 = vld [vmem:[#allocation2 + $0x28] sm:$0xf0]  ;;  %v940_v5 = vsel %vm7088_vm5, %v5329_v57, %v939_v58  ;;  %v941_v6 = vrot.slane %v939_v58, 4 }
  0x55   : > { %1634 = vst [vmem:[#allocation2 + $0x7c] sm:$0xf] %v1262_v46  ;;  %v437_v62 = vsel %vm7074_vm3, %v432_v52, %v436_v43  ;;  %v5347_v7 = vld [vmem:[%s6927_s28 + $0x24] sm:$0xf]  ;;  %v6500_v8 = vld [vmem:[#allocation2 + $0xc] sm:$0xf]  ;;  %v5642_v23 = vor.u32 %v6504_v3, %v5641_v2 }
  0x56   : > { %v447_v4 = vsel %vm7074_vm3, %v442_v56, %v446_v53  ;;  %796 = vst [vmem:[#allocation2 + $0x94] sm:$0xf] %v437_v62  ;;  %v5643_v9 = vld [vmem:[#allocation2 + $0x2c] sm:$0xf0]  ;;  %v1266_v11 = vrot.slane %v1264_v51, 4  ;;  %v1267_v12 = vshll.u32 %v5381_v40, 16  ;;  %v943_v15 = vsel %vm7088_vm5, %v941_v6, %v942_v60 }
  0x57   : > { %v5649_v10 = vld [vmem:[#allocation2 + $0x10] sm:$0xf]  ;;  %797 = vst [vmem:[#allocation2 + $0xb8] sm:$0xf] %v447_v4  ;;  %v1273_v13 = vshll.u32 %v5382_v61, 16  ;;  %v1277_v14 = vshrl.u32 %v5382_v61, 16 }
  0x58   : > { %1071 = vst [vmem:[#allocation2 + $0x98] sm:$0xf] %v940_v5  ;;  %v5348_v16 = vld [vmem:[%s6927_s28 + $0x28] sm:$0xf]  ;;  %v1283_v17 = vshll.u32 %v5383_v63, 16  ;;  %v1269_v19 = vrot.slane %v1267_v12, 5 }
  0x59   : > { %v6505_v18 = vld [vmem:[#allocation2 + $0x30] sm:$0xf0]  ;;  %1072 = vst [vmem:[#allocation2 + $0xbc] sm:$0xf] %v943_v15  ;;  %v1275_v20 = vrot.slane %v1273_v13, 5 }
  0x5a   : > { %1139 = vst [vmem:[#allocation2 + $0x9c] sm:$0xf] %v5347_v7  ;;  %v1270_v24 = vor.u32 %v1269_v19, %v1266_v11  ;;  %v1285_v28 = vrot.slane %v1283_v17, 5  ;;  %v334_v29 = vld [vmem:[%s6927_s28 + $0x24] sm:$0xf]  ;;  %v6697_v40 = vld [vmem:[%s8273_s1 + $0x1b0] sm:$0xff] }
  0x5b   : > { %1140 = vst [vmem:[#allocation2 + $0xc0] sm:$0xf] %v5348_v16  ;;  %v335_v30 = vld [vmem:[%s6927_s28 + $0x28] sm:$0xf]  ;;  %v449_v32 = vshrl.u32 %v334_v29, 16  ;;  %v452_v33 = vshll.u32 %v334_v29, 16  ;;  %4782 = vmatpush.bf16.msra.mxu2 %v6697_v40 }
  0x5c   : > { %4290 = vmatmul.bf16.gmra.mxu1 %v5886_v21  ;;  %4310 = vmatmul.bf16.gmra.mxu2 %v6030_v22  ;;  %v1279_v21 = vrot.slane %v1277_v14, 4  ;;  %v5638_v22 = vor.u32 %v6499_v0, %v5635_v1  ;;  %v1271_v31 = vrot.slane %v1270_v24, 4  ;;  %v458_v35 = vshll.u32 %v335_v30, 16  ;;  %v6689_v43 = vld [vmem:[%s8273_s1 + $0x170] sm:$0xff]  ;;  %v336_v47 = vld [vmem:[%s6927_s28 + $0x2c] sm:$0x1] }
  0x5d   : > { %4330 = vmatmul.bf16.gmra.mxu3 %v6174_v25  ;;  %v5646_v25 = vor.u32 %v6500_v8, %v5643_v9  ;;  %v462_v36 = vshrl.u32 %v335_v30, 16  ;;  %v451_v38 = vrot.slane %v449_v32, 4  ;;  %v454_v39 = vrot.slane %v452_v33, 5  ;;  %v5384_v50 = vld [vmem:[%s6927_s28 + $0x30] sm:$0xf]  ;;  %4693 = vmatpush.bf16.msra.mxu1 %v6689_v43 }
  0x5e   : > { %4270 = vmatmul.bf16.gmra.mxu0 %v5742_v26  ;;  %v5650_v26 = vor.u32 %v6505_v18, %v5649_v10  ;;  %v1280_v27 = vor.u32 %v1279_v21, %v1275_v20  ;;  %v1276_v37 = vsel %vm7074_vm3, %v1271_v31, %v1275_v20  ;;  %v460_v48 = vrot.slane %v458_v35, 5  ;;  %v833_v53 = vld [vmem:[%s6927_s28 + $0x24] sm:$0xe]  ;;  %v834_v54 = vld [vmem:[%s6927_s28 + $0x28] sm:$0xf] }
  0x5f   : > { %1635 = vst [vmem:[#allocation2 + $0xa0] sm:$0xf] %v1276_v37  ;;  %v455_v46 = vor.u32 %v454_v39, %v451_v38  ;;  %v464_v49 = vrot.slane %v462_v36, 4  ;;  %v468_v52 = vshll.u32 %v336_v47, 16  ;;  %v835_v56 = vld [vmem:[%s6927_s28 + $0x2c] sm:$0x1] }
  0x60   : > { %v1281_v34 = vrot.slane %v1280_v27, 4  ;;  %v5330_v57 = vrot.slane %v833_v53, 9  ;;  %v946_v58 = vrot.slane %v834_v54, 5  ;;  %v5385_v60 = vld [vmem:[%s6927_s28 + $0x34] sm:$0xf]  ;;  %v949_v63 = vrot.slane %v835_v56, 5 }
  0x61   : > { %v456_v51 = vrot.slane %v455_v46, 4  ;;  %v465_v55 = vor.u32 %v464_v49, %v460_v48  ;;  %v470_v62 = vrot.slane %v468_v52, 5  ;;  %v5349_v0 = vld [vmem:[%s6927_s28 + $0x30] sm:$0xf]  ;;  %v5386_v1 = vld [vmem:[%s6927_s28 + $0x38] sm:$0x1] }
  0x62   : > { %v1286_v41 = vsel %vm7074_vm3, %v1281_v34, %v1285_v28  ;;  %v6508_v2 = vld [vmem:[#allocation2 + $0x4c] sm:$0xf]  ;;  %v5671_v3 = vld [vmem:[#allocation2 + $0x6c] sm:$0xf0]  ;;  %v6513_v5 = vld [vmem:[#allocation2 + $0x70] sm:$0xf0]  ;;  %v947_v7 = vsel %vm7088_vm5, %v5330_v57, %v946_v58 }
  0x63   : > { %1636 = vst [vmem:[#allocation2 + $0xc4] sm:$0xf] %v1286_v41  ;;  %v461_v61 = vsel %vm7074_vm3, %v456_v51, %v460_v48  ;;  %v5677_v4 = vld [vmem:[#allocation2 + $0x50] sm:$0xf]  ;;  %v466_v6 = vrot.slane %v465_v55, 4  ;;  %v948_v8 = vrot.slane %v946_v58, 4 }
  0x64   : > { %798 = vst [vmem:[#allocation2 + $0xdc] sm:$0xf] %v461_v61  ;;  %v1288_v9 = vshrl.u32 %v5384_v50, 16  ;;  %v6509_v10 = vld [vmem:[#allocation2 + $0x54] sm:$0xf]  ;;  %v1291_v14 = vshll.u32 %v5384_v50, 16 }
  0x65   : > { %v5679_v11 = vld [vmem:[#allocation2 + $0x74] sm:$0xf0]  ;;  %v6514_v13 = vld [vmem:[#allocation2 + $0x78] sm:$0xf0]  ;;  %1073 = vst [vmem:[#allocation2 + $0xe0] sm:$0xf] %v947_v7  ;;  %v471_v16 = vsel %vm7074_vm3, %v466_v6, %v470_v62  ;;  %v950_v17 = vsel %vm7088_vm5, %v948_v8, %v949_v63 }
  0x66   : > { %v5685_v12 = vld [vmem:[#allocation2 + $0x58] sm:$0xf]  ;;  %v1297_v15 = vshll.u32 %v5385_v60, 16  ;;  %v5350_v18 = vld [vmem:[%s6927_s28 + $0x34] sm:$0xf]  ;;  %v1290_v19 = vrot.slane %v1288_v9, 4  ;;  %v5682_v28 = vor.u32 %v6509_v10, %v5679_v11 }
  0x67   : > { %1141 = vst [vmem:[#allocation2 + $0xe4] sm:$0xf] %v5349_v0  ;;  %v1301_v20 = vshrl.u32 %v5385_v60, 16  ;;  %v1293_v21 = vrot.slane %v1291_v14, 5  ;;  %v5686_v29 = vor.u32 %v6514_v13, %v5685_v12  ;;  %v337_v32 = vld [vmem:[%s6927_s28 + $0x30] sm:$0xf] }
  0x68   : > { %799 = vst [vmem:[#allocation2 + $0x100] sm:$0xf] %v471_v16  ;;  %v338_v33 = vld [vmem:[%s6927_s28 + $0x34] sm:$0xf]  ;;  %v473_v35 = vshrl.u32 %v337_v32, 16  ;;  %v476_v36 = vshll.u32 %v337_v32, 16 }
  0x69   : > { %1074 = vst [vmem:[#allocation2 + $0x104] sm:$0xf] %v950_v17  ;;  %v1303_v24 = vrot.slane %v1301_v20, 4  ;;  %v1294_v27 = vor.u32 %v1293_v21, %v1290_v19  ;;  %v482_v37 = vshll.u32 %v338_v33, 16  ;;  %v486_v39 = vshrl.u32 %v338_v33, 16 }
  0x6a   : > { %1142 = vst [vmem:[#allocation2 + $0x108] sm:$0xf] %v5350_v18  ;;  %v475_v41 = vrot.slane %v473_v35, 4  ;;  %v478_v42 = vrot.slane %v476_v36, 5  ;;  %v339_v46 = vld [vmem:[%s6927_s28 + $0x38] sm:$0x1] }
  0x6b   : > { %v1295_v34 = vrot.slane %v1294_v27, 4  ;;  %v484_v45 = vrot.slane %v482_v37, 5  ;;  %v488_v48 = vrot.slane %v486_v39, 4  ;;  %v492_v49 = vshll.u32 %v339_v46, 16  ;;  %v836_v50 = vld [vmem:[%s6927_s28 + $0x30] sm:$0xe] }
  0x6c   : > { %4344 = vmatmul.bf16.vlgmr.msrb.gmra.mxu1 %v5638_v22  ;;  %4433 = vmatmul.bf16.vlgmr.msrb.gmra.mxu2 %v5642_v23  ;;  %v1299_v22 = vrot.slane %v1297_v15, 5  ;;  %v1307_v23 = vshll.u32 %v5386_v1, 16  ;;  %v479_v47 = vor.u32 %v478_v42, %v475_v41  ;;  %v5387_v51 = vld [vmem:[%s6927_s28 + $0x3c] sm:$0xf]  ;;  %v837_v53 = vld [vmem:[%s6927_s28 + $0x34] sm:$0xf] }
  0x6d   : > { %4522 = vmatmul.bf16.vlgmr.msrb.gmra.mxu3 %v5646_v25  ;;  %v5674_v25 = vor.u32 %v6508_v2, %v5671_v3  ;;  %v838_v54 = vld [vmem:[%s6927_s28 + $0x38] sm:$0x1]  ;;  %v5331_v55 = vrot.slane %v836_v50, 9  ;;  %v489_v56 = vor.u32 %v488_v48, %v484_v45  ;;  %v494_v57 = vrot.slane %v492_v49, 5  ;;  %v5388_v61 = vld [vmem:[%s6927_s28 + $0x40] sm:$0xf] }
  0x6e   : > { %4611 = vmatmul.bf16.vlgmr.msrb.gmra.mxu0 %v5650_v26  ;;  %v5678_v26 = vor.u32 %v6513_v5, %v5677_v4  ;;  %v1304_v30 = vor.u32 %v1303_v24, %v1299_v22  ;;  %v1309_v31 = vrot.slane %v1307_v23, 5  ;;  %v1300_v40 = vsel %vm7074_vm3, %v1295_v34, %v1299_v22  ;;  %v5351_v63 = vld [vmem:[%s6927_s28 + $0x3c] sm:$0xf]  ;;  %v5389_v0 = vld [vmem:[%s6927_s28 + $0x44] sm:$0x1]  ;;  %v6696_v42 = vld [vmem:[%s8273_s1 + $0x1a8] sm:$0xff] }
  0x6f   : > { %1637 = vst [vmem:[#allocation2 + $0xe8] sm:$0xf] %v1300_v40  ;;  %v480_v52 = vrot.slane %v479_v47, 4  ;;  %v953_v58 = vrot.slane %v837_v53, 5  ;;  %v956_v60 = vrot.slane %v838_v54, 5  ;;  %v490_v5 = vrot.slane %v489_v56, 4  ;;  %4783 = vmatpush.bf16.msra.mxu2 %v6696_v42 }
  0x70   : > { %v1305_v38 = vrot.slane %v1304_v30, 4  ;;  %v6517_v1 = vld [vmem:[#allocation2 + $0x94] sm:$0xf]  ;;  %v5707_v2 = vld [vmem:[#allocation2 + $0xb4] sm:$0xf0]  ;;  %v1312_v8 = vshrl.u32 %v5387_v51, 16 }
  0x71   : > { %v485_v62 = vsel %vm7074_vm3, %v480_v52, %v484_v45  ;;  %v5713_v3 = vld [vmem:[#allocation2 + $0x98] sm:$0xf]  ;;  %v6522_v4 = vld [vmem:[#allocation2 + $0xb8] sm:$0xf0]  ;;  %v954_v6 = vsel %vm7088_vm5, %v5331_v55, %v953_v58  ;;  %v955_v7 = vrot.slane %v953_v58, 4  ;;  %v1315_v13 = vshll.u32 %v5387_v51, 16 }
  0x72   : > { %v1310_v43 = vsel %vm7074_vm3, %v1305_v38, %v1309_v31  ;;  %800 = vst [vmem:[#allocation2 + $0x124] sm:$0xf] %v485_v62  ;;  %v6518_v9 = vld [vmem:[#allocation2 + $0x9c] sm:$0xf]  ;;  %v5715_v10 = vld [vmem:[#allocation2 + $0xbc] sm:$0xf0]  ;;  %v495_v15 = vsel %vm7074_vm3, %v490_v5, %v494_v57  ;;  %v5710_v24 = vor.u32 %v6517_v1, %v5707_v2 }
  0x73   : > { %1638 = vst [vmem:[#allocation2 + $0x10c] sm:$0xf] %v1310_v43  ;;  %v5721_v11 = vld [vmem:[#allocation2 + $0xa0] sm:$0xf]  ;;  %v6523_v12 = vld [vmem:[#allocation2 + $0xc0] sm:$0xf0]  ;;  %v957_v16 = vsel %vm7088_vm5, %v955_v7, %v956_v60  ;;  %v5718_v27 = vor.u32 %v6518_v9, %v5715_v10 }
  0x74   : > { %1075 = vst [vmem:[#allocation2 + $0x128] sm:$0xf] %v954_v6  ;;  %v1321_v14 = vshll.u32 %v5388_v61, 16  ;;  %v5352_v17 = vld [vmem:[%s6927_s28 + $0x40] sm:$0xf]  ;;  %v1314_v18 = vrot.slane %v1312_v8, 4 }
  0x75   : > { %1143 = vst [vmem:[#allocation2 + $0x12c] sm:$0xf] %v5351_v63  ;;  %v1325_v19 = vshrl.u32 %v5388_v61, 16  ;;  %v1317_v20 = vrot.slane %v1315_v13, 5  ;;  %v1331_v22 = vshll.u32 %v5389_v0, 16  ;;  %v6704_v45 = vld [vmem:[%s8273_s1 + $0x1e8] sm:$0xff] }
  0x76   : > { %801 = vst [vmem:[#allocation2 + $0x148] sm:$0xf] %v495_v15  ;;  %v1323_v21 = vrot.slane %v1321_v14, 5  ;;  %v340_v31 = vld [vmem:[%s6927_s28 + $0x3c] sm:$0xf]  ;;  %4872 = vmatpush.bf16.msra.mxu3 %v6704_v45  ;;  %v6688_v57 = vld [vmem:[%s8273_s1 + $0x168] sm:$0xff] }
  0x77   : > { %1076 = vst [vmem:[#allocation2 + $0x14c] sm:$0xf] %v957_v16  ;;  %v1327_v23 = vrot.slane %v1325_v19, 4  ;;  %v1333_v30 = vrot.slane %v1331_v22, 5  ;;  %v341_v32 = vld [vmem:[%s6927_s28 + $0x40] sm:$0xf]  ;;  %4694 = vmatpush.bf16.msra.mxu1 %v6688_v57 }
  0x78   : > { %1144 = vst [vmem:[#allocation2 + $0x150] sm:$0xf] %v5352_v17  ;;  %v497_v34 = vshrl.u32 %v340_v31, 16  ;;  %v500_v35 = vshll.u32 %v340_v31, 16  ;;  %v506_v36 = vshll.u32 %v341_v32, 16  ;;  %v510_v38 = vshrl.u32 %v341_v32, 16 }
  0x79   : > { %v342_v47 = vld [vmem:[%s6927_s28 + $0x44] sm:$0x1]  ;;  %v839_v51 = vld [vmem:[%s6927_s28 + $0x3c] sm:$0xe]  ;;  %v5390_v52 = vld [vmem:[%s6927_s28 + $0x48] sm:$0xf] }
  0x7a   : > { %v499_v40 = vrot.slane %v497_v34, 4  ;;  %v502_v41 = vrot.slane %v500_v35, 5  ;;  %v508_v46 = vrot.slane %v506_v36, 5  ;;  %v512_v49 = vrot.slane %v510_v38, 4  ;;  %v840_v54 = vld [vmem:[%s6927_s28 + $0x40] sm:$0xf] }
  0x7b   : > { %v516_v50 = vshll.u32 %v342_v47, 16  ;;  %v841_v55 = vld [vmem:[%s6927_s28 + $0x44] sm:$0x1]  ;;  %v5332_v56 = vrot.slane %v839_v51, 9  ;;  %v960_v61 = vrot.slane %v840_v54, 5  ;;  %v6712_v7 = vld [vmem:[%s8273_s1 + $0x228] sm:$0xff] }
  0x7c   : > { %4349 = vmatmul.bf16.gmra.mxu1 %v5674_v25  ;;  %4438 = vmatmul.bf16.gmra.mxu2 %v5678_v26  ;;  %v5714_v25 = vor.u32 %v6522_v4, %v5713_v3  ;;  %v1318_v26 = vor.u32 %v1317_v20, %v1314_v18  ;;  %v503_v48 = vor.u32 %v502_v41, %v499_v40  ;;  %v963_v62 = vrot.slane %v841_v55, 5  ;;  %v5391_v63 = vld [vmem:[%s6927_s28 + $0x4c] sm:$0xf]  ;;  %v5353_v1 = vld [vmem:[%s6927_s28 + $0x48] sm:$0xf] }
  0x7d   : > { %4527 = vmatmul.bf16.gmra.mxu3 %v5682_v28  ;;  %v5722_v28 = vor.u32 %v6523_v12, %v5721_v11  ;;  %v513_v58 = vor.u32 %v512_v49, %v508_v46  ;;  %v518_v60 = vrot.slane %v516_v50, 5  ;;  %v5392_v2 = vld [vmem:[%s6927_s28 + $0x50] sm:$0x1]  ;;  %v6526_v3 = vld [vmem:[#allocation2 + $0xdc] sm:$0xf]  ;;  %v961_v9 = vsel %vm7088_vm5, %v5332_v56, %v960_v61  ;;  %4961 = vmatpush.bf16.msra.mxu0 %v6712_v7 }
  0x7e   : > { %4616 = vmatmul.bf16.gmra.mxu0 %v5686_v29  ;;  %v1328_v29 = vor.u32 %v1327_v23, %v1323_v21  ;;  %v1319_v33 = vrot.slane %v1318_v26, 4  ;;  %v504_v53 = vrot.slane %v503_v48, 4  ;;  %v5743_v4 = vld [vmem:[#allocation2 + $0xfc] sm:$0xf0]  ;;  %v6531_v6 = vld [vmem:[#allocation2 + $0x100] sm:$0xf0] }
  0x7f   : > { %v5749_v5 = vld [vmem:[#allocation2 + $0xe0] sm:$0xf]  ;;  %v514_v8 = vrot.slane %v513_v58, 4  ;;  %v962_v10 = vrot.slane %v960_v61, 4  ;;  %v1336_v11 = vshrl.u32 %v5390_v52, 16  ;;  %v1339_v16 = vshll.u32 %v5390_v52, 16 }
  0x80   : > { %v1329_v37 = vrot.slane %v1328_v29, 4  ;;  %v1324_v39 = vsel %vm7074_vm3, %v1319_v33, %v1323_v21  ;;  %v509_v0 = vsel %vm7074_vm3, %v504_v53, %v508_v46  ;;  %v6527_v12 = vld [vmem:[#allocation2 + $0xe4] sm:$0xf]  ;;  %v5751_v13 = vld [vmem:[#allocation2 + $0x104] sm:$0xf0]  ;;  %v1345_v17 = vshll.u32 %v5391_v63, 16 }
  0x81   : > { %1639 = vst [vmem:[#allocation2 + $0x130] sm:$0xf] %v1324_v39  ;;  %v5757_v14 = vld [vmem:[#allocation2 + $0xe8] sm:$0xf]  ;;  %v6532_v15 = vld [vmem:[#allocation2 + $0x108] sm:$0xf0]  ;;  %v519_v18 = vsel %vm7074_vm3, %v514_v8, %v518_v60  ;;  %v964_v19 = vsel %vm7088_vm5, %v962_v10, %v963_v62 }
  0x82   : > { %v1334_v43 = vsel %vm7074_vm3, %v1329_v37, %v1333_v30  ;;  %802 = vst [vmem:[#allocation2 + $0x16c] sm:$0xf] %v509_v0  ;;  %v5354_v20 = vld [vmem:[%s6927_s28 + $0x4c] sm:$0xf]  ;;  %v1338_v21 = vrot.slane %v1336_v11, 4  ;;  %v1349_v22 = vshrl.u32 %v5391_v63, 16  ;;  %v5754_v30 = vor.u32 %v6527_v12, %v5751_v13 }
  0x83   : > { %1640 = vst [vmem:[#allocation2 + $0x154] sm:$0xf] %v1334_v43  ;;  %v1341_v23 = vrot.slane %v1339_v16, 5  ;;  %v5758_v31 = vor.u32 %v6532_v15, %v5757_v14  ;;  %v343_v34 = vld [vmem:[%s6927_s28 + $0x48] sm:$0xf] }
  0x84   : > { %1077 = vst [vmem:[#allocation2 + $0x170] sm:$0xf] %v961_v9  ;;  %v1351_v26 = vrot.slane %v1349_v22, 4  ;;  %v344_v35 = vld [vmem:[%s6927_s28 + $0x4c] sm:$0xf]  ;;  %v521_v37 = vshrl.u32 %v343_v34, 16 }
  0x85   : > { %1145 = vst [vmem:[#allocation2 + $0x174] sm:$0xf] %v5353_v1  ;;  %v1342_v29 = vor.u32 %v1341_v23, %v1338_v21  ;;  %v524_v38 = vshll.u32 %v343_v34, 16  ;;  %v530_v39 = vshll.u32 %v344_v35, 16  ;;  %v534_v41 = vshrl.u32 %v344_v35, 16 }
  0x86   : > { %803 = vst [vmem:[#allocation2 + $0x190] sm:$0xf] %v519_v18  ;;  %v523_v43 = vrot.slane %v521_v37, 4  ;;  %v345_v48 = vld [vmem:[%s6927_s28 + $0x50] sm:$0x1] }
  0x87   : > { %1078 = vst [vmem:[#allocation2 + $0x194] sm:$0xf] %v964_v19  ;;  %v1343_v36 = vrot.slane %v1342_v29, 4  ;;  %v526_v45 = vrot.slane %v524_v38, 5  ;;  %v532_v46 = vrot.slane %v530_v39, 5  ;;  %v536_v50 = vrot.slane %v534_v41, 4 }
  0x88   : > { %1146 = vst [vmem:[#allocation2 + $0x198] sm:$0xf] %v5354_v20  ;;  %v540_v51 = vshll.u32 %v345_v48, 16  ;;  %v5393_v52 = vld [vmem:[%s6927_s28 + $0x54] sm:$0xf] }
  0x89   : > { %v527_v49 = vor.u32 %v526_v45, %v523_v43  ;;  %v842_v53 = vld [vmem:[%s6927_s28 + $0x48] sm:$0xe]  ;;  %v843_v54 = vld [vmem:[%s6927_s28 + $0x4c] sm:$0xf]  ;;  %v537_v56 = vor.u32 %v536_v50, %v532_v46  ;;  %v844_v58 = vld [vmem:[%s6927_s28 + $0x50] sm:$0x1] }
  0x8a   : > { %v542_v57 = vrot.slane %v540_v51, 5  ;;  %v5394_v60 = vld [vmem:[%s6927_s28 + $0x58] sm:$0xf]  ;;  %v5333_v61 = vrot.slane %v842_v53, 9  ;;  %v967_v62 = vrot.slane %v843_v54, 5  ;;  %v970_v63 = vrot.slane %v844_v58, 5 }
  0x8b   : > { %v528_v55 = vrot.slane %v527_v49, 4  ;;  %v1360_v0 = vshrl.u32 %v5393_v52, 16  ;;  %v6535_v1 = vld [vmem:[#allocation2 + $0x124] sm:$0xf]  ;;  %v5785_v7 = vld [vmem:[#allocation2 + $0x128] sm:$0xf] }
  0x8c   : > { %4354 = vmatmul.bf16.gmra.mxu1 %v5710_v24  ;;  %4443 = vmatmul.bf16.gmra.mxu2 %v5714_v25  ;;  %v1347_v24 = vrot.slane %v1345_v17, 5  ;;  %v1355_v25 = vshll.u32 %v5392_v2, 16  ;;  %v5779_v2 = vld [vmem:[#allocation2 + $0x144] sm:$0xf0]  ;;  %v6540_v8 = vld [vmem:[#allocation2 + $0x148] sm:$0xf0]  ;;  %v968_v9 = vsel %vm7088_vm5, %v5333_v61, %v967_v62 }
  0x8d   : > { %4532 = vmatmul.bf16.gmra.mxu3 %v5718_v27  ;;  %v5746_v27 = vor.u32 %v6526_v3, %v5743_v4  ;;  %v533_v3 = vsel %vm7074_vm3, %v528_v55, %v532_v46  ;;  %v538_v4 = vrot.slane %v537_v56, 4  ;;  %v969_v10 = vrot.slane %v967_v62, 4  ;;  %v7278_v13 = vld [vmem:[%s8274_s2] ss:$0 sm:$0xff]  ;;  %v6536_v14 = vld [vmem:[#allocation2 + $0x12c] sm:$0xf] }
  0x8e   : > { %4621 = vmatmul.bf16.gmra.mxu0 %v5722_v28  ;;  %v5750_v28 = vor.u32 %v6531_v6, %v5749_v5  ;;  %v1352_v32 = vor.u32 %v1351_v26, %v1347_v24  ;;  %v1357_v33 = vrot.slane %v1355_v25, 5  ;;  %v1348_v42 = vsel %vm7074_vm3, %v1343_v36, %v1347_v24  ;;  %v5395_v5 = vld [vmem:[%s6927_s28 + $0x5c] sm:$0x1]  ;;  %804 = vst [vmem:[#allocation2 + $0x1b4] sm:$0xf] %v533_v3  ;;  %v6695_v49 = vld [vmem:[%s8273_s1 + $0x1a0] sm:$0xff] }
  0x8f   : > { %1641 = vst [vmem:[#allocation2 + $0x178] sm:$0xf] %v1348_v42  ;;  %v1363_v6 = vshll.u32 %v5393_v52, 16  ;;  %v1362_v11 = vrot.slane %v1360_v0, 4  ;;  %v1369_v12 = vshll.u32 %v5394_v60, 16  ;;  %v543_v17 = vsel %vm7074_vm3, %v538_v4, %v542_v57  ;;  %v6703_v50 = vld [vmem:[%s8273_s1 + $0x1e0] sm:$0xff]  ;;  %4784 = vmatpush.bf16.msra.mxu2 %v6695_v49 }
  0x90   : > { %v1353_v40 = vrot.slane %v1352_v32, 4  ;;  %v5787_v15 = vld [vmem:[#allocation2 + $0x14c] sm:$0xf0]  ;;  %1079 = vst [vmem:[#allocation2 + $0x1b8] sm:$0xf] %v968_v9  ;;  %v1373_v20 = vshrl.u32 %v5394_v60, 16  ;;  %v971_v21 = vsel %vm7088_vm5, %v969_v10, %v970_v63  ;;  %v5786_v29 = vor.u32 %v6540_v8, %v5785_v7  ;;  %4873 = vmatpush.bf16.msra.mxu3 %v6703_v50 }
  0x91   : > { %v5793_v16 = vld [vmem:[#allocation2 + $0x130] sm:$0xf]  ;;  %v5355_v18 = vld [vmem:[%s6927_s28 + $0x54] sm:$0xf]  ;;  %v1365_v19 = vrot.slane %v1363_v6, 5  ;;  %v1371_v23 = vrot.slane %v1369_v12, 5  ;;  %v5790_v34 = vor.u32 %v6536_v14, %v5787_v15 }
  0x92   : > { %v1358_v47 = vsel %vm7074_vm3, %v1353_v40, %v1357_v33  ;;  %805 = vst [vmem:[#allocation2 + $0x1d8] sm:$0xf] %v543_v17  ;;  %v5356_v22 = vld [vmem:[%s6927_s28 + $0x58] sm:$0xf]  ;;  %v1379_v24 = vshll.u32 %v5395_v5, 16  ;;  %v6687_v3 = vld [vmem:[%s8273_s1 + $0x160] sm:$0xff] }
  0x93   : > { %1642 = vst [vmem:[#allocation2 + $0x19c] sm:$0xf] %v1358_v47  ;;  %v6541_v25 = vld [vmem:[#allocation2 + $0x150] sm:$0xf0]  ;;  %v1366_v26 = vor.u32 %v1365_v19, %v1362_v11  ;;  %v347_v37 = vld [vmem:[%s6927_s28 + $0x58] sm:$0xf]  ;;  %4695 = vmatpush.bf16.msra.mxu1 %v6687_v3 }
  0x94   : > { %1080 = vst [vmem:[#allocation2 + $0x1dc] sm:$0xf] %v971_v21  ;;  %v1381_v32 = vrot.slane %v1379_v24, 5  ;;  %v5794_v35 = vor.u32 %v6541_v25, %v5793_v16  ;;  %v346_v36 = vld [vmem:[%s6927_s28 + $0x54] sm:$0xf]  ;;  %v554_v45 = vshll.u32 %v347_v37, 16 }
  0x95   : > { %1147 = vst [vmem:[#allocation2 + $0x1bc] sm:$0xf] %v5355_v18  ;;  %v545_v42 = vshrl.u32 %v346_v36, 16  ;;  %v548_v43 = vshll.u32 %v346_v36, 16  ;;  %v558_v48 = vshrl.u32 %v347_v37, 16  ;;  %v6711_v17 = vld [vmem:[%s8273_s1 + $0x220] sm:$0xff] }
  0x96   : > { %1148 = vst [vmem:[#allocation2 + $0x1e0] sm:$0xf] %v5356_v22  ;;  %v348_v51 = vld [vmem:[%s6927_s28 + $0x5c] sm:$0x1]  ;;  %v556_v53 = vrot.slane %v554_v45, 5  ;;  %4962 = vmatpush.bf16.msra.mxu0 %v6711_v17 }
  0x97   : > { %v547_v47 = vrot.slane %v545_v42, 4  ;;  %v550_v52 = vrot.slane %v548_v43, 5  ;;  %v560_v55 = vrot.slane %v558_v48, 4  ;;  %v564_v56 = vshll.u32 %v348_v51, 16  ;;  %v845_v57 = vld [vmem:[%s6927_s28 + $0x54] sm:$0xe] }
  0x98   : > { %v846_v62 = vld [vmem:[%s6927_s28 + $0x58] sm:$0xf]  ;;  %v847_v63 = vld [vmem:[%s6927_s28 + $0x5c] sm:$0x1]  ;;  %v5334_v0 = vrot.slane %v845_v57, 9 }
  0x99   : > { %v551_v61 = vor.u32 %v550_v52, %v547_v47  ;;  %v561_v4 = vor.u32 %v560_v55, %v556_v53  ;;  %v566_v5 = vrot.slane %v564_v56, 5  ;;  %v974_v6 = vrot.slane %v846_v62, 5  ;;  %v6544_v9 = vld [vmem:[#allocation2 + $0x16c] sm:$0xf]  ;;  %v5815_v10 = vld [vmem:[#allocation2 + $0x18c] sm:$0xf0] }
  0x9a   : > { %v5821_v11 = vld [vmem:[#allocation2 + $0x170] sm:$0xf]  ;;  %v6549_v12 = vld [vmem:[#allocation2 + $0x190] sm:$0xf0]  ;;  %v977_v15 = vrot.slane %v847_v63, 5 }
  0x9b   : > { %v552_v14 = vrot.slane %v551_v61, 4  ;;  %v5396_v16 = vld [vmem:[%s6927_s28 + $0x60] sm:$0xf]  ;;  %v562_v18 = vrot.slane %v561_v4, 4  ;;  %v975_v19 = vsel %vm7088_vm5, %v5334_v0, %v974_v6  ;;  %v5397_v21 = vld [vmem:[%s6927_s28 + $0x64] sm:$0xf] }
  0x9c   : > { %4359 = vmatmul.bf16.gmra.mxu1 %v5746_v27  ;;  %4448 = vmatmul.bf16.gmra.mxu2 %v5750_v28  ;;  %v1375_v27 = vrot.slane %v1373_v20, 4  ;;  %v5782_v28 = vor.u32 %v6535_v1, %v5779_v2  ;;  %v976_v20 = vrot.slane %v974_v6, 4  ;;  %v6545_v22 = vld [vmem:[#allocation2 + $0x174] sm:$0xf]  ;;  %v5829_v24 = vld [vmem:[#allocation2 + $0x178] sm:$0xf] }
  0x9d   : > { %4537 = vmatmul.bf16.gmra.mxu3 %v5754_v30  ;;  %v1367_v30 = vrot.slane %v1366_v26, 4  ;;  %v6550_v25 = vld [vmem:[#allocation2 + $0x198] sm:$0xf0]  ;;  %v557_v26 = vsel %vm7074_vm3, %v552_v14, %v556_v53  ;;  %1081 = vst [vmem:[#allocation2 + $0x200] sm:$0xf] %v975_v19 }
  0x9e   : > { %4626 = vmatmul.bf16.gmra.mxu0 %v5758_v31  ;;  %v1376_v31 = vor.u32 %v1375_v27, %v1371_v23  ;;  %v5357_v27 = vld [vmem:[%s6927_s28 + $0x60] sm:$0xf]  ;;  %806 = vst [vmem:[#allocation2 + $0x1fc] sm:$0xf] %v557_v26  ;;  %v5830_v52 = vor.u32 %v6550_v25, %v5829_v24  ;;  %v350_v61 = vld [vmem:[%s6927_s28 + $0x64] sm:$0xf] }
  0x9f   : > { %v1372_v40 = vsel %vm7074_vm3, %v1367_v30, %v1371_v23  ;;  %v5823_v23 = vld [vmem:[#allocation2 + $0x194] sm:$0xf0]  ;;  %v978_v30 = vsel %vm7088_vm5, %v976_v20, %v977_v15  ;;  %1149 = vst [vmem:[#allocation2 + $0x204] sm:$0xf] %v5357_v27  ;;  %v578_v0 = vshll.u32 %v350_v61, 16 }
  0xa0   : > { %v1377_v41 = vrot.slane %v1376_v31, 4  ;;  %1643 = vst [vmem:[#allocation2 + $0x1c0] sm:$0xf] %v1372_v40  ;;  %v5358_v31 = vld [vmem:[%s6927_s28 + $0x64] sm:$0xf]  ;;  %v5818_v40 = vor.u32 %v6544_v9, %v5815_v10  ;;  %v5826_v51 = vor.u32 %v6545_v22, %v5823_v23 }
  0xa1   : > { %1082 = vst [vmem:[#allocation2 + $0x224] sm:$0xf] %v978_v30  ;;  %v351_v6 = vld [vmem:[%s6927_s28 + $0x68] sm:$0x1]  ;;  %v580_v10 = vrot.slane %v578_v0, 5 }
  0xa2   : > { %v1382_v46 = vsel %vm7074_vm3, %v1377_v41, %v1381_v32  ;;  %v1384_v32 = vshrl.u32 %v5396_v16, 16  ;;  %v5822_v41 = vor.u32 %v6549_v12, %v5821_v11  ;;  %1150 = vst [vmem:[#allocation2 + $0x228] sm:$0xf] %v5358_v31  ;;  %v849_v15 = vld [vmem:[%s6927_s28 + $0x64] sm:$0xf] }
  0xa3   : > { %1644 = vst [vmem:[#allocation2 + $0x1e4] sm:$0xf] %v1382_v46  ;;  %v981_v19 = vrot.slane %v849_v15, 5  ;;  %v848_v23 = vld [vmem:[%s6927_s28 + $0x60] sm:$0xe] }
  0xa4   : > { %v1386_v42 = vrot.slane %v1384_v32, 4  ;;  %v6553_v32 = vld [vmem:[#allocation2 + $0x1b4] sm:$0xf] }
  0xa9   : > { %v4276_v33 = vpop.f32.mrf.mxu1 }
  0xaa   : > { %v7289_v38 = vadd.f32 %v7278_v13, %v4276_v33  ;;  %v1387_v33 = vshll.u32 %v5396_v16, 16  ;;  %v6559_v0 = vld [vmem:[#allocation2 + $0x1e0] sm:$0xf0] }
  0xab   : > { %v7291_v39 = vpop.f32.mrf.mxu0 }
  0xac   : > { %4364 = vmatmul.bf16.gmra.mxu1 %v5782_v28  ;;  %4453 = vmatmul.bf16.gmra.mxu2 %v5786_v29  ;;  %v5398_v28 = vld [vmem:[%s6927_s28 + $0x68] sm:$0x1]  ;;  %v567_v29 = vsel %vm7074_vm3, %v562_v18, %v566_v5  ;;  %v1389_v46 = vrot.slane %v1387_v33, 5  ;;  %v588_v18 = vshll.u32 %v351_v6, 16  ;;  %v5851_v33 = vld [vmem:[#allocation2 + $0x1d4] sm:$0xf0] }
  0xad   : > { %4542 = vmatmul.bf16.gmra.mxu3 %v5790_v34  ;;  %807 = vst [vmem:[#allocation2 + $0x220] sm:$0xf] %v567_v29  ;;  %v1393_v34 = vshll.u32 %v5397_v21, 16  ;;  %v1403_v36 = vshll.u32 %v5398_v28, 16  ;;  %v850_v28 = vld [vmem:[%s6927_s28 + $0x68] sm:$0x1] }
  0xae   : > { %4631 = vmatmul.bf16.gmra.mxu0 %v5794_v35  ;;  %v1397_v35 = vshrl.u32 %v5397_v21, 16  ;;  %v1390_v57 = vor.u32 %v1389_v46, %v1386_v42  ;;  %v590_v27 = vrot.slane %v588_v18, 5  ;;  %v5399_v29 = vld [vmem:[%s6927_s28 + $0x6c] sm:$0xf]  ;;  %v6554_v42 = vld [vmem:[#allocation2 + $0x1bc] sm:$0xf] }
  0xaf   : > { %v4296_v54 = vpop.f32.mrf.mxu2  ;;  %v1395_v47 = vrot.slane %v1393_v34, 5  ;;  %v1405_v53 = vrot.slane %v1403_v36, 5  ;;  %v983_v36 = vrot.slane %v981_v19, 4 }
  0xb0   : > { %v7306_v58 = vadd.f32 %v7278_v13, %v4296_v54  ;;  %v4316_v60 = vpop.f32.mrf.mxu3  ;;  %v1399_v48 = vrot.slane %v1397_v35, 4  ;;  %v349_v54 = vld [vmem:[%s6927_s28 + $0x60] sm:$0xf]  ;;  %v1391_v3 = vrot.slane %v1390_v57, 4  ;;  %v5335_v35 = vrot.slane %v848_v23, 9 }
  0xb1   : > { %v7311_v1 = vadd.f32 %v7278_v13, %v4316_v60  ;;  %v4278_v2 = vpop.f32.mrf.mxu1  ;;  %v569_v62 = vshrl.u32 %v349_v54, 16  ;;  %v572_v63 = vshll.u32 %v349_v54, 16  ;;  %v5400_v54 = vld [vmem:[%s6927_s28 + $0x70] sm:$0xf]  ;;  %v5401_v57 = vld [vmem:[%s6927_s28 + $0x74] sm:$0x1] }
  0xb2   : > { %v7317_v7 = vadd.f32 %v7278_v13, %v4278_v2  ;;  %v1400_v60 = vor.u32 %v1399_v48, %v1395_v47  ;;  %v582_v2 = vshrl.u32 %v350_v61, 16  ;;  %v1396_v11 = vsel %vm7074_vm3, %v1391_v3, %v1395_v47  ;;  %v5360_v48 = vld [vmem:[%s6927_s28 + $0x70] sm:$0xf] }
  0xb3   : > { %v7319_v8 = vpop.f32.mrf.mxu0  ;;  %v571_v5 = vrot.slane %v569_v62, 4  ;;  %v574_v9 = vrot.slane %v572_v63, 5  ;;  %1645 = vst [vmem:[#allocation2 + $0x208] sm:$0xf] %v1396_v11  ;;  %v984_v47 = vrot.slane %v850_v28, 5  ;;  %v1411_v62 = vshll.u32 %v5399_v29, 16 }
  0xb4   : > { %v1401_v4 = vrot.slane %v1400_v60, 4  ;;  %v584_v14 = vrot.slane %v582_v2, 4  ;;  %v1417_v63 = vshll.u32 %v5400_v54, 16  ;;  %v1421_v2 = vshrl.u32 %v5400_v54, 16  ;;  %1152 = vst [vmem:[#allocation2 + $0x270] sm:$0xf] %v5360_v48 }
  0xb5   : > { %v575_v17 = vor.u32 %v574_v9, %v571_v5  ;;  %v985_v60 = vsel %vm7088_vm5, %v983_v36, %v984_v47  ;;  %v1427_v3 = vshll.u32 %v5401_v57, 16  ;;  %v5854_v5 = vor.u32 %v6553_v32, %v5851_v33  ;;  %v353_v23 = vld [vmem:[%s6927_s28 + $0x70] sm:$0xf]  ;;  %v354_v48 = vld [vmem:[%s6927_s28 + $0x74] sm:$0x1] }
  0xb6   : > { %v1406_v12 = vsel %vm7074_vm3, %v1401_v4, %v1405_v53  ;;  %v585_v22 = vor.u32 %v584_v14, %v580_v10  ;;  %v982_v53 = vsel %vm7088_vm5, %v5335_v35, %v981_v19  ;;  %1084 = vst [vmem:[#allocation2 + $0x26c] sm:$0xf] %v985_v60  ;;  %v1413_v6 = vrot.slane %v1411_v62, 5  ;;  %v852_v62 = vld [vmem:[%s6927_s28 + $0x70] sm:$0xf] }
  0xb7   : > { %v4298_v37 = vpop.f32.mrf.mxu2  ;;  %1646 = vst [vmem:[#allocation2 + $0x22c] sm:$0xf] %v1406_v12  ;;  %v576_v26 = vrot.slane %v575_v17, 4  ;;  %v1419_v9 = vrot.slane %v1417_v63, 5  ;;  %v1423_v15 = vrot.slane %v1421_v2, 4  ;;  %v602_v33 = vshll.u32 %v353_v23, 16 }
  0xb8   : > { %v7338_v43 = vadd.f32 %v7278_v13, %v4298_v37  ;;  %v4318_v45 = vpop.f32.mrf.mxu3  ;;  %v586_v34 = vrot.slane %v585_v22, 4  ;;  %v5359_v37 = vld [vmem:[%s6927_s28 + $0x6c] sm:$0xf]  ;;  %1083 = vst [vmem:[#allocation2 + $0x248] sm:$0xf] %v982_v53  ;;  %v612_v53 = vshll.u32 %v354_v48, 16 }
  0xb9   : > { %v7341_v49 = vadd.f32 %v7278_v13, %v4318_v45  ;;  %v4281_v50 = vpop.f32.mrf.mxu1  ;;  %v5859_v45 = vld [vmem:[#allocation2 + $0x1dc] sm:$0xf0]  ;;  %v581_v46 = vsel %vm7074_vm3, %v576_v26, %v580_v10  ;;  %1151 = vst [vmem:[#allocation2 + $0x24c] sm:$0xf] %v5359_v37  ;;  %v352_v22 = vld [vmem:[%s6927_s28 + $0x6c] sm:$0xf] }
  0xba   : > { %v7345_v55 = vadd.f32 %v7278_v13, %v4281_v50  ;;  %v1408_v50 = vshrl.u32 %v5399_v29, 16  ;;  %808 = vst [vmem:[#allocation2 + $0x244] sm:$0xf] %v581_v46  ;;  %v5862_v14 = vor.u32 %v6554_v42, %v5859_v45  ;;  %v593_v28 = vshrl.u32 %v352_v22, 16  ;;  %v6702_v42 = vld [vmem:[%s8273_s1 + $0x1d8] sm:$0xff] }
  0xbb   : > { %v7347_v56 = vpop.f32.mrf.mxu0  ;;  %v596_v29 = vshll.u32 %v352_v22, 16  ;;  %v604_v45 = vrot.slane %v602_v33, 5  ;;  %4874 = vmatpush.bf16.msra.mxu3 %v6702_v42  ;;  %v6567_v22 = vld [vmem:[#allocation2 + $0x220] sm:$0xf0]  ;;  %v5901_v33 = vld [vmem:[#allocation2 + $0x208] sm:$0xf] }
  0xbc   : > { %4369 = vmatmul.bf16.gmra.mxu1 %v5818_v40  ;;  %4458 = vmatmul.bf16.gmra.mxu2 %v5822_v41  ;;  %v5857_v40 = vld [vmem:[#allocation2 + $0x1b8] sm:$0xf]  ;;  %v6558_v41 = vld [vmem:[#allocation2 + $0x1d8] sm:$0xf0]  ;;  %v1410_v61 = vrot.slane %v1408_v50, 4  ;;  %v595_v36 = vrot.slane %v593_v28, 4 }
  0xbd   : > { %4547 = vmatmul.bf16.gmra.mxu3 %v5826_v51  ;;  %v5865_v51 = vld [vmem:[#allocation2 + $0x1c0] sm:$0xf]  ;;  %v5858_v12 = vor.u32 %v6558_v41, %v5857_v40  ;;  %v598_v37 = vrot.slane %v596_v29, 5  ;;  %v6694_v40 = vld [vmem:[%s8273_s1 + $0x198] sm:$0xff] }
  0xbe   : > { %4636 = vmatmul.bf16.gmra.mxu0 %v5830_v52  ;;  %v591_v52 = vsel %vm7074_vm3, %v586_v34, %v590_v27  ;;  %v5866_v18 = vor.u32 %v6559_v0, %v5865_v51  ;;  %v1414_v19 = vor.u32 %v1413_v6, %v1410_v61  ;;  %v1424_v27 = vor.u32 %v1423_v15, %v1419_v9  ;;  %v851_v61 = vld [vmem:[%s6927_s28 + $0x6c] sm:$0xe]  ;;  %v6710_v15 = vld [vmem:[%s8273_s1 + $0x218] sm:$0xff] }
  0xbf   : > { %v4301_v16 = vpop.f32.mrf.mxu2  ;;  %809 = vst [vmem:[#allocation2 + $0x268] sm:$0xf] %v591_v52  ;;  %v606_v34 = vshrl.u32 %v353_v23, 16  ;;  %v599_v50 = vor.u32 %v598_v37, %v595_v36  ;;  %4785 = vmatpush.bf16.msra.mxu2 %v6694_v40  ;;  %v6563_v23 = vld [vmem:[#allocation2 + $0x204] sm:$0xf]  ;;  %4963 = vmatpush.bf16.msra.mxu0 %v6710_v15 }
  0xc0   : > { %v7357_v20 = vadd.f32 %v7278_v13, %v4301_v16  ;;  %v4321_v21 = vpop.f32.mrf.mxu3  ;;  %v1415_v32 = vrot.slane %v1414_v19, 4  ;;  %v1425_v35 = vrot.slane %v1424_v27, 4  ;;  %v5895_v27 = vld [vmem:[#allocation2 + $0x224] sm:$0xf0]  ;;  %v5361_v29 = vld [vmem:[%s6927_s28 + $0x78] sm:$0xf] }
  0xc1   : > { %v7361_v24 = vadd.f32 %v7278_v13, %v4321_v21  ;;  %v4283_v25 = vpop.f32.mrf.mxu1  ;;  %v1429_v21 = vrot.slane %v1427_v3, 5  ;;  %v608_v46 = vrot.slane %v606_v34, 4  ;;  %v600_v60 = vrot.slane %v599_v50, 4  ;;  %v5403_v36 = vld [vmem:[%s6927_s28 + $0x7c] sm:$0xf] }
  0xc2   : > { %v7366_v30 = vadd.f32 %v7278_v13, %v4283_v25  ;;  %v1420_v41 = vsel %vm7074_vm3, %v1415_v32, %v1419_v9  ;;  %v614_v3 = vrot.slane %v612_v53, 5  ;;  %v5402_v32 = vld [vmem:[%s6927_s28 + $0x78] sm:$0xf]  ;;  %v5362_v40 = vld [vmem:[%s6927_s28 + $0x7c] sm:$0xf] }
  0xc3   : > { %v7368_v31 = vpop.f32.mrf.mxu0  ;;  %v1430_v47 = vsel %vm7074_vm3, %v1425_v35, %v1429_v21  ;;  %1647 = vst [vmem:[#allocation2 + $0x250] sm:$0xf] %v1420_v41  ;;  %v609_v52 = vor.u32 %v608_v46, %v604_v45  ;;  %v5893_v21 = vld [vmem:[#allocation2 + $0x200] sm:$0xf]  ;;  %v1432_v37 = vshrl.u32 %v5402_v32, 16 }
  0xc4   : > { %1648 = vst [vmem:[#allocation2 + $0x274] sm:$0xf] %v1430_v47  ;;  %v5404_v41 = vld [vmem:[%s6927_s28 + $0x80] sm:$0x1]  ;;  %v6568_v42 = vld [vmem:[#allocation2 + $0x228] sm:$0xf0] }
  0xc5   : > { %v610_v2 = vrot.slane %v609_v52, 4  ;;  %1153 = vst [vmem:[#allocation2 + $0x294] sm:$0xf] %v5361_v29  ;;  %v1434_v46 = vrot.slane %v1432_v37, 4  ;;  %v1435_v47 = vshll.u32 %v5402_v32, 16  ;;  %v1445_v52 = vshrl.u32 %v5403_v36, 16 }
  0xc6   : > { %v1451_v53 = vshll.u32 %v5404_v41, 16  ;;  %1154 = vst [vmem:[#allocation2 + $0x2b8] sm:$0xf] %v5362_v40 }
  0xc7   : > { %v4303_v4 = vpop.f32.mrf.mxu2  ;;  %v615_v28 = vsel %vm7074_vm3, %v610_v2, %v614_v3 }
  0xc8   : > { %v7383_v10 = vadd.f32 %v7278_v13, %v4303_v4  ;;  %v4323_v11 = vpop.f32.mrf.mxu3  ;;  %v853_v4 = vld [vmem:[%s6927_s28 + $0x74] sm:$0x1]  ;;  %811 = vst [vmem:[#allocation2 + $0x2b0] sm:$0xf] %v615_v28 }
  0xc9   : > { %v7386_v16 = vadd.f32 %v7278_v13, %v4323_v11  ;;  %v4286_v17 = vpop.f32.mrf.mxu1  ;;  %v6562_v11 = vld [vmem:[#allocation2 + $0x1fc] sm:$0xf]  ;;  %v991_v19 = vrot.slane %v853_v4, 5  ;;  %v5902_v4 = vor.u32 %v6568_v42, %v5901_v33 }
  0xca   : > { %v7391_v25 = vadd.f32 %v7278_v13, %v4286_v17  ;;  %v605_v17 = vsel %vm7074_vm3, %v600_v60, %v604_v45 }
  0xcb   : > { %v7393_v26 = vpop.f32.mrf.mxu0  ;;  %810 = vst [vmem:[#allocation2 + $0x28c] sm:$0xf] %v605_v17 }
  0xcc   : > { %4374 = vmatmul.bf16.gmra.mxu1 %v5854_v5  ;;  %4463 = vmatmul.bf16.gmra.mxu2 %v5858_v12  ;;  %v5336_v5 = vrot.slane %v851_v61, 9  ;;  %v5887_v12 = vld [vmem:[#allocation2 + $0x21c] sm:$0xf0]  ;;  %v5894_v61 = vor.u32 %v6567_v22, %v5893_v21 }
  0xcd   : > { %4552 = vmatmul.bf16.gmra.mxu3 %v5862_v14  ;;  %v6686_v14 = vld [vmem:[%s8273_s1 + $0x158] sm:$0xff]  ;;  %v5890_v50 = vor.u32 %v6562_v11, %v5887_v12  ;;  %v1447_v11 = vrot.slane %v1445_v52, 4 }
  0xce   : > { %4641 = vmatmul.bf16.gmra.mxu0 %v5866_v18  ;;  %v988_v18 = vrot.slane %v852_v62, 5  ;;  %4696 = vmatpush.bf16.msra.mxu1 %v6686_v14  ;;  %v5898_v62 = vor.u32 %v6563_v23, %v5895_v27  ;;  %v355_v12 = vld [vmem:[%s6927_s28 + $0x78] sm:$0xf]  ;;  %v1453_v23 = vrot.slane %v1451_v53, 5 }
  0xcf   : > { %v4306_v51 = vpop.f32.mrf.mxu2  ;;  %v620_v21 = vshll.u32 %v355_v12, 16 }
  0xd0   : > { %v7407_v54 = vadd.f32 %v7278_v13, %v4306_v51  ;;  %v4326_v57 = vpop.f32.mrf.mxu3  ;;  %v989_v34 = vsel %vm7088_vm5, %v5336_v5, %v988_v18  ;;  %v990_v35 = vrot.slane %v988_v18, 4  ;;  %v1441_v51 = vshll.u32 %v5403_v36, 16  ;;  %v356_v18 = vld [vmem:[%s6927_s28 + $0x7c] sm:$0xf] }
  0xd1   : > { %v7412_v63 = vadd.f32 %v7278_v13, %v4326_v57  ;;  %v4288_v0 = vpop.f32.mrf.mxu1  ;;  %1085 = vst [vmem:[#allocation2 + $0x290] sm:$0xf] %v989_v34  ;;  %v626_v27 = vshll.u32 %v356_v18, 16  ;;  %v630_v28 = vshrl.u32 %v356_v18, 16  ;;  %v622_v33 = vrot.slane %v620_v21, 5 }
  0xd2   : > { %v7416_v6 = vadd.f32 %v7278_v13, %v4288_v0  ;;  %v992_v45 = vsel %vm7088_vm5, %v990_v35, %v991_v19  ;;  %v1437_v0 = vrot.slane %v1435_v47, 5  ;;  %v1443_v5 = vrot.slane %v1441_v51, 5  ;;  %v357_v35 = vld [vmem:[%s6927_s28 + $0x80] sm:$0x1]  ;;  %v6571_v18 = vld [vmem:[#allocation2 + $0x244] sm:$0xf] }
  0xd3   : > { %v7418_v9 = vpop.f32.mrf.mxu0  ;;  %1086 = vst [vmem:[#allocation2 + $0x2b4] sm:$0xf] %v992_v45  ;;  %v617_v19 = vshrl.u32 %v355_v12, 16  ;;  %v628_v36 = vrot.slane %v626_v27, 5  ;;  %v632_v41 = vrot.slane %v630_v28, 4  ;;  %v636_v42 = vshll.u32 %v357_v35, 16 }
  0xd4   : > { %v1438_v17 = vor.u32 %v1437_v0, %v1434_v46  ;;  %v1448_v22 = vor.u32 %v1447_v11, %v1443_v5  ;;  %v855_v45 = vld [vmem:[%s6927_s28 + $0x7c] sm:$0xf]  ;;  %v5406_v11 = vld [vmem:[%s6927_s28 + $0x88] sm:$0xf]  ;;  %v5363_v27 = vld [vmem:[%s6927_s28 + $0x84] sm:$0xf] }
  0xd5   : > { %v619_v32 = vrot.slane %v617_v19, 4  ;;  %v5923_v19 = vld [vmem:[#allocation2 + $0x264] sm:$0xf0]  ;;  %1155 = vst [vmem:[#allocation2 + $0x2dc] sm:$0xf] %v5363_v27 }
  0xd6   : > { %v1439_v29 = vrot.slane %v1438_v17, 4  ;;  %v1449_v34 = vrot.slane %v1448_v22, 4  ;;  %v5929_v28 = vld [vmem:[#allocation2 + $0x248] sm:$0xf] }
  0xd7   : > { %v4308_v48 = vpop.f32.mrf.mxu2  ;;  %v623_v40 = vor.u32 %v622_v33, %v619_v32  ;;  %v6572_v32 = vld [vmem:[#allocation2 + $0x24c] sm:$0xf]  ;;  %v5931_v33 = vld [vmem:[#allocation2 + $0x26c] sm:$0xf0] }
  0xd8   : > { %v7440_v57 = vadd.f32 %v7278_v13, %v4308_v48  ;;  %v4328_v60 = vpop.f32.mrf.mxu3  ;;  %v1444_v37 = vsel %vm7074_vm3, %v1439_v29, %v1443_v5  ;;  %v1454_v47 = vsel %vm7074_vm3, %v1449_v34, %v1453_v23  ;;  %v854_v48 = vld [vmem:[%s6927_s28 + $0x78] sm:$0xe]  ;;  %v995_v5 = vrot.slane %v855_v45, 5  ;;  %v6576_v29 = vld [vmem:[#allocation2 + $0x268] sm:$0xf0] }
  0xd9   : > { %v7443_v2 = vadd.f32 %v7278_v13, %v4328_v60  ;;  %v4291_v3 = vpop.f32.mrf.mxu1  ;;  %1649 = vst [vmem:[#allocation2 + $0x298] sm:$0xf] %v1444_v37  ;;  %v624_v53 = vrot.slane %v623_v40, 4  ;;  %v633_v60 = vor.u32 %v632_v41, %v628_v36  ;;  %v5407_v37 = vld [vmem:[%s6927_s28 + $0x8c] sm:$0x1]  ;;  %v1465_v45 = vshll.u32 %v5406_v11, 16 }
  0xda   : > { %v7447_v14 = vadd.f32 %v7278_v13, %v4291_v3  ;;  %1650 = vst [vmem:[#allocation2 + $0x2bc] sm:$0xf] %v1454_v47  ;;  %v638_v3 = vrot.slane %v636_v42, 5  ;;  %v997_v35 = vrot.slane %v995_v5, 4  ;;  %v5937_v41 = vld [vmem:[#allocation2 + $0x250] sm:$0xf] }
  0xdb   : > { %8281 = vst [vmem:[#allocation3_spill] sm:$0xff] %v7443_v2  ;;  %v7449_v15 = vpop.f32.mrf.mxu0  ;;  %v629_v21 = vsel %vm7074_vm3, %v624_v53, %v628_v36  ;;  %v634_v22 = vrot.slane %v633_v60, 4  ;;  %v1475_v53 = vshll.u32 %v5407_v37, 16  ;;  %v6577_v60 = vld [vmem:[#allocation2 + $0x270] sm:$0xf0] }
  0xdc   : > { %4379 = vmatmul.bf16.gmra.mxu1 %v5890_v50  ;;  %4468 = vmatmul.bf16.gmra.mxu2 %v5894_v61  ;;  %v5405_v50 = vld [vmem:[%s6927_s28 + $0x84] sm:$0xf]  ;;  %v856_v61 = vld [vmem:[%s6927_s28 + $0x80] sm:$0x1]  ;;  %812 = vst [vmem:[#allocation2 + $0x2d4] sm:$0xf] %v629_v21 }
  0xdd   : > { %4557 = vmatmul.bf16.gmra.mxu3 %v5898_v62  ;;  %v998_v23 = vrot.slane %v856_v61, 5  ;;  %v1456_v40 = vshrl.u32 %v5405_v50, 16  ;;  %v639_v42 = vsel %vm7074_vm3, %v634_v22, %v638_v3  ;;  %v1459_v36 = vshll.u32 %v5405_v50, 16 }
  0xde   : > { %4646 = vmatmul.bf16.gmra.mxu0 %v5902_v4  ;;  %v5337_v4 = vrot.slane %v854_v48, 9  ;;  %813 = vst [vmem:[#allocation2 + $0x2f8] sm:$0xf] %v639_v42  ;;  %v5364_v48 = vld [vmem:[%s6927_s28 + $0x88] sm:$0xf]  ;;  %v5926_v50 = vor.u32 %v6571_v18, %v5923_v19  ;;  %v5930_v22 = vor.u32 %v6576_v29, %v5929_v28  ;;  %v1477_v42 = vrot.slane %v1475_v53, 5 }
  0xdf   : > { %v4311_v46 = vpop.f32.mrf.mxu2  ;;  %v999_v47 = vsel %vm7088_vm5, %v997_v35, %v998_v23  ;;  %v1461_v61 = vrot.slane %v1459_v36, 5  ;;  %v5934_v23 = vor.u32 %v6572_v32, %v5931_v33  ;;  %1156 = vst [vmem:[#allocation2 + $0x300] sm:$0xf] %v5364_v48  ;;  %v358_v36 = vld [vmem:[%s6927_s28 + $0x84] sm:$0xf]  ;;  %v6693_v53 = vld [vmem:[%s8273_s1 + $0x190] sm:$0xff] }
  0xe0   : > { %v7461_v51 = vadd.f32 %v7278_v13, %v4311_v46  ;;  %v4331_v52 = vpop.f32.mrf.mxu3  ;;  %v996_v34 = vsel %vm7088_vm5, %v5337_v4, %v995_v5  ;;  %v1469_v46 = vshrl.u32 %v5406_v11, 16  ;;  %1088 = vst [vmem:[#allocation2 + $0x2fc] sm:$0xf] %v999_v47  ;;  %v4257_v4 = vadd.f32 %v7278_v13, %v7291_v39  ;;  %v359_v18 = vld [vmem:[%s6927_s28 + $0x88] sm:$0xf]  ;;  %4786 = vmatpush.bf16.msra.mxu2 %v6693_v53 }
  0xe1   : > { %v7465_v62 = vadd.f32 %v7278_v13, %v4331_v52  ;;  %v4293_v0 = vpop.f32.mrf.mxu1  ;;  %1087 = vst [vmem:[#allocation2 + $0x2d8] sm:$0xf] %v996_v34  ;;  %v1458_v52 = vrot.slane %v1456_v40, 4  ;;  %v5938_v40 = vor.u32 %v6577_v60, %v5937_v41  ;;  %v644_v47 = vshll.u32 %v358_v36, 16  ;;  %v5959_v53 = vld [vmem:[#allocation2 + $0x2ac] sm:$0xf0] }
  0xe2   : > { %v7469_v12 = vadd.f32 %v7278_v13, %v4293_v0  ;;  %v1467_v0 = vrot.slane %v1465_v45, 5  ;;  %v1471_v5 = vrot.slane %v1469_v46, 4  ;;  %v641_v46 = vshrl.u32 %v358_v36, 16 }
  0xe3   : > { %8282 = vst [vmem:[#allocation4_spill] sm:$0xff] %v7465_v62  ;;  %v7471_v17 = vpop.f32.mrf.mxu0  ;;  %v1462_v34 = vor.u32 %v1461_v61, %v1458_v52  ;;  %v650_v29 = vshll.u32 %v359_v18, 16  ;;  %v654_v32 = vshrl.u32 %v359_v18, 16  ;;  %v646_v48 = vrot.slane %v644_v47, 5  ;;  %v5408_v52 = vld [vmem:[%s6927_s28 + $0x90] sm:$0xf] }
  0xe4   : > { %v1472_v39 = vor.u32 %v1471_v5, %v1467_v0  ;;  %v643_v41 = vrot.slane %v641_v46, 4  ;;  %v6701_v61 = vld [vmem:[%s8273_s1 + $0x1d0] sm:$0xff]  ;;  %v1483_v36 = vshll.u32 %v5408_v52, 16  ;;  %v859_v47 = vld [vmem:[%s6927_s28 + $0x8c] sm:$0x1] }
  0xe5   : > { %v1463_v45 = vrot.slane %v1462_v34, 4  ;;  %4875 = vmatpush.bf16.msra.mxu3 %v6701_v61  ;;  %v656_v5 = vrot.slane %v654_v32, 4  ;;  %v5365_v61 = vld [vmem:[%s6927_s28 + $0x90] sm:$0xf] }
  0xe6   : > { %v1473_v28 = vrot.slane %v1472_v39, 4  ;;  %v857_v39 = vld [vmem:[%s6927_s28 + $0x84] sm:$0xe]  ;;  %1157 = vst [vmem:[#allocation2 + $0x324] sm:$0xf] %v5365_v61 }
  0xe7   : > { %v4313_v3 = vpop.f32.mrf.mxu2  ;;  %v1468_v33 = vsel %vm7074_vm3, %v1463_v45, %v1467_v0  ;;  %v360_v0 = vld [vmem:[%s6927_s28 + $0x8c] sm:$0x1]  ;;  %v361_v62 = vld [vmem:[%s6927_s28 + $0x90] sm:$0xf] }
  0xe8   : > { %v7487_v11 = vadd.f32 %v7278_v13, %v4313_v3  ;;  %v4333_v21 = vpop.f32.mrf.mxu3  ;;  %v1478_v60 = vsel %vm7074_vm3, %v1473_v28, %v1477_v42  ;;  %1651 = vst [vmem:[#allocation2 + $0x2e0] sm:$0xf] %v1468_v33  ;;  %v858_v42 = vld [vmem:[%s6927_s28 + $0x88] sm:$0xf]  ;;  %v5338_v28 = vrot.slane %v857_v39, 9 }
  0xe9   : > { %v7490_v35 = vadd.f32 %v7278_v13, %v4333_v21  ;;  %v4345_v37 = vpop.f32.mrf.mxu1  ;;  %1652 = vst [vmem:[#allocation2 + $0x304] sm:$0xf] %v1478_v60  ;;  %v660_v21 = vshll.u32 %v360_v0, 16  ;;  %v1002_v33 = vrot.slane %v858_v42, 5  ;;  %v1005_v60 = vrot.slane %v859_v47, 5 }
  0xea   : > { %v4346_v19 = vadd.f32 %v4345_v37, %v4257_v4  ;;  %v647_v4 = vor.u32 %v646_v48, %v643_v41  ;;  %v6580_v48 = vld [vmem:[#allocation2 + $0x28c] sm:$0xf]  ;;  %v5965_v0 = vld [vmem:[#allocation2 + $0x290] sm:$0xf]  ;;  %v6586_v39 = vld [vmem:[#allocation2 + $0x2b8] sm:$0xf0] }
  0xeb   : > { %8283 = vst [vmem:[#allocation5_spill] sm:$0xff] %v7490_v35  ;;  %v7494_v27 = vpop.f32.mrf.mxu0  ;;  %v662_v46 = vrot.slane %v660_v21, 5  ;;  %v1004_v21 = vrot.slane %v1002_v33, 4  ;;  %v5410_v47 = vld [vmem:[%s6927_s28 + $0x98] sm:$0x1] }
  0xec   : > { %4384 = vmatmul.bf16.gmra.mxu1 %v5926_v50  ;;  %4473 = vmatmul.bf16.gmra.mxu2 %v5930_v22  ;;  %v652_v50 = vrot.slane %v650_v29, 5  ;;  %v1480_v22 = vshrl.u32 %v5408_v52, 16 }
  0xed   : > { %4562 = vmatmul.bf16.gmra.mxu3 %v5934_v23  ;;  %v4259_v23 = vadd.f32 %v7278_v13, %v7319_v8  ;;  %v6685_v8 = vld [vmem:[%s8273_s1 + $0x150] sm:$0xff] }
  0xee   : > { %4651 = vmatmul.bf16.gmra.mxu0 %v5938_v40  ;;  %v648_v40 = vrot.slane %v647_v4, 4  ;;  %v657_v45 = vor.u32 %v656_v5, %v652_v50  ;;  %v6585_v4 = vld [vmem:[#allocation2 + $0x2b0] sm:$0xf0]  ;;  %v1003_v5 = vsel %vm7088_vm5, %v5338_v28, %v1002_v33  ;;  %4697 = vmatpush.bf16.msra.mxu1 %v6685_v8  ;;  %v1482_v28 = vrot.slane %v1480_v22, 4 }
  0xef   : > { %v4434_v3 = vpop.f32.mrf.mxu2  ;;  %1089 = vst [vmem:[#allocation2 + $0x320] sm:$0xf] %v1003_v5  ;;  %v1485_v33 = vrot.slane %v1483_v36, 5  ;;  %v4262_v8 = vadd.f32 %v7278_v13, %v7347_v56  ;;  %v362_v13 = vld [vmem:[%s6927_s28 + $0x94] sm:$0xf] }
  0xf0   : > { %v4435_v34 = vadd.f32 %v4434_v3, %v4346_v19  ;;  %v4523_v37 = vpop.f32.mrf.mxu3  ;;  %v6709_v19 = vld [vmem:[%s8273_s1 + $0x210] sm:$0xff]  ;;  %v653_v52 = vsel %vm7074_vm3, %v648_v40, %v652_v50  ;;  %v658_v3 = vrot.slane %v657_v45, 4 }
  0xf1   : > { %v4347_v18 = vpop.f32.mrf.mxu1  ;;  %814 = vst [vmem:[#allocation2 + $0x31c] sm:$0xf] %v653_v52  ;;  %4964 = vmatpush.bf16.msra.mxu0 %v6709_v19  ;;  %v5409_v50 = vld [vmem:[%s6927_s28 + $0x94] sm:$0xf]  ;;  %v1486_v61 = vor.u32 %v1485_v33, %v1482_v28 }
  0xf2   : > { %v4524_v29 = vadd.f32 %v4523_v37, %v4435_v34  ;;  %v4348_v32 = vadd.f32 %v4347_v18, %v4259_v23  ;;  %v6581_v23 = vld [vmem:[#allocation2 + $0x294] sm:$0xf]  ;;  %v5967_v34 = vld [vmem:[#allocation2 + $0x2b4] sm:$0xf0]  ;;  %v663_v42 = vsel %vm7074_vm3, %v658_v3, %v662_v46  ;;  %v1006_v18 = vsel %vm7088_vm5, %v1004_v21, %v1005_v60 }
  0xf3   : > { %v7513_v41 = vpop.f32.mrf.mxu0  ;;  %v5973_v37 = vld [vmem:[#allocation2 + $0x298] sm:$0xf]  ;;  %v5366_v45 = vld [vmem:[%s6927_s28 + $0x94] sm:$0xf]  ;;  %815 = vst [vmem:[#allocation2 + $0x340] sm:$0xf] %v663_v42  ;;  %v5966_v60 = vor.u32 %v6585_v4, %v5965_v0  ;;  %v5970_v22 = vor.u32 %v6581_v23, %v5967_v34 }
  0xf4   : > { %v7528_v40 = vadd.f32 %v7494_v27, %v4524_v29  ;;  %v1489_v52 = vshll.u32 %v5409_v50, 16  ;;  %v5962_v27 = vor.u32 %v6580_v48, %v5959_v53  ;;  %1090 = vst [vmem:[#allocation2 + $0x344] sm:$0xf] %v1006_v18  ;;  %v1493_v29 = vshrl.u32 %v5409_v50, 16 }
  0xf5   : > { %v1499_v46 = vshll.u32 %v5410_v47, 16  ;;  %1158 = vst [vmem:[#allocation2 + $0x348] sm:$0xf] %v5366_v45  ;;  %v5974_v36 = vor.u32 %v6586_v39, %v5973_v37  ;;  %v1487_v53 = vrot.slane %v1486_v61, 4  ;;  %v665_v50 = vshrl.u32 %v361_v62, 16 }
  0xf6   : > { %8284 = vst [vmem:[#allocation6_spill] sm:$0xff] %v7528_v40  ;;  %v1491_v21 = vrot.slane %v1489_v52, 5  ;;  %v1495_v40 = vrot.slane %v1493_v29, 4  ;;  %v668_v18 = vshll.u32 %v361_v62, 16  ;;  %v674_v0 = vshll.u32 %v362_v13, 16 }
  0xf7   : > { %v4436_v19 = vpop.f32.mrf.mxu2  ;;  %v1501_v35 = vrot.slane %v1499_v46, 5  ;;  %v678_v4 = vshrl.u32 %v362_v13, 16  ;;  %v667_v34 = vrot.slane %v665_v50, 4  ;;  %v363_v62 = vld [vmem:[%s6927_s28 + $0x98] sm:$0x1] }
  0xf8   : > { %v4437_v3 = vadd.f32 %v4436_v19, %v4348_v32  ;;  %v4525_v5 = vpop.f32.mrf.mxu3  ;;  %v1496_v32 = vor.u32 %v1495_v40, %v1491_v21  ;;  %v1492_v23 = vsel %vm7074_vm3, %v1487_v53, %v1491_v21  ;;  %v670_v45 = vrot.slane %v668_v18, 5  ;;  %v860_v19 = vld [vmem:[%s6927_s28 + $0x90] sm:$0xe]  ;;  %v5412_v13 = vld [vmem:[%s6927_s28 + $0xa0] sm:$0xf] }
  0xf9   : > { %v4350_v42 = vpop.f32.mrf.mxu1  ;;  %1653 = vst [vmem:[#allocation2 + $0x328] sm:$0xf] %v1492_v23  ;;  %v676_v40 = vrot.slane %v674_v0, 5  ;;  %v680_v47 = vrot.slane %v678_v4, 4  ;;  %v5995_v0 = vld [vmem:[#allocation2 + $0x2f4] sm:$0xf0] }
  0xfa   : > { %v4526_v56 = vadd.f32 %v4525_v5, %v4437_v3  ;;  %v4351_v2 = vadd.f32 %v4350_v42, %v4262_v8  ;;  %v1497_v39 = vrot.slane %v1496_v32, 4  ;;  %v671_v52 = vor.u32 %v670_v45, %v667_v34  ;;  %v6001_v4 = vld [vmem:[#allocation2 + $0x2d8] sm:$0xf]  ;;  %v6594_v23 = vld [vmem:[#allocation2 + $0x2f8] sm:$0xf0] }
  0xfb   : > { %v7540_v48 = vpop.f32.mrf.mxu0  ;;  %v684_v8 = vshll.u32 %v363_v62, 16  ;;  %v681_v5 = vor.u32 %v680_v47, %v676_v40  ;;  %v5413_v62 = vld [vmem:[%s6927_s28 + $0xa4] sm:$0x1] }
  0xfc   : > { %4389 = vmatmul.bf16.gmra.mxu1 %v5962_v27  ;;  %4478 = vmatmul.bf16.gmra.mxu2 %v5966_v60  ;;  %v7545_v37 = vadd.f32 %v7513_v41, %v4526_v56  ;;  %v1502_v33 = vsel %vm7074_vm3, %v1497_v39, %v1501_v35  ;;  %v5411_v41 = vld [vmem:[%s6927_s28 + $0x9c] sm:$0xf]  ;;  %v7555_v27 = vld [vmem:[%s8274_s2] ss:$0 sm:$0xff]  ;;  %v861_v60 = vld [vmem:[%s6927_s28 + $0x94] sm:$0xf] }
  0xfd   : > { %4567 = vmatmul.bf16.gmra.mxu3 %v5970_v22  ;;  %v4264_v29 = vadd.f32 %v7555_v27, %v7368_v31  ;;  %1654 = vst [vmem:[#allocation2 + $0x34c] sm:$0xf] %v1502_v33  ;;  %v862_v35 = vld [vmem:[%s6927_s28 + $0x98] sm:$0x1]  ;;  %v672_v21 = vrot.slane %v671_v52, 4  ;;  %v686_v42 = vrot.slane %v684_v8, 5 }
  0xfe   : > { %4656 = vmatmul.bf16.gmra.mxu0 %v5974_v36  ;;  %v5339_v22 = vrot.slane %v860_v19, 9  ;;  %v1009_v36 = vrot.slane %v861_v60, 5  ;;  %v682_v32 = vrot.slane %v681_v5, 4  ;;  %v1012_v18 = vrot.slane %v862_v35, 5  ;;  %v5367_v31 = vld [vmem:[%s6927_s28 + $0x9c] sm:$0xf] }
  0xff   : > { %v4439_v28 = vpop.f32.mrf.mxu2  ;;  %v677_v34 = vsel %vm7074_vm3, %v672_v21, %v676_v40  ;;  %1159 = vst [vmem:[#allocation2 + $0x36c] sm:$0xf] %v5367_v31  ;;  %v1504_v47 = vshrl.u32 %v5411_v41, 16  ;;  %v6003_v33 = vld [vmem:[#allocation2 + $0x2fc] sm:$0xf0]  ;;  %v1517_v60 = vshrl.u32 %v5412_v13, 16  ;;  %v6002_v31 = vor.u32 %v6594_v23, %v6001_v4 }
 0x100   : > { %v4440_v46 = vadd.f32 %v4439_v28, %v4351_v2  ;;  %v4528_v3 = vpop.f32.mrf.mxu3  ;;  %v6589_v2 = vld [vmem:[#allocation2 + $0x2d4] sm:$0xf]  ;;  %v1010_v39 = vsel %vm7088_vm5, %v5339_v22, %v1009_v36  ;;  %v1011_v45 = vrot.slane %v1009_v36, 4  ;;  %v6590_v28 = vld [vmem:[#allocation2 + $0x2dc] sm:$0xf]  ;;  %v687_v8 = vsel %vm7074_vm3, %v682_v32, %v686_v42 }
 0x101   : > { %v4352_v61 = vpop.f32.mrf.mxu1  ;;  %v6009_v52 = vld [vmem:[#allocation2 + $0x2e0] sm:$0xf]  ;;  %816 = vst [vmem:[#allocation2 + $0x364] sm:$0xf] %v677_v34  ;;  %v1506_v5 = vrot.slane %v1504_v47, 4  ;;  %v1523_v35 = vshll.u32 %v5413_v62, 16  ;;  %v4267_v42 = vadd.f32 %v7555_v27, %v7393_v26  ;;  %v5998_v32 = vor.u32 %v6589_v2, %v5995_v0 }
 0x102   : > { %v4529_v56 = vadd.f32 %v4528_v3, %v4440_v46  ;;  %v4353_v53 = vadd.f32 %v4352_v61, %v4264_v29  ;;  %v5368_v19 = vld [vmem:[%s6927_s28 + $0xa0] sm:$0xf]  ;;  %v1507_v29 = vshll.u32 %v5411_v41, 16  ;;  %v1513_v46 = vshll.u32 %v5412_v13, 16  ;;  %817 = vst [vmem:[#allocation2 + $0x388] sm:$0xf] %v687_v8 }
 0x103   : > { %v4619_v50 = vpop.f32.mrf.mxu0  ;;  %v1013_v40 = vsel %vm7088_vm5, %v1011_v45, %v1012_v18  ;;  %v6595_v61 = vld [vmem:[#allocation2 + $0x300] sm:$0xf0]  ;;  %1091 = vst [vmem:[#allocation2 + $0x368] sm:$0xf] %v1010_v39  ;;  %v6006_v34 = vor.u32 %v6590_v28, %v6003_v33  ;;  %v1525_v62 = vrot.slane %v1523_v35, 5  ;;  %v6692_v33 = vld [vmem:[%s8273_s1 + $0x188] sm:$0xff] }
 0x104   : > { %v7572_v3 = vadd.f32 %v7540_v48, %v4529_v56  ;;  %v1509_v21 = vrot.slane %v1507_v29, 5  ;;  %v1515_v22 = vrot.slane %v1513_v46, 5  ;;  %1092 = vst [vmem:[#allocation2 + $0x38c] sm:$0xf] %v1013_v40  ;;  %v1519_v48 = vrot.slane %v1517_v60, 4  ;;  %4787 = vmatpush.bf16.msra.mxu2 %v6692_v33 }
 0x105   : > { %1160 = vst [vmem:[#allocation2 + $0x390] sm:$0xf] %v5368_v19  ;;  %v6010_v45 = vor.u32 %v6595_v61, %v6009_v52  ;;  %v364_v47 = vld [vmem:[%s6927_s28 + $0x9c] sm:$0xf]  ;;  %v365_v8 = vld [vmem:[%s6927_s28 + $0xa0] sm:$0xf] }
 0x106   : > { %8285 = vst [vmem:[#allocation7_spill] sm:$0xff] %v7572_v3  ;;  %v1510_v18 = vor.u32 %v1509_v21, %v1506_v5  ;;  %v1520_v39 = vor.u32 %v1519_v48, %v1515_v22  ;;  %v689_v40 = vshrl.u32 %v364_v47, 16  ;;  %v692_v60 = vshll.u32 %v364_v47, 16  ;;  %v6700_v19 = vld [vmem:[%s8273_s1 + $0x1c8] sm:$0xff] }
 0x107   : > { %v4441_v41 = vpop.f32.mrf.mxu2  ;;  %v698_v2 = vshll.u32 %v365_v8, 16  ;;  %v702_v0 = vshrl.u32 %v365_v8, 16  ;;  %4876 = vmatpush.bf16.msra.mxu3 %v6700_v19 }
 0x108   : > { %v4442_v36 = vadd.f32 %v4441_v41, %v4353_v53  ;;  %v4530_v56 = vpop.f32.mrf.mxu3  ;;  %v1511_v3 = vrot.slane %v1510_v18, 4  ;;  %v1521_v53 = vrot.slane %v1520_v39, 4  ;;  %v691_v23 = vrot.slane %v689_v40, 4  ;;  %v6603_v40 = vld [vmem:[#allocation2 + $0x340] sm:$0xf0] }
 0x109   : > { %v4355_v13 = vpop.f32.mrf.mxu1  ;;  %v694_v35 = vrot.slane %v692_v60, 5  ;;  %v700_v61 = vrot.slane %v698_v2, 5  ;;  %v704_v21 = vrot.slane %v702_v0, 4  ;;  %v6708_v60 = vld [vmem:[%s8273_s1 + $0x208] sm:$0xff] }
 0x10a   : > { %v4531_v29 = vadd.f32 %v4530_v56, %v4442_v36  ;;  %v4356_v46 = vadd.f32 %v4355_v13, %v4267_v42  ;;  %v1516_v4 = vsel %vm7074_vm3, %v1511_v3, %v1515_v22  ;;  %v1526_v52 = vsel %vm7074_vm3, %v1521_v53, %v1525_v62  ;;  %v7595_v3 = vld [vmem:[%s6927_s28 + $0xa8] sm:$0xf]  ;;  %v863_v36 = vld [vmem:[%s6927_s28 + $0x9c] sm:$0xe]  ;;  %v864_v56 = vld [vmem:[%s6927_s28 + $0xa0] sm:$0xf]  ;;  %4965 = vmatpush.bf16.msra.mxu0 %v6708_v60 }
 0x10b   : > { %v7580_v26 = vpop.f32.mrf.mxu0  ;;  %1655 = vst [vmem:[#allocation2 + $0x370] sm:$0xf] %v1516_v4  ;;  %v4269_v22 = vadd.f32 %v7555_v27, %v7418_v9  ;;  %v695_v18 = vor.u32 %v694_v35, %v691_v23  ;;  %v705_v13 = vor.u32 %v704_v21, %v700_v61  ;;  %v1016_v39 = vrot.slane %v864_v56, 5  ;;  %v6598_v9 = vld [vmem:[#allocation2 + $0x31c] sm:$0xf]  ;;  %v6684_v53 = vld [vmem:[%s8273_s1 + $0x148] sm:$0xff] }
 0x10c   : > { %4394 = vmatmul.bf16.gmra.mxu1 %v5998_v32  ;;  %4483 = vmatmul.bf16.gmra.mxu2 %v6002_v31  ;;  %v7584_v28 = vadd.f32 %v4619_v50, %v4531_v29  ;;  %1656 = vst [vmem:[#allocation2 + $0x394] sm:$0xf] %v1526_v52  ;;  %v366_v50 = vld [vmem:[%s6927_s28 + $0xa4] sm:$0x1]  ;;  %v1528_v32 = vshrl.u32 %v7595_v3, 16 }
 0x10d   : > { %4572 = vmatmul.bf16.gmra.mxu3 %v6006_v34  ;;  %v708_v48 = vshll.u32 %v366_v50, 16  ;;  %v865_v34 = vld [vmem:[%s6927_s28 + $0xa4] sm:$0x1]  ;;  %v6031_v29 = vld [vmem:[#allocation2 + $0x33c] sm:$0xf0]  ;;  %v696_v23 = vrot.slane %v695_v18, 4  ;;  %4698 = vmatpush.bf16.msra.mxu1 %v6684_v53 }
 0x10e   : > { %4661 = vmatmul.bf16.gmra.mxu0 %v6010_v45  ;;  %v5340_v45 = vrot.slane %v863_v36, 9  ;;  %v1019_v0 = vrot.slane %v865_v34, 5  ;;  %v5369_v4 = vld [vmem:[%s6927_s28 + $0xa8] sm:$0xf]  ;;  %v706_v33 = vrot.slane %v705_v13, 4  ;;  %v1018_v19 = vrot.slane %v1016_v39, 4 }
 0x10f   : > { %v4444_v5 = vpop.f32.mrf.mxu2  ;;  %v710_v2 = vrot.slane %v708_v48, 5  ;;  %v5415_v50 = vld [vmem:[%s6927_s28 + $0xac] sm:$0xf]  ;;  %v6039_v35 = vld [vmem:[#allocation2 + $0x344] sm:$0xf0]  ;;  %v701_v48 = vsel %vm7074_vm3, %v696_v23, %v700_v61  ;;  %v1530_v18 = vrot.slane %v1528_v32, 4  ;;  %v6034_v61 = vor.u32 %v6598_v9, %v6031_v29 }
 0x110   : > { %v4445_v42 = vadd.f32 %v4444_v5, %v4356_v46  ;;  %v4533_v41 = vpop.f32.mrf.mxu3  ;;  %v6037_v46 = vld [vmem:[#allocation2 + $0x320] sm:$0xf]  ;;  %v1017_v52 = vsel %vm7088_vm5, %v5340_v45, %v1016_v39  ;;  %v6599_v5 = vld [vmem:[#allocation2 + $0x324] sm:$0xf]  ;;  %v6045_v21 = vld [vmem:[#allocation2 + $0x328] sm:$0xf]  ;;  %v1020_v56 = vsel %vm7088_vm5, %v1018_v19, %v1019_v0 }
 0x111   : > { %v4357_v31 = vpop.f32.mrf.mxu1  ;;  %1093 = vst [vmem:[#allocation2 + $0x3b0] sm:$0xf] %v1017_v52  ;;  %v711_v36 = vsel %vm7074_vm3, %v706_v33, %v710_v2  ;;  %v1531_v13 = vshll.u32 %v7595_v3, 16  ;;  %v1537_v34 = vshll.u32 %v5415_v50, 16  ;;  %v1541_v45 = vshrl.u32 %v5415_v50, 16 }
 0x112   : > { %v4534_v62 = vadd.f32 %v4533_v41, %v4445_v42  ;;  %v4358_v47 = vadd.f32 %v4357_v31, %v4269_v22  ;;  %v5416_v22 = vld [vmem:[%s6927_s28 + $0xb0] sm:$0x1]  ;;  %v6604_v41 = vld [vmem:[#allocation2 + $0x348] sm:$0xf0]  ;;  %1161 = vst [vmem:[#allocation2 + $0x3b4] sm:$0xf] %v5369_v4  ;;  %v6042_v3 = vor.u32 %v6599_v5, %v6039_v35 }
 0x113   : > { %v7604_v8 = vpop.f32.mrf.mxu0  ;;  %v5370_v31 = vld [vmem:[%s6927_s28 + $0xac] sm:$0xf]  ;;  %818 = vst [vmem:[#allocation2 + $0x3ac] sm:$0xf] %v701_v48  ;;  %v1547_v53 = vshll.u32 %v5416_v22, 16  ;;  %v1533_v0 = vrot.slane %v1531_v13, 5  ;;  %v6046_v33 = vor.u32 %v6604_v41, %v6045_v21 }
 0x114   : > { %v7618_v42 = vadd.f32 %v7580_v26, %v4534_v62  ;;  %v4272_v26 = vadd.f32 %v7555_v27, %v7449_v15  ;;  %v6038_v62 = vor.u32 %v6603_v40, %v6037_v46  ;;  %819 = vst [vmem:[#allocation2 + $0x3d0] sm:$0xf] %v711_v36  ;;  %v1539_v4 = vrot.slane %v1537_v34, 5  ;;  %v367_v19 = vld [vmem:[%s6927_s28 + $0xa8] sm:$0xf] }
 0x115   : > { %1094 = vst [vmem:[#allocation2 + $0x3d4] sm:$0xf] %v1020_v56  ;;  %v1543_v32 = vrot.slane %v1541_v45, 4  ;;  %v1549_v52 = vrot.slane %v1547_v53, 5  ;;  %v1534_v29 = vor.u32 %v1533_v0, %v1530_v18  ;;  %v713_v40 = vshrl.u32 %v367_v19, 16 }
 0x116   : > { %1162 = vst [vmem:[#allocation2 + $0x3d8] sm:$0xf] %v5370_v31  ;;  %v716_v22 = vshll.u32 %v367_v19, 16  ;;  %v369_v41 = vld [vmem:[%s6927_s28 + $0xb0] sm:$0x1]  ;;  %v4274_v53 = vadd.f32 %v7555_v27, %v7471_v17 }
 0x117   : > { %v4446_v39 = vpop.f32.mrf.mxu2  ;;  %v1544_v46 = vor.u32 %v1543_v32, %v1539_v4  ;;  %v1535_v5 = vrot.slane %v1534_v29, 4  ;;  %v715_v56 = vrot.slane %v713_v40, 4  ;;  %v5417_v32 = vld [vmem:[%s6927_s28 + $0xb4] sm:$0xf]  ;;  %v6607_v27 = vld [vmem:[#allocation2 + $0x364] sm:$0xf] }
 0x118   : > { %v4447_v60 = vadd.f32 %v4446_v39, %v4358_v47  ;;  %v4535_v2 = vpop.f32.mrf.mxu3  ;;  %v368_v47 = vld [vmem:[%s6927_s28 + $0xac] sm:$0xf]  ;;  %v718_v31 = vrot.slane %v716_v22, 5  ;;  %v5371_v17 = vld [vmem:[%s6927_s28 + $0xb4] sm:$0xf] }
 0x119   : > { %v4360_v23 = vpop.f32.mrf.mxu1  ;;  %v722_v48 = vshll.u32 %v368_v47, 16  ;;  %v726_v36 = vshrl.u32 %v368_v47, 16  ;;  %v1545_v35 = vrot.slane %v1544_v46, 4  ;;  %v1540_v18 = vsel %vm7074_vm3, %v1535_v5, %v1539_v4  ;;  %v866_v4 = vld [vmem:[%s6927_s28 + $0xa8] sm:$0xe] }
 0x11a   : > { %v4536_v15 = vadd.f32 %v4535_v2, %v4447_v60  ;;  %v4361_v50 = vadd.f32 %v4360_v23, %v4272_v26  ;;  %v867_v26 = vld [vmem:[%s6927_s28 + $0xac] sm:$0xf]  ;;  %1657 = vst [vmem:[#allocation2 + $0x3b8] sm:$0xf] %v1540_v18  ;;  %v5341_v19 = vrot.slane %v866_v4, 9 }
 0x11b   : > { %v7631_v9 = vpop.f32.mrf.mxu0  ;;  %v1550_v13 = vsel %vm7074_vm3, %v1545_v35, %v1549_v52  ;;  %v724_v34 = vrot.slane %v722_v48, 5  ;;  %v728_v45 = vrot.slane %v726_v36, 4  ;;  %v868_v52 = vld [vmem:[%s6927_s28 + $0xb0] sm:$0x1]  ;;  %v6073_v22 = vld [vmem:[#allocation2 + $0x368] sm:$0xf] }
 0x11c   : > { %4399 = vmatmul.bf16.gmra.mxu1 %v6034_v61  ;;  %4488 = vmatmul.bf16.gmra.mxu2 %v6038_v62  ;;  %v7635_v21 = vadd.f32 %v7604_v8, %v4536_v15  ;;  %v719_v8 = vor.u32 %v718_v31, %v715_v56  ;;  %v732_v61 = vshll.u32 %v369_v41, 16  ;;  %v1023_v62 = vrot.slane %v867_v26, 5  ;;  %1658 = vst [vmem:[#allocation2 + $0x3dc] sm:$0xf] %v1550_v13  ;;  %v6612_v48 = vld [vmem:[#allocation2 + $0x388] sm:$0xf0] }
 0x11d   : > { %4577 = vmatmul.bf16.gmra.mxu3 %v6042_v3  ;;  %v729_v0 = vor.u32 %v728_v45, %v724_v34  ;;  %v1026_v35 = vrot.slane %v868_v52, 5  ;;  %v5372_v41 = vld [vmem:[%s6927_s28 + $0xb8] sm:$0xf]  ;;  %1163 = vst [vmem:[#allocation2 + $0x3fc] sm:$0xf] %v5371_v17  ;;  %v1552_v31 = vshrl.u32 %v5417_v32, 16 }
 0x11e   : > { %4666 = vmatmul.bf16.gmra.mxu0 %v6046_v33  ;;  %v720_v3 = vrot.slane %v719_v8, 4  ;;  %v734_v33 = vrot.slane %v732_v61, 5  ;;  %v1025_v40 = vrot.slane %v1023_v62, 4  ;;  %v1024_v5 = vsel %vm7088_vm5, %v5341_v19, %v1023_v62  ;;  %v5418_v56 = vld [vmem:[%s6927_s28 + $0xb8] sm:$0xf] }
 0x11f   : > { %v4449_v39 = vpop.f32.mrf.mxu2  ;;  %v730_v47 = vrot.slane %v729_v0, 4  ;;  %v6608_v18 = vld [vmem:[#allocation2 + $0x36c] sm:$0xf]  ;;  %v6075_v13 = vld [vmem:[#allocation2 + $0x38c] sm:$0xf0]  ;;  %v1555_v8 = vshll.u32 %v5417_v32, 16  ;;  %v6074_v19 = vor.u32 %v6612_v48, %v6073_v22 }
 0x120   : > { %v4450_v60 = vadd.f32 %v4449_v39, %v4361_v50  ;;  %v4538_v2 = vpop.f32.mrf.mxu3  ;;  %v6067_v50 = vld [vmem:[#allocation2 + $0x384] sm:$0xf0]  ;;  %v725_v36 = vsel %vm7074_vm3, %v720_v3, %v724_v34  ;;  %v6081_v45 = vld [vmem:[#allocation2 + $0x370] sm:$0xf]  ;;  %v5419_v39 = vld [vmem:[%s6927_s28 + $0xbc] sm:$0x1]  ;;  %v1027_v62 = vsel %vm7088_vm5, %v1025_v40, %v1026_v35  ;;  %v6078_v40 = vor.u32 %v6608_v18, %v6075_v13 }
 0x121   : > { %v4362_v23 = vpop.f32.mrf.mxu1  ;;  %v735_v26 = vsel %vm7074_vm3, %v730_v47, %v734_v33  ;;  %820 = vst [vmem:[#allocation2 + $0x3f4] sm:$0xf] %v725_v36  ;;  %v1561_v61 = vshll.u32 %v5418_v56, 16  ;;  %v6613_v0 = vld [vmem:[#allocation2 + $0x390] sm:$0xf0]  ;;  %v1557_v4 = vrot.slane %v1555_v8, 5 }
 0x122   : > { %v4539_v15 = vadd.f32 %v4538_v2, %v4450_v60  ;;  %v4363_v29 = vadd.f32 %v4362_v23, %v4274_v53  ;;  %821 = vst [vmem:[#allocation2 + $0x418] sm:$0xf] %v735_v26  ;;  %v1554_v53 = vrot.slane %v1552_v31, 4  ;;  %v1565_v60 = vshrl.u32 %v5418_v56, 16  ;;  %v370_v56 = vld [vmem:[%s6927_s28 + $0xb4] sm:$0xf] }
 0x123   : > { %v4629_v46 = vpop.f32.mrf.mxu0  ;;  %v1571_v2 = vshll.u32 %v5419_v39, 16  ;;  %1095 = vst [vmem:[#allocation2 + $0x3f8] sm:$0xf] %v1024_v5  ;;  %v1563_v23 = vrot.slane %v1561_v61, 5  ;;  %v6082_v17 = vor.u32 %v6613_v0, %v6081_v45  ;;  %v371_v5 = vld [vmem:[%s6927_s28 + $0xb8] sm:$0xf] }
 0x124   : > { %v7659_v34 = vadd.f32 %v7631_v9, %v4539_v15  ;;  %1096 = vst [vmem:[#allocation2 + $0x41c] sm:$0xf] %v1027_v62  ;;  %v1567_v32 = vrot.slane %v1565_v60, 4  ;;  %v6070_v9 = vor.u32 %v6607_v27, %v6067_v50  ;;  %v1558_v15 = vor.u32 %v1557_v4, %v1554_v53  ;;  %v6699_v45 = vld [vmem:[%s8273_s1 + $0x1c0] sm:$0xff] }
 0x125   : > { %1164 = vst [vmem:[#allocation2 + $0x420] sm:$0xf] %v5372_v41  ;;  %v1573_v35 = vrot.slane %v1571_v2, 5  ;;  %v737_v61 = vshrl.u32 %v370_v56, 16  ;;  %v740_v27 = vshll.u32 %v370_v56, 16  ;;  %v746_v50 = vshll.u32 %v371_v5, 16  ;;  %4877 = vmatpush.bf16.msra.mxu3 %v6699_v45 }
 0x126   : > { %v1568_v36 = vor.u32 %v1567_v32, %v1563_v23  ;;  %v1559_v8 = vrot.slane %v1558_v15, 4  ;;  %v750_v22 = vshrl.u32 %v371_v5, 16  ;;  %v7681_v62 = vld [vmem:[%s6927_s28 + $0xc0] sm:$0xf]  ;;  %v869_v32 = vld [vmem:[%s6927_s28 + $0xb4] sm:$0xe] }
 0x127   : > { %v4451_v3 = vpop.f32.mrf.mxu2  ;;  %v739_v41 = vrot.slane %v737_v61, 4  ;;  %v742_v60 = vrot.slane %v740_v27, 5  ;;  %v748_v2 = vrot.slane %v746_v50, 5  ;;  %v6616_v5 = vld [vmem:[#allocation2 + $0x3ac] sm:$0xf]  ;;  %v6683_v61 = vld [vmem:[%s8273_s1 + $0x140] sm:$0xff] }
 0x128   : > { %v4452_v33 = vadd.f32 %v4451_v3, %v4363_v29  ;;  %v4540_v52 = vpop.f32.mrf.mxu3  ;;  %v1569_v29 = vrot.slane %v1568_v36, 4  ;;  %v1564_v48 = vsel %vm7074_vm3, %v1559_v8, %v1563_v23  ;;  %v752_v0 = vrot.slane %v750_v22, 4  ;;  %v6621_v8 = vld [vmem:[#allocation2 + $0x3d0] sm:$0xf0]  ;;  %v5373_v22 = vld [vmem:[%s6927_s28 + $0xc0] sm:$0xf]  ;;  %4699 = vmatpush.bf16.msra.mxu1 %v6683_v61 }
 0x129   : > { %v4365_v47 = vpop.f32.mrf.mxu1  ;;  %1659 = vst [vmem:[#allocation2 + $0x400] sm:$0xf] %v1564_v48  ;;  %v6617_v45 = vld [vmem:[#allocation2 + $0x3b4] sm:$0xf] }
 0x12a   : > { %v4541_v31 = vadd.f32 %v4540_v52, %v4452_v33  ;;  %v4366_v26 = vadd.f32 %v4365_v47, %v7289_v38  ;;  %v6691_v38 = vld [vmem:[%s8273_s1 + $0x180] sm:$0xff]  ;;  %v1574_v13 = vsel %vm7074_vm3, %v1569_v29, %v1573_v35  ;;  %v870_v33 = vld [vmem:[%s6927_s28 + $0xb8] sm:$0xf]  ;;  %v1576_v52 = vshrl.u32 %v7681_v62, 16  ;;  %v871_v47 = vld [vmem:[%s6927_s28 + $0xbc] sm:$0x1] }
 0x12b   : > { %v7666_v39 = vpop.f32.mrf.mxu0  ;;  %1660 = vst [vmem:[#allocation2 + $0x424] sm:$0xf] %v1574_v13  ;;  %4788 = vmatpush.bf16.msra.mxu2 %v6691_v38  ;;  %v753_v15 = vor.u32 %v752_v0, %v748_v2  ;;  %v6707_v29 = vld [vmem:[%s8273_s1 + $0x200] sm:$0xff]  ;;  %v1033_v50 = vrot.slane %v871_v47, 5 }
 0x12c   : > { %4404 = vmatmul.bf16.gmra.mxu1 %v6070_v9  ;;  %4493 = vmatmul.bf16.gmra.mxu2 %v6074_v19  ;;  %v7670_v18 = vadd.f32 %v4629_v46, %v4541_v31  ;;  %v372_v46 = vld [vmem:[%s6927_s28 + $0xbc] sm:$0x1]  ;;  %v743_v19 = vor.u32 %v742_v60, %v739_v41  ;;  %v6103_v31 = vld [vmem:[#allocation2 + $0x3cc] sm:$0xf0]  ;;  %v5421_v13 = vld [vmem:[%s6927_s28 + $0xc4] sm:$0xf] }
 0x12d   : > { %4582 = vmatmul.bf16.gmra.mxu3 %v6078_v40  ;;  %v756_v3 = vshll.u32 %v372_v46, 16  ;;  %v5342_v40 = vrot.slane %v869_v32, 9  ;;  %v754_v41 = vrot.slane %v753_v15, 4  ;;  %v6111_v46 = vld [vmem:[#allocation2 + $0x3d4] sm:$0xf0]  ;;  %4966 = vmatpush.bf16.msra.mxu0 %v6707_v29  ;;  %v1585_v15 = vshll.u32 %v5421_v13, 16 }
 0x12e   : > { %4671 = vmatmul.bf16.gmra.mxu0 %v6082_v17  ;;  %v1030_v17 = vrot.slane %v870_v33, 5  ;;  %v744_v48 = vrot.slane %v743_v19, 4  ;;  %v5422_v60 = vld [vmem:[%s6927_s28 + $0xc8] sm:$0x1]  ;;  %v5374_v33 = vld [vmem:[%s6927_s28 + $0xc4] sm:$0xf] }
 0x12f   : > { %v4454_v53 = vpop.f32.mrf.mxu2  ;;  %v758_v27 = vrot.slane %v756_v3, 5  ;;  %1165 = vst [vmem:[#allocation2 + $0x444] sm:$0xf] %v5373_v22  ;;  %v1579_v19 = vshll.u32 %v7681_v62, 16  ;;  %v1589_v47 = vshrl.u32 %v5421_v13, 16 }
 0x130   : > { %v4455_v4 = vadd.f32 %v4454_v53, %v4366_v26  ;;  %v4543_v23 = vpop.f32.mrf.mxu3  ;;  %v6109_v26 = vld [vmem:[#allocation2 + $0x3b0] sm:$0xf]  ;;  %v1032_v38 = vrot.slane %v1030_v17, 4  ;;  %v6117_v53 = vld [vmem:[#allocation2 + $0x3b8] sm:$0xf] }
 0x131   : > { %v4367_v9 = vpop.f32.mrf.mxu1  ;;  %v759_v3 = vsel %vm7074_vm3, %v754_v41, %v758_v27  ;;  %v1581_v29 = vrot.slane %v1579_v19, 5  ;;  %v1587_v27 = vrot.slane %v1585_v15, 5  ;;  %1166 = vst [vmem:[#allocation2 + $0x468] sm:$0xf] %v5374_v33  ;;  %v5519_v41 = vld [vmem:[%s6927_s28 + $0x18] sm:$0xf] }
 0x132   : > { %v4544_v36 = vadd.f32 %v4543_v23, %v4455_v4  ;;  %v4368_v35 = vadd.f32 %v4367_v9, %v7317_v7  ;;  %v1031_v7 = vsel %vm7088_vm5, %v5342_v40, %v1030_v17  ;;  %v6622_v4 = vld [vmem:[#allocation2 + $0x3d8] sm:$0xf0]  ;;  %v749_v23 = vsel %vm7074_vm3, %v744_v48, %v748_v2  ;;  %823 = vst [vmem:[#allocation2 + $0x460] sm:$0xf] %v759_v3 }
 0x133   : > { %v4634_v56 = vpop.f32.mrf.mxu0  ;;  %1097 = vst [vmem:[#allocation2 + $0x440] sm:$0xf] %v1031_v7  ;;  %v1034_v32 = vsel %vm7088_vm5, %v1032_v38, %v1033_v50  ;;  %v1578_v9 = vrot.slane %v1576_v52, 4  ;;  %v6106_v40 = vor.u32 %v6616_v5, %v6103_v31  ;;  %v6110_v17 = vor.u32 %v6621_v8, %v6109_v26 }
 0x134   : > { %v7701_v0 = vadd.f32 %v7666_v39, %v4544_v36  ;;  %822 = vst [vmem:[#allocation2 + $0x43c] sm:$0xf] %v749_v23  ;;  %v1595_v2 = vshll.u32 %v5422_v60, 16  ;;  %v1591_v50 = vrot.slane %v1589_v47, 4  ;;  %v6114_v48 = vor.u32 %v6617_v45, %v6111_v46  ;;  %v5424_v46 = vld [vmem:[%s6927_s28 + $0x10] sm:$0xf] }
 0x135   : > { %1098 = vst [vmem:[#allocation2 + $0x464] sm:$0xf] %v1034_v32  ;;  %v6118_v52 = vor.u32 %v6622_v4, %v6117_v53  ;;  %v1582_v26 = vor.u32 %v1581_v29, %v1578_v9  ;;  %v2052_v60 = vshrl.u32 %v5519_v41, 16  ;;  %v2055_v53 = vshll.u32 %v5519_v41, 16  ;;  %v5423_v9 = vld [vmem:[%s6927_s28 + $0xc] sm:$0xe] }
 0x136   : > { %v1597_v62 = vrot.slane %v1595_v2, 5  ;;  %v1592_v8 = vor.u32 %v1591_v50, %v1587_v27  ;;  %v1761_v3 = vrot.slane %v5424_v46, 5  ;;  %v5425_v47 = vld [vmem:[%s6927_s28 + $0x14] sm:$0x1]  ;;  %v6147_v46 = vld [vmem:[#allocation2 + $0x41c] sm:$0xf0] }
 0x137   : > { %v4456_v39 = vpop.f32.mrf.mxu2  ;;  %v1583_v38 = vrot.slane %v1582_v26, 4  ;;  %v2057_v41 = vrot.slane %v2055_v53, 5  ;;  %v6630_v26 = vld [vmem:[#allocation2 + $0x418] sm:$0xf0] }
 0x138   : > { %v4457_v36 = vadd.f32 %v4456_v39, %v4368_v35  ;;  %v4545_v61 = vpop.f32.mrf.mxu3  ;;  %v5520_v35 = vld [vmem:[%s6927_s28 + $0x1c] sm:$0xf]  ;;  %v1593_v13 = vrot.slane %v1592_v8, 4  ;;  %v2054_v39 = vrot.slane %v2052_v60, 4  ;;  %v1763_v2 = vrot.slane %v1761_v3, 4 }
 0x139   : > { %v4370_v22 = vpop.f32.mrf.mxu1  ;;  %v2061_v4 = vshll.u32 %v5520_v35, 16  ;;  %v2065_v32 = vshrl.u32 %v5520_v35, 16  ;;  %v6626_v60 = vld [vmem:[#allocation2 + $0x3fc] sm:$0xf] }
 0x13a   : > { %v4546_v7 = vadd.f32 %v4545_v61, %v4457_v36  ;;  %v4371_v5 = vadd.f32 %v4370_v22, %v7345_v55  ;;  %v1588_v55 = vsel %vm7074_vm3, %v1583_v38, %v1587_v27  ;;  %v1598_v23 = vsel %vm7074_vm3, %v1593_v13, %v1597_v62  ;;  %v5567_v61 = vld [vmem:[%s6927_s28 + $0x18] sm:$0xe]  ;;  %v6625_v22 = vld [vmem:[#allocation2 + $0x3f4] sm:$0xf]  ;;  %v5488_v62 = vld [vmem:[%s6927_s28 + $0x1c] sm:$0xf] }
 0x13b   : > { %v4637_v31 = vpop.f32.mrf.mxu0  ;;  %1661 = vst [vmem:[#allocation2 + $0x448] sm:$0xf] %v1588_v55  ;;  %v1764_v36 = vrot.slane %v5425_v47, 5  ;;  %v2067_v38 = vrot.slane %v2065_v32, 4  ;;  %v2058_v55 = vor.u32 %v2057_v41, %v2054_v39  ;;  %v6631_v47 = vld [vmem:[#allocation2 + $0x420] sm:$0xf0]  ;;  %v6150_v41 = vor.u32 %v6626_v60, %v6147_v46 }
 0x13c   : > { %4409 = vmatmul.bf16.gmra.mxu1 %v6106_v40  ;;  %4498 = vmatmul.bf16.gmra.mxu2 %v6110_v17  ;;  %v7714_v45 = vadd.f32 %v4634_v56, %v4546_v7  ;;  %v5521_v56 = vld [vmem:[%s6927_s28 + $0x20] sm:$0x1]  ;;  %1662 = vst [vmem:[#allocation2 + $0x46c] sm:$0xf] %v1598_v23  ;;  %v5471_v17 = vrot.slane %v5423_v9, 9  ;;  %v2063_v7 = vrot.slane %v2061_v4, 5 }
 0x13d   : > { %4587 = vmatmul.bf16.gmra.mxu3 %v6114_v48  ;;  %v6139_v48 = vld [vmem:[#allocation2 + $0x414] sm:$0xf0]  ;;  %v1765_v35 = vsel %vm7088_vm5, %v1763_v2, %v1764_v36  ;;  %v2071_v13 = vshll.u32 %v5521_v56, 16  ;;  %v5569_v23 = vld [vmem:[%s6927_s28 + $0x20] sm:$0x1] }
 0x13e   : > { %4676 = vmatmul.bf16.gmra.mxu0 %v6118_v52  ;;  %v5487_v52 = vld [vmem:[%s6927_s28 + $0x18] sm:$0xf]  ;;  %v1762_v8 = vsel %vm7088_vm5, %v5471_v17, %v1761_v3  ;;  %v6153_v9 = vld [vmem:[#allocation2 + $0x400] sm:$0xf]  ;;  %1904 = vst [vmem:[#allocation2 + $0x38] sm:$0xf] %v1765_v35  ;;  %v6142_v17 = vor.u32 %v6625_v22, %v6139_v48 }
 0x13f   : > { %v4459_v33 = vpop.f32.mrf.mxu2  ;;  %1971 = vst [vmem:[#allocation2 + $0x18] sm:$0xf] %v5487_v52  ;;  %v2073_v3 = vrot.slane %v2071_v13, 5  ;;  %v5523_v22 = vld [vmem:[%s6927_s28 + $0x28] sm:$0xf] }
 0x140   : > { %v4460_v19 = vadd.f32 %v4459_v33, %v4371_v5  ;;  %v4548_v15 = vpop.f32.mrf.mxu3  ;;  %v6145_v5 = vld [vmem:[#allocation2 + $0x3f8] sm:$0xf]  ;;  %1903 = vst [vmem:[#allocation2 + $0x14] sm:$0xf] %v1762_v8  ;;  %v5615_v33 = vrot.slane %v5567_v61, 9  ;;  %v6154_v8 = vor.u32 %v6631_v47, %v6153_v9  ;;  %v2085_v13 = vshll.u32 %v5523_v22, 16 }
 0x141   : > { %v4372_v40 = vpop.f32.mrf.mxu1  ;;  %1972 = vst [vmem:[#allocation2 + $0x3c] sm:$0xf] %v5488_v62  ;;  %v6146_v61 = vor.u32 %v6630_v26, %v6145_v5 }
 0x142   : > { %v4549_v29 = vadd.f32 %v4548_v15, %v4460_v19  ;;  %v4373_v27 = vadd.f32 %v4372_v40, %v7366_v30  ;;  %v5568_v30 = vld [vmem:[%s6927_s28 + $0x1c] sm:$0xf]  ;;  %v2068_v19 = vor.u32 %v2067_v38, %v2063_v7  ;;  %v2600_v15 = vrot.slane %v5569_v23, 5  ;;  %v5522_v38 = vld [vmem:[%s6927_s28 + $0x24] sm:$0xf] }
 0x143   : > { %v4639_v50 = vpop.f32.mrf.mxu0  ;;  %v2597_v53 = vrot.slane %v5568_v30, 5  ;;  %v2059_v40 = vrot.slane %v2058_v55, 4  ;;  %v2079_v26 = vshll.u32 %v5522_v38, 16  ;;  %v2089_v30 = vshrl.u32 %v5523_v22, 16  ;;  %v5427_v23 = vld [vmem:[%s6927_s28 + $0x1c] sm:$0xf] }
 0x144   : > { %v7734_v4 = vadd.f32 %v4637_v31, %v4549_v29  ;;  %v2069_v2 = vrot.slane %v2068_v19, 4  ;;  %v2087_v9 = vrot.slane %v2085_v13, 5  ;;  %v6634_v22 = vld [vmem:[#allocation2 + $0x43c] sm:$0xf] }
 0x145   : > { %v2598_v32 = vsel %vm7088_vm5, %v5615_v33, %v2597_v53  ;;  %v2599_v56 = vrot.slane %v2597_v53, 4  ;;  %v2064_v29 = vsel %vm7074_vm3, %v2059_v40, %v2063_v7  ;;  %v2076_v7 = vshrl.u32 %v5522_v38, 16  ;;  %v5490_v38 = vld [vmem:[%s6927_s28 + $0x28] sm:$0xf] }
 0x146   : > { %2739 = vst [vmem:[#allocation2 + $0x20] sm:$0xf] %v2598_v32  ;;  %v2074_v35 = vsel %vm7074_vm3, %v2069_v2, %v2073_v3  ;;  %v2081_v46 = vrot.slane %v2079_v26, 5  ;;  %v1768_v33 = vrot.slane %v5427_v23, 5  ;;  %v5426_v3 = vld [vmem:[%s6927_s28 + $0x18] sm:$0xe] }
 0x147   : > { %v4461_v39 = vpop.f32.mrf.mxu2  ;;  %v2601_v52 = vsel %vm7088_vm5, %v2599_v56, %v2600_v15  ;;  %2467 = vst [vmem:[#allocation2 + $0x1c] sm:$0xf] %v2064_v29  ;;  %v2078_v60 = vrot.slane %v2076_v7, 4  ;;  %v5428_v15 = vld [vmem:[%s6927_s28 + $0x20] sm:$0x1]  ;;  %v2091_v47 = vrot.slane %v2089_v30, 4 }
 0x148   : > { %v4462_v31 = vadd.f32 %v4461_v39, %v4373_v27  ;;  %v4550_v36 = vpop.f32.mrf.mxu3  ;;  %2468 = vst [vmem:[#allocation2 + $0x40] sm:$0xf] %v2074_v35  ;;  %v5472_v39 = vrot.slane %v5426_v3, 9  ;;  %v5570_v29 = vld [vmem:[%s6927_s28 + $0x24] sm:$0xe] }
 0x149   : > { %v4375_v62 = vpop.f32.mrf.mxu1  ;;  %2740 = vst [vmem:[#allocation2 + $0x44] sm:$0xf] %v2601_v52  ;;  %v2082_v53 = vor.u32 %v2081_v46, %v2078_v60  ;;  %v5489_v35 = vld [vmem:[%s6927_s28 + $0x24] sm:$0xf]  ;;  %v5571_v30 = vld [vmem:[%s6927_s28 + $0x28] sm:$0xf] }
 0x14a   : > { %v4551_v48 = vadd.f32 %v4550_v36, %v4462_v31  ;;  %v4376_v27 = vadd.f32 %v4375_v62, %v7391_v25  ;;  %v5524_v25 = vld [vmem:[%s6927_s28 + $0x2c] sm:$0x1]  ;;  %v2092_v36 = vor.u32 %v2091_v47, %v2087_v9  ;;  %v6639_v7 = vld [vmem:[#allocation2 + $0x460] sm:$0xf0]  ;;  %v6183_v46 = vld [vmem:[#allocation2 + $0x464] sm:$0xf0] }
 0x14b   : > { %v4642_v5 = vpop.f32.mrf.mxu0  ;;  %v2095_v40 = vshll.u32 %v5524_v25, 16  ;;  %v2083_v31 = vrot.slane %v2082_v53, 4  ;;  %v6635_v60 = vld [vmem:[#allocation2 + $0x444] sm:$0xf]  ;;  %v5572_v23 = vld [vmem:[%s6927_s28 + $0x2c] sm:$0x1] }
 0x14c   : > { %4414 = vmatmul.bf16.gmra.mxu1 %v6142_v17  ;;  %4503 = vmatmul.bf16.gmra.mxu2 %v6146_v61  ;;  %v7747_v55 = vadd.f32 %v4639_v50, %v4551_v48  ;;  %v1770_v50 = vrot.slane %v1768_v33, 4  ;;  %v1771_v17 = vrot.slane %v5428_v15, 5  ;;  %v6175_v48 = vld [vmem:[#allocation2 + $0x45c] sm:$0xf0]  ;;  %v2093_v13 = vrot.slane %v2092_v36, 4 }
 0x14d   : > { %4592 = vmatmul.bf16.gmra.mxu3 %v6150_v41  ;;  %v2097_v61 = vrot.slane %v2095_v40, 5  ;;  %v5616_v25 = vrot.slane %v5570_v29, 9  ;;  %1973 = vst [vmem:[#allocation2 + $0x60] sm:$0xf] %v5489_v35  ;;  %v2607_v15 = vrot.slane %v5572_v23, 5 }
 0x14e   : > { %4681 = vmatmul.bf16.gmra.mxu0 %v6154_v8  ;;  %v1769_v8 = vsel %vm7088_vm5, %v5472_v39, %v1768_v33  ;;  %v1772_v26 = vsel %vm7088_vm5, %v1770_v50, %v1771_v17  ;;  %v2604_v33 = vrot.slane %v5571_v30, 5  ;;  %v6640_v47 = vld [vmem:[#allocation2 + $0x468] sm:$0xf0]  ;;  %1974 = vst [vmem:[#allocation2 + $0x84] sm:$0xf] %v5490_v38 }
 0x14f   : > { %v4464_v19 = vpop.f32.mrf.mxu2  ;;  %1905 = vst [vmem:[#allocation2 + $0x5c] sm:$0xf] %v1769_v8  ;;  %v2098_v3 = vsel %vm7074_vm3, %v2093_v13, %v2097_v61  ;;  %v5525_v61 = vld [vmem:[%s6927_s28 + $0x30] sm:$0xf]  ;;  %v5526_v29 = vld [vmem:[%s6927_s28 + $0x34] sm:$0xf] }
 0x150   : > { %v4465_v32 = vadd.f32 %v4464_v19, %v4376_v27  ;;  %v4553_v56 = vpop.f32.mrf.mxu3  ;;  %v6181_v27 = vld [vmem:[#allocation2 + $0x440] sm:$0xf]  ;;  %1906 = vst [vmem:[#allocation2 + $0x80] sm:$0xf] %v1772_v26  ;;  %v6189_v19 = vld [vmem:[#allocation2 + $0x448] sm:$0xf]  ;;  %v2605_v40 = vsel %vm7088_vm5, %v5616_v25, %v2604_v33 }
 0x151   : > { %v4377_v2 = vpop.f32.mrf.mxu1  ;;  %v6182_v50 = vor.u32 %v6639_v7, %v6181_v27  ;;  %2470 = vst [vmem:[#allocation2 + $0x88] sm:$0xf] %v2098_v3  ;;  %v6190_v36 = vor.u32 %v6640_v47, %v6189_v19  ;;  %v2103_v38 = vshll.u32 %v5525_v61, 16  ;;  %v5430_v26 = vld [vmem:[%s6927_s28 + $0x28] sm:$0xf]  ;;  %v2113_v13 = vshrl.u32 %v5526_v29, 16 }
 0x152   : > { %v4554_v52 = vadd.f32 %v4553_v56, %v4465_v32  ;;  %v4378_v62 = vadd.f32 %v4377_v2, %v7416_v6  ;;  %v2088_v6 = vsel %vm7074_vm3, %v2083_v31, %v2087_v9  ;;  %v2606_v32 = vrot.slane %v2604_v33, 4  ;;  %2741 = vst [vmem:[#allocation2 + $0x68] sm:$0xf] %v2605_v40  ;;  %v5431_v23 = vld [vmem:[%s6927_s28 + $0x2c] sm:$0x1] }
 0x153   : > { %v4644_v41 = vpop.f32.mrf.mxu0  ;;  %2469 = vst [vmem:[#allocation2 + $0x64] sm:$0xf] %v2088_v6  ;;  %v6186_v31 = vor.u32 %v6635_v60, %v6183_v46  ;;  %v2105_v27 = vrot.slane %v2103_v38, 5  ;;  %v1775_v30 = vrot.slane %v5430_v26, 5  ;;  %v5429_v6 = vld [vmem:[%s6927_s28 + $0x24] sm:$0xe] }
 0x154   : > { %v7765_v53 = vadd.f32 %v4642_v5, %v4554_v52  ;;  %v6178_v5 = vor.u32 %v6634_v22, %v6175_v48  ;;  %v2608_v17 = vsel %vm7088_vm5, %v2606_v32, %v2607_v15  ;;  %v2109_v22 = vshll.u32 %v5526_v29, 16  ;;  %v5651_v29 = vld [vmem:[#allocation2 + $0x34] sm:$0xf0]  ;;  %v5665_v26 = vld [vmem:[#allocation2 + $0x20] sm:$0xf] }
 0x155   : > { %2742 = vst [vmem:[#allocation2 + $0x8c] sm:$0xf] %v2608_v17  ;;  %v5473_v3 = vrot.slane %v5429_v6, 9  ;;  %v1778_v47 = vrot.slane %v5431_v23, 5  ;;  %v2115_v32 = vrot.slane %v2113_v13, 4 }
 0x156   : > { %v2111_v25 = vrot.slane %v2109_v22, 5  ;;  %v6507_v23 = vld [vmem:[#allocation2 + $0x40] sm:$0xf0] }
 0x157   : > { %v4466_v9 = vpop.f32.mrf.mxu2  ;;  %v1776_v17 = vsel %vm7088_vm5, %v5473_v3, %v1775_v30 }
 0x158   : > { %v4467_v56 = vadd.f32 %v4466_v9, %v4378_v62  ;;  %v4555_v39 = vpop.f32.mrf.mxu3  ;;  %v2100_v62 = vshrl.u32 %v5525_v61, 16  ;;  %v6501_v61 = vld [vmem:[#allocation2 + $0x14] sm:$0xf]  ;;  %1907 = vst [vmem:[#allocation2 + $0xa4] sm:$0xf] %v1776_v17  ;;  %v2116_v22 = vor.u32 %v2115_v32, %v2111_v25 }
 0x159   : > { %v4380_v2 = vpop.f32.mrf.mxu1  ;;  %v5529_v17 = vld [vmem:[%s6927_s28 + $0x40] sm:$0xf] }
 0x15a   : > { %v4556_v52 = vadd.f32 %v4555_v39, %v4467_v56  ;;  %v4381_v8 = vadd.f32 %v4380_v2, %v7447_v14  ;;  %v2102_v48 = vrot.slane %v2100_v62, 4  ;;  %v5527_v14 = vld [vmem:[%s6927_s28 + $0x38] sm:$0x1]  ;;  %v5574_v56 = vld [vmem:[%s6927_s28 + $0x34] sm:$0xf]  ;;  %v2117_v6 = vrot.slane %v2116_v22, 4 }
 0x15b   : > { %v4647_v35 = vpop.f32.mrf.mxu0  ;;  %v2119_v9 = vshll.u32 %v5527_v14, 16  ;;  %v5491_v2 = vld [vmem:[%s6927_s28 + $0x30] sm:$0xf]  ;;  %v2137_v22 = vshrl.u32 %v5529_v17, 16 }
 0x15c   : > { %4419 = vmatmul.bf16.gmra.mxu1 %v6178_v5  ;;  %4508 = vmatmul.bf16.gmra.mxu2 %v6182_v50  ;;  %v7776_v7 = vadd.f32 %v4644_v41, %v4556_v52  ;;  %v2106_v60 = vor.u32 %v2105_v27, %v2102_v48  ;;  %v1777_v41 = vrot.slane %v1775_v30, 4  ;;  %v5657_v52 = vld [vmem:[#allocation2 + $0x18] sm:$0xf]  ;;  %v6502_v27 = vld [vmem:[#allocation2 + $0x1c] sm:$0xf]  ;;  %v2611_v30 = vrot.slane %v5574_v56, 5 }
 0x15d   : > { %4597 = vmatmul.bf16.gmra.mxu3 %v6186_v31  ;;  %v5492_v31 = vld [vmem:[%s6927_s28 + $0x34] sm:$0xf]  ;;  %v5575_v48 = vld [vmem:[%s6927_s28 + $0x38] sm:$0x1]  ;;  %1975 = vst [vmem:[#allocation2 + $0xa8] sm:$0xf] %v5491_v2  ;;  %v5666_v56 = vor.u32 %v6507_v23, %v5665_v26 }
 0x15e   : > { %4686 = vmatmul.bf16.gmra.mxu0 %v6190_v36  ;;  %v2107_v40 = vrot.slane %v2106_v60, 4  ;;  %v5573_v36 = vld [vmem:[%s6927_s28 + $0x30] sm:$0xe]  ;;  %v1779_v62 = vsel %vm7088_vm5, %v1777_v41, %v1778_v47  ;;  %v2614_v14 = vrot.slane %v5575_v48, 5  ;;  %1976 = vst [vmem:[#allocation2 + $0xcc] sm:$0xf] %v5492_v31 }
 0x15f   : > { %v4469_v46 = vpop.f32.mrf.mxu2  ;;  %1908 = vst [vmem:[#allocation2 + $0xc8] sm:$0xf] %v1779_v62  ;;  %v5617_v13 = vrot.slane %v5573_v36, 9  ;;  %v5432_v26 = vld [vmem:[%s6927_s28 + $0x30] sm:$0xe] }
 0x160   : > { %v4470_v33 = vadd.f32 %v4469_v46, %v4381_v8  ;;  %v4558_v19 = vpop.f32.mrf.mxu3  ;;  %v6506_v8 = vld [vmem:[#allocation2 + $0x38] sm:$0xf0]  ;;  %v2112_v38 = vsel %vm7074_vm3, %v2107_v40, %v2111_v25  ;;  %v5659_v46 = vld [vmem:[#allocation2 + $0x3c] sm:$0xf0]  ;;  %v2613_v25 = vrot.slane %v2611_v30, 4 }
 0x161   : > { %v4382_v15 = vpop.f32.mrf.mxu1  ;;  %2471 = vst [vmem:[#allocation2 + $0xac] sm:$0xf] %v2112_v38  ;;  %v5658_v47 = vor.u32 %v6506_v8, %v5657_v52  ;;  %v5433_v38 = vld [vmem:[%s6927_s28 + $0x34] sm:$0xf] }
 0x162   : > { %v4559_v39 = vadd.f32 %v4558_v19, %v4470_v33  ;;  %v4383_v5 = vadd.f32 %v4382_v15, %v7469_v12  ;;  %v2121_v12 = vrot.slane %v2119_v9, 5  ;;  %v2612_v33 = vsel %vm7088_vm5, %v5617_v13, %v2611_v30  ;;  %v5434_v13 = vld [vmem:[%s6927_s28 + $0x38] sm:$0x1] }
 0x163   : > { %v4649_v50 = vpop.f32.mrf.mxu0  ;;  %v2615_v40 = vsel %vm7088_vm5, %v2613_v25, %v2614_v14  ;;  %v5662_v9 = vor.u32 %v6502_v27, %v5659_v46  ;;  %2743 = vst [vmem:[#allocation2 + $0xb0] sm:$0xf] %v2612_v33  ;;  %v1785_v33 = vrot.slane %v5434_v13, 5  ;;  %v6516_v13 = vld [vmem:[#allocation2 + $0x88] sm:$0xf0] }
 0x164   : > { %v7794_v60 = vadd.f32 %v4647_v35, %v4559_v39  ;;  %v2122_v3 = vsel %vm7074_vm3, %v2117_v6, %v2121_v12  ;;  %v5654_v35 = vor.u32 %v6501_v61, %v5651_v29  ;;  %v5528_v39 = vld [vmem:[%s6927_s28 + $0x3c] sm:$0xf]  ;;  %2744 = vst [vmem:[#allocation2 + $0xd4] sm:$0xf] %v2615_v40  ;;  %v2133_v29 = vshll.u32 %v5529_v17, 16 }
 0x165   : > { %2472 = vst [vmem:[#allocation2 + $0xd0] sm:$0xf] %v2122_v3  ;;  %v2127_v61 = vshll.u32 %v5528_v39, 16  ;;  %v1782_v12 = vrot.slane %v5433_v38, 5  ;;  %v5474_v6 = vrot.slane %v5432_v26, 9 }
 0x166   : > { %v2135_v30 = vrot.slane %v2133_v29, 5  ;;  %v5687_v17 = vld [vmem:[#allocation2 + $0x7c] sm:$0xf0]  ;;  %v5695_v38 = vld [vmem:[#allocation2 + $0x84] sm:$0xf0] }
 0x167   : > { %v4471_v19 = vpop.f32.mrf.mxu2  ;;  %v2129_v8 = vrot.slane %v2127_v61, 5  ;;  %v1783_v40 = vsel %vm7088_vm5, %v5474_v6, %v1782_v12 }
 0x168   : > { %v4472_v41 = vadd.f32 %v4471_v19, %v4383_v5  ;;  %v4560_v15 = vpop.f32.mrf.mxu3  ;;  %v2124_v5 = vshrl.u32 %v5528_v39, 16  ;;  %v2139_v19 = vrot.slane %v2137_v22, 4  ;;  %v6510_v39 = vld [vmem:[#allocation2 + $0x5c] sm:$0xf]  ;;  %1909 = vst [vmem:[#allocation2 + $0xec] sm:$0xf] %v1783_v40 }
 0x169   : > { %v4385_v32 = vpop.f32.mrf.mxu1  ;;  %v5532_v40 = vld [vmem:[%s6927_s28 + $0x4c] sm:$0xf] }
 0x16a   : > { %v4561_v2 = vadd.f32 %v4560_v15, %v4472_v41  ;;  %v4386_v31 = vadd.f32 %v4385_v32, %v7306_v58  ;;  %v2126_v52 = vrot.slane %v2124_v5, 4  ;;  %v5530_v58 = vld [vmem:[%s6927_s28 + $0x44] sm:$0x1]  ;;  %v5577_v41 = vld [vmem:[%s6927_s28 + $0x40] sm:$0xf]  ;;  %v2140_v29 = vor.u32 %v2139_v19, %v2135_v30 }
 0x16b   : > { %v4652_v36 = vpop.f32.mrf.mxu0  ;;  %v2143_v3 = vshll.u32 %v5530_v58, 16  ;;  %v5493_v32 = vld [vmem:[%s6927_s28 + $0x3c] sm:$0xf] }
 0x16c   : > { %4700 = vmatmul.bf16.vlgmr.msra.gmra.mxu1 %v5654_v35  ;;  %4789 = vmatmul.bf16.vlgmr.msra.gmra.mxu2 %v5658_v47  ;;  %v7805_v62 = vadd.f32 %v4649_v50, %v4561_v2  ;;  %v2130_v48 = vor.u32 %v2129_v8, %v2126_v52  ;;  %v1784_v50 = vrot.slane %v1782_v12, 4  ;;  %v5693_v2 = vld [vmem:[#allocation2 + $0x60] sm:$0xf]  ;;  %v5578_v52 = vld [vmem:[%s6927_s28 + $0x44] sm:$0x1]  ;;  %v2618_v12 = vrot.slane %v5577_v41, 5 }
 0x16d   : > { %4878 = vmatmul.bf16.vlgmr.msra.gmra.mxu3 %v5662_v9  ;;  %v5494_v9 = vld [vmem:[%s6927_s28 + $0x40] sm:$0xf]  ;;  %v6511_v8 = vld [vmem:[#allocation2 + $0x64] sm:$0xf]  ;;  %v2621_v58 = vrot.slane %v5578_v52, 5  ;;  %v2141_v26 = vrot.slane %v2140_v29, 4 }
 0x16e   : > { %4967 = vmatmul.bf16.vlgmr.msra.gmra.mxu0 %v5666_v56  ;;  %v2131_v25 = vrot.slane %v2130_v48, 4  ;;  %v5576_v56 = vld [vmem:[%s6927_s28 + $0x3c] sm:$0xe]  ;;  %v1786_v5 = vsel %vm7088_vm5, %v1784_v50, %v1785_v33  ;;  %1977 = vst [vmem:[#allocation2 + $0xf0] sm:$0xf] %v5493_v32  ;;  %v2161_v29 = vshrl.u32 %v5532_v40, 16 }
 0x16f   : > { %v4474_v27 = vpop.f32.mrf.mxu2  ;;  %1910 = vst [vmem:[#allocation2 + $0x110] sm:$0xf] %v1786_v5  ;;  %v5618_v22 = vrot.slane %v5576_v56, 9 }
 0x170   : > { %v4475_v14 = vadd.f32 %v4474_v27, %v4386_v31  ;;  %v4563_v46 = vpop.f32.mrf.mxu3  ;;  %v6515_v31 = vld [vmem:[#allocation2 + $0x80] sm:$0xf0]  ;;  %v2136_v61 = vsel %vm7074_vm3, %v2131_v25, %v2135_v30  ;;  %v5701_v27 = vld [vmem:[#allocation2 + $0x68] sm:$0xf]  ;;  %1978 = vst [vmem:[#allocation2 + $0x114] sm:$0xf] %v5494_v9 }
 0x171   : > { %v4387_v23 = vpop.f32.mrf.mxu1  ;;  %v2620_v30 = vrot.slane %v2618_v12, 4  ;;  %2473 = vst [vmem:[#allocation2 + $0xf4] sm:$0xf] %v2136_v61  ;;  %v5694_v33 = vor.u32 %v6515_v31, %v5693_v2  ;;  %v5702_v41 = vor.u32 %v6516_v13, %v5701_v27  ;;  %v5436_v61 = vld [vmem:[%s6927_s28 + $0x40] sm:$0xf] }
 0x172   : > { %v4564_v15 = vadd.f32 %v4563_v46, %v4475_v14  ;;  %v4388_v35 = vadd.f32 %v4387_v23, %v7338_v43  ;;  %v2145_v43 = vrot.slane %v2143_v3, 5  ;;  %v2619_v14 = vsel %vm7088_vm5, %v5618_v22, %v2618_v12  ;;  %v5437_v22 = vld [vmem:[%s6927_s28 + $0x44] sm:$0x1] }
 0x173   : > { %v4654_v47 = vpop.f32.mrf.mxu0  ;;  %v2622_v25 = vsel %vm7088_vm5, %v2620_v30, %v2621_v58  ;;  %v5698_v3 = vor.u32 %v6511_v8, %v5695_v38  ;;  %2745 = vst [vmem:[#allocation2 + $0xf8] sm:$0xf] %v2619_v14  ;;  %v5435_v38 = vld [vmem:[%s6927_s28 + $0x3c] sm:$0xe]  ;;  %v1792_v14 = vrot.slane %v5437_v22, 5 }
 0x174   : > { %v7823_v48 = vadd.f32 %v4652_v36, %v4564_v15  ;;  %v2146_v6 = vsel %vm7074_vm3, %v2141_v26, %v2145_v43  ;;  %v5690_v36 = vor.u32 %v6510_v39, %v5687_v17  ;;  %v5531_v15 = vld [vmem:[%s6927_s28 + $0x48] sm:$0xf]  ;;  %2746 = vst [vmem:[#allocation2 + $0x11c] sm:$0xf] %v2622_v25  ;;  %v2157_v17 = vshll.u32 %v5532_v40, 16 }
 0x175   : > { %2474 = vst [vmem:[#allocation2 + $0x118] sm:$0xf] %v2146_v6  ;;  %v2151_v39 = vshll.u32 %v5531_v15, 16  ;;  %v1789_v43 = vrot.slane %v5436_v61, 5  ;;  %v5475_v26 = vrot.slane %v5435_v38, 9 }
 0x176   : > { %v2159_v12 = vrot.slane %v2157_v17, 5  ;;  %v5723_v40 = vld [vmem:[#allocation2 + $0xc4] sm:$0xf0]  ;;  %v5731_v61 = vld [vmem:[#allocation2 + $0xcc] sm:$0xf0] }
 0x177   : > { %v4476_v46 = vpop.f32.mrf.mxu2  ;;  %v2153_v31 = vrot.slane %v2151_v39, 5  ;;  %v1790_v25 = vsel %vm7088_vm5, %v5475_v26, %v1789_v43  ;;  %v6525_v22 = vld [vmem:[#allocation2 + $0xd0] sm:$0xf0] }
 0x178   : > { %v4477_v50 = vadd.f32 %v4476_v46, %v4388_v35  ;;  %v4565_v23 = vpop.f32.mrf.mxu3  ;;  %v2148_v35 = vshrl.u32 %v5531_v15, 16  ;;  %v2163_v46 = vrot.slane %v2161_v29, 4  ;;  %v6519_v15 = vld [vmem:[#allocation2 + $0xa4] sm:$0xf]  ;;  %1911 = vst [vmem:[#allocation2 + $0x134] sm:$0xf] %v1790_v25 }
 0x179   : > { %v4390_v19 = vpop.f32.mrf.mxu1  ;;  %v5535_v25 = vld [vmem:[%s6927_s28 + $0x58] sm:$0xf] }
 0x17a   : > { %v4566_v32 = vadd.f32 %v4565_v23, %v4477_v50  ;;  %v4391_v9 = vadd.f32 %v4390_v19, %v7357_v20  ;;  %v2150_v2 = vrot.slane %v2148_v35, 4  ;;  %v5533_v20 = vld [vmem:[%s6927_s28 + $0x50] sm:$0x1]  ;;  %v5580_v50 = vld [vmem:[%s6927_s28 + $0x4c] sm:$0xf]  ;;  %v2164_v17 = vor.u32 %v2163_v46, %v2159_v12 }
 0x17b   : > { %v4657_v56 = vpop.f32.mrf.mxu0  ;;  %v2167_v6 = vshll.u32 %v5533_v20, 16  ;;  %v5495_v19 = vld [vmem:[%s6927_s28 + $0x48] sm:$0xf] }
 0x17c   : > { %4705 = vmatmul.bf16.gmra.mxu1 %v5690_v36  ;;  %4794 = vmatmul.bf16.gmra.mxu2 %v5694_v33  ;;  %v7834_v5 = vadd.f32 %v4654_v47, %v4566_v32  ;;  %v2154_v52 = vor.u32 %v2153_v31, %v2150_v2  ;;  %v1791_v47 = vrot.slane %v1789_v43, 4  ;;  %v5729_v32 = vld [vmem:[#allocation2 + $0xa8] sm:$0xf]  ;;  %v5581_v2 = vld [vmem:[%s6927_s28 + $0x50] sm:$0x1]  ;;  %v2625_v43 = vrot.slane %v5580_v50, 5 }
 0x17d   : > { %4883 = vmatmul.bf16.gmra.mxu3 %v5698_v3  ;;  %v5496_v3 = vld [vmem:[%s6927_s28 + $0x4c] sm:$0xf]  ;;  %v2628_v20 = vrot.slane %v5581_v2, 5  ;;  %1979 = vst [vmem:[#allocation2 + $0x138] sm:$0xf] %v5495_v19  ;;  %v2165_v38 = vrot.slane %v2164_v17, 4 }
 0x17e   : > { %4972 = vmatmul.bf16.gmra.mxu0 %v5702_v41  ;;  %v2155_v30 = vrot.slane %v2154_v52, 4  ;;  %v5579_v41 = vld [vmem:[%s6927_s28 + $0x48] sm:$0xe]  ;;  %v1793_v35 = vsel %vm7088_vm5, %v1791_v47, %v1792_v14  ;;  %v6520_v31 = vld [vmem:[#allocation2 + $0xac] sm:$0xf]  ;;  %v2185_v17 = vshrl.u32 %v5535_v25, 16 }
 0x17f   : > { %v4479_v8 = vpop.f32.mrf.mxu2  ;;  %1912 = vst [vmem:[#allocation2 + $0x158] sm:$0xf] %v1793_v35  ;;  %v5619_v29 = vrot.slane %v5579_v41, 9 }
 0x180   : > { %v4480_v58 = vadd.f32 %v4479_v8, %v4391_v9  ;;  %v4568_v27 = vpop.f32.mrf.mxu3  ;;  %v6524_v9 = vld [vmem:[#allocation2 + $0xc8] sm:$0xf0]  ;;  %v2160_v39 = vsel %vm7074_vm3, %v2155_v30, %v2159_v12  ;;  %v5737_v8 = vld [vmem:[#allocation2 + $0xb0] sm:$0xf]  ;;  %1980 = vst [vmem:[#allocation2 + $0x15c] sm:$0xf] %v5496_v3 }
 0x181   : > { %v4392_v13 = vpop.f32.mrf.mxu1  ;;  %v2627_v12 = vrot.slane %v2625_v43, 4  ;;  %2475 = vst [vmem:[#allocation2 + $0x13c] sm:$0xf] %v2160_v39  ;;  %v5730_v14 = vor.u32 %v6524_v9, %v5729_v32  ;;  %v5738_v50 = vor.u32 %v6525_v22, %v5737_v8  ;;  %v5439_v39 = vld [vmem:[%s6927_s28 + $0x4c] sm:$0xf] }
 0x182   : > { %v4569_v23 = vadd.f32 %v4568_v27, %v4480_v58  ;;  %v4393_v36 = vadd.f32 %v4392_v13, %v7383_v10  ;;  %v2169_v10 = vrot.slane %v2167_v6, 5  ;;  %v2626_v58 = vsel %vm7088_vm5, %v5619_v29, %v2625_v43  ;;  %v5440_v29 = vld [vmem:[%s6927_s28 + $0x50] sm:$0x1] }
 0x183   : > { %v4659_v33 = vpop.f32.mrf.mxu0  ;;  %v2629_v30 = vsel %vm7088_vm5, %v2627_v12, %v2628_v20  ;;  %v5734_v6 = vor.u32 %v6520_v31, %v5731_v61  ;;  %2747 = vst [vmem:[#allocation2 + $0x140] sm:$0xf] %v2626_v58  ;;  %v5438_v61 = vld [vmem:[%s6927_s28 + $0x48] sm:$0xe]  ;;  %v1799_v58 = vrot.slane %v5440_v29, 5 }
 0x184   : > { %v7852_v52 = vadd.f32 %v4657_v56, %v4569_v23  ;;  %v2170_v26 = vsel %vm7074_vm3, %v2165_v38, %v2169_v10  ;;  %v5726_v56 = vor.u32 %v6519_v15, %v5723_v40  ;;  %v5534_v23 = vld [vmem:[%s6927_s28 + $0x54] sm:$0xf]  ;;  %2748 = vst [vmem:[#allocation2 + $0x164] sm:$0xf] %v2629_v30  ;;  %v2181_v40 = vshll.u32 %v5535_v25, 16 }
 0x185   : > { %2476 = vst [vmem:[#allocation2 + $0x160] sm:$0xf] %v2170_v26  ;;  %v2175_v15 = vshll.u32 %v5534_v23, 16  ;;  %v1796_v10 = vrot.slane %v5439_v39, 5  ;;  %v5476_v38 = vrot.slane %v5438_v61, 9 }
 0x186   : > { %v2183_v43 = vrot.slane %v2181_v40, 5  ;;  %v5759_v25 = vld [vmem:[#allocation2 + $0x10c] sm:$0xf0]  ;;  %v5767_v39 = vld [vmem:[#allocation2 + $0x114] sm:$0xf0] }
 0x187   : > { %v4481_v27 = vpop.f32.mrf.mxu2  ;;  %v2177_v9 = vrot.slane %v2175_v15, 5  ;;  %v1797_v30 = vsel %vm7088_vm5, %v5476_v38, %v1796_v10  ;;  %v6534_v29 = vld [vmem:[#allocation2 + $0x118] sm:$0xf0] }
 0x188   : > { %v4482_v47 = vadd.f32 %v4481_v27, %v4393_v36  ;;  %v4570_v13 = vpop.f32.mrf.mxu3  ;;  %v2172_v36 = vshrl.u32 %v5534_v23, 16  ;;  %v2187_v27 = vrot.slane %v2185_v17, 4  ;;  %v6528_v23 = vld [vmem:[#allocation2 + $0xec] sm:$0xf]  ;;  %1913 = vst [vmem:[#allocation2 + $0x17c] sm:$0xf] %v1797_v30 }
 0x189   : > { %v4395_v46 = vpop.f32.mrf.mxu1  ;;  %v5538_v30 = vld [vmem:[%s6927_s28 + $0x64] sm:$0xf] }
 0x18a   : > { %v4571_v19 = vadd.f32 %v4570_v13, %v4482_v47  ;;  %v4396_v3 = vadd.f32 %v4395_v46, %v7407_v54  ;;  %v2174_v32 = vrot.slane %v2172_v36, 4  ;;  %v5536_v54 = vld [vmem:[%s6927_s28 + $0x5c] sm:$0x1]  ;;  %v5583_v47 = vld [vmem:[%s6927_s28 + $0x58] sm:$0xf]  ;;  %v2188_v40 = vor.u32 %v2187_v27, %v2183_v43 }
 0x18b   : > { %v4662_v41 = vpop.f32.mrf.mxu0  ;;  %v2191_v26 = vshll.u32 %v5536_v54, 16  ;;  %v5497_v46 = vld [vmem:[%s6927_s28 + $0x54] sm:$0xf] }
 0x18c   : > { %4710 = vmatmul.bf16.gmra.mxu1 %v5726_v56  ;;  %4799 = vmatmul.bf16.gmra.mxu2 %v5730_v14  ;;  %v7863_v35 = vadd.f32 %v4659_v33, %v4571_v19  ;;  %v2178_v2 = vor.u32 %v2177_v9, %v2174_v32  ;;  %v1798_v33 = vrot.slane %v1796_v10, 4  ;;  %v5765_v19 = vld [vmem:[#allocation2 + $0xf0] sm:$0xf]  ;;  %v5584_v32 = vld [vmem:[%s6927_s28 + $0x5c] sm:$0x1]  ;;  %v2632_v10 = vrot.slane %v5583_v47, 5 }
 0x18d   : > { %4888 = vmatmul.bf16.gmra.mxu3 %v5734_v6  ;;  %v5498_v6 = vld [vmem:[%s6927_s28 + $0x58] sm:$0xf]  ;;  %v6529_v9 = vld [vmem:[#allocation2 + $0xf4] sm:$0xf]  ;;  %v2635_v54 = vrot.slane %v5584_v32, 5  ;;  %v2189_v61 = vrot.slane %v2188_v40, 4 }
 0x18e   : > { %4977 = vmatmul.bf16.gmra.mxu0 %v5738_v50  ;;  %v2179_v12 = vrot.slane %v2178_v2, 4  ;;  %v5582_v50 = vld [vmem:[%s6927_s28 + $0x54] sm:$0xe]  ;;  %v1800_v36 = vsel %vm7088_vm5, %v1798_v33, %v1799_v58  ;;  %1981 = vst [vmem:[#allocation2 + $0x180] sm:$0xf] %v5497_v46  ;;  %v2209_v40 = vshrl.u32 %v5538_v30, 16 }
 0x18f   : > { %v4484_v31 = vpop.f32.mrf.mxu2  ;;  %1914 = vst [vmem:[#allocation2 + $0x1a0] sm:$0xf] %v1800_v36  ;;  %v5620_v17 = vrot.slane %v5582_v50, 9 }
 0x190   : > { %v4485_v20 = vadd.f32 %v4484_v31, %v4396_v3  ;;  %v4573_v8 = vpop.f32.mrf.mxu3  ;;  %v6533_v3 = vld [vmem:[#allocation2 + $0x110] sm:$0xf0]  ;;  %v2184_v15 = vsel %vm7074_vm3, %v2179_v12, %v2183_v43  ;;  %v5773_v31 = vld [vmem:[#allocation2 + $0xf8] sm:$0xf]  ;;  %1982 = vst [vmem:[#allocation2 + $0x1a4] sm:$0xf] %v5498_v6 }
 0x191   : > { %v4397_v22 = vpop.f32.mrf.mxu1  ;;  %v2634_v43 = vrot.slane %v2632_v10, 4  ;;  %2477 = vst [vmem:[#allocation2 + $0x184] sm:$0xf] %v2184_v15  ;;  %v5766_v58 = vor.u32 %v6533_v3, %v5765_v19  ;;  %v5774_v47 = vor.u32 %v6534_v29, %v5773_v31  ;;  %v5442_v15 = vld [vmem:[%s6927_s28 + $0x58] sm:$0xf] }
 0x192   : > { %v4574_v13 = vadd.f32 %v4573_v8, %v4485_v20  ;;  %v4398_v56 = vadd.f32 %v4397_v22, %v7440_v57  ;;  %v2193_v57 = vrot.slane %v2191_v26, 5  ;;  %v2633_v20 = vsel %vm7088_vm5, %v5620_v17, %v2632_v10  ;;  %v5443_v17 = vld [vmem:[%s6927_s28 + $0x5c] sm:$0x1] }
 0x193   : > { %v4664_v14 = vpop.f32.mrf.mxu0  ;;  %v2636_v12 = vsel %vm7088_vm5, %v2634_v43, %v2635_v54  ;;  %v5770_v26 = vor.u32 %v6529_v9, %v5767_v39  ;;  %2749 = vst [vmem:[#allocation2 + $0x188] sm:$0xf] %v2633_v20  ;;  %v5441_v39 = vld [vmem:[%s6927_s28 + $0x54] sm:$0xe]  ;;  %v1806_v20 = vrot.slane %v5443_v17, 5 }
 0x194   : > { %v7881_v2 = vadd.f32 %v4662_v41, %v4574_v13  ;;  %v2194_v38 = vsel %vm7074_vm3, %v2189_v61, %v2193_v57  ;;  %v5762_v41 = vor.u32 %v6528_v23, %v5759_v25  ;;  %v5537_v13 = vld [vmem:[%s6927_s28 + $0x60] sm:$0xf]  ;;  %2750 = vst [vmem:[#allocation2 + $0x1ac] sm:$0xf] %v2636_v12  ;;  %v2205_v25 = vshll.u32 %v5538_v30, 16 }
 0x195   : > { %2478 = vst [vmem:[#allocation2 + $0x1a8] sm:$0xf] %v2194_v38  ;;  %v2199_v23 = vshll.u32 %v5537_v13, 16  ;;  %v1803_v57 = vrot.slane %v5442_v15, 5  ;;  %v5477_v61 = vrot.slane %v5441_v39, 9 }
 0x196   : > { %v2207_v10 = vrot.slane %v2205_v25, 5  ;;  %v5795_v30 = vld [vmem:[#allocation2 + $0x154] sm:$0xf0]  ;;  %v5803_v15 = vld [vmem:[#allocation2 + $0x15c] sm:$0xf0] }
 0x197   : > { %v4486_v8 = vpop.f32.mrf.mxu2  ;;  %v2201_v3 = vrot.slane %v2199_v23, 5  ;;  %v1804_v12 = vsel %vm7088_vm5, %v5477_v61, %v1803_v57  ;;  %v6543_v17 = vld [vmem:[#allocation2 + $0x160] sm:$0xf0] }
 0x198   : > { %v4487_v33 = vadd.f32 %v4486_v8, %v4398_v56  ;;  %v4575_v22 = vpop.f32.mrf.mxu3  ;;  %v2196_v56 = vshrl.u32 %v5537_v13, 16  ;;  %v2211_v8 = vrot.slane %v2209_v40, 4  ;;  %v6537_v13 = vld [vmem:[#allocation2 + $0x134] sm:$0xf]  ;;  %1915 = vst [vmem:[#allocation2 + $0x1c4] sm:$0xf] %v1804_v12 }
 0x199   : > { %v4400_v27 = vpop.f32.mrf.mxu1  ;;  %v5541_v12 = vld [vmem:[%s6927_s28 + $0x70] sm:$0xf] }
 0x19a   : > { %v4576_v46 = vadd.f32 %v4575_v22, %v4487_v33  ;;  %v4401_v6 = vadd.f32 %v4400_v27, %v7461_v51  ;;  %v2198_v19 = vrot.slane %v2196_v56, 4  ;;  %v5539_v51 = vld [vmem:[%s6927_s28 + $0x68] sm:$0x1]  ;;  %v5586_v33 = vld [vmem:[%s6927_s28 + $0x64] sm:$0xf]  ;;  %v2212_v25 = vor.u32 %v2211_v8, %v2207_v10 }
 0x19b   : > { %v4667_v50 = vpop.f32.mrf.mxu0  ;;  %v2215_v38 = vshll.u32 %v5539_v51, 16  ;;  %v5499_v27 = vld [vmem:[%s6927_s28 + $0x60] sm:$0xf] }
 0x19c   : > { %4715 = vmatmul.bf16.gmra.mxu1 %v5762_v41  ;;  %4804 = vmatmul.bf16.gmra.mxu2 %v5766_v58  ;;  %v7892_v36 = vadd.f32 %v4664_v14, %v4576_v46  ;;  %v2202_v32 = vor.u32 %v2201_v3, %v2198_v19  ;;  %v1805_v14 = vrot.slane %v1803_v57, 4  ;;  %v5801_v46 = vld [vmem:[#allocation2 + $0x138] sm:$0xf]  ;;  %v5587_v19 = vld [vmem:[%s6927_s28 + $0x68] sm:$0x1]  ;;  %v2639_v57 = vrot.slane %v5586_v33, 5 }
 0x19d   : > { %4893 = vmatmul.bf16.gmra.mxu3 %v5770_v26  ;;  %v5500_v26 = vld [vmem:[%s6927_s28 + $0x64] sm:$0xf]  ;;  %v6538_v3 = vld [vmem:[#allocation2 + $0x13c] sm:$0xf]  ;;  %v2642_v51 = vrot.slane %v5587_v19, 5  ;;  %v2213_v39 = vrot.slane %v2212_v25, 4 }
 0x19e   : > { %4982 = vmatmul.bf16.gmra.mxu0 %v5774_v47  ;;  %v2203_v43 = vrot.slane %v2202_v32, 4  ;;  %v5585_v47 = vld [vmem:[%s6927_s28 + $0x60] sm:$0xe]  ;;  %v1807_v56 = vsel %vm7088_vm5, %v1805_v14, %v1806_v20  ;;  %1983 = vst [vmem:[#allocation2 + $0x1c8] sm:$0xf] %v5499_v27  ;;  %v2233_v25 = vshrl.u32 %v5541_v12, 16 }
 0x19f   : > { %v4489_v9 = vpop.f32.mrf.mxu2  ;;  %1916 = vst [vmem:[#allocation2 + $0x1e8] sm:$0xf] %v1807_v56  ;;  %v5621_v40 = vrot.slane %v5585_v47, 9 }
 0x1a0   : > { %v4490_v54 = vadd.f32 %v4489_v9, %v4401_v6  ;;  %v4578_v31 = vpop.f32.mrf.mxu3  ;;  %v6542_v6 = vld [vmem:[#allocation2 + $0x158] sm:$0xf0]  ;;  %v2208_v23 = vsel %vm7074_vm3, %v2203_v43, %v2207_v10  ;;  %v5809_v9 = vld [vmem:[#allocation2 + $0x140] sm:$0xf]  ;;  %1984 = vst [vmem:[#allocation2 + $0x1ec] sm:$0xf] %v5500_v26 }
 0x1a1   : > { %v4402_v29 = vpop.f32.mrf.mxu1  ;;  %v2641_v10 = vrot.slane %v2639_v57, 4  ;;  %2479 = vst [vmem:[#allocation2 + $0x1cc] sm:$0xf] %v2208_v23  ;;  %v5802_v20 = vor.u32 %v6542_v6, %v5801_v46  ;;  %v5810_v33 = vor.u32 %v6543_v17, %v5809_v9  ;;  %v5445_v23 = vld [vmem:[%s6927_s28 + $0x64] sm:$0xf] }
 0x1a2   : > { %v4579_v22 = vadd.f32 %v4578_v31, %v4490_v54  ;;  %v4403_v41 = vadd.f32 %v4402_v29, %v7487_v11  ;;  %v2217_v11 = vrot.slane %v2215_v38, 5  ;;  %v2640_v54 = vsel %vm7088_vm5, %v5621_v40, %v2639_v57  ;;  %v5446_v40 = vld [vmem:[%s6927_s28 + $0x68] sm:$0x1] }
 0x1a3   : > { %v4669_v58 = vpop.f32.mrf.mxu0  ;;  %v2643_v43 = vsel %vm7088_vm5, %v2641_v10, %v2642_v51  ;;  %v5806_v38 = vor.u32 %v6538_v3, %v5803_v15  ;;  %2751 = vst [vmem:[#allocation2 + $0x1d0] sm:$0xf] %v2640_v54  ;;  %v5444_v15 = vld [vmem:[%s6927_s28 + $0x60] sm:$0xe]  ;;  %v1813_v54 = vrot.slane %v5446_v40, 5 }
 0x1a4   : > { %v7910_v32 = vadd.f32 %v4667_v50, %v4579_v22  ;;  %v2218_v61 = vsel %vm7074_vm3, %v2213_v39, %v2217_v11  ;;  %v5798_v50 = vor.u32 %v6537_v13, %v5795_v30  ;;  %v5540_v22 = vld [vmem:[%s6927_s28 + $0x6c] sm:$0xf]  ;;  %2752 = vst [vmem:[#allocation2 + $0x1f4] sm:$0xf] %v2643_v43  ;;  %v2229_v30 = vshll.u32 %v5541_v12, 16 }
 0x1a5   : > { %2480 = vst [vmem:[#allocation2 + $0x1f0] sm:$0xf] %v2218_v61  ;;  %v2223_v13 = vshll.u32 %v5540_v22, 16  ;;  %v1810_v11 = vrot.slane %v5445_v23, 5  ;;  %v5478_v39 = vrot.slane %v5444_v15, 9 }
 0x1a6   : > { %v2231_v57 = vrot.slane %v2229_v30, 5  ;;  %v5831_v12 = vld [vmem:[#allocation2 + $0x19c] sm:$0xf0]  ;;  %v5839_v23 = vld [vmem:[#allocation2 + $0x1a4] sm:$0xf0] }
 0x1a7   : > { %v4491_v31 = vpop.f32.mrf.mxu2  ;;  %v2225_v6 = vrot.slane %v2223_v13, 5  ;;  %v1811_v43 = vsel %vm7088_vm5, %v5478_v39, %v1810_v11  ;;  %v6552_v40 = vld [vmem:[#allocation2 + $0x1a8] sm:$0xf0] }
 0x1a8   : > { %v4492_v14 = vadd.f32 %v4491_v31, %v4403_v41  ;;  %v4580_v29 = vpop.f32.mrf.mxu3  ;;  %v2220_v41 = vshrl.u32 %v5540_v22, 16  ;;  %v2235_v31 = vrot.slane %v2233_v25, 4  ;;  %v6546_v22 = vld [vmem:[#allocation2 + $0x17c] sm:$0xf]  ;;  %1917 = vst [vmem:[#allocation2 + $0x20c] sm:$0xf] %v1811_v43 }
 0x1a9   : > { %v4405_v8 = vpop.f32.mrf.mxu1  ;;  %v5544_v43 = vld [vmem:[%s6927_s28 + $0x7c] sm:$0xf] }
 0x1aa   : > { %v4581_v27 = vadd.f32 %v4580_v29, %v4492_v14  ;;  %v4406_v26 = vadd.f32 %v4405_v8, %v7311_v1  ;;  %v2222_v46 = vrot.slane %v2220_v41, 4  ;;  %v5542_v1 = vld [vmem:[%s6927_s28 + $0x74] sm:$0x1]  ;;  %v5589_v14 = vld [vmem:[%s6927_s28 + $0x70] sm:$0xf]  ;;  %v2236_v30 = vor.u32 %v2235_v31, %v2231_v57 }
 0x1ab   : > { %v4672_v47 = vpop.f32.mrf.mxu0  ;;  %v2239_v61 = vshll.u32 %v5542_v1, 16  ;;  %v5501_v8 = vld [vmem:[%s6927_s28 + $0x6c] sm:$0xf] }
 0x1ac   : > { %4720 = vmatmul.bf16.gmra.mxu1 %v5798_v50  ;;  %4809 = vmatmul.bf16.gmra.mxu2 %v5802_v20  ;;  %v7921_v56 = vadd.f32 %v4669_v58, %v4581_v27  ;;  %v2226_v19 = vor.u32 %v2225_v6, %v2222_v46  ;;  %v1812_v58 = vrot.slane %v1810_v11, 4  ;;  %v5837_v27 = vld [vmem:[#allocation2 + $0x180] sm:$0xf]  ;;  %v5590_v46 = vld [vmem:[%s6927_s28 + $0x74] sm:$0x1]  ;;  %v2646_v11 = vrot.slane %v5589_v14, 5 }
 0x1ad   : > { %4898 = vmatmul.bf16.gmra.mxu3 %v5806_v38  ;;  %v5502_v38 = vld [vmem:[%s6927_s28 + $0x70] sm:$0xf]  ;;  %v6547_v6 = vld [vmem:[#allocation2 + $0x184] sm:$0xf]  ;;  %v2649_v1 = vrot.slane %v5590_v46, 5  ;;  %v2237_v15 = vrot.slane %v2236_v30, 4 }
 0x1ae   : > { %4987 = vmatmul.bf16.gmra.mxu0 %v5810_v33  ;;  %v2227_v10 = vrot.slane %v2226_v19, 4  ;;  %v5588_v33 = vld [vmem:[%s6927_s28 + $0x6c] sm:$0xe]  ;;  %v1814_v41 = vsel %vm7088_vm5, %v1812_v58, %v1813_v54  ;;  %1985 = vst [vmem:[#allocation2 + $0x210] sm:$0xf] %v5501_v8  ;;  %v2257_v30 = vshrl.u32 %v5544_v43, 16 }
 0x1af   : > { %v4494_v3 = vpop.f32.mrf.mxu2  ;;  %1918 = vst [vmem:[#allocation2 + $0x230] sm:$0xf] %v1814_v41  ;;  %v5622_v25 = vrot.slane %v5588_v33, 9 }
 0x1b0   : > { %v4495_v51 = vadd.f32 %v4494_v3, %v4406_v26  ;;  %v4583_v9 = vpop.f32.mrf.mxu3  ;;  %v6551_v26 = vld [vmem:[#allocation2 + $0x1a0] sm:$0xf0]  ;;  %v2232_v13 = vsel %vm7074_vm3, %v2227_v10, %v2231_v57  ;;  %v5845_v3 = vld [vmem:[#allocation2 + $0x188] sm:$0xf]  ;;  %1986 = vst [vmem:[#allocation2 + $0x234] sm:$0xf] %v5502_v38 }
 0x1b1   : > { %v4407_v17 = vpop.f32.mrf.mxu1  ;;  %v2648_v57 = vrot.slane %v2646_v11, 4  ;;  %2481 = vst [vmem:[#allocation2 + $0x214] sm:$0xf] %v2232_v13  ;;  %v5838_v54 = vor.u32 %v6551_v26, %v5837_v27  ;;  %v5846_v14 = vor.u32 %v6552_v40, %v5845_v3  ;;  %v5448_v13 = vld [vmem:[%s6927_s28 + $0x70] sm:$0xf] }
 0x1b2   : > { %v4584_v29 = vadd.f32 %v4583_v9, %v4495_v51  ;;  %v4408_v50 = vadd.f32 %v4407_v17, %v7341_v49  ;;  %v2241_v49 = vrot.slane %v2239_v61, 5  ;;  %v2647_v51 = vsel %vm7088_vm5, %v5622_v25, %v2646_v11  ;;  %v5449_v25 = vld [vmem:[%s6927_s28 + $0x74] sm:$0x1] }
 0x1b3   : > { %v4674_v20 = vpop.f32.mrf.mxu0  ;;  %v2650_v10 = vsel %vm7088_vm5, %v2648_v57, %v2649_v1  ;;  %v5842_v61 = vor.u32 %v6547_v6, %v5839_v23  ;;  %2753 = vst [vmem:[#allocation2 + $0x218] sm:$0xf] %v2647_v51  ;;  %v5447_v23 = vld [vmem:[%s6927_s28 + $0x6c] sm:$0xe]  ;;  %v1820_v51 = vrot.slane %v5449_v25, 5 }
 0x1b4   : > { %v7939_v19 = vadd.f32 %v4672_v47, %v4584_v29  ;;  %v2242_v39 = vsel %vm7074_vm3, %v2237_v15, %v2241_v49  ;;  %v5834_v47 = vor.u32 %v6546_v22, %v5831_v12  ;;  %v5543_v29 = vld [vmem:[%s6927_s28 + $0x78] sm:$0xf]  ;;  %2754 = vst [vmem:[#allocation2 + $0x23c] sm:$0xf] %v2650_v10  ;;  %v2253_v12 = vshll.u32 %v5544_v43, 16 }
 0x1b5   : > { %2482 = vst [vmem:[#allocation2 + $0x238] sm:$0xf] %v2242_v39  ;;  %v2247_v22 = vshll.u32 %v5543_v29, 16  ;;  %v1817_v49 = vrot.slane %v5448_v13, 5  ;;  %v5479_v15 = vrot.slane %v5447_v23, 9 }
 0x1b6   : > { %v2255_v11 = vrot.slane %v2253_v12, 5  ;;  %v5867_v43 = vld [vmem:[#allocation2 + $0x1e4] sm:$0xf0]  ;;  %v5875_v13 = vld [vmem:[#allocation2 + $0x1ec] sm:$0xf0] }
 0x1b7   : > { %v4496_v9 = vpop.f32.mrf.mxu2  ;;  %v2249_v26 = vrot.slane %v2247_v22, 5  ;;  %v1818_v10 = vsel %vm7088_vm5, %v5479_v15, %v1817_v49  ;;  %v6561_v25 = vld [vmem:[#allocation2 + $0x1f0] sm:$0xf0] }
 0x1b8   : > { %v4497_v58 = vadd.f32 %v4496_v9, %v4408_v50  ;;  %v4585_v17 = vpop.f32.mrf.mxu3  ;;  %v2244_v50 = vshrl.u32 %v5543_v29, 16  ;;  %v2259_v9 = vrot.slane %v2257_v30, 4  ;;  %v6555_v29 = vld [vmem:[#allocation2 + $0x1c4] sm:$0xf]  ;;  %1919 = vst [vmem:[#allocation2 + $0x254] sm:$0xf] %v1818_v10 }
 0x1b9   : > { %v4410_v31 = vpop.f32.mrf.mxu1  ;;  %v5547_v10 = vld [vmem:[%s6927_s28 + $0x88] sm:$0xf] }
 0x1ba   : > { %v4586_v8 = vadd.f32 %v4585_v17, %v4497_v58  ;;  %v4411_v38 = vadd.f32 %v4410_v31, %v7361_v24  ;;  %v2246_v27 = vrot.slane %v2244_v50, 4  ;;  %v5545_v24 = vld [vmem:[%s6927_s28 + $0x80] sm:$0x1]  ;;  %v5592_v58 = vld [vmem:[%s6927_s28 + $0x7c] sm:$0xf]  ;;  %v2260_v12 = vor.u32 %v2259_v9, %v2255_v11 }
 0x1bb   : > { %v4677_v33 = vpop.f32.mrf.mxu0  ;;  %v2263_v39 = vshll.u32 %v5545_v24, 16  ;;  %v5503_v31 = vld [vmem:[%s6927_s28 + $0x78] sm:$0xf] }
 0x1bc   : > { %4725 = vmatmul.bf16.gmra.mxu1 %v5834_v47  ;;  %4814 = vmatmul.bf16.gmra.mxu2 %v5838_v54  ;;  %v7950_v41 = vadd.f32 %v4674_v20, %v4586_v8  ;;  %v2250_v46 = vor.u32 %v2249_v26, %v2246_v27  ;;  %v1819_v20 = vrot.slane %v1817_v49, 4  ;;  %v5873_v8 = vld [vmem:[#allocation2 + $0x1c8] sm:$0xf]  ;;  %v5593_v27 = vld [vmem:[%s6927_s28 + $0x80] sm:$0x1]  ;;  %v2653_v49 = vrot.slane %v5592_v58, 5 }
 0x1bd   : > { %4903 = vmatmul.bf16.gmra.mxu3 %v5842_v61  ;;  %v5504_v61 = vld [vmem:[%s6927_s28 + $0x7c] sm:$0xf]  ;;  %v6556_v26 = vld [vmem:[#allocation2 + $0x1cc] sm:$0xf]  ;;  %v2656_v24 = vrot.slane %v5593_v27, 5  ;;  %v2261_v23 = vrot.slane %v2260_v12, 4 }
 0x1be   : > { %4992 = vmatmul.bf16.gmra.mxu0 %v5846_v14  ;;  %v2251_v57 = vrot.slane %v2250_v46, 4  ;;  %v5591_v14 = vld [vmem:[%s6927_s28 + $0x78] sm:$0xe]  ;;  %v1821_v50 = vsel %vm7088_vm5, %v1819_v20, %v1820_v51  ;;  %1987 = vst [vmem:[#allocation2 + $0x258] sm:$0xf] %v5503_v31  ;;  %v2281_v12 = vshrl.u32 %v5547_v10, 16 }
 0x1bf   : > { %v4499_v6 = vpop.f32.mrf.mxu2  ;;  %1920 = vst [vmem:[#allocation2 + $0x278] sm:$0xf] %v1821_v50  ;;  %v5623_v30 = vrot.slane %v5591_v14, 9 }
 0x1c0   : > { %v4500_v1 = vadd.f32 %v4499_v6, %v4411_v38  ;;  %v4588_v3 = vpop.f32.mrf.mxu3  ;;  %v6560_v38 = vld [vmem:[#allocation2 + $0x1e8] sm:$0xf0]  ;;  %v2256_v22 = vsel %vm7074_vm3, %v2251_v57, %v2255_v11  ;;  %v5881_v6 = vld [vmem:[#allocation2 + $0x1d0] sm:$0xf]  ;;  %1988 = vst [vmem:[#allocation2 + $0x27c] sm:$0xf] %v5504_v61 }
 0x1c1   : > { %v4412_v40 = vpop.f32.mrf.mxu1  ;;  %v2655_v11 = vrot.slane %v2653_v49, 4  ;;  %2483 = vst [vmem:[#allocation2 + $0x25c] sm:$0xf] %v2256_v22  ;;  %v5874_v51 = vor.u32 %v6560_v38, %v5873_v8  ;;  %v5882_v58 = vor.u32 %v6561_v25, %v5881_v6  ;;  %v5451_v22 = vld [vmem:[%s6927_s28 + $0x7c] sm:$0xf] }
 0x1c2   : > { %v4589_v17 = vadd.f32 %v4588_v3, %v4500_v1  ;;  %v4413_v47 = vadd.f32 %v4412_v40, %v7386_v16  ;;  %v2265_v16 = vrot.slane %v2263_v39, 5  ;;  %v2654_v1 = vsel %vm7088_vm5, %v5623_v30, %v2653_v49  ;;  %v5452_v30 = vld [vmem:[%s6927_s28 + $0x80] sm:$0x1] }
 0x1c3   : > { %v4679_v54 = vpop.f32.mrf.mxu0  ;;  %v2657_v57 = vsel %vm7088_vm5, %v2655_v11, %v2656_v24  ;;  %v5878_v39 = vor.u32 %v6556_v26, %v5875_v13  ;;  %2755 = vst [vmem:[#allocation2 + $0x260] sm:$0xf] %v2654_v1  ;;  %v5450_v13 = vld [vmem:[%s6927_s28 + $0x78] sm:$0xe]  ;;  %v1827_v1 = vrot.slane %v5452_v30, 5 }
 0x1c4   : > { %v7968_v46 = vadd.f32 %v4677_v33, %v4589_v17  ;;  %v2266_v15 = vsel %vm7074_vm3, %v2261_v23, %v2265_v16  ;;  %v5870_v33 = vor.u32 %v6555_v29, %v5867_v43  ;;  %v5546_v17 = vld [vmem:[%s6927_s28 + $0x84] sm:$0xf]  ;;  %2756 = vst [vmem:[#allocation2 + $0x284] sm:$0xf] %v2657_v57  ;;  %v2277_v43 = vshll.u32 %v5547_v10, 16 }
 0x1c5   : > { %2484 = vst [vmem:[#allocation2 + $0x280] sm:$0xf] %v2266_v15  ;;  %v2271_v29 = vshll.u32 %v5546_v17, 16  ;;  %v1824_v16 = vrot.slane %v5451_v22, 5  ;;  %v5480_v23 = vrot.slane %v5450_v13, 9 }
 0x1c6   : > { %v2279_v49 = vrot.slane %v2277_v43, 5  ;;  %v6564_v10 = vld [vmem:[#allocation2 + $0x20c] sm:$0xf]  ;;  %v5917_v30 = vld [vmem:[#allocation2 + $0x218] sm:$0xf] }
 0x1c7   : > { %v4501_v3 = vpop.f32.mrf.mxu2  ;;  %v2273_v38 = vrot.slane %v2271_v29, 5  ;;  %v5596_v22 = vld [vmem:[%s6927_s28 + $0x8c] sm:$0x1] }
 0x1c8   : > { %v4502_v20 = vadd.f32 %v4501_v3, %v4413_v47  ;;  %v4590_v40 = vpop.f32.mrf.mxu3  ;;  %v2268_v47 = vshrl.u32 %v5546_v17, 16  ;;  %v2283_v3 = vrot.slane %v2281_v12, 4  ;;  %v5594_v17 = vld [vmem:[%s6927_s28 + $0x84] sm:$0xe]  ;;  %v6565_v12 = vld [vmem:[#allocation2 + $0x214] sm:$0xf] }
 0x1c9   : > { %v4415_v9 = vpop.f32.mrf.mxu1 }
 0x1ca   : > { %v4591_v31 = vadd.f32 %v4590_v40, %v4502_v20  ;;  %v4416_v61 = vadd.f32 %v4415_v9, %v7412_v63  ;;  %v2270_v8 = vrot.slane %v2268_v47, 4  ;;  %v5548_v63 = vld [vmem:[%s6927_s28 + $0x8c] sm:$0x1]  ;;  %v5595_v20 = vld [vmem:[%s6927_s28 + $0x88] sm:$0xf]  ;;  %v1825_v9 = vsel %vm7088_vm5, %v5480_v23, %v1824_v16 }
 0x1cb   : > { %v4682_v14 = vpop.f32.mrf.mxu0  ;;  %v2287_v15 = vshll.u32 %v5548_v63, 16  ;;  %v6569_v47 = vld [vmem:[#allocation2 + $0x230] sm:$0xf0]  ;;  %1921 = vst [vmem:[#allocation2 + $0x29c] sm:$0xf] %v1825_v9 }
 0x1cc   : > { %4730 = vmatmul.bf16.gmra.mxu1 %v5870_v33  ;;  %4819 = vmatmul.bf16.gmra.mxu2 %v5874_v51  ;;  %v7979_v50 = vadd.f32 %v4679_v54, %v4591_v31  ;;  %v2274_v27 = vor.u32 %v2273_v38, %v2270_v8  ;;  %v1826_v54 = vrot.slane %v1824_v16, 4  ;;  %v8286_v33 = vld [vmem:[#allocation3_spill] sm:$0xff]  ;;  %v5903_v31 = vld [vmem:[#allocation2 + $0x22c] sm:$0xf0]  ;;  %v2284_v8 = vor.u32 %v2283_v3, %v2279_v49  ;;  %v5911_v63 = vld [vmem:[#allocation2 + $0x234] sm:$0xf0] }
 0x1cd   : > { %4908 = vmatmul.bf16.gmra.mxu3 %v5878_v39  ;;  %v5505_v39 = vld [vmem:[%s6927_s28 + $0x84] sm:$0xf]  ;;  %v2289_v38 = vrot.slane %v2287_v15, 5  ;;  %v5624_v16 = vrot.slane %v5594_v17, 9  ;;  %v5549_v9 = vld [vmem:[%s6927_s28 + $0x90] sm:$0xf] }
 0x1ce   : > { %4997 = vmatmul.bf16.gmra.mxu0 %v5882_v58  ;;  %v2275_v11 = vrot.slane %v2274_v27, 4  ;;  %v5506_v58 = vld [vmem:[%s6927_s28 + $0x88] sm:$0xf]  ;;  %v1828_v29 = vsel %vm7088_vm5, %v1826_v54, %v1827_v1  ;;  %v2660_v27 = vrot.slane %v5595_v20, 5  ;;  %1989 = vst [vmem:[#allocation2 + $0x2a0] sm:$0xf] %v5505_v39 }
 0x1cf   : > { %v4504_v26 = vpop.f32.mrf.mxu2  ;;  %1922 = vst [vmem:[#allocation2 + $0x2c0] sm:$0xf] %v1828_v29  ;;  %v5550_v39 = vld [vmem:[%s6927_s28 + $0x94] sm:$0xf]  ;;  %v8287_v17 = vld [vmem:[#allocation4_spill] sm:$0xff] }
 0x1d0   : > { %v4505_v24 = vadd.f32 %v4504_v26, %v4416_v61  ;;  %v4593_v6 = vpop.f32.mrf.mxu3  ;;  %v5909_v61 = vld [vmem:[#allocation2 + $0x210] sm:$0xf]  ;;  %v2280_v43 = vsel %vm7074_vm3, %v2275_v11, %v2279_v49  ;;  %v2663_v26 = vrot.slane %v5596_v22, 5  ;;  %1990 = vst [vmem:[#allocation2 + $0x2c4] sm:$0xf] %v5506_v58  ;;  %v2661_v23 = vsel %vm7088_vm5, %v5624_v16, %v2660_v27 }
 0x1d1   : > { %v4417_v25 = vpop.f32.mrf.mxu1  ;;  %v2662_v49 = vrot.slane %v2660_v27, 4  ;;  %2485 = vst [vmem:[#allocation2 + $0x2a4] sm:$0xf] %v2280_v43  ;;  %v5910_v3 = vor.u32 %v6569_v47, %v5909_v61 }
 0x1d2   : > { %v4594_v40 = vadd.f32 %v4593_v6, %v4505_v24  ;;  %v4418_v51 = vadd.f32 %v4417_v25, %v8286_v33  ;;  %v2285_v24 = vrot.slane %v2284_v8, 4  ;;  %v6570_v6 = vld [vmem:[#allocation2 + $0x238] sm:$0xf0]  ;;  %2757 = vst [vmem:[#allocation2 + $0x2a8] sm:$0xf] %v2661_v23 }
 0x1d3   : > { %v4684_v57 = vpop.f32.mrf.mxu0  ;;  %v2664_v15 = vsel %vm7088_vm5, %v2662_v49, %v2663_v26  ;;  %v5918_v33 = vor.u32 %v6570_v6, %v5917_v30  ;;  %v5454_v8 = vld [vmem:[%s6927_s28 + $0x88] sm:$0xf]  ;;  %v5453_v26 = vld [vmem:[%s6927_s28 + $0x84] sm:$0xe]  ;;  %v5455_v30 = vld [vmem:[%s6927_s28 + $0x8c] sm:$0x1] }
 0x1d4   : > { %v7997_v13 = vadd.f32 %v4682_v14, %v4594_v40  ;;  %v2290_v25 = vsel %vm7074_vm3, %v2285_v24, %v2289_v38  ;;  %v5906_v14 = vor.u32 %v6564_v10, %v5903_v31  ;;  %v5914_v40 = vor.u32 %v6565_v12, %v5911_v63  ;;  %2758 = vst [vmem:[#allocation2 + $0x2cc] sm:$0xf] %v2664_v15  ;;  %v5551_v63 = vld [vmem:[%s6927_s28 + $0x98] sm:$0x1] }
 0x1d5   : > { %2486 = vst [vmem:[#allocation2 + $0x2c8] sm:$0xf] %v2290_v25  ;;  %v2295_v10 = vshll.u32 %v5549_v9, 16  ;;  %v2301_v31 = vshll.u32 %v5550_v39, 16  ;;  %v2305_v38 = vshrl.u32 %v5550_v39, 16  ;;  %v1831_v12 = vrot.slane %v5454_v8, 5 }
 0x1d6   : > { %v5481_v49 = vrot.slane %v5453_v26, 9  ;;  %v5507_v39 = vld [vmem:[%s6927_s28 + $0x90] sm:$0xf] }
 0x1d7   : > { %v4506_v54 = vpop.f32.mrf.mxu2  ;;  %v2297_v47 = vrot.slane %v2295_v10, 5  ;;  %v2303_v24 = vrot.slane %v2301_v31, 5  ;;  %v5945_v10 = vld [vmem:[#allocation2 + $0x258] sm:$0xf]  ;;  %v6578_v31 = vld [vmem:[#allocation2 + $0x278] sm:$0xf0] }
 0x1d8   : > { %v4507_v1 = vadd.f32 %v4506_v54, %v4418_v51  ;;  %v4595_v11 = vpop.f32.mrf.mxu3  ;;  %v2292_v51 = vshrl.u32 %v5549_v9, 16  ;;  %v1833_v54 = vrot.slane %v1831_v12, 4  ;;  %v1832_v9 = vsel %vm7088_vm5, %v5481_v49, %v1831_v12  ;;  %1991 = vst [vmem:[#allocation2 + $0x2e8] sm:$0xf] %v5507_v39 }
 0x1d9   : > { %v4420_v20 = vpop.f32.mrf.mxu1  ;;  %1923 = vst [vmem:[#allocation2 + $0x2e4] sm:$0xf] %v1832_v9 }
 0x1da   : > { %v4596_v58 = vadd.f32 %v4595_v11, %v4507_v1  ;;  %v4421_v29 = vadd.f32 %v4420_v20, %v8287_v17  ;;  %v2294_v61 = vrot.slane %v2292_v51, 4  ;;  %v1834_v1 = vrot.slane %v5455_v30, 5  ;;  %v8289_v20 = vld [vmem:[#allocation5_spill] sm:$0xff]  ;;  %v5939_v51 = vld [vmem:[#allocation2 + $0x274] sm:$0xf0] }
 0x1db   : > { %v4687_v43 = vpop.f32.mrf.mxu0  ;;  %v5597_v17 = vld [vmem:[%s6927_s28 + $0x90] sm:$0xe] }
 0x1dc   : > { %4735 = vmatmul.bf16.gmra.mxu1 %v5906_v14  ;;  %4824 = vmatmul.bf16.gmra.mxu2 %v5910_v3  ;;  %v8009_v22 = vadd.f32 %v4684_v57, %v4596_v58  ;;  %v2298_v16 = vor.u32 %v2297_v47, %v2294_v61  ;;  %v2307_v57 = vrot.slane %v2305_v38, 4  ;;  %v2311_v14 = vshll.u32 %v5551_v63, 16  ;;  %v5598_v3 = vld [vmem:[%s6927_s28 + $0x94] sm:$0xf]  ;;  %v5599_v63 = vld [vmem:[%s6927_s28 + $0x98] sm:$0x1] }
 0x1dd   : > { %4913 = vmatmul.bf16.gmra.mxu3 %v5914_v40  ;;  %v5508_v58 = vld [vmem:[%s6927_s28 + $0x94] sm:$0xf]  ;;  %v1835_v61 = vsel %vm7088_vm5, %v1833_v54, %v1834_v1  ;;  %v5625_v12 = vrot.slane %v5597_v17, 9  ;;  %v2667_v26 = vrot.slane %v5598_v3, 5  ;;  %v2670_v30 = vrot.slane %v5599_v63, 5 }
 0x1de   : > { %5002 = vmatmul.bf16.gmra.mxu0 %v5918_v33  ;;  %8288 = vst [vmem:[#allocation3_spill] sm:$0xff] %v8009_v22  ;;  %v2299_v11 = vrot.slane %v2298_v16, 4  ;;  %v2308_v8 = vor.u32 %v2307_v57, %v2303_v24  ;;  %v2313_v38 = vrot.slane %v2311_v14, 5  ;;  %v6574_v16 = vld [vmem:[#allocation2 + $0x25c] sm:$0xf]  ;;  %v5946_v3 = vor.u32 %v6578_v31, %v5945_v10 }
 0x1df   : > { %v4509_v27 = vpop.f32.mrf.mxu2  ;;  %1924 = vst [vmem:[#allocation2 + $0x308] sm:$0xf] %v1835_v61  ;;  %v6579_v54 = vld [vmem:[#allocation2 + $0x280] sm:$0xf0]  ;;  %v5553_v17 = vld [vmem:[%s6927_s28 + $0xa0] sm:$0xf] }
 0x1e0   : > { %v4510_v6 = vadd.f32 %v4509_v27, %v4421_v29  ;;  %v4598_v23 = vpop.f32.mrf.mxu3  ;;  %v6573_v29 = vld [vmem:[#allocation2 + $0x254] sm:$0xf]  ;;  %v2304_v47 = vsel %vm7074_vm3, %v2299_v11, %v2303_v24  ;;  %v5947_v27 = vld [vmem:[#allocation2 + $0x27c] sm:$0xf0]  ;;  %v2309_v49 = vrot.slane %v2308_v8, 4  ;;  %v2669_v24 = vrot.slane %v2667_v26, 4 }
 0x1e1   : > { %v4422_v25 = vpop.f32.mrf.mxu1  ;;  %1992 = vst [vmem:[#allocation2 + $0x30c] sm:$0xf] %v5508_v58  ;;  %v5950_v9 = vor.u32 %v6574_v16, %v5947_v27  ;;  %v5552_v58 = vld [vmem:[%s6927_s28 + $0x9c] sm:$0xf]  ;;  %v5457_v31 = vld [vmem:[%s6927_s28 + $0x94] sm:$0xf] }
 0x1e2   : > { %v4599_v15 = vadd.f32 %v4598_v23, %v4510_v6  ;;  %v4423_v40 = vadd.f32 %v4422_v25, %v8289_v20  ;;  %v5953_v23 = vld [vmem:[#allocation2 + $0x260] sm:$0xf]  ;;  %v2668_v25 = vsel %vm7088_vm5, %v5625_v12, %v2667_v26  ;;  %v2314_v11 = vsel %vm7074_vm3, %v2309_v49, %v2313_v38  ;;  %2487 = vst [vmem:[#allocation2 + $0x2ec] sm:$0xf] %v2304_v47  ;;  %v8292_v16 = vld [vmem:[#allocation6_spill] sm:$0xff] }
 0x1e3   : > { %v4689_v33 = vpop.f32.mrf.mxu0  ;;  %2488 = vst [vmem:[#allocation2 + $0x310] sm:$0xf] %v2314_v11  ;;  %v5954_v39 = vor.u32 %v6579_v54, %v5953_v23  ;;  %v2319_v47 = vshll.u32 %v5552_v58, 16  ;;  %v2329_v38 = vshrl.u32 %v5553_v17, 16  ;;  %v1838_v12 = vrot.slane %v5457_v31, 5  ;;  %v8048_v49 = vld [vmem:[%s8040_s26] sm:$0xff]  }
 0x1e4   : > { %v8026_v6 = vadd.f32 %v4687_v43, %v4599_v15  ;;  %v5942_v43 = vor.u32 %v6573_v29, %v5939_v51  ;;  %v2671_v15 = vsel %vm7088_vm5, %v2669_v24, %v2670_v30  ;;  %2759 = vst [vmem:[#allocation2 + $0x2f0] sm:$0xf] %v2668_v25  ;;  %v2325_v29 = vshll.u32 %v5553_v17, 16  ;;  %v5554_v26 = vld [vmem:[%s6927_s28 + $0xa4] sm:$0x1] }
 0x1e5   : > { %2760 = vst [vmem:[#allocation2 + $0x314] sm:$0xf] %v2671_v15  ;;  %v2321_v10 = vrot.slane %v2319_v47, 5  ;;  %v5456_v54 = vld [vmem:[%s6927_s28 + $0x90] sm:$0xe]  ;;  %v2331_v15 = vrot.slane %v2329_v38, 4 }
 0x1e6   : > { %8290 = vst [vmem:[#allocation4_spill] sm:$0xff] %v8026_v6  ;;  %v5458_v25 = vld [vmem:[%s6927_s28 + $0x98] sm:$0x1]  ;;  %v2327_v24 = vrot.slane %v2325_v29, 5  ;;  %v5509_v29 = vld [vmem:[%s6927_s28 + $0x9c] sm:$0xf] }
 0x1e7   : > { %v4511_v1 = vpop.f32.mrf.mxu2  ;;  %v5981_v31 = vld [vmem:[#allocation2 + $0x2a0] sm:$0xf]  ;;  %1993 = vst [vmem:[#allocation2 + $0x330] sm:$0xf] %v5509_v29 }
 0x1e8   : > { %v4512_v57 = vadd.f32 %v4511_v1, %v4423_v40  ;;  %v4600_v14 = vpop.f32.mrf.mxu3  ;;  %v2316_v40 = vshrl.u32 %v5552_v58, 16  ;;  %v6717_v58 = vunpack.c.l.bf16 %v8048_v49 }
 0x1e9   : > { %v4701_v20 = vpop.f32.mrf.mxu1 }
 0x1ea   : > { %v4601_v61 = vadd.f32 %v4600_v14, %v4512_v57  ;;  %v2318_v51 = vrot.slane %v2316_v40, 4  ;;  %v4702_v27 = vadd.f32 %v4701_v20, %v8292_v16  ;;  %v5482_v57 = vrot.slane %v5456_v54, 9  ;;  %v5975_v40 = vld [vmem:[#allocation2 + $0x2bc] sm:$0xf0]  ;;  %v6587_v16 = vld [vmem:[#allocation2 + $0x2c0] sm:$0xf0] }
 0x1eb   : > { %v4968_v8 = vpop.f32.mrf.mxu0  ;;  %v2335_v20 = vshll.u32 %v5554_v26, 16  ;;  %v2332_v26 = vor.u32 %v2331_v15, %v2327_v24 }
 0x1ec   : > { %4740 = vmatmul.bf16.gmra.mxu1 %v5942_v43  ;;  %4829 = vmatmul.bf16.gmra.mxu2 %v5946_v3  ;;  %v8043_v63 = vadd.f32 %v4689_v33, %v4601_v61  ;;  %v2322_v30 = vor.u32 %v2321_v10, %v2318_v51  ;;  %v1840_v33 = vrot.slane %v1838_v12, 4  ;;  %v1841_v43 = vrot.slane %v5458_v25, 5  ;;  %v6582_v61 = vld [vmem:[#allocation2 + $0x29c] sm:$0xf]  ;;  %v5510_v51 = vld [vmem:[%s6927_s28 + $0xa0] sm:$0xf] }
 0x1ed   : > { %4918 = vmatmul.bf16.gmra.mxu3 %v5950_v9  ;;  %v5601_v9 = vld [vmem:[%s6927_s28 + $0xa0] sm:$0xf]  ;;  %v1839_v47 = vsel %vm7088_vm5, %v5482_v57, %v1838_v12  ;;  %v5600_v10 = vld [vmem:[%s6927_s28 + $0x9c] sm:$0xe]  ;;  %v6583_v25 = vld [vmem:[#allocation2 + $0x2a4] sm:$0xf]  ;;  %v5978_v15 = vor.u32 %v6582_v61, %v5975_v40 }
 0x1ee   : > { %5007 = vmatmul.bf16.gmra.mxu0 %v5954_v39  ;;  %8291 = vst [vmem:[#allocation5_spill] sm:$0xff] %v8043_v63  ;;  %v2323_v3 = vrot.slane %v2322_v30, 4  ;;  %v1842_v38 = vsel %vm7088_vm5, %v1840_v33, %v1841_v43  ;;  %v2337_v30 = vrot.slane %v2335_v20, 5  ;;  %v5626_v12 = vrot.slane %v5600_v10, 9  ;;  %v5989_v63 = vld [vmem:[#allocation2 + $0x2a8] sm:$0xf] }
 0x1ef   : > { %v4790_v23 = vpop.f32.mrf.mxu2  ;;  %1925 = vst [vmem:[#allocation2 + $0x32c] sm:$0xf] %v1839_v47  ;;  %v2333_v6 = vrot.slane %v2332_v26, 4  ;;  %v6588_v43 = vld [vmem:[#allocation2 + $0x2c8] sm:$0xf0] }
 0x1f0   : > { %v4791_v1 = vadd.f32 %v4790_v23, %v4702_v27  ;;  %v4879_v11 = vpop.f32.mrf.mxu3  ;;  %v2328_v27 = vsel %vm7074_vm3, %v2323_v3, %v2327_v24  ;;  %v5602_v23 = vld [vmem:[%s6927_s28 + $0xa4] sm:$0x1]  ;;  %1926 = vst [vmem:[#allocation2 + $0x350] sm:$0xf] %v1842_v38  ;;  %v5555_v10 = vld [vmem:[%s6927_s28 + $0xa8] sm:$0xf] }
 0x1f1   : > { %v4703_v14 = vpop.f32.mrf.mxu1  ;;  %v2677_v57 = vrot.slane %v5602_v23, 5  ;;  %1994 = vst [vmem:[#allocation2 + $0x354] sm:$0xf] %v5510_v51  ;;  %v2338_v20 = vsel %vm7074_vm3, %v2333_v6, %v2337_v30  ;;  %v5990_v51 = vor.u32 %v6588_v43, %v5989_v63  ;;  %v6718_v6 = vunpack.c.h.bf16 %v8048_v49  ;;  %v5556_v38 = vld [vmem:[%s6927_s28 + $0xac] sm:$0xf] }
 0x1f2   : > { %v4880_v39 = vadd.f32 %v4879_v11, %v4791_v1  ;;  %v5983_v1 = vld [vmem:[#allocation2 + $0x2c4] sm:$0xf0]  ;;  %v2674_v11 = vrot.slane %v5601_v9, 5  ;;  %v4704_v33 = vadd.f32 %v4703_v14, %v7545_v37  ;;  %2489 = vst [vmem:[#allocation2 + $0x334] sm:$0xf] %v2328_v27  ;;  %v2343_v27 = vshll.u32 %v5555_v10, 16 }
 0x1f3   : > { %v4970_v17 = vpop.f32.mrf.mxu0  ;;  %2490 = vst [vmem:[#allocation2 + $0x358] sm:$0xf] %v2338_v20  ;;  %v5986_v29 = vor.u32 %v6583_v25, %v5983_v1  ;;  %v5460_v26 = vld [vmem:[%s6927_s28 + $0xa0] sm:$0xf]  ;;  %v2349_v23 = vshll.u32 %v5556_v38, 16  ;;  %v2353_v1 = vshrl.u32 %v5556_v38, 16 }
 0x1f4   : > { %v4969_v54 = vadd.f32 %v4968_v8, %v4880_v39  ;;  %v2675_v24 = vsel %vm7088_vm5, %v5626_v12, %v2674_v11  ;;  %v2676_v3 = vrot.slane %v2674_v11, 4  ;;  %v5982_v39 = vor.u32 %v6587_v16, %v5981_v31  ;;  %v8293_v16 = vld [vmem:[#allocation7_spill] sm:$0xff]  ;;  %v8084_v11 = vld [vmem:[%s8040_s26 + $0x8] sm:$0xff]  }
 0x1f5   : > { %2761 = vst [vmem:[#allocation2 + $0x338] sm:$0xf] %v2675_v24  ;;  %v2345_v25 = vrot.slane %v2343_v27, 5  ;;  %v2355_v38 = vrot.slane %v2353_v1, 4  ;;  %v6017_v27 = vld [vmem:[#allocation2 + $0x2e8] sm:$0xf] }
 0x1f6   : > { %v5112_v22 = vadd.f32 %v6717_v58, %v4969_v54  ;;  %v2678_v58 = vsel %vm7088_vm5, %v2676_v3, %v2677_v57  ;;  %v1845_v54 = vrot.slane %v5460_v26, 5  ;;  %v5461_v57 = vld [vmem:[%s6927_s28 + $0xa4] sm:$0x1] }
 0x1f7   : > { %v4792_v8 = vpop.f32.mrf.mxu2  ;;  %2762 = vst [vmem:[#allocation2 + $0x35c] sm:$0xf] %v2678_v58 }
 0x1f8   : > { %v5144_v37 = vmax.f32 %v5112_v22, 0.0  ;;  %v4793_v14 = vadd.f32 %v4792_v8, %v4704_v33  ;;  %v4881_v9 = vpop.f32.mrf.mxu3  ;;  %v2340_v22 = vshrl.u32 %v5555_v10, 16  ;;  %v5557_v8 = vld [vmem:[%s6927_s28 + $0xb0] sm:$0x1]  ;;  %v1847_v20 = vrot.slane %v1845_v54, 4 }
 0x1f9   : > { %v4706_v47 = vpop.f32.mrf.mxu1  ;;  %v6011_v10 = vld [vmem:[#allocation2 + $0x304] sm:$0xf0] }
 0x1fa   : > { %5176 = vst [vmem:[%s8071_s30] sm:$0xff] %v5144_v37  ;;  %v4882_v61 = vadd.f32 %v4881_v9, %v4793_v14  ;;  %v4707_v63 = vadd.f32 %v4706_v47, %v8293_v16  ;;  %v2342_v30 = vrot.slane %v2340_v22, 4  ;;  %v1848_v37 = vrot.slane %v5461_v57, 5  ;;  %v5604_v22 = vld [vmem:[%s6927_s28 + $0xac] sm:$0xf]  ;;  %v6025_v57 = vld [vmem:[#allocation2 + $0x2f0] sm:$0xf] }
 0x1fb   : > { %v4973_v40 = vpop.f32.mrf.mxu0  ;;  %v2351_v9 = vrot.slane %v2349_v23, 5  ;;  %v6721_v47 = vunpack.c.l.bf16 %v8084_v11 }
 0x1fc   : > { %v4971_v31 = vadd.f32 %v4970_v17, %v4882_v61  ;;  %4745 = vmatmul.bf16.gmra.mxu1 %v5978_v15  ;;  %4834 = vmatmul.bf16.gmra.mxu2 %v5982_v39  ;;  %v5459_v17 = vld [vmem:[%s6927_s28 + $0x9c] sm:$0xe]  ;;  %v2346_v14 = vor.u32 %v2345_v25, %v2342_v30  ;;  %v5603_v39 = vld [vmem:[%s6927_s28 + $0xa8] sm:$0xe]  ;;  %v1849_v16 = vsel %vm7088_vm5, %v1847_v20, %v1848_v37  ;;  %v2359_v30 = vshll.u32 %v5557_v8, 16 }
 0x1fd   : > { %4923 = vmatmul.bf16.gmra.mxu3 %v5986_v29  ;;  %v5483_v3 = vrot.slane %v5459_v17, 9  ;;  %v6019_v25 = vld [vmem:[#allocation2 + $0x30c] sm:$0xf0]  ;;  %1928 = vst [vmem:[#allocation2 + $0x398] sm:$0xf] %v1849_v16 }
 0x1fe   : > { %5012 = vmatmul.bf16.gmra.mxu0 %v5990_v51  ;;  %v5113_v49 = vadd.f32 %v6718_v6, %v4971_v31  ;;  %v6591_v51 = vld [vmem:[#allocation2 + $0x2e4] sm:$0xf]  ;;  %v5511_v6 = vld [vmem:[%s6927_s28 + $0xa8] sm:$0xf]  ;;  %v6596_v31 = vld [vmem:[#allocation2 + $0x308] sm:$0xf0] }
 0x1ff   : > { %v4795_v12 = vpop.f32.mrf.mxu2  ;;  %v1846_v61 = vsel %vm7088_vm5, %v5483_v3, %v1845_v54  ;;  %v2347_v26 = vrot.slane %v2346_v14, 4  ;;  %v5605_v17 = vld [vmem:[%s6927_s28 + $0xb0] sm:$0x1]  ;;  %v5627_v54 = vrot.slane %v5603_v39, 9  ;;  %1995 = vst [vmem:[#allocation2 + $0x378] sm:$0xf] %v5511_v6  ;;  %v6014_v14 = vor.u32 %v6591_v51, %v6011_v10 }
 0x200   : > { %v5145_v33 = vmax.f32 %v5113_v49, 0.0  ;;  %v4796_v43 = vadd.f32 %v4795_v12, %v4707_v63  ;;  %v4884_v24 = vpop.f32.mrf.mxu3  ;;  %1927 = vst [vmem:[#allocation2 + $0x374] sm:$0xf] %v1846_v61  ;;  %v5512_v63 = vld [vmem:[%s6927_s28 + $0xac] sm:$0xf]  ;;  %v2356_v12 = vor.u32 %v2355_v38, %v2351_v9 }
 0x201   : > { %v4708_v15 = vpop.f32.mrf.mxu1  ;;  %v6592_v49 = vld [vmem:[#allocation2 + $0x2ec] sm:$0xf]  ;;  %v2352_v1 = vsel %vm7074_vm3, %v2347_v26, %v2351_v9  ;;  %v6597_v20 = vld [vmem:[#allocation2 + $0x310] sm:$0xf0]  ;;  %1996 = vst [vmem:[#allocation2 + $0x39c] sm:$0xf] %v5512_v63  ;;  %v6722_v63 = vunpack.c.h.bf16 %v8084_v11 }
 0x202   : > { %5177 = vst [vmem:[%s8071_s30 + $0x8] sm:$0xff] %v5145_v33  ;;  %v4885_v58 = vadd.f32 %v4884_v24, %v4796_v43  ;;  %v2361_v33 = vrot.slane %v2359_v30, 5  ;;  %v2681_v43 = vrot.slane %v5604_v22, 5  ;;  %v4709_v3 = vadd.f32 %v4708_v15, %v7584_v28  ;;  %v5558_v10 = vld [vmem:[%s6927_s28 + $0xb4] sm:$0xf] }
 0x203   : > { %v4975_v29 = vpop.f32.mrf.mxu0  ;;  %v2357_v8 = vrot.slane %v2356_v12, 4  ;;  %2491 = vst [vmem:[#allocation2 + $0x37c] sm:$0xf] %v2352_v1  ;;  %v6022_v38 = vor.u32 %v6592_v49, %v6019_v25  ;;  %v6026_v22 = vor.u32 %v6597_v20, %v6025_v57  ;;  %v5559_v30 = vld [vmem:[%s6927_s28 + $0xb8] sm:$0xf] }
 0x204   : > { %v4974_v23 = vadd.f32 %v4973_v40, %v4885_v58  ;;  %v2684_v40 = vrot.slane %v5605_v17, 5  ;;  %v2682_v39 = vsel %vm7088_vm5, %v5627_v54, %v2681_v43  ;;  %v2683_v58 = vrot.slane %v2681_v43, 4  ;;  %v5463_v25 = vld [vmem:[%s6927_s28 + $0xac] sm:$0xf]  ;;  %v8116_v43 = vld [vmem:[%s8040_s26 + $0x10] sm:$0xff]  }
 0x205   : > { %v2362_v28 = vsel %vm7074_vm3, %v2357_v8, %v2361_v33  ;;  %2763 = vst [vmem:[#allocation2 + $0x380] sm:$0xf] %v2682_v39  ;;  %v2373_v17 = vshll.u32 %v5559_v30, 16  ;;  %v1852_v54 = vrot.slane %v5463_v25, 5  ;;  %v2377_v1 = vshrl.u32 %v5559_v30, 16 }
 0x206   : > { %v5114_v24 = vadd.f32 %v6721_v47, %v4974_v23  ;;  %v6018_v47 = vor.u32 %v6596_v31, %v6017_v27  ;;  %2492 = vst [vmem:[#allocation2 + $0x3a0] sm:$0xf] %v2362_v28  ;;  %v2685_v51 = vsel %vm7088_vm5, %v2683_v58, %v2684_v40  ;;  %v2364_v27 = vshrl.u32 %v5558_v10, 16  ;;  %v6605_v30 = vld [vmem:[#allocation2 + $0x350] sm:$0xf0] }
 0x207   : > { %v4797_v37 = vpop.f32.mrf.mxu2  ;;  %v2367_v31 = vshll.u32 %v5558_v10, 16  ;;  %2764 = vst [vmem:[#allocation2 + $0x3a4] sm:$0xf] %v2685_v51  ;;  %v1854_v40 = vrot.slane %v1852_v54, 4  ;;  %v5513_v51 = vld [vmem:[%s6927_s28 + $0xb4] sm:$0xf] }
 0x208   : > { %v5146_v61 = vmax.f32 %v5114_v24, 0.0  ;;  %v4798_v9 = vadd.f32 %v4797_v37, %v4709_v3  ;;  %v4886_v6 = vpop.f32.mrf.mxu3  ;;  %v2366_v12 = vrot.slane %v2364_v27, 4  ;;  %v5464_v24 = vld [vmem:[%s6927_s28 + $0xb0] sm:$0x1]  ;;  %v5560_v37 = vld [vmem:[%s6927_s28 + $0xbc] sm:$0x1] }
 0x209   : > { %v4711_v15 = vpop.f32.mrf.mxu1  ;;  %v2369_v57 = vrot.slane %v2367_v31, 5  ;;  %v1855_v39 = vrot.slane %v5464_v24, 5  ;;  %v2379_v10 = vrot.slane %v2377_v1, 4  ;;  %v5514_v31 = vld [vmem:[%s6927_s28 + $0xb8] sm:$0xf] }
 0x20a   : > { %5178 = vst [vmem:[%s8071_s30 + $0x10] sm:$0xff] %v5146_v61  ;;  %v4887_v16 = vadd.f32 %v4886_v6, %v4798_v9  ;;  %v4712_v49 = vadd.f32 %v4711_v15, %v7618_v42  ;;  %v2375_v61 = vrot.slane %v2373_v17, 5  ;;  %v5606_v9 = vld [vmem:[%s6927_s28 + $0xb4] sm:$0xe]  ;;  %v6600_v15 = vld [vmem:[#allocation2 + $0x32c] sm:$0xf] }
 0x20b   : > { %v4978_v26 = vpop.f32.mrf.mxu0  ;;  %v2370_v58 = vor.u32 %v2369_v57, %v2366_v12  ;;  %v1856_v27 = vsel %vm7088_vm5, %v1854_v40, %v1855_v39  ;;  %v6601_v12 = vld [vmem:[#allocation2 + $0x334] sm:$0xf]  ;;  %v6055_v17 = vld [vmem:[#allocation2 + $0x354] sm:$0xf0]  ;;  %v5608_v57 = vld [vmem:[%s6927_s28 + $0xbc] sm:$0x1] }
 0x20c   : > { %v4976_v23 = vadd.f32 %v4975_v29, %v4887_v16  ;;  %4750 = vmatmul.bf16.gmra.mxu1 %v6014_v14  ;;  %4839 = vmatmul.bf16.gmra.mxu2 %v6018_v47  ;;  %v5462_v29 = vld [vmem:[%s6927_s28 + $0xa8] sm:$0xe]  ;;  %v6725_v47 = vunpack.c.l.bf16 %v8116_v43  ;;  %v5607_v16 = vld [vmem:[%s6927_s28 + $0xb8] sm:$0xf]  ;;  %1930 = vst [vmem:[#allocation2 + $0x3e0] sm:$0xf] %v1856_v27 }
 0x20d   : > { %4928 = vmatmul.bf16.gmra.mxu3 %v6022_v38  ;;  %v5484_v8 = vrot.slane %v5462_v29, 9  ;;  %v6047_v38 = vld [vmem:[#allocation2 + $0x34c] sm:$0xf0]  ;;  %1997 = vst [vmem:[#allocation2 + $0x3c0] sm:$0xf] %v5513_v51  ;;  %v2688_v24 = vrot.slane %v5607_v16, 5  ;;  %v6726_v16 = vunpack.c.h.bf16 %v8116_v43 }
 0x20e   : > { %5017 = vmatmul.bf16.gmra.mxu0 %v6026_v22  ;;  %v5115_v11 = vadd.f32 %v6722_v63, %v4976_v23  ;;  %v6053_v63 = vld [vmem:[#allocation2 + $0x330] sm:$0xf]  ;;  %v2371_v23 = vrot.slane %v2370_v58, 4  ;;  %1998 = vst [vmem:[#allocation2 + $0x3e4] sm:$0xf] %v5514_v31 }
 0x20f   : > { %v4800_v33 = vpop.f32.mrf.mxu2  ;;  %v1853_v22 = vsel %vm7088_vm5, %v5484_v8, %v1852_v54  ;;  %v5628_v54 = vrot.slane %v5606_v9, 9  ;;  %v2690_v58 = vrot.slane %v2688_v24, 4  ;;  %v5562_v31 = vld [vmem:[%s6927_s28 + $0xc4] sm:$0xf] }
 0x210   : > { %v5147_v3 = vmax.f32 %v5115_v11, 0.0  ;;  %v4801_v20 = vadd.f32 %v4800_v33, %v4712_v49  ;;  %v4889_v42 = vpop.f32.mrf.mxu3  ;;  %1929 = vst [vmem:[#allocation2 + $0x3bc] sm:$0xf] %v1853_v22  ;;  %v2383_v49 = vshll.u32 %v5560_v37, 16  ;;  %v2380_v11 = vor.u32 %v2379_v10, %v2375_v61  ;;  %v6061_v33 = vld [vmem:[#allocation2 + $0x338] sm:$0xf] }
 0x211   : > { %v4713_v14 = vpop.f32.mrf.mxu1  ;;  %v2376_v1 = vsel %vm7074_vm3, %v2371_v23, %v2375_v61  ;;  %v6050_v37 = vor.u32 %v6600_v15, %v6047_v38  ;;  %v2689_v39 = vsel %vm7088_vm5, %v5628_v54, %v2688_v24  ;;  %v6058_v22 = vor.u32 %v6601_v12, %v6055_v17  ;;  %v5561_v38 = vld [vmem:[%s6927_s28 + $0xc0] sm:$0xf] }
 0x212   : > { %5179 = vst [vmem:[%s8071_s30 + $0x18] sm:$0xff] %v5147_v3  ;;  %v4890_v6 = vadd.f32 %v4889_v42, %v4801_v20  ;;  %v2385_v29 = vrot.slane %v2383_v49, 5  ;;  %v4714_v20 = vadd.f32 %v4713_v14, %v7635_v21  ;;  %v6606_v42 = vld [vmem:[#allocation2 + $0x358] sm:$0xf0]  ;;  %v2381_v8 = vrot.slane %v2380_v11, 4 }
 0x213   : > { %v4980_v28 = vpop.f32.mrf.mxu0  ;;  %2493 = vst [vmem:[#allocation2 + $0x3c4] sm:$0xf] %v2376_v1  ;;  %v6062_v51 = vor.u32 %v6606_v42, %v6061_v33  ;;  %v2397_v17 = vshll.u32 %v5562_v31, 16  ;;  %v2401_v54 = vshrl.u32 %v5562_v31, 16  ;;  %v8148_v1 = vld [vmem:[%s8040_s26 + $0x18] sm:$0xff]  }
 0x214   : > { %v4979_v25 = vadd.f32 %v4978_v26, %v4890_v6  ;;  %v2691_v26 = vrot.slane %v5608_v57, 5  ;;  %v2386_v21 = vsel %vm7074_vm3, %v2381_v8, %v2385_v29  ;;  %2765 = vst [vmem:[#allocation2 + $0x3c8] sm:$0xf] %v2689_v39  ;;  %v5467_v29 = vld [vmem:[%s6927_s28 + $0xbc] sm:$0x1] }
 0x215   : > { %2494 = vst [vmem:[#allocation2 + $0x3e8] sm:$0xf] %v2386_v21  ;;  %v5563_v8 = vld [vmem:[%s6927_s28 + $0xc8] sm:$0x1]  ;;  %v2399_v39 = vrot.slane %v2397_v17, 5 }
 0x216   : > { %v5116_v3 = vadd.f32 %v6725_v47, %v4979_v25  ;;  %v6054_v47 = vor.u32 %v6605_v30, %v6053_v63  ;;  %v2692_v15 = vsel %vm7088_vm5, %v2690_v58, %v2691_v26  ;;  %v2388_v63 = vshrl.u32 %v5561_v38, 16  ;;  %v5466_v25 = vld [vmem:[%s6927_s28 + $0xb8] sm:$0xf]  ;;  %v5609_v58 = vld [vmem:[%s6927_s28 + $0xc0] sm:$0xe] }
 0x217   : > { %v4802_v40 = vpop.f32.mrf.mxu2  ;;  %v2391_v30 = vshll.u32 %v5561_v38, 16  ;;  %2766 = vst [vmem:[#allocation2 + $0x3ec] sm:$0xf] %v2692_v15  ;;  %v1859_v11 = vrot.slane %v5466_v25, 5  ;;  %v6083_v21 = vld [vmem:[#allocation2 + $0x394] sm:$0xf0] }
 0x218   : > { %v5148_v9 = vmax.f32 %v5116_v3, 0.0  ;;  %v4803_v61 = vadd.f32 %v4802_v40, %v4714_v20  ;;  %v4891_v6 = vpop.f32.mrf.mxu3  ;;  %v2390_v12 = vrot.slane %v2388_v63, 4  ;;  %v1862_v40 = vrot.slane %v5467_v29, 5  ;;  %v5610_v15 = vld [vmem:[%s6927_s28 + $0xc4] sm:$0xf] }
 0x219   : > { %v4716_v14 = vpop.f32.mrf.mxu1  ;;  %v2393_v57 = vrot.slane %v2391_v30, 5  ;;  %v1861_v42 = vrot.slane %v1859_v11, 4  ;;  %v6089_v38 = vld [vmem:[#allocation2 + $0x378] sm:$0xf]  ;;  %v5516_v31 = vld [vmem:[%s6927_s28 + $0xc4] sm:$0xf] }
 0x21a   : > { %5180 = vst [vmem:[%s8071_s30 + $0x20] sm:$0xff] %v5148_v9  ;;  %v4892_v10 = vadd.f32 %v4891_v6, %v4803_v61  ;;  %v4717_v49 = vadd.f32 %v4716_v14, %v7659_v34  ;;  %v6729_v61 = vunpack.c.l.bf16 %v8148_v1  ;;  %v2407_v30 = vshll.u32 %v5563_v8, 16  ;;  %v6097_v25 = vld [vmem:[#allocation2 + $0x380] sm:$0xf]  ;;  %v5611_v17 = vld [vmem:[%s6927_s28 + $0xc8] sm:$0x1] }
 0x21b   : > { %v4983_v27 = vpop.f32.mrf.mxu0  ;;  %2000 = vst [vmem:[#allocation2 + $0x42c] sm:$0xf] %v5516_v31 }
 0x21c   : > { %v4981_v23 = vadd.f32 %v4980_v28, %v4892_v10  ;;  %4755 = vmatmul.bf16.gmra.mxu1 %v6050_v37  ;;  %4844 = vmatmul.bf16.gmra.mxu2 %v6054_v47  ;;  %v5465_v28 = vld [vmem:[%s6927_s28 + $0xb4] sm:$0xe]  ;;  %v2394_v37 = vor.u32 %v2393_v57, %v2390_v12  ;;  %v6614_v10 = vld [vmem:[#allocation2 + $0x398] sm:$0xf0] }
 0x21d   : > { %4933 = vmatmul.bf16.gmra.mxu3 %v6058_v22  ;;  %v5485_v20 = vrot.slane %v5465_v28, 9  ;;  %v6609_v47 = vld [vmem:[#allocation2 + $0x374] sm:$0xf]  ;;  %v5515_v22 = vld [vmem:[%s6927_s28 + $0xc0] sm:$0xf] }
 0x21e   : > { %5022 = vmatmul.bf16.gmra.mxu0 %v6062_v51  ;;  %v5117_v43 = vadd.f32 %v6726_v16, %v4981_v23  ;;  %v2403_v51 = vrot.slane %v2401_v54, 4  ;;  %v1863_v16 = vsel %vm7088_vm5, %v1861_v42, %v1862_v40  ;;  %v2395_v63 = vrot.slane %v2394_v37, 4  ;;  %1999 = vst [vmem:[#allocation2 + $0x408] sm:$0xf] %v5515_v22 }
 0x21f   : > { %v4805_v33 = vpop.f32.mrf.mxu2  ;;  %v1860_v14 = vsel %vm7088_vm5, %v5485_v20, %v1859_v11  ;;  %1932 = vst [vmem:[#allocation2 + $0x428] sm:$0xf] %v1863_v16  ;;  %v6091_v11 = vld [vmem:[#allocation2 + $0x39c] sm:$0xf0]  ;;  %v2409_v54 = vrot.slane %v2407_v30, 5  ;;  %v6086_v20 = vor.u32 %v6609_v47, %v6083_v21  ;;  %v6730_v22 = vunpack.c.h.bf16 %v8148_v1 }
 0x220   : > { %v5149_v24 = vmax.f32 %v5117_v43, 0.0  ;;  %v4806_v3 = vadd.f32 %v4805_v33, %v4717_v49  ;;  %v4894_v34 = vpop.f32.mrf.mxu3  ;;  %1931 = vst [vmem:[#allocation2 + $0x404] sm:$0xf] %v1860_v14  ;;  %v6610_v49 = vld [vmem:[#allocation2 + $0x37c] sm:$0xf]  ;;  %v2404_v12 = vor.u32 %v2403_v51, %v2399_v39  ;;  %v5629_v43 = vrot.slane %v5609_v58, 9 }
 0x221   : > { %v4718_v26 = vpop.f32.mrf.mxu1  ;;  %v2400_v57 = vsel %vm7074_vm3, %v2395_v63, %v2399_v39  ;;  %v2695_v33 = vrot.slane %v5610_v15, 5  ;;  %v6090_v58 = vor.u32 %v6614_v10, %v6089_v38  ;;  %v5564_v21 = vld [vmem:[%s6927_s28 + $0xcc] sm:$0xf]  ;;  %v5565_v15 = vld [vmem:[%s6927_s28 + $0xd0] sm:$0xf] }
 0x222   : > { %5181 = vst [vmem:[%s8071_s30 + $0x28] sm:$0xff] %v5149_v24  ;;  %v4895_v9 = vadd.f32 %v4894_v34, %v4806_v3  ;;  %v4719_v29 = vadd.f32 %v4718_v26, %v7670_v18  ;;  %v6615_v24 = vld [vmem:[#allocation2 + $0x3a0] sm:$0xf0]  ;;  %v2405_v3 = vrot.slane %v2404_v12, 4  ;;  %v2412_v38 = vshrl.u32 %v5564_v21, 16 }
 0x223   : > { %v4985_v6 = vpop.f32.mrf.mxu0  ;;  %2495 = vst [vmem:[#allocation2 + $0x40c] sm:$0xf] %v2400_v57  ;;  %v2696_v42 = vsel %vm7088_vm5, %v5629_v43, %v2695_v33  ;;  %v2697_v8 = vrot.slane %v2695_v33, 4  ;;  %v2415_v10 = vshll.u32 %v5564_v21, 16  ;;  %v5469_v63 = vld [vmem:[%s6927_s28 + $0xc4] sm:$0xf] }
 0x224   : > { %v4984_v23 = vadd.f32 %v4983_v27, %v4895_v9  ;;  %v2698_v27 = vrot.slane %v5611_v17, 5  ;;  %v2410_v18 = vsel %vm7074_vm3, %v2405_v3, %v2409_v54  ;;  %2767 = vst [vmem:[#allocation2 + $0x410] sm:$0xf] %v2696_v42  ;;  %v6094_v9 = vor.u32 %v6610_v49, %v6091_v11  ;;  %v8180_v43 = vld [vmem:[%s8040_s26 + $0x20] sm:$0xff]   ;;  %v5470_v11 = vld [vmem:[%s6927_s28 + $0xc8] sm:$0x1] }
 0x225   : > { %2496 = vst [vmem:[#allocation2 + $0x430] sm:$0xf] %v2410_v18  ;;  %v2414_v30 = vrot.slane %v2412_v38, 4  ;;  %v1866_v49 = vrot.slane %v5469_v63, 5  ;;  %v2425_v12 = vshrl.u32 %v5565_v15, 16  ;;  %v1869_v3 = vrot.slane %v5470_v11, 5 }
 0x226   : > { %v5118_v28 = vadd.f32 %v6729_v61, %v4984_v23  ;;  %v6098_v61 = vor.u32 %v6615_v24, %v6097_v25  ;;  %v2699_v47 = vsel %vm7088_vm5, %v2697_v8, %v2698_v27  ;;  %v2421_v23 = vshll.u32 %v5565_v15, 16  ;;  %v5517_v18 = vld [vmem:[%s6927_s28 + $0xcc] sm:$0xf]  ;;  %v5614_v63 = vld [vmem:[%s6927_s28 + $0xd4] sm:$0x1] }
 0x227   : > { %v4807_v34 = vpop.f32.mrf.mxu2  ;;  %2768 = vst [vmem:[#allocation2 + $0x434] sm:$0xf] %v2699_v47  ;;  %v2417_v25 = vrot.slane %v2415_v10, 5  ;;  %v6733_v8 = vunpack.c.l.bf16 %v8180_v43  ;;  %v6623_v47 = vld [vmem:[#allocation2 + $0x3e0] sm:$0xf0] }
 0x228   : > { %v5150_v40 = vmax.f32 %v5118_v28, 0.0  ;;  %v4808_v37 = vadd.f32 %v4807_v34, %v4719_v29  ;;  %v4896_v39 = vpop.f32.mrf.mxu3  ;;  %v1868_v28 = vrot.slane %v1866_v49, 4  ;;  %v5566_v29 = vld [vmem:[%s6927_s28 + $0xd4] sm:$0x1]  ;;  %v2423_v34 = vrot.slane %v2421_v23, 5 }
 0x229   : > { %v4721_v26 = vpop.f32.mrf.mxu1  ;;  %v2418_v27 = vor.u32 %v2417_v25, %v2414_v30  ;;  %v2431_v15 = vshll.u32 %v5566_v29, 16  ;;  %v6619_v10 = vld [vmem:[#allocation2 + $0x3c4] sm:$0xf]  ;;  %v6127_v23 = vld [vmem:[#allocation2 + $0x3e4] sm:$0xf0] }
 0x22a   : > { %5182 = vst [vmem:[%s8071_s30 + $0x30] sm:$0xff] %v5150_v40  ;;  %v4897_v14 = vadd.f32 %v4896_v39, %v4808_v37  ;;  %v4722_v31 = vadd.f32 %v4721_v26, %v7701_v0  ;;  %v6618_v37 = vld [vmem:[#allocation2 + $0x3bc] sm:$0xf]  ;;  %v6119_v39 = vld [vmem:[#allocation2 + $0x3dc] sm:$0xf0]  ;;  %v2427_v26 = vrot.slane %v2425_v12, 4  ;;  %v1870_v21 = vsel %vm7088_vm5, %v1868_v28, %v1869_v3 }
 0x22b   : > { %v4988_v51 = vpop.f32.mrf.mxu0  ;;  %1934 = vst [vmem:[#allocation2 + $0x470] sm:$0xf] %v1870_v21 }
 0x22c   : > { %v4986_v16 = vadd.f32 %v4985_v6, %v4897_v14  ;;  %4760 = vmatmul.bf16.gmra.mxu1 %v6086_v20  ;;  %4849 = vmatmul.bf16.gmra.mxu2 %v6090_v58  ;;  %v5468_v6 = vld [vmem:[%s6927_s28 + $0xc0] sm:$0xe]  ;;  %v5612_v20 = vld [vmem:[%s6927_s28 + $0xcc] sm:$0xe]  ;;  %v5518_v14 = vld [vmem:[%s6927_s28 + $0xd0] sm:$0xf] }
 0x22d   : > { %4938 = vmatmul.bf16.gmra.mxu3 %v6094_v9  ;;  %v5486_v33 = vrot.slane %v5468_v6, 9  ;;  %v5613_v9 = vld [vmem:[%s6927_s28 + $0xd0] sm:$0xf]  ;;  %v5630_v30 = vrot.slane %v5612_v20, 9  ;;  %2001 = vst [vmem:[#allocation2 + $0x450] sm:$0xf] %v5517_v18 }
 0x22e   : > { %5027 = vmatmul.bf16.gmra.mxu0 %v6098_v61  ;;  %v5119_v1 = vadd.f32 %v6730_v22, %v4986_v16  ;;  %v6125_v61 = vld [vmem:[#allocation2 + $0x3c0] sm:$0xf]  ;;  %v2419_v22 = vrot.slane %v2418_v27, 4  ;;  %v6133_v16 = vld [vmem:[#allocation2 + $0x3c8] sm:$0xf]  ;;  %v2702_v25 = vrot.slane %v5613_v9, 5 }
 0x22f   : > { %v4810_v17 = vpop.f32.mrf.mxu2  ;;  %v1867_v58 = vsel %vm7088_vm5, %v5486_v33, %v1866_v49  ;;  %v2433_v49 = vrot.slane %v2431_v15, 5  ;;  %v6624_v6 = vld [vmem:[#allocation2 + $0x3e8] sm:$0xf0]  ;;  %2002 = vst [vmem:[#allocation2 + $0x474] sm:$0xf] %v5518_v14  ;;  %v6126_v27 = vor.u32 %v6623_v47, %v6125_v61 }
 0x230   : > { %v5151_v57 = vmax.f32 %v5119_v1, 0.0  ;;  %v4811_v54 = vadd.f32 %v4810_v17, %v4722_v31  ;;  %v4899_v0 = vpop.f32.mrf.mxu3  ;;  %1933 = vst [vmem:[#allocation2 + $0x44c] sm:$0xf] %v1867_v58  ;;  %v2428_v31 = vor.u32 %v2427_v26, %v2423_v34  ;;  %v2424_v1 = vsel %vm7074_vm3, %v2419_v22, %v2423_v34  ;;  %v6783_v9 = vld [vmem:[%s8040_s26 + $0x28] sm:$0xff]  }
 0x231   : > { %v4723_v24 = vpop.f32.mrf.mxu1  ;;  %2497 = vst [vmem:[#allocation2 + $0x454] sm:$0xf] %v2424_v1  ;;  %v2704_v33 = vrot.slane %v2702_v25, 4  ;;  %v6134_v20 = vor.u32 %v6624_v6, %v6133_v16  ;;  %v6632_v16 = vld [vmem:[#allocation2 + $0x428] sm:$0xf0] }
 0x232   : > { %5183 = vst [vmem:[%s8071_s30 + $0x38] sm:$0xff] %v5151_v57  ;;  %v4900_v42 = vadd.f32 %v4899_v0, %v4811_v54  ;;  %v4724_v17 = vadd.f32 %v4723_v24, %v7714_v45  ;;  %v2429_v11 = vrot.slane %v2428_v31, 4  ;;  %v6122_v54 = vor.u32 %v6618_v37, %v6119_v39  ;;  %v6628_v31 = vld [vmem:[#allocation2 + $0x40c] sm:$0xf]  ;;  %v6633_v1 = vld [vmem:[#allocation2 + $0x430] sm:$0xf0] }
 0x233   : > { %v4990_v40 = vpop.f32.mrf.mxu0  ;;  %v2703_v0 = vsel %vm7088_vm5, %v5630_v30, %v2702_v25  ;;  %v6130_v24 = vor.u32 %v6619_v10, %v6127_v23  ;;  %v6734_v37 = vunpack.c.h.bf16 %v8180_v43  ;;  %v6737_v43 = vunpack.c.l.bf16 %v6783_v9  ;;  %v6161_v10 = vld [vmem:[#allocation2 + $0x408] sm:$0xf]  ;;  %v6163_v30 = vld [vmem:[#allocation2 + $0x42c] sm:$0xf0] }
 0x234   : > { %v4989_v38 = vadd.f32 %v4988_v51, %v4900_v42  ;;  %v2705_v51 = vrot.slane %v5614_v63, 5  ;;  %v2434_v34 = vsel %vm7074_vm3, %v2429_v11, %v2433_v49  ;;  %2769 = vst [vmem:[#allocation2 + $0x458] sm:$0xf] %v2703_v0  ;;  %v6169_v23 = vld [vmem:[#allocation2 + $0x410] sm:$0xf]  ;;  %v6162_v11 = vor.u32 %v6632_v16, %v6161_v10 }
 0x235   : > { %2498 = vst [vmem:[#allocation2 + $0x478] sm:$0xf] %v2434_v34  ;;  %v6784_v34 = vld [vmem:[%s8040_s26 + $0x30] sm:$0xff]  }
 0x236   : > { %v5120_v12 = vadd.f32 %v6733_v8, %v4989_v38  ;;  %v2706_v42 = vsel %vm7088_vm5, %v2704_v33, %v2705_v51  ;;  %v6627_v38 = vld [vmem:[#allocation2 + $0x404] sm:$0xf]  ;;  %v6738_v33 = vunpack.c.h.bf16 %v6783_v9  ;;  %v6641_v9 = vld [vmem:[#allocation2 + $0x470] sm:$0xf0] }
 0x237   : > { %v4812_v57 = vpop.f32.mrf.mxu2  ;;  %2770 = vst [vmem:[#allocation2 + $0x47c] sm:$0xf] %v2706_v42 }
 0x238   : > { %v5152_v28 = vmax.f32 %v5120_v12, 0.0  ;;  %v4813_v29 = vadd.f32 %v4812_v57, %v4724_v17  ;;  %v4901_v3 = vpop.f32.mrf.mxu3  ;;  %v6166_v57 = vor.u32 %v6628_v31, %v6163_v30  ;;  %v6742_v30 = vunpack.c.h.bf16 %v6784_v34 }
 0x239   : > { %v4726_v45 = vpop.f32.mrf.mxu1 }
 0x23a   : > { %5184 = vst [vmem:[%s8071_s30 + $0x40] sm:$0xff] %v5152_v28  ;;  %v4902_v8 = vadd.f32 %v4901_v3, %v4813_v29  ;;  %v4727_v18 = vadd.f32 %v4726_v45, %v7734_v4 }
 0x23b   : > { %v4993_v39 = vpop.f32.mrf.mxu0 }
 0x23c   : > { %v4991_v58 = vadd.f32 %v4990_v40, %v4902_v8  ;;  %4765 = vmatmul.bf16.gmra.mxu1 %v6122_v54  ;;  %4854 = vmatmul.bf16.gmra.mxu2 %v6126_v27  ;;  %v6155_v40 = vld [vmem:[#allocation2 + $0x424] sm:$0xf0]  ;;  %v6170_v54 = vor.u32 %v6633_v1, %v6169_v23 }
 0x23d   : > { %4943 = vmatmul.bf16.gmra.mxu3 %v6130_v24  ;;  %v6158_v6 = vor.u32 %v6627_v38, %v6155_v40 }
 0x23e   : > { %5032 = vmatmul.bf16.gmra.mxu0 %v6134_v20  ;;  %v5121_v44 = vadd.f32 %v6734_v37, %v4991_v58  ;;  %v6741_v37 = vunpack.c.l.bf16 %v6784_v34 }
 0x23f   : > { %v4815_v26 = vpop.f32.mrf.mxu2 }
 0x240   : > { %v5153_v61 = vmax.f32 %v5121_v44, 0.0  ;;  %v4816_v59 = vadd.f32 %v4815_v26, %v4727_v18  ;;  %v4904_v47 = vpop.f32.mrf.mxu3  ;;  %v6636_v44 = vld [vmem:[#allocation2 + $0x44c] sm:$0xf]  ;;  %v6191_v18 = vld [vmem:[#allocation2 + $0x46c] sm:$0xf0] }
 0x241   : > { %v4728_v21 = vpop.f32.mrf.mxu1  ;;  %v6197_v26 = vld [vmem:[#allocation2 + $0x450] sm:$0xf]  ;;  %v6194_v40 = vor.u32 %v6636_v44, %v6191_v18 }
 0x242   : > { %5185 = vst [vmem:[%s8071_s30 + $0x48] sm:$0xff] %v5153_v61  ;;  %v4905_v14 = vadd.f32 %v4904_v47, %v4816_v59  ;;  %v4729_v4 = vadd.f32 %v4728_v21, %v7747_v55  ;;  %v6637_v61 = vld [vmem:[#allocation2 + $0x454] sm:$0xf]  ;;  %v6199_v47 = vld [vmem:[#allocation2 + $0x474] sm:$0xf0]  ;;  %v6198_v10 = vor.u32 %v6641_v9, %v6197_v26 }
 0x243   : > { %v4995_v22 = vpop.f32.mrf.mxu0  ;;  %v6205_v21 = vld [vmem:[#allocation2 + $0x458] sm:$0xf]  ;;  %v6202_v31 = vor.u32 %v6637_v61, %v6199_v47 }
 0x244   : > { %v4994_v15 = vadd.f32 %v4993_v39, %v4905_v14  ;;  %v6642_v14 = vld [vmem:[#allocation2 + $0x478] sm:$0xf0] }
 0x246   : > { %v5122_v63 = vadd.f32 %v6737_v43, %v4994_v15 }
 0x247   : > { %v4817_v49 = vpop.f32.mrf.mxu2 }
 0x248   : > { %v5154_v25 = vmax.f32 %v5122_v63, 0.0  ;;  %v4818_v12 = vadd.f32 %v4817_v49, %v4729_v4  ;;  %v4906_v17 = vpop.f32.mrf.mxu3  ;;  %v6206_v63 = vor.u32 %v6642_v14, %v6205_v21 }
 0x249   : > { %v4731_v51 = vpop.f32.mrf.mxu1 }
 0x24a   : > { %5186 = vst [vmem:[%s8071_s30 + $0x50] sm:$0xff] %v5154_v25  ;;  %v4907_v0 = vadd.f32 %v4906_v17, %v4818_v12  ;;  %v4732_v3 = vadd.f32 %v4731_v51, %v7765_v53  ;;  %v6785_v12 = vld [vmem:[%s8040_s26 + $0x38] sm:$0xff]  }
 0x24b   : > { %v4998_v28 = vpop.f32.mrf.mxu0 }
 0x24c   : > { %v4996_v29 = vadd.f32 %v4995_v22, %v4907_v0  ;;  %4770 = vmatmul.bf16.gmra.mxu1 %v6158_v6  ;;  %4859 = vmatmul.bf16.gmra.mxu2 %v6162_v11 }
 0x24d   : > { %4948 = vmatmul.bf16.gmra.mxu3 %v6166_v57 }
 0x24e   : > { %5037 = vmatmul.bf16.gmra.mxu0 %v6170_v54  ;;  %v5123_v55 = vadd.f32 %v6738_v33, %v4996_v29  ;;  %v6745_v54 = vunpack.c.l.bf16 %v6785_v12 }
 0x24f   : > { %v4820_v27 = vpop.f32.mrf.mxu2 }
 0x250   : > { %v5155_v45 = vmax.f32 %v5123_v55, 0.0  ;;  %v4821_v24 = vadd.f32 %v4820_v27, %v4732_v3  ;;  %v4909_v20 = vpop.f32.mrf.mxu3 }
 0x251   : > { %v4733_v42 = vpop.f32.mrf.mxu1 }
 0x252   : > { %5187 = vst [vmem:[%s8071_s30 + $0x58] sm:$0xff] %v5155_v45  ;;  %v4910_v8 = vadd.f32 %v4909_v20, %v4821_v24  ;;  %v4734_v53 = vadd.f32 %v4733_v42, %v7776_v7  ;;  %v6746_v24 = vunpack.c.h.bf16 %v6785_v12 }
 0x253   : > { %v5000_v39 = vpop.f32.mrf.mxu0 }
 0x254   : > { %v4999_v58 = vadd.f32 %v4998_v28, %v4910_v8 }
 0x256   : > { %v5124_v59 = vadd.f32 %v6741_v37, %v4999_v58  ;;  %v6786_v58 = vld [vmem:[%s8040_s26 + $0x40] sm:$0xff]  }
 0x257   : > { %v4822_v43 = vpop.f32.mrf.mxu2  ;;  %v6749_v61 = vunpack.c.l.bf16 %v6786_v58 }
 0x258   : > { %v5156_v22 = vmax.f32 %v5124_v59, 0.0  ;;  %v4823_v15 = vadd.f32 %v4822_v43, %v4734_v53  ;;  %v4911_v38 = vpop.f32.mrf.mxu3 }
 0x259   : > { %v4736_v16 = vpop.f32.mrf.mxu1 }
 0x25a   : > { %5188 = vst [vmem:[%s8071_s30 + $0x60] sm:$0xff] %v5156_v22  ;;  %v4912_v4 = vadd.f32 %v4911_v38, %v4823_v15  ;;  %v4737_v49 = vadd.f32 %v4736_v16, %v7794_v60 }
 0x25b   : > { %v5003_v23 = vpop.f32.mrf.mxu0 }
 0x25c   : > { %v5001_v1 = vadd.f32 %v5000_v39, %v4912_v4  ;;  %4775 = vmatmul.bf16.gmra.mxu1 %v6194_v40  ;;  %4864 = vmatmul.bf16.gmra.mxu2 %v6198_v10  ;;  %v6750_v40 = vunpack.c.h.bf16 %v6786_v58 }
 0x25d   : > { %4953 = vmatmul.bf16.gmra.mxu3 %v6202_v31 }
 0x25e   : > { %5042 = vmatmul.bf16.gmra.mxu0 %v6206_v63  ;;  %v5125_v7 = vadd.f32 %v6742_v30, %v5001_v1  ;;  %v6787_v30 = vld [vmem:[%s8040_s26 + $0x48] sm:$0xff]  }
 0x25f   : > { %v4825_v25 = vpop.f32.mrf.mxu2 }
 0x260   : > { %v5157_v17 = vmax.f32 %v5125_v7, 0.0  ;;  %v4826_v6 = vadd.f32 %v4825_v25, %v4737_v49  ;;  %v4914_v11 = vpop.f32.mrf.mxu3  ;;  %v6753_v25 = vunpack.c.l.bf16 %v6787_v30 }
 0x261   : > { %v4738_v51 = vpop.f32.mrf.mxu1 }
 0x262   : > { %5189 = vst [vmem:[%s8071_s30 + $0x68] sm:$0xff] %v5157_v17  ;;  %v4915_v57 = vadd.f32 %v4914_v11, %v4826_v6  ;;  %v4739_v29 = vadd.f32 %v4738_v51, %v7805_v62 }
 0x263   : > { %v5005_v0 = vpop.f32.mrf.mxu0 }
 0x264   : > { %v5004_v33 = vadd.f32 %v5003_v23, %v4915_v57 }
 0x266   : > { %v5126_v28 = vadd.f32 %v6745_v54, %v5004_v33 }
 0x267   : > { %v4827_v55 = vpop.f32.mrf.mxu2 }
 0x268   : > { %v5158_v3 = vmax.f32 %v5126_v28, 0.0  ;;  %v4828_v27 = vadd.f32 %v4827_v55, %v4739_v29  ;;  %v4916_v60 = vpop.f32.mrf.mxu3  ;;  %v6754_v28 = vunpack.c.h.bf16 %v6787_v30 }
 0x269   : > { %v4741_v34 = vpop.f32.mrf.mxu1 }
 0x26a   : > { %5190 = vst [vmem:[%s8071_s30 + $0x70] sm:$0xff] %v5158_v3  ;;  %v4917_v45 = vadd.f32 %v4916_v60, %v4828_v27  ;;  %v4742_v37 = vadd.f32 %v4741_v34, %v7823_v48  ;;  %v6788_v34 = vld [vmem:[%s8040_s26 + $0x50] sm:$0xff]  }
 0x26b   : > { %v5008_v20 = vpop.f32.mrf.mxu0 }
 0x26c   : > { %v5006_v42 = vadd.f32 %v5005_v0, %v4917_v45 }
 0x26e   : > { %v5127_v8 = vadd.f32 %v6746_v24, %v5006_v42 }
 0x26f   : > { %v4830_v39 = vpop.f32.mrf.mxu2 }
 0x270   : > { %v5159_v44 = vmax.f32 %v5127_v8, 0.0  ;;  %v4831_v18 = vadd.f32 %v4830_v39, %v4742_v37  ;;  %v4919_v62 = vpop.f32.mrf.mxu3  ;;  %v6757_v8 = vunpack.c.l.bf16 %v6788_v34 }
 0x271   : > { %v4743_v26 = vpop.f32.mrf.mxu1 }
 0x272   : > { %5191 = vst [vmem:[%s8071_s30 + $0x78] sm:$0xff] %v5159_v44  ;;  %v4920_v9 = vadd.f32 %v4919_v62, %v4831_v18  ;;  %v4744_v21 = vadd.f32 %v4743_v26, %v7834_v5 }
 0x273   : > { %v5010_v59 = vpop.f32.mrf.mxu0 }
 0x274   : > { %v5009_v53 = vadd.f32 %v5008_v20, %v4920_v9 }
 0x276   : > { %v5128_v47 = vadd.f32 %v6749_v61, %v5009_v53 }
 0x277   : > { %v4832_v14 = vpop.f32.mrf.mxu2 }
 0x278   : > { %v5160_v43 = vmax.f32 %v5128_v47, 0.0  ;;  %v4833_v22 = vadd.f32 %v4832_v14, %v4744_v21  ;;  %v4921_v48 = vpop.f32.mrf.mxu3 }
 0x279   : > { %v4746_v15 = vpop.f32.mrf.mxu1 }
 0x27a   : > { %5192 = vst [vmem:[%s8071_s30 + $0x80] sm:$0xff] %v5160_v43  ;;  %v4922_v38 = vadd.f32 %v4921_v48, %v4833_v22  ;;  %v4747_v63 = vadd.f32 %v4746_v15, %v7852_v52  ;;  %v6789_v22 = vld [vmem:[%s8040_s26 + $0x58] sm:$0xff]  }
 0x27b   : > { %v5013_v10 = vpop.f32.mrf.mxu0 }
 0x27c   : > { %v5011_v16 = vadd.f32 %v5010_v59, %v4922_v38  ;;  %v6758_v59 = vunpack.c.h.bf16 %v6788_v34 }
 0x27e   : > { %v5129_v31 = vadd.f32 %v6750_v40, %v5011_v16 }
 0x27f   : > { %v4835_v4 = vpop.f32.mrf.mxu2 }
 0x280   : > { %v5161_v23 = vmax.f32 %v5129_v31, 0.0  ;;  %v4836_v1 = vadd.f32 %v4835_v4, %v4747_v63  ;;  %v4924_v5 = vpop.f32.mrf.mxu3 }
 0x281   : > { %v4748_v7 = vpop.f32.mrf.mxu1 }
 0x282   : > { %5193 = vst [vmem:[%s8071_s30 + $0x88] sm:$0xff] %v5161_v23  ;;  %v4925_v49 = vadd.f32 %v4924_v5, %v4836_v1  ;;  %v4749_v11 = vadd.f32 %v4748_v7, %v7863_v35 }
 0x283   : > { %v5015_v12 = vpop.f32.mrf.mxu0 }
 0x284   : > { %v5014_v17 = vadd.f32 %v5013_v10, %v4925_v49  ;;  %v6761_v10 = vunpack.c.l.bf16 %v6789_v22  ;;  %v6762_v49 = vunpack.c.h.bf16 %v6789_v22 }
 0x286   : > { %v5130_v6 = vadd.f32 %v6753_v25, %v5014_v17 }
 0x287   : > { %v4837_v51 = vpop.f32.mrf.mxu2 }
 0x288   : > { %v5162_v57 = vmax.f32 %v5130_v6, 0.0  ;;  %v4838_v54 = vadd.f32 %v4837_v51, %v4749_v11  ;;  %v4926_v52 = vpop.f32.mrf.mxu3  ;;  %v6790_v51 = vld [vmem:[%s8040_s26 + $0x60] sm:$0xff]  }
 0x289   : > { %v4751_v0 = vpop.f32.mrf.mxu1 }
 0x28a   : > { %5194 = vst [vmem:[%s8071_s30 + $0x90] sm:$0xff] %v5162_v57  ;;  %v4927_v33 = vadd.f32 %v4926_v52, %v4838_v54  ;;  %v4752_v27 = vadd.f32 %v4751_v0, %v7881_v2 }
 0x28b   : > { %v5018_v29 = vpop.f32.mrf.mxu0 }
 0x28c   : > { %v5016_v55 = vadd.f32 %v5015_v12, %v4927_v33  ;;  %v6765_v33 = vunpack.c.l.bf16 %v6790_v51 }
 0x28e   : > { %v5131_v3 = vadd.f32 %v6754_v28, %v5016_v55 }
 0x28f   : > { %v4840_v60 = vpop.f32.mrf.mxu2 }
 0x290   : > { %v5163_v45 = vmax.f32 %v5131_v3, 0.0  ;;  %v4841_v24 = vadd.f32 %v4840_v60, %v4752_v27  ;;  %v4929_v35 = vpop.f32.mrf.mxu3 }
 0x291   : > { %v4753_v20 = vpop.f32.mrf.mxu1 }
 0x292   : > { %5195 = vst [vmem:[%s8071_s30 + $0x98] sm:$0xff] %v5163_v45  ;;  %v4930_v42 = vadd.f32 %v4929_v35, %v4841_v24  ;;  %v4754_v44 = vadd.f32 %v4753_v20, %v7892_v36  ;;  %v6766_v35 = vunpack.c.h.bf16 %v6790_v51 }
 0x293   : > { %v5020_v37 = vpop.f32.mrf.mxu0 }
 0x294   : > { %v5019_v39 = vadd.f32 %v5018_v29, %v4930_v42 }
 0x296   : > { %v5132_v58 = vadd.f32 %v6757_v8, %v5019_v39 }
 0x297   : > { %v4842_v18 = vpop.f32.mrf.mxu2 }
 0x298   : > { %v5164_v62 = vmax.f32 %v5132_v58, 0.0  ;;  %v4843_v26 = vadd.f32 %v4842_v18, %v4754_v44  ;;  %v4931_v2 = vpop.f32.mrf.mxu3  ;;  %v6791_v58 = vld [vmem:[%s8040_s26 + $0x68] sm:$0xff]  }
 0x299   : > { %v4756_v9 = vpop.f32.mrf.mxu1 }
 0x29a   : > { %5196 = vst [vmem:[%s8071_s30 + $0xa0] sm:$0xff] %v5164_v62  ;;  %v4932_v61 = vadd.f32 %v4931_v2, %v4843_v26  ;;  %v4757_v14 = vadd.f32 %v4756_v9, %v7910_v32  ;;  %v6769_v2 = vunpack.c.l.bf16 %v6791_v58 }
 0x29b   : > { %v5023_v53 = vpop.f32.mrf.mxu0 }
 0x29c   : > { %v5021_v47 = vadd.f32 %v5020_v37, %v4932_v61 }
 0x29e   : > { %v5133_v21 = vadd.f32 %v6758_v59, %v5021_v47 }
 0x29f   : > { %v4845_v43 = vpop.f32.mrf.mxu2 }
 0x2a0   : > { %v5165_v48 = vmax.f32 %v5133_v21, 0.0  ;;  %v4846_v15 = vadd.f32 %v4845_v43, %v4757_v14  ;;  %v4934_v36 = vpop.f32.mrf.mxu3 }
 0x2a1   : > { %v4758_v38 = vpop.f32.mrf.mxu1 }
 0x2a2   : > { %5197 = vst [vmem:[%s8071_s30 + $0xa8] sm:$0xff] %v5165_v48  ;;  %v4935_v40 = vadd.f32 %v4934_v36, %v4846_v15  ;;  %v4759_v4 = vadd.f32 %v4758_v38, %v7921_v56  ;;  %v6770_v48 = vunpack.c.h.bf16 %v6791_v58 }
 0x2a3   : > { %v5025_v16 = vpop.f32.mrf.mxu0 }
 0x2a4   : > { %v5024_v31 = vadd.f32 %v5023_v53, %v4935_v40 }
 0x2a6   : > { %v5134_v63 = vadd.f32 %v6761_v10, %v5024_v31 }
 0x2a7   : > { %v4847_v30 = vpop.f32.mrf.mxu2 }
 0x2a8   : > { %v5166_v23 = vmax.f32 %v5134_v63, 0.0  ;;  %v4848_v1 = vadd.f32 %v4847_v30, %v4759_v4  ;;  %v4936_v32 = vpop.f32.mrf.mxu3 }
 0x2a9   : > { %v4761_v5 = vpop.f32.mrf.mxu1 }
 0x2aa   : > { %5198 = vst [vmem:[%s8071_s30 + $0xb0] sm:$0xff] %v5166_v23  ;;  %v4937_v7 = vadd.f32 %v4936_v32, %v4848_v1  ;;  %v4762_v6 = vadd.f32 %v4761_v5, %v7939_v19  ;;  %v8294_v5 = vld [vmem:[#allocation3_spill] sm:$0xff] }
 0x2ab   : > { %v5028_v25 = vpop.f32.mrf.mxu0 }
 0x2ac   : > { %v5026_v12 = vadd.f32 %v5025_v16, %v4937_v7  ;;  %v6792_v16 = vld [vmem:[%s8040_s26 + $0x70] sm:$0xff]  }
 0x2ad   : > { %v6773_v23 = vunpack.c.l.bf16 %v6792_v16  ;;  %v6774_v51 = vunpack.c.h.bf16 %v6792_v16 }
 0x2ae   : > { %v5135_v17 = vadd.f32 %v6762_v49, %v5026_v12 }
 0x2af   : > { %v4850_v11 = vpop.f32.mrf.mxu2 }
 0x2b0   : > { %v5167_v57 = vmax.f32 %v5135_v17, 0.0  ;;  %v4851_v54 = vadd.f32 %v4850_v11, %v4762_v6  ;;  %v4939_v56 = vpop.f32.mrf.mxu3 }
 0x2b1   : > { %v4763_v52 = vpop.f32.mrf.mxu1 }
 0x2b2   : > { %5199 = vst [vmem:[%s8071_s30 + $0xb8] sm:$0xff] %v5167_v57  ;;  %v4940_v0 = vadd.f32 %v4939_v56, %v4851_v54  ;;  %v4764_v3 = vadd.f32 %v4763_v52, %v7950_v41  ;;  %v8295_v56 = vld [vmem:[#allocation4_spill] sm:$0xff] }
 0x2b3   : > { %v5030_v28 = vpop.f32.mrf.mxu0 }
 0x2b4   : > { %v5029_v29 = vadd.f32 %v5028_v25, %v4940_v0 }
 0x2b6   : > { %v5136_v55 = vadd.f32 %v6765_v33, %v5029_v29  ;;  %v6793_v33 = vld [vmem:[%s8040_s26 + $0x78] sm:$0xff]  }
 0x2b7   : > { %v4852_v27 = vpop.f32.mrf.mxu2  ;;  %v6778_v58 = vunpack.c.h.bf16 %v6793_v33 }
 0x2b8   : > { %v5168_v60 = vmax.f32 %v5136_v55, 0.0  ;;  %v4853_v34 = vadd.f32 %v4852_v27, %v4764_v3  ;;  %v4941_v19 = vpop.f32.mrf.mxu3 }
 0x2b9   : > { %v4766_v45 = vpop.f32.mrf.mxu1 }
 0x2ba   : > { %5200 = vst [vmem:[%s8071_s30 + $0xc0] sm:$0xff] %v5168_v60  ;;  %v4942_v24 = vadd.f32 %v4941_v19, %v4853_v34  ;;  %v4767_v37 = vadd.f32 %v4766_v45, %v7968_v46  ;;  %v6777_v60 = vunpack.c.l.bf16 %v6793_v33 }
 0x2bb   : > { %v5033_v20 = vpop.f32.mrf.mxu0 }
 0x2bc   : > { %v5031_v42 = vadd.f32 %v5030_v28, %v4942_v24  ;;  %v8296_v24 = vld [vmem:[#allocation5_spill] sm:$0xff] }
 0x2be   : > { %v5137_v8 = vadd.f32 %v6766_v35, %v5031_v42 }
 0x2bf   : > { %v4855_v39 = vpop.f32.mrf.mxu2 }
 0x2c0   : > { %v5169_v44 = vmax.f32 %v5137_v8, 0.0  ;;  %v4856_v18 = vadd.f32 %v4855_v39, %v4767_v37  ;;  %v4944_v41 = vpop.f32.mrf.mxu3 }
 0x2c1   : > { %v4768_v62 = vpop.f32.mrf.mxu1 }
 0x2c2   : > { %5201 = vst [vmem:[%s8071_s30 + $0xc8] sm:$0xff] %v5169_v44  ;;  %v4945_v26 = vadd.f32 %v4944_v41, %v4856_v18  ;;  %v4769_v53 = vadd.f32 %v4768_v62, %v7979_v50 }
 0x2c3   : > { %v5035_v9 = vpop.f32.mrf.mxu0 }
 0x2c4   : > { %v5034_v61 = vadd.f32 %v5033_v20, %v4945_v26 }
 0x2c6   : > { %v5138_v59 = vadd.f32 %v6769_v2, %v5034_v61 }
 0x2c7   : > { %v4857_v47 = vpop.f32.mrf.mxu2 }
 0x2c8   : > { %v5170_v21 = vmax.f32 %v5138_v59, 0.0  ;;  %v4858_v14 = vadd.f32 %v4857_v47, %v4769_v53  ;;  %v4946_v46 = vpop.f32.mrf.mxu3 }
 0x2c9   : > { %v4771_v43 = vpop.f32.mrf.mxu1 }
 0x2ca   : > { %5202 = vst [vmem:[%s8071_s30 + $0xd0] sm:$0xff] %v5170_v21  ;;  %v4947_v22 = vadd.f32 %v4946_v46, %v4858_v14  ;;  %v4772_v40 = vadd.f32 %v4771_v43, %v7997_v13 }
 0x2cb   : > { %v5038_v36 = vpop.f32.mrf.mxu0 }
 0x2cc   : > { %v5036_v15 = vadd.f32 %v5035_v9, %v4947_v22 }
 0x2ce   : > { %v5139_v38 = vadd.f32 %v6770_v48, %v5036_v15 }
 0x2cf   : > { %v4860_v10 = vpop.f32.mrf.mxu2 }
 0x2d0   : > { %v5171_v31 = vmax.f32 %v5139_v38, 0.0  ;;  %v4861_v63 = vadd.f32 %v4860_v10, %v4772_v40  ;;  %v4949_v50 = vpop.f32.mrf.mxu3 }
 0x2d1   : > { %v4773_v4 = vpop.f32.mrf.mxu1 }
 0x2d2   : > { %5203 = vst [vmem:[%s8071_s30 + $0xd8] sm:$0xff] %v5171_v31  ;;  %v4950_v30 = vadd.f32 %v4949_v50, %v4861_v63  ;;  %v4774_v7 = vadd.f32 %v4773_v4, %v8294_v5 }
 0x2d3   : > { %v5040_v49 = vpop.f32.mrf.mxu0 }
 0x2d4   : > { %v5039_v1 = vadd.f32 %v5038_v36, %v4950_v30 }
 0x2d6   : > { %v5140_v32 = vadd.f32 %v6773_v23, %v5039_v1 }
 0x2d7   : > { %v4862_v25 = vpop.f32.mrf.mxu2 }
 0x2d8   : > { %v5172_v12 = vmax.f32 %v5140_v32, 0.0  ;;  %v4863_v13 = vadd.f32 %v4862_v25, %v4774_v7  ;;  %v4951_v17 = vpop.f32.mrf.mxu3 }
 0x2d9   : > { %v4776_v6 = vpop.f32.mrf.mxu1 }
 0x2da   : > { %5204 = vst [vmem:[%s8071_s30 + $0xe0] sm:$0xff] %v5172_v12  ;;  %v4952_v11 = vadd.f32 %v4951_v17, %v4863_v13  ;;  %v4777_v52 = vadd.f32 %v4776_v6, %v8295_v56 }
 0x2db   : > { %v5043_v3 = vpop.f32.mrf.mxu0 }
 0x2dc   : > { %v5041_v57 = vadd.f32 %v5040_v49, %v4952_v11 }
 0x2de   : > { %v5141_v54 = vadd.f32 %v6774_v51, %v5041_v57 }
 0x2df   : > { %v4865_v0 = vpop.f32.mrf.mxu2 }
 0x2e0   : > { %v5173_v28 = vmax.f32 %v5141_v54, 0.0  ;;  %v4866_v29 = vadd.f32 %v4865_v0, %v4777_v52  ;;  %v4954_v55 = vpop.f32.mrf.mxu3 }
 0x2e1   : > { %v4778_v34 = vpop.f32.mrf.mxu1 }
 0x2e2   : > { %5205 = vst [vmem:[%s8071_s30 + $0xe8] sm:$0xff] %v5173_v28  ;;  %v4955_v27 = vadd.f32 %v4954_v55, %v4866_v29  ;;  %v4779_v35 = vadd.f32 %v4778_v34, %v8296_v24 }
 0x2e3   : > { %v5045_v44 = vpop.f32.mrf.mxu0 }
 0x2e4   : > { %v5044_v19 = vadd.f32 %v5043_v3, %v4955_v27 }
 0x2e6   : > { %v5142_v45 = vadd.f32 %v6777_v60, %v5044_v19 }
 0x2e7   : > { %v4867_v20 = vpop.f32.mrf.mxu2 }
 0x2e8   : > { %v5174_v42 = vmax.f32 %v5142_v45, 0.0  ;;  %v4868_v8 = vadd.f32 %v4867_v20, %v4779_v35  ;;  %v4956_v37 = vpop.f32.mrf.mxu3 }
 0x2ea   : > { %5206 = vst [vmem:[%s8071_s30 + $0xf0] sm:$0xff] %v5174_v42  ;;  %v4957_v39 = vadd.f32 %v4956_v37, %v4868_v8 }
 0x2ec   : > { %v5046_v18 = vadd.f32 %v5045_v44, %v4957_v39 }
 0x2ee   : > { %v5143_v41 = vadd.f32 %v6778_v58, %v5046_v18 }
 0x2f0   : > { %v5175_v62 = vmax.f32 %v5143_v41, 0.0 }
 0x2f2   : > { %5207 = vst [vmem:[%s8071_s30 + $0xf8] sm:$0xff] %v5175_v62 }
 0x2f3 PF: > { %s14_s17 = sadd.s32 1, %s6867_s17   ;;  %s8297_s15 = smov %s6863_s16 }
 0x2f4   : > { %p11_p5 = scmp.ge.s32.totalorder %s14_s17, 4   ;;  %s8298_s16 = smov %s8300_s18 }
 0x2f6   :  { %13 = sbr.rel (!%p11_p5) target bundleno = 2 (0x2), region = 72 }

</bundles_post_ra>
